<compile_context>
chip_gen: v7x
topology: tpu7x:2x2x1
jax: 0.10.0
libtpu: 0.0.40
codegen_flags: <defaults>
</compile_context>

<pallas_src>
import numpy as np
import jax
import jax.numpy as jnp
from jax.experimental import pallas as pl
from jax.experimental.pallas import tpu as pltpu

EMB = 768                          # hidden size of the (simulated) BERT encoder
HID = 1024                         # hole_projector hidden size
NULL_HID = 256                     # null_predictor hidden size
_EPS_LN = 1e-5                     # torch.nn.LayerNorm default eps
_UNIV = 1.0 / float(np.sqrt(EMB))  # elementwise value of ones(768)/||ones(768)||
_CONST_ROWS = 16                   # rows of the packed fp32 constant slab


# ----------------------------------------------------------------------------
# Fused kernel factory (P, K, T are trace-time static)
# ----------------------------------------------------------------------------
def _make_kernel(n_pat: int, n_not: int, n_tok: int):
    n_hid_rows = n_not * n_tok
    inv_pat = 1.0 / float(n_pat)
    inv_not = 1.0 / float(n_not)
    inv_hid = 1.0 / float(n_hid_rows)

    def kernel(idx_ref,                                   # SMEM (P,) int32  (scalar prefetch)
               consts_ref,                                # VMEM (16,1024) f32 packed consts
               acts_ref,                                  # VMEM (R,768)  f32 packed activations
               wmha_hbm, hpw1_hbm, hpw2_hbm, npw1_hbm,    # HBM (pl.ANY) bf16 weights
               out_ref,                                   # VMEM (4,768)  f32
               wmha_v, hpw1_v, hpw2_v, npw1_v, sem):      # scratch
        f32 = jnp.float32
        bf16 = jnp.bfloat16

        # ---- 1. kick off every weight DMA immediately (HBM -> VMEM) --------
        cp_mha = pltpu.make_async_copy(wmha_hbm, wmha_v, sem.at[0]); cp_mha.start()
        cp_w1 = pltpu.make_async_copy(hpw1_hbm, hpw1_v, sem.at[1]); cp_w1.start()
        cp_w2 = pltpu.make_async_copy(hpw2_hbm, hpw2_v, sem.at[2]); cp_w2.start()
        cp_np = pltpu.make_async_copy(npw1_hbm, npw1_v, sem.at[3]); cp_np.start()

        # ---- 2. weight-free compute, hidden under the weight stream --------
        # In-kernel gather + mean of selected primitive rows (SMEM scalar reads
        # happen before any .wait()).  Mean-before-matmul is exact (linearity).
        prims = consts_ref[8:16, 0:EMB]                   # (8,768), rows >= 4 are zero
        row_ids = jax.lax.broadcasted_iota(jnp.int32, (8, EMB), 0)
        sel = jnp.zeros((8, EMB), f32)
        for i in range(n_pat):                            # static unroll (small P)
            sel = sel + (row_ids == idx_ref[i]).astype(f32)
        pattern_mean = jnp.sum(sel * prims, axis=0, keepdims=True) * inv_pat   # (1,768)

        noth = acts_ref[0:n_hid_rows, :]                                  # (K*T,768)
        notp = acts_ref[n_hid_rows:n_hid_rows + n_not, :]                 # (K,768)
        concept = acts_ref[n_hid_rows + n_not:n_hid_rows + n_not + 1, :]  # (1,768)

        not_space_vec = jnp.sum(noth, axis=0, keepdims=True) * inv_hid    # (1,768)
        not_agg = jnp.sum(notp, axis=0, keepdims=True) * inv_not          # (1,768)
        hole = _UNIV - not_agg                                            # (1,768)

        b_mha = consts_ref[4:5, 0:EMB]                    # folded bv@Wo + bo

        # ---- 3. pattern path: wait only for w_mha, then matmul -------------
        cp_mha.wait()
        pattern_vec = jnp.dot(pattern_mean.astype(bf16), wmha_v[...],
                              preferred_element_type=f32) + b_mha         # (1,768)

        # ---- 4. hole_projector ----------------------------------------------
        cp_w1.wait()
        h = jnp.dot(hole.astype(bf16), hpw1_v[...],
                    preferred_element_type=f32) + consts_ref[0:1, :]      # (1,1024)
        mu = jnp.mean(h, axis=-1, keepdims=True)          # one-pass LayerNorm
        mu2 = jnp.mean(h * h, axis=-1, keepdims=True)
        h = (h - mu) * jax.lax.rsqrt(mu2 - mu * mu + _EPS_LN)
        h = h * consts_ref[1:2, :] + consts_ref[2:3, :]   # LN affine
        h = jnp.maximum(h, 0.0)                           # ReLU (dropout = identity)

        cp_w2.wait()
        y = jnp.tanh(jnp.dot(h.astype(bf16), hpw2_v[...],
                             preferred_element_type=f32) + consts_ref[3:4, 0:EMB])
        fv = y * concept                                                  # (1,768)
        norm = jnp.sqrt(jnp.sum(fv * fv, axis=-1, keepdims=True))         # (1,1)
        hole_vec = fv * pl.reciprocal(norm + 1e-8, approx=True)

        combined = (pattern_vec + hole_vec) * 0.5                         # (1,768)

        # ---- 5. null_predictor (scalar consumed in-kernel) ------------------
        cp_np.wait()
        nh = jnp.dot(combined.astype(bf16), npw1_v[...],
                     preferred_element_type=f32) + consts_ref[5:6, 0:NULL_HID]
        nh = jnp.maximum(nh, 0.0)
        s = jnp.sum(nh * consts_ref[6:7, 0:NULL_HID], axis=-1, keepdims=True) \
            + consts_ref[7:8, 0:1]
        null_ratio = jax.nn.sigmoid(s)                                    # (1,1)

        final_vec = combined * (1.0 - null_ratio)                         # (1,768)

        # ---- 6. empathy: reuse the VMEM-resident folded MHA weight ----------
        emp = jnp.dot(final_vec.astype(bf16), wmha_v[...],
                      preferred_element_type=f32) + b_mha                 # (1,768)
        mutual = jnp.sqrt(jnp.sum(emp * emp, axis=-1, keepdims=True))     # (1,1)

        # ---- 7. single lane-dense (4,768) store ------------------------------
        out_ref[...] = jnp.concatenate(
            [final_vec, not_space_vec,
             jnp.broadcast_to(null_ratio, (1, EMB)),
             jnp.broadcast_to(mutual, (1, EMB))], axis=0)

    return kernel


# ----------------------------------------------------------------------------
# Forward pass (mirrors VectorizedObjectGenerator.forward), single pallas_call
# ----------------------------------------------------------------------------
@jax.jit
def forward(pattern_idx, concept_encoding, not_encoding_pooled, not_hidden, params):
    P = pattern_idx.shape[0]
    K, T, _ = not_hidden.shape
    R = K * T + K + 1

    # one packed activation operand: [not_hidden rows ; not_pooled ; concept]
    acts = jnp.concatenate(
        [not_hidden.reshape(-1, EMB), not_encoding_pooled, concept_encoding],
        axis=0)                                                           # (R,768)

    grid_spec = pltpu.PrefetchScalarGridSpec(
        num_scalar_prefetch=1,
        grid=(1,),
        in_specs=[
            pl.BlockSpec((_CONST_ROWS, HID), lambda i, idx: (0, 0)),   # consts
            pl.BlockSpec((R, EMB), lambda i, idx: (0, 0)),             # activations
            pl.BlockSpec(memory_space=pl.ANY),                         # w_mha   (HBM)
            pl.BlockSpec(memory_space=pl.ANY),                         # hp_w1   (HBM)
            pl.BlockSpec(memory_space=pl.ANY),                         # hp_w2   (HBM)
            pl.BlockSpec(memory_space=pl.ANY),                         # np_w1   (HBM)
        ],
        out_specs=pl.BlockSpec((4, EMB), lambda i, idx: (0, 0)),
        scratch_shapes=[
            pltpu.VMEM((EMB, EMB), jnp.bfloat16),        # w_mha landing buffer
            pltpu.VMEM((EMB, HID), jnp.bfloat16),        # hp_w1
            pltpu.VMEM((HID, EMB), jnp.bfloat16),        # hp_w2
            pltpu.VMEM((EMB, NULL_HID), jnp.bfloat16),   # np_w1
            pltpu.SemaphoreType.DMA((4,)),
        ])

    out = pl.pallas_call(
        _make_kernel(P, K, T),
        out_shape=jax.ShapeDtypeStruct((4, EMB), jnp.float32),
        grid_spec=grid_spec,
        compiler_params=pltpu.CompilerParams(
            dimension_semantics=("arbitrary",),
            vmem_limit_bytes=32 * 1024 * 1024),
    )(pattern_idx, params["consts"], acts,
      params["w_mha"], params["hp_w1"], params["hp_w2"], params["np_w1"])

    final_vector = out[0]
    not_space_vector = out[1]
    null_ratio = out[2, 0]
    mutual_empathy = out[3, 0]
    empathy_scores = {
        "self_empathy": jnp.float32(1.0),   # softmax over a single key is exactly 1
        "other_empathy": jnp.float32(0.0),
        "mutual_empathy": mutual_empathy,
    }
    return {
        "vector": final_vector,
        "null_ratio": null_ratio,
        "not_space_vector": not_space_vector,
        "empathy_scores": empathy_scores,
    }


# ----------------------------------------------------------------------------
# Deterministic parameter / primitive-embedding initialization
# ----------------------------------------------------------------------------
def init_raw_params(key):
    """Weights stored as (in_features, out_features): y = x @ W + b."""
    ks = jax.random.split(key, 6)
    s = 0.02
    return {
        # hole_projector: Linear(768,1024) + LayerNorm(1024) + Linear(1024,768)
        "hp_w1": jax.random.normal(ks[0], (EMB, HID), jnp.float32) * s,
        "hp_b1": jnp.zeros((1, HID), jnp.float32),
        "hp_g": jnp.ones((1, HID), jnp.float32),
        "hp_beta": jnp.zeros((1, HID), jnp.float32),
        "hp_w2": jax.random.normal(ks[1], (HID, EMB), jnp.float32) * s,
        "hp_b2": jnp.zeros((1, EMB), jnp.float32),
        # null_predictor: Linear(768,256) + Linear(256,1)
        "np_w1": jax.random.normal(ks[2], (EMB, NULL_HID), jnp.float32) * s,
        "np_b1": jnp.zeros((1, NULL_HID), jnp.float32),
        "np_w2": jax.random.normal(ks[3], (NULL_HID, 1), jnp.float32) * s,
        "np_b2": jnp.zeros((1, 1), jnp.float32),
        # empathy_attention (only v/out projections matter at seq_len == 1)
        "mha_wv": jax.random.normal(ks[4], (EMB, EMB), jnp.float32) * s,
        "mha_bv": jnp.zeros((1, EMB), jnp.float32),
        "mha_wo": jax.random.normal(ks[5], (EMB, EMB), jnp.float32) * s,
        "mha_bo": jnp.zeros((1, EMB), jnp.float32),
    }


def prepare_params(raw, primitives):
    """Fold seq-len-1 MHA, cast big weights to bf16, pack small consts (done once)."""
    # TODO(synk): weight-only int8 (v5e/v6e) / fp8 (v7x) would halve streamed
    #             bytes again; kept bf16 for fidelity to the fp32 reference.
    b_mha = raw["mha_bv"] @ raw["mha_wo"] + raw["mha_bo"]            # (1,768)

    def pad_lanes(x):
        return jnp.pad(x, ((0, 0), (0, HID - x.shape[1])))

    prims8 = jnp.pad(primitives, ((0, 8 - primitives.shape[0]), (0, 0)))  # (8,768)
    consts = jnp.concatenate([
        raw["hp_b1"],                               # row 0              (1024 lanes)
        raw["hp_g"],                                # row 1
        raw["hp_beta"],                             # row 2
        pad_lanes(raw["hp_b2"]),                    # row 3   lanes 0:768
        pad_lanes(b_mha),                           # row 4   lanes 0:768
        pad_lanes(raw["np_b1"]),                    # row 5   lanes 0:256
        pad_lanes(raw["np_w2"].T),                  # row 6   lanes 0:256
        jnp.broadcast_to(raw["np_b2"], (1, HID)),   # row 7   lane 0 used
        pad_lanes(prims8),                          # rows 8..15  lanes 0:768
    ], axis=0).astype(jnp.float32)                  # (16,1024)

    return {
        "consts": consts,
        "w_mha": (raw["mha_wv"] @ raw["mha_wo"]).astype(jnp.bfloat16),   # folded Wv@Wo
        "hp_w1": raw["hp_w1"].astype(jnp.bfloat16),
        "hp_w2": raw["hp_w2"].astype(jnp.bfloat16),
        "np_w1": raw["np_w1"].astype(jnp.bfloat16),
    }


def init_primitives():
    # hadamard(1024)[:4, :768], row-normalized; rows correspond to '1','!1','&&','||'
    H = np.array([[1.0]], dtype=np.float64)
    for _ in range(10):
        H = np.block([[H, H], [H, -H]])
    P = H[:4, :EMB].astype(np.float32)
    P = P / np.linalg.norm(P, axis=1, keepdims=True)
    return jnp.asarray(P)


# ----------------------------------------------------------------------------
# Pure-JAX fp32 reference (same folded-MHA semantics) for a sanity check
# ----------------------------------------------------------------------------
def reference_forward(pattern_idx, concept_encoding, not_encoding_pooled,
                      not_hidden, primitives, raw):
    w_mha = raw["mha_wv"] @ raw["mha_wo"]
    b_mha = raw["mha_bv"] @ raw["mha_wo"] + raw["mha_bo"]
    pat = jnp.take(primitives, pattern_idx, axis=0)                     # (P,768)
    pattern_vec = (pat @ w_mha + b_mha).mean(axis=0, keepdims=True)

    not_agg = not_encoding_pooled.mean(axis=0, keepdims=True)
    hole = _UNIV - not_agg
    h = hole @ raw["hp_w1"] + raw["hp_b1"]
    mu = h.mean(-1, keepdims=True)
    var = ((h - mu) ** 2).mean(-1, keepdims=True)
    h = (h - mu) / jnp.sqrt(var + _EPS_LN) * raw["hp_g"] + raw["hp_beta"]
    h = jnp.maximum(h, 0.0)
    y = jnp.tanh(h @ raw["hp_w2"] + raw["hp_b2"])
    fv = y * concept_encoding
    hole_vec = fv / (jnp.linalg.norm(fv, axis=-1, keepdims=True) + 1e-8)

    combined = (pattern_vec + hole_vec) * 0.5
    nh = jnp.maximum(combined @ raw["np_w1"] + raw["np_b1"], 0.0)
    null_ratio = jax.nn.sigmoid(nh @ raw["np_w2"] + raw["np_b2"])[0, 0]
    final_vec = (combined * (1.0 - null_ratio))[0]

    emp = final_vec[None, :] @ w_mha + b_mha
    mutual = jnp.linalg.norm(emp)
    not_space_vec = not_hidden.reshape(-1, EMB).mean(axis=0)
    return final_vec, not_space_vec, null_ratio, mutual


if __name__ == "__main__":
    key = jax.random.PRNGKey(0)
    k_par, k_ce, k_ne, k_nh = jax.random.split(key, 4)

    raw = init_raw_params(k_par)
    primitives = init_primitives()
    params = prepare_params(raw, primitives)

    K, T = 3, 8  # not-space phrases, tokens per phrase
    pattern_idx = jnp.array([0, 2, 1, 3], dtype=jnp.int32)                # ['1','&&','!1','||']
    concept_encoding = jax.random.normal(k_ce, (1, EMB), jnp.float32)     # mean-pooled BERT
    not_encoding_pooled = jax.random.normal(k_ne, (K, EMB), jnp.float32)  # mean-pooled BERT
    not_hidden = jax.random.normal(k_nh, (K, T, EMB), jnp.float32)        # BERT last_hidden

    out = forward(pattern_idx, concept_encoding, not_encoding_pooled,
                  not_hidden, params)
    jax.block_until_ready(out)

    # loose-tolerance check vs. fp32 reference (bf16 weight storage + approx rcp)
    ref_vec, ref_nsv, ref_null, ref_mut = reference_forward(
        pattern_idx, concept_encoding, not_encoding_pooled, not_hidden,
        primitives, raw)
    np.testing.assert_allclose(np.asarray(out["vector"]), np.asarray(ref_vec),
                               rtol=1e-1, atol=2e-2)
    np.testing.assert_allclose(np.asarray(out["not_space_vector"]),
                               np.asarray(ref_nsv), rtol=1e-1, atol=2e-2)
    np.testing.assert_allclose(float(out["null_ratio"]), float(ref_null),
                               rtol=1e-1, atol=2e-2)
    np.testing.assert_allclose(float(out["empathy_scores"]["mutual_empathy"]),
                               float(ref_mut), rtol=1e-1, atol=2e-2)

    print("KERNEL_OK")
</pallas_src>

<mosaic_0001>
module attributes {stable_mosaic.version = 11 : i64} {
  func.func @kernel(%arg0: i32, %arg1: memref<4xi32, #tpu.memory_space<smem>>, %arg2: memref<16x1024xf32, #tpu.memory_space<vmem>>, %arg3: memref<28x768xf32, #tpu.memory_space<vmem>>, %arg4: memref<768x768xbf16, #tpu.memory_space<any>>, %arg5: memref<768x1024xbf16, #tpu.memory_space<any>>, %arg6: memref<1024x768xbf16, #tpu.memory_space<any>>, %arg7: memref<768x256xbf16, #tpu.memory_space<any>>, %arg8: memref<4x768xf32, #tpu.memory_space<vmem>>, %arg9: memref<768x768xbf16, #tpu.memory_space<vmem>>, %arg10: memref<768x1024xbf16, #tpu.memory_space<vmem>>, %arg11: memref<1024x768xbf16, #tpu.memory_space<vmem>>, %arg12: memref<768x256xbf16, #tpu.memory_space<vmem>>, %arg13: memref<4x!tpu.dma_semaphore, #tpu.memory_space<semaphore_mem>>) attributes {dimension_semantics = [#tpu.dimension_semantics<arbitrary>], iteration_bounds = array<i64: 1>, scalar_prefetch = 1 : i64, scratch_operands = 5 : i64, tpu.core_type = #tpu.core_type<tc>, window_params = [{pipeline_mode = #tpu.pipeline_mode<synchronous>, transform_indices = @transform_0, window_bounds = array<i64: 16, 1024>}, {pipeline_mode = #tpu.pipeline_mode<synchronous>, transform_indices = @transform_1, window_bounds = array<i64: 28, 768>}, {}, {}, {}, {}, {pipeline_mode = #tpu.pipeline_mode<synchronous>, transform_indices = @transform_6, window_bounds = array<i64: 4, 768>}]} {
    %c0_i32 = arith.constant 0 : i32
    %0 = tpu.memref_slice %arg13[%c0_i32] : memref<4x!tpu.dma_semaphore, #tpu.memory_space<semaphore_mem>> -> memref<1x!tpu.dma_semaphore, #tpu.memory_space<semaphore_mem>>
    %1 = tpu.memref_squeeze %0 : memref<1x!tpu.dma_semaphore, #tpu.memory_space<semaphore_mem>> -> memref<!tpu.dma_semaphore, #tpu.memory_space<semaphore_mem>>
    tpu.enqueue_dma source(%arg4 : memref<768x768xbf16, #tpu.memory_space<any>>) target(%arg9 : memref<768x768xbf16, #tpu.memory_space<vmem>>) target_semaphore(%1 : memref<!tpu.dma_semaphore, #tpu.memory_space<semaphore_mem>>)
    %c1_i32 = arith.constant 1 : i32
    %2 = tpu.memref_slice %arg13[%c1_i32] : memref<4x!tpu.dma_semaphore, #tpu.memory_space<semaphore_mem>> -> memref<1x!tpu.dma_semaphore, #tpu.memory_space<semaphore_mem>>
    %3 = tpu.memref_squeeze %2 : memref<1x!tpu.dma_semaphore, #tpu.memory_space<semaphore_mem>> -> memref<!tpu.dma_semaphore, #tpu.memory_space<semaphore_mem>>
    tpu.enqueue_dma source(%arg5 : memref<768x1024xbf16, #tpu.memory_space<any>>) target(%arg10 : memref<768x1024xbf16, #tpu.memory_space<vmem>>) target_semaphore(%3 : memref<!tpu.dma_semaphore, #tpu.memory_space<semaphore_mem>>)
    %c2_i32 = arith.constant 2 : i32
    %4 = tpu.memref_slice %arg13[%c2_i32] : memref<4x!tpu.dma_semaphore, #tpu.memory_space<semaphore_mem>> -> memref<1x!tpu.dma_semaphore, #tpu.memory_space<semaphore_mem>>
    %5 = tpu.memref_squeeze %4 : memref<1x!tpu.dma_semaphore, #tpu.memory_space<semaphore_mem>> -> memref<!tpu.dma_semaphore, #tpu.memory_space<semaphore_mem>>
    tpu.enqueue_dma source(%arg6 : memref<1024x768xbf16, #tpu.memory_space<any>>) target(%arg11 : memref<1024x768xbf16, #tpu.memory_space<vmem>>) target_semaphore(%5 : memref<!tpu.dma_semaphore, #tpu.memory_space<semaphore_mem>>)
    %c3_i32 = arith.constant 3 : i32
    %6 = tpu.memref_slice %arg13[%c3_i32] : memref<4x!tpu.dma_semaphore, #tpu.memory_space<semaphore_mem>> -> memref<1x!tpu.dma_semaphore, #tpu.memory_space<semaphore_mem>>
    %7 = tpu.memref_squeeze %6 : memref<1x!tpu.dma_semaphore, #tpu.memory_space<semaphore_mem>> -> memref<!tpu.dma_semaphore, #tpu.memory_space<semaphore_mem>>
    tpu.enqueue_dma source(%arg7 : memref<768x256xbf16, #tpu.memory_space<any>>) target(%arg12 : memref<768x256xbf16, #tpu.memory_space<vmem>>) target_semaphore(%7 : memref<!tpu.dma_semaphore, #tpu.memory_space<semaphore_mem>>)
    %c8 = arith.constant 8 : index
    %c0 = arith.constant 0 : index
    %8 = vector.load %arg2[%c8, %c0] : memref<16x1024xf32, #tpu.memory_space<vmem>>, vector<8x768xf32>
    %9 = tpu.iota {dimensions = array<i32: 0>} : vector<8x768xi32>
    %cst = arith.constant 0.000000e+00 : f32
    %10 = vector.broadcast %cst : f32 to vector<8x768xf32>
    %c0_0 = arith.constant 0 : index
    %11 = memref.load %arg1[%c0_0] : memref<4xi32, #tpu.memory_space<smem>>
    %12 = vector.broadcast %11 : i32 to vector<8x768xi32>
    %13 = arith.cmpi eq, %9, %12 : vector<8x768xi32>
    %14 = arith.extui %13 : vector<8x768xi1> to vector<8x768xi32>
    %15 = arith.sitofp %14 : vector<8x768xi32> to vector<8x768xf32>
    %16 = arith.addf %10, %15 : vector<8x768xf32>
    %c1 = arith.constant 1 : index
    %17 = memref.load %arg1[%c1] : memref<4xi32, #tpu.memory_space<smem>>
    %18 = vector.broadcast %17 : i32 to vector<8x768xi32>
    %19 = arith.cmpi eq, %9, %18 : vector<8x768xi32>
    %20 = arith.extui %19 : vector<8x768xi1> to vector<8x768xi32>
    %21 = arith.sitofp %20 : vector<8x768xi32> to vector<8x768xf32>
    %22 = arith.addf %16, %21 : vector<8x768xf32>
    %c2 = arith.constant 2 : index
    %23 = memref.load %arg1[%c2] : memref<4xi32, #tpu.memory_space<smem>>
    %24 = vector.broadcast %23 : i32 to vector<8x768xi32>
    %25 = arith.cmpi eq, %9, %24 : vector<8x768xi32>
    %26 = arith.extui %25 : vector<8x768xi1> to vector<8x768xi32>
    %27 = arith.sitofp %26 : vector<8x768xi32> to vector<8x768xf32>
    %28 = arith.addf %22, %27 : vector<8x768xf32>
    %c3 = arith.constant 3 : index
    %29 = memref.load %arg1[%c3] : memref<4xi32, #tpu.memory_space<smem>>
    %30 = vector.broadcast %29 : i32 to vector<8x768xi32>
    %31 = arith.cmpi eq, %9, %30 : vector<8x768xi32>
    %32 = arith.extui %31 : vector<8x768xi1> to vector<8x768xi32>
    %33 = arith.sitofp %32 : vector<8x768xi32> to vector<8x768xf32>
    %34 = arith.addf %28, %33 : vector<8x768xf32>
    %35 = arith.mulf %34, %8 : vector<8x768xf32>
    %cst_1 = arith.constant dense<0.000000e+00> : vector<768xf32>
    %36 = vector.multi_reduction <add>, %35, %cst_1 [0] : vector<8x768xf32> to vector<768xf32>
    %37 = vector.shape_cast %36 : vector<768xf32> to vector<1x768xf32>
    %cst_2 = arith.constant 2.500000e-01 : f32
    %38 = vector.broadcast %cst_2 : f32 to vector<1x768xf32>
    %39 = arith.mulf %37, %38 : vector<1x768xf32>
    %c0_3 = arith.constant 0 : index
    %c0_4 = arith.constant 0 : index
    %40 = vector.load %arg3[%c0_3, %c0_4] : memref<28x768xf32, #tpu.memory_space<vmem>>, vector<24x768xf32>
    %c24 = arith.constant 24 : index
    %c0_5 = arith.constant 0 : index
    %41 = vector.load %arg3[%c24, %c0_5] : memref<28x768xf32, #tpu.memory_space<vmem>>, vector<3x768xf32>
    %c27 = arith.constant 27 : index
    %c0_6 = arith.constant 0 : index
    %42 = vector.load %arg3[%c27, %c0_6] : memref<28x768xf32, #tpu.memory_space<vmem>>, vector<1x768xf32>
    %cst_7 = arith.constant dense<0.000000e+00> : vector<768xf32>
    %43 = vector.multi_reduction <add>, %40, %cst_7 [0] : vector<24x768xf32> to vector<768xf32>
    %44 = vector.shape_cast %43 : vector<768xf32> to vector<1x768xf32>
    %cst_8 = arith.constant 0.0416666679 : f32
    %45 = vector.broadcast %cst_8 : f32 to vector<1x768xf32>
    %46 = arith.mulf %44, %45 : vector<1x768xf32>
    %cst_9 = arith.constant dense<0.000000e+00> : vector<768xf32>
    %47 = vector.multi_reduction <add>, %41, %cst_9 [0] : vector<3x768xf32> to vector<768xf32>
    %48 = vector.shape_cast %47 : vector<768xf32> to vector<1x768xf32>
    %cst_10 = arith.constant 0.333333343 : f32
    %49 = vector.broadcast %cst_10 : f32 to vector<1x768xf32>
    %50 = arith.mulf %48, %49 : vector<1x768xf32>
    %cst_11 = arith.constant 0.0360843912 : f32
    %51 = vector.broadcast %cst_11 : f32 to vector<1x768xf32>
    %52 = arith.subf %51, %50 : vector<1x768xf32>
    %c4 = arith.constant 4 : index
    %c0_12 = arith.constant 0 : index
    %53 = vector.load %arg2[%c4, %c0_12] : memref<16x1024xf32, #tpu.memory_space<vmem>>, vector<1x768xf32>
    %c0_i32_13 = arith.constant 0 : i32
    %54 = tpu.memref_slice %arg13[%c0_i32_13] : memref<4x!tpu.dma_semaphore, #tpu.memory_space<semaphore_mem>> -> memref<1x!tpu.dma_semaphore, #tpu.memory_space<semaphore_mem>>
    %55 = tpu.memref_squeeze %54 : memref<1x!tpu.dma_semaphore, #tpu.memory_space<semaphore_mem>> -> memref<!tpu.dma_semaphore, #tpu.memory_space<semaphore_mem>>
    tpu.wait_dma2 semaphore(%55 : memref<!tpu.dma_semaphore, #tpu.memory_space<semaphore_mem>>) src(%arg4 : memref<768x768xbf16, #tpu.memory_space<any>>) dst(%arg9 : memref<768x768xbf16, #tpu.memory_space<vmem>>)
    %56 = arith.truncf %39 : vector<1x768xf32> to vector<1x768xbf16>
    %c0_14 = arith.constant 0 : index
    %c0_15 = arith.constant 0 : index
    %57 = vector.load %arg9[%c0_14, %c0_15] : memref<768x768xbf16, #tpu.memory_space<vmem>>, vector<768x768xbf16>
    %cst_16 = arith.constant dense<0.000000e+00> : vector<1x768xf32>
    %58 = tpu.matmul %56, %57, %cst_16 {dimension_numbers = #tpu.dot_dimension_numbers<[1], [0], [0], [1], [0, 0, 1, 1], [], []>} : vector<1x768xbf16>, vector<768x768xbf16>, vector<1x768xf32> -> vector<1x768xf32>
    %59 = arith.addf %58, %53 : vector<1x768xf32>
    %c1_i32_17 = arith.constant 1 : i32
    %60 = tpu.memref_slice %arg13[%c1_i32_17] : memref<4x!tpu.dma_semaphore, #tpu.memory_space<semaphore_mem>> -> memref<1x!tpu.dma_semaphore, #tpu.memory_space<semaphore_mem>>
    %61 = tpu.memref_squeeze %60 : memref<1x!tpu.dma_semaphore, #tpu.memory_space<semaphore_mem>> -> memref<!tpu.dma_semaphore, #tpu.memory_space<semaphore_mem>>
    tpu.wait_dma2 semaphore(%61 : memref<!tpu.dma_semaphore, #tpu.memory_space<semaphore_mem>>) src(%arg5 : memref<768x1024xbf16, #tpu.memory_space<any>>) dst(%arg10 : memref<768x1024xbf16, #tpu.memory_space<vmem>>)
    %62 = arith.truncf %52 : vector<1x768xf32> to vector<1x768xbf16>
    %c0_18 = arith.constant 0 : index
    %c0_19 = arith.constant 0 : index
    %63 = vector.load %arg10[%c0_18, %c0_19] : memref<768x1024xbf16, #tpu.memory_space<vmem>>, vector<768x1024xbf16>
    %cst_20 = arith.constant dense<0.000000e+00> : vector<1x1024xf32>
    %64 = tpu.matmul %62, %63, %cst_20 {dimension_numbers = #tpu.dot_dimension_numbers<[1], [0], [0], [1], [0, 0, 1, 1], [], []>} : vector<1x768xbf16>, vector<768x1024xbf16>, vector<1x1024xf32> -> vector<1x1024xf32>
    %c0_21 = arith.constant 0 : index
    %c0_22 = arith.constant 0 : index
    %65 = vector.load %arg2[%c0_21, %c0_22] : memref<16x1024xf32, #tpu.memory_space<vmem>>, vector<1x1024xf32>
    %66 = arith.addf %64, %65 : vector<1x1024xf32>
    %cst_23 = arith.constant dense<0.000000e+00> : vector<1xf32>
    %67 = vector.multi_reduction <add>, %66, %cst_23 [1] : vector<1x1024xf32> to vector<1xf32>
    %68 = vector.shape_cast %67 : vector<1xf32> to vector<1x1xf32>
    %cst_24 = arith.constant 1.024000e+03 : f32
    %69 = vector.broadcast %cst_24 : f32 to vector<1x1xf32>
    %70 = arith.divf %68, %69 : vector<1x1xf32>
    %71 = arith.mulf %66, %66 : vector<1x1024xf32>
    %cst_25 = arith.constant dense<0.000000e+00> : vector<1xf32>
    %72 = vector.multi_reduction <add>, %71, %cst_25 [1] : vector<1x1024xf32> to vector<1xf32>
    %73 = vector.shape_cast %72 : vector<1xf32> to vector<1x1xf32>
    %cst_26 = arith.constant 1.024000e+03 : f32
    %74 = vector.broadcast %cst_26 : f32 to vector<1x1xf32>
    %75 = arith.divf %73, %74 : vector<1x1xf32>
    %76 = vector.broadcast %70 : vector<1x1xf32> to vector<1x1024xf32>
    %77 = arith.subf %66, %76 : vector<1x1024xf32>
    %78 = arith.mulf %70, %70 : vector<1x1xf32>
    %79 = arith.subf %75, %78 : vector<1x1xf32>
    %cst_27 = arith.constant 9.99999974E-6 : f32
    %80 = vector.broadcast %cst_27 : f32 to vector<1x1xf32>
    %81 = arith.addf %79, %80 : vector<1x1xf32>
    %82 = math.rsqrt %81 : vector<1x1xf32>
    %83 = vector.broadcast %82 : vector<1x1xf32> to vector<1x1024xf32>
    %84 = arith.mulf %77, %83 : vector<1x1024xf32>
    %c1_28 = arith.constant 1 : index
    %c0_29 = arith.constant 0 : index
    %85 = vector.load %arg2[%c1_28, %c0_29] : memref<16x1024xf32, #tpu.memory_space<vmem>>, vector<1x1024xf32>
    %86 = arith.mulf %84, %85 : vector<1x1024xf32>
    %c2_30 = arith.constant 2 : index
    %c0_31 = arith.constant 0 : index
    %87 = vector.load %arg2[%c2_30, %c0_31] : memref<16x1024xf32, #tpu.memory_space<vmem>>, vector<1x1024xf32>
    %88 = arith.addf %86, %87 : vector<1x1024xf32>
    %cst_32 = arith.constant 0.000000e+00 : f32
    %89 = vector.broadcast %cst_32 : f32 to vector<1x1024xf32>
    %90 = arith.maximumf %88, %89 : vector<1x1024xf32>
    %c2_i32_33 = arith.constant 2 : i32
    %91 = tpu.memref_slice %arg13[%c2_i32_33] : memref<4x!tpu.dma_semaphore, #tpu.memory_space<semaphore_mem>> -> memref<1x!tpu.dma_semaphore, #tpu.memory_space<semaphore_mem>>
    %92 = tpu.memref_squeeze %91 : memref<1x!tpu.dma_semaphore, #tpu.memory_space<semaphore_mem>> -> memref<!tpu.dma_semaphore, #tpu.memory_space<semaphore_mem>>
    tpu.wait_dma2 semaphore(%92 : memref<!tpu.dma_semaphore, #tpu.memory_space<semaphore_mem>>) src(%arg6 : memref<1024x768xbf16, #tpu.memory_space<any>>) dst(%arg11 : memref<1024x768xbf16, #tpu.memory_space<vmem>>)
    %93 = arith.truncf %90 : vector<1x1024xf32> to vector<1x1024xbf16>
    %c0_34 = arith.constant 0 : index
    %c0_35 = arith.constant 0 : index
    %94 = vector.load %arg11[%c0_34, %c0_35] : memref<1024x768xbf16, #tpu.memory_space<vmem>>, vector<1024x768xbf16>
    %cst_36 = arith.constant dense<0.000000e+00> : vector<1x768xf32>
    %95 = tpu.matmul %93, %94, %cst_36 {dimension_numbers = #tpu.dot_dimension_numbers<[1], [0], [0], [1], [0, 0, 1, 1], [], []>} : vector<1x1024xbf16>, vector<1024x768xbf16>, vector<1x768xf32> -> vector<1x768xf32>
    %c3_37 = arith.constant 3 : index
    %c0_38 = arith.constant 0 : index
    %96 = vector.load %arg2[%c3_37, %c0_38] : memref<16x1024xf32, #tpu.memory_space<vmem>>, vector<1x768xf32>
    %97 = arith.addf %95, %96 : vector<1x768xf32>
    %98 = math.tanh %97 : vector<1x768xf32>
    %99 = arith.mulf %98, %42 : vector<1x768xf32>
    %100 = arith.mulf %99, %99 : vector<1x768xf32>
    %cst_39 = arith.constant dense<0.000000e+00> : vector<1xf32>
    %101 = vector.multi_reduction <add>, %100, %cst_39 [1] : vector<1x768xf32> to vector<1xf32>
    %102 = vector.shape_cast %101 : vector<1xf32> to vector<1x1xf32>
    %103 = math.sqrt %102 : vector<1x1xf32>
    %cst_40 = arith.constant 9.99999993E-9 : f32
    %104 = vector.broadcast %cst_40 : f32 to vector<1x1xf32>
    %105 = arith.addf %103, %104 : vector<1x1xf32>
    %106 = tpu.reciprocal %105 {approx = true} : vector<1x1xf32> -> vector<1x1xf32>
    %107 = vector.broadcast %106 : vector<1x1xf32> to vector<1x768xf32>
    %108 = arith.mulf %99, %107 : vector<1x768xf32>
    %109 = arith.addf %59, %108 : vector<1x768xf32>
    %cst_41 = arith.constant 5.000000e-01 : f32
    %110 = vector.broadcast %cst_41 : f32 to vector<1x768xf32>
    %111 = arith.mulf %109, %110 : vector<1x768xf32>
    %c3_i32_42 = arith.constant 3 : i32
    %112 = tpu.memref_slice %arg13[%c3_i32_42] : memref<4x!tpu.dma_semaphore, #tpu.memory_space<semaphore_mem>> -> memref<1x!tpu.dma_semaphore, #tpu.memory_space<semaphore_mem>>
    %113 = tpu.memref_squeeze %112 : memref<1x!tpu.dma_semaphore, #tpu.memory_space<semaphore_mem>> -> memref<!tpu.dma_semaphore, #tpu.memory_space<semaphore_mem>>
    tpu.wait_dma2 semaphore(%113 : memref<!tpu.dma_semaphore, #tpu.memory_space<semaphore_mem>>) src(%arg7 : memref<768x256xbf16, #tpu.memory_space<any>>) dst(%arg12 : memref<768x256xbf16, #tpu.memory_space<vmem>>)
    %114 = arith.truncf %111 : vector<1x768xf32> to vector<1x768xbf16>
    %c0_43 = arith.constant 0 : index
    %c0_44 = arith.constant 0 : index
    %115 = vector.load %arg12[%c0_43, %c0_44] : memref<768x256xbf16, #tpu.memory_space<vmem>>, vector<768x256xbf16>
    %cst_45 = arith.constant dense<0.000000e+00> : vector<1x256xf32>
    %116 = tpu.matmul %114, %115, %cst_45 {dimension_numbers = #tpu.dot_dimension_numbers<[1], [0], [0], [1], [0, 0, 1, 1], [], []>} : vector<1x768xbf16>, vector<768x256xbf16>, vector<1x256xf32> -> vector<1x256xf32>
    %c5 = arith.constant 5 : index
    %c0_46 = arith.constant 0 : index
    %117 = vector.load %arg2[%c5, %c0_46] : memref<16x1024xf32, #tpu.memory_space<vmem>>, vector<1x256xf32>
    %118 = arith.addf %116, %117 : vector<1x256xf32>
    %cst_47 = arith.constant 0.000000e+00 : f32
    %119 = vector.broadcast %cst_47 : f32 to vector<1x256xf32>
    %120 = arith.maximumf %118, %119 : vector<1x256xf32>
    %c6 = arith.constant 6 : index
    %c0_48 = arith.constant 0 : index
    %121 = vector.load %arg2[%c6, %c0_48] : memref<16x1024xf32, #tpu.memory_space<vmem>>, vector<1x256xf32>
    %122 = arith.mulf %120, %121 : vector<1x256xf32>
    %cst_49 = arith.constant dense<0.000000e+00> : vector<1xf32>
    %123 = vector.multi_reduction <add>, %122, %cst_49 [1] : vector<1x256xf32> to vector<1xf32>
    %124 = vector.shape_cast %123 : vector<1xf32> to vector<1x1xf32>
    %c7 = arith.constant 7 : index
    %c0_50 = arith.constant 0 : index
    %125 = vector.load %arg2[%c7, %c0_50] : memref<16x1024xf32, #tpu.memory_space<vmem>>, vector<1x1xf32>
    %126 = arith.addf %124, %125 : vector<1x1xf32>
    %127 = arith.negf %126 : vector<1x1xf32>
    %128 = math.exp %127 : vector<1x1xf32>
    %cst_51 = arith.constant 1.000000e+00 : f32
    %129 = vector.broadcast %cst_51 : f32 to vector<1x1xf32>
    %130 = arith.addf %129, %128 : vector<1x1xf32>
    %131 = arith.divf %129, %130 : vector<1x1xf32>
    %cst_52 = arith.constant 1.000000e+00 : f32
    %132 = vector.broadcast %cst_52 : f32 to vector<1x1xf32>
    %133 = arith.subf %132, %131 : vector<1x1xf32>
    %134 = vector.broadcast %133 : vector<1x1xf32> to vector<1x768xf32>
    %135 = arith.mulf %111, %134 : vector<1x768xf32>
    %136 = arith.truncf %135 : vector<1x768xf32> to vector<1x768xbf16>
    %c0_53 = arith.constant 0 : index
    %c0_54 = arith.constant 0 : index
    %137 = vector.load %arg9[%c0_53, %c0_54] : memref<768x768xbf16, #tpu.memory_space<vmem>>, vector<768x768xbf16>
    %cst_55 = arith.constant dense<0.000000e+00> : vector<1x768xf32>
    %138 = tpu.matmul %136, %137, %cst_55 {dimension_numbers = #tpu.dot_dimension_numbers<[1], [0], [0], [1], [0, 0, 1, 1], [], []>} : vector<1x768xbf16>, vector<768x768xbf16>, vector<1x768xf32> -> vector<1x768xf32>
    %139 = arith.addf %138, %53 : vector<1x768xf32>
    %140 = arith.mulf %139, %139 : vector<1x768xf32>
    %cst_56 = arith.constant dense<0.000000e+00> : vector<1xf32>
    %141 = vector.multi_reduction <add>, %140, %cst_56 [1] : vector<1x768xf32> to vector<1xf32>
    %142 = vector.shape_cast %141 : vector<1xf32> to vector<1x1xf32>
    %143 = math.sqrt %142 : vector<1x1xf32>
    %144 = vector.shape_cast %131 : vector<1x1xf32> to vector<1x1xf32>
    %145 = vector.broadcast %144 : vector<1x1xf32> to vector<1x768xf32>
    %146 = vector.shape_cast %143 : vector<1x1xf32> to vector<1x1xf32>
    %147 = vector.broadcast %146 : vector<1x1xf32> to vector<1x768xf32>
    %148 = tpu.concatenate %135, %46, %145, %147 in 0 : vector<1x768xf32>, vector<1x768xf32>, vector<1x768xf32>, vector<1x768xf32> -> vector<4x768xf32>
    %c0_57 = arith.constant 0 : index
    %c0_58 = arith.constant 0 : index
    %149 = vector.load %arg8[%c0_57, %c0_58] : memref<4x768xf32, #tpu.memory_space<vmem>>, vector<4x768xf32>
    tpu.vector_store %arg8[%c0_57, %c0_58], %148 {strides = array<i32>} : memref<4x768xf32, #tpu.memory_space<vmem>>, vector<4x768xf32>,
    return
  }
  func.func @transform_0(%arg0: i32, %arg1: memref<4xi32, #tpu.memory_space<smem>>) -> (i32, i32) {
    %c0_i32 = arith.constant 0 : i32
    %c0_i32_0 = arith.constant 0 : i32
    %c0_i32_1 = arith.constant 0 : i32
    return %c0_i32, %c0_i32_0 : i32, i32
  }
  func.func @transform_1(%arg0: i32, %arg1: memref<4xi32, #tpu.memory_space<smem>>) -> (i32, i32) {
    %c0_i32 = arith.constant 0 : i32
    %c0_i32_0 = arith.constant 0 : i32
    %c0_i32_1 = arith.constant 0 : i32
    return %c0_i32, %c0_i32_0 : i32, i32
  }
  func.func @transform_6(%arg0: i32, %arg1: memref<4xi32, #tpu.memory_space<smem>>) -> (i32, i32) {
    %c0_i32 = arith.constant 0 : i32
    %c0_i32_0 = arith.constant 0 : i32
    %c0_i32_1 = arith.constant 0 : i32
    return %c0_i32, %c0_i32_0 : i32, i32
  }
}

</mosaic_0001>

<bundles_post_ra>
// kernel: forward.1
= control target key start
LH: loop header
LB: loop body
LE: loop exit
PB: predicated region body
PF: predicated region fallthrough
CT: control target
= control target key end

     0   :  { %s5313_s0 = inlined_call_operand.hbm [shape: s32[4], index: 0, kind: input, shape index: {}]   ;;  %s5314_s1 = inlined_call_operand.hbm [shape: f32[16,1024], index: 1, kind: input, shape index: {}]   ;;  %s5315_s2 = inlined_call_operand.vmem [shape: f32[28,768], index: 2, kind: input, shape index: {}]   ;;  %s5316_s3 = inlined_call_operand.hbm [shape: bf16[768,768], index: 3, kind: input, shape index: {}]   ;;  %s5317_s4 = inlined_call_operand.hbm [shape: bf16[768,1024], index: 4, kind: input, shape index: {}]   ;;  %s5318_s5 = inlined_call_operand.hbm [shape: bf16[1024,768], index: 5, kind: input, shape index: {}]   ;;  %s5319_s6 = inlined_call_operand.hbm [shape: bf16[768,256], index: 6, kind: input, shape index: {}]   ;;  %s5320_s7 = inlined_call_operand.vmem [shape: f32[4,768], index: 7, kind: output, shape index: {}]  }
   0x1   :  { %s4458_s26 = scalar_lea.hbm %s5313_s0, 16 }
   0x2   :  { %p4459_p0 = scmp.ne.s32.totalorder %s5313_s0, %s4458_s26  ;;  %p4462_p1 = scmp.lt.u32.totalorder %s4458_s26, %s5313_s0 }
   0x4   :  { %p4464_p2 = pnand %p4462_p1, %p4459_p0 }
   0x6   :  { %4467 = shalt.err (!%p4464_p2)  }
   0x7   :  { %s4502_s8 = smov [#allocation8]  }
   0x8   :  { %13 = dma.hbm_to_smem %s5313_s0, 16, %s4502_s8, [#allocation7] }
   0x9   :  { %4490 = dma.done.wait [#allocation7], 16 }
   0xa   :  { %4491 = vsyncadd [#allocation7], 4294967280 }
   0xb   :  { %15 = sfence }
   0xc   :  { %16 = vsyncpa [#allocation10], 0  ;;  %s4503_s11 = smov [#allocation9]   ;;  %s4468_s15 = scalar_lea.hbm %s5314_s1, 2048 }
   0xd   :  { %s22_s12 = sshll.u32 %s4503_s11, 4  ;;  %p4469_p3 = scmp.ne.s32.totalorder %s5314_s1, %s4468_s15  ;;  %s23_s12 = int_to_ptr.vmem [resolvable:$true] %s22_s12 }
   0xe   :  { %p4472_p4 = scmp.lt.u32.totalorder %s4468_s15, %s5314_s1 }
  0x10   :  { %p4474_p5 = pnand %p4472_p4, %p4469_p3 }
  0x12   :  { %4477 = shalt.err (!%p4474_p5)
}
  0x13   :  { %s4478_s0 = scalar_lea.vmem %s23_s12, 2048  ;;  %p4483_p7 = scmp.lt.s32.totalorder %s23_s12, %s23_s12 }
  0x14   :  { %p4479_p6 = scmp.ne.s32.totalorder %s23_s12, %s4478_s0  ;;  %p4484_p8 = scmp.lt.s32.totalorder %s4478_s0, %s4478_s0 }
  0x16   :  { %p4485_p9 = por %p4484_p8, %p4483_p7 }
  0x18   :  { %p4486_p10 = pnand %p4485_p9, %p4479_p6 }
  0x1a   :  { %4489 = shalt.err (!%p4486_p10)
}
  0x1b   :  { %s4504_s20 = smov 1024   ;;  %s4505_s21 = smov 64  }
  0x1c   :  { %28 = dma.hbm_to_vmem [thread:$0]  %s5314_s1, 2048, %s23_s12, [#allocation10], %s4504_s20, %s4504_s20, %s4505_s21  }
  0x1d   :  { %4492 = dma.done.wait [#allocation10], 2048  }
  0x1e   :  { %4493 = vsyncadd [#allocation10], 4294965248  ;;  %s38_s24 = sld [smem:[#allocation0]]   ;;  %s4506_s25 = smov 768   ;;  %v180_v0 = vlaneseq  ;;  %v4527_v6 = vmov 0.0   ;;  %vm336_vm4 = vcmask 1042432  }
  0x1f   :  { %50 = sst [smem:[#allocation12]] %s4506_s25  ;;  %s4507_s26 = smov 6  }
  0x20   :  { %52 = sst [smem:[#allocation12 + $0x1]] %s4506_s25  ;;  %s4508_s27 = smov 128   ;;  %v4646_v1 = vshrl.u32 %v180_v0, 7 }
  0x21   :  { %54 = sst [smem:[#allocation12 + $0x2]] %s4507_s26  ;;  %s4509_s28 = smov 2  }
  0x22   :  { %56 = sst [smem:[#allocation12 + $0x3]] %s4505_s21  ;;  %s4510_s1 = smov [#allocation2]  }
  0x23   :  { %58 = sst [smem:[#allocation12 + $0x4]] %s4508_s27  ;;  %s46_s29 = sshll.u32 %s4510_s1, 4  ;;  %s47_s29 = int_to_ptr.vmem [resolvable:$true] %s46_s29 }
  0x24   :  { %60 = sst [smem:[#allocation12 + $0x5]] %s4509_s28  ;;  %s4261_s30 = sshll.u32 %s38_s24, 26 }
  0x25   :  { %s4511_s8 = smov 384   ;;  %s4603_s9 = sadd.s32 134217728, %s4261_s30 }
  0x26   :  { %62 = sst [smem:[#allocation12 + $0x6]] %s4511_s8  ;;  %s4512_s10 = smov 4  }
  0x27   :  { %64 = sst [smem:[#allocation12 + $0x7]] %s4505_s21  ;;  %s4513_s11 = smov [#allocation6]  }
  0x28   :  { %66 = sst [smem:[#allocation12 + $0x8]] %s4512_s10  ;;  %s4514_s12 = smov [#allocation11]  }
  0x29   :  { %68 = dma.general %s5316_s3, 36864, %s47_s29, %s4513_s11, %s4514_s12, [#allocation12], %s4603_s9, 0  }
  0x2a   :  { %85 = sst [smem:[#allocation14]] %s4504_s20  ;;  %s4515_s15 = smov 8  }
  0x2b   :  { %87 = sst [smem:[#allocation14 + $0x1]] %s4504_s20  ;;  %s4516_s16 = smov [#allocation3]  }
  0x2c   :  { %89 = sst [smem:[#allocation14 + $0x2]] %s4515_s15  ;;  %s81_s17 = sshll.u32 %s4516_s16, 4  ;;  %s82_s17 = int_to_ptr.vmem [resolvable:$true] %s81_s17 }
  0x2d   :  { %91 = sst [smem:[#allocation14 + $0x3]] %s4505_s21  ;;  %s4517_s18 = smov 512  }
  0x2e   :  { %93 = sst [smem:[#allocation14 + $0x4]] %s4508_s27  ;;  %s4518_s3 = smov [#allocation6 + $0x1]  }
  0x2f   :  { %95 = sst [smem:[#allocation14 + $0x5]] %s4509_s28  ;;  %s4519_s19 = smov [#allocation13]  }
  0x30   :  { %97 = sst [smem:[#allocation14 + $0x6]] %s4517_s18  ;;  %s4520_s22 = smov [#allocation4]  }
  0x31   :  { %99 = sst [smem:[#allocation14 + $0x7]] %s4505_s21  ;;  %s116_s23 = sshll.u32 %s4520_s22, 4  ;;  %s117_s23 = int_to_ptr.vmem [resolvable:$true] %s116_s23 }
  0x32   :  { %101 = sst [smem:[#allocation14 + $0x8]] %s4512_s10  ;;  %s4522_s24 = smov [#allocation15]  }
  0x33   :  { %103 = dma.general %s5317_s4, 49152, %s82_s17, %s4518_s3, %s4519_s19, [#allocation14], %s4603_s9, 0  }
  0x34   :  { %120 = sst [smem:[#allocation16]] %s4506_s25  ;;  %s4521_s4 = smov [#allocation6 + $0x2]  }
  0x35   :  { %122 = sst [smem:[#allocation16 + $0x1]] %s4506_s25  ;;  %s4524_s29 = smov [#allocation5]  }
  0x36   :  { %124 = sst [smem:[#allocation16 + $0x2]] %s4507_s26  ;;  %s4523_s26 = smov 256  }
  0x37   :  { %126 = sst [smem:[#allocation16 + $0x3]] %s4505_s21  ;;  %s151_s30 = sshll.u32 %s4524_s29, 4  ;;  %s152_s30 = int_to_ptr.vmem [resolvable:$true] %s151_s30 }
  0x38   :  { %128 = sst [smem:[#allocation16 + $0x4]] %s4508_s27 }
  0x39   :  { %130 = sst [smem:[#allocation16 + $0x5]] %s4509_s28 }
  0x3a   :  { %132 = sst [smem:[#allocation16 + $0x6]] %s4511_s8  ;;  %s4526_s8 = smov [#allocation17]  }
  0x3b   :  { %134 = sst [smem:[#allocation16 + $0x7]] %s4505_s21 }
  0x3c   :  { %136 = sst [smem:[#allocation16 + $0x8]] %s4512_s10 }
  0x3d   :  { %138 = dma.general %s5318_s5, 49152, %s117_s23, %s4521_s4, %s4522_s24, [#allocation16], %s4603_s9, 0  }
  0x3e   :  { %155 = sst [smem:[#allocation18]] %s4523_s26  ;;  %s4525_s5 = smov [#allocation6 + $0x3]  }
  0x3f   :  { %157 = sst [smem:[#allocation18 + $0x1]] %s4523_s26 }
  0x40   :  { %159 = sst [smem:[#allocation18 + $0x2]] %s4509_s28 }
  0x41   :  { %161 = sst [smem:[#allocation18 + $0x3]] %s4505_s21 }
  0x42   :  { %163 = sst [smem:[#allocation18 + $0x4]] %s4508_s27 }
  0x43   :  { %165 = sst [smem:[#allocation18 + $0x5]] %s4509_s28 }
  0x44   :  { %167 = sst [smem:[#allocation18 + $0x6]] %s4508_s27 }
  0x45   :  { %169 = sst [smem:[#allocation18 + $0x7]] %s4505_s21 }
  0x46   :  { %171 = sst [smem:[#allocation18 + $0x8]] %s4512_s10 }
  0x47   :  { %173 = dma.general %s5319_s6, 12288, %s152_s30, %s4525_s5, %s4526_s8, [#allocation18], %s4603_s9, 0  }
  0x48   :  { %s182_s13 = sld [smem:[#allocation8]]  ;;  %s4270_s14 = sld [smem:[#allocation8 + $0x1]]  ;;  %v254_v9 = vld [vmem:[%s5315_s2] sm:$0xff]  ;;  %v255_v10 = vld [vmem:[%s5315_s2 + $0x8] sm:$0xff]  ;;  %v256_v11 = vld [vmem:[%s5315_s2 + $0x10] sm:$0xff] }
  0x49   :  { %s4272_s15 = sld [smem:[#allocation8 + $0x2]]  ;;  %s4274_s16 = sld [smem:[#allocation8 + $0x3]]  ;;  %v257_v14 = vld [vmem:[%s5315_s2 + $0x18] sm:$0xff]  ;;  %v258_v15 = vld [vmem:[%s5315_s2 + $0x20] sm:$0xff]  ;;  %v259_v16 = vld [vmem:[%s5315_s2 + $0x28] sm:$0xff] }
  0x4a   :  { %v174_v17 = vld [vmem:[#allocation9 + $0x40] sm:$0xff]  ;;  %v175_v18 = vld [vmem:[#allocation9 + $0x48] sm:$0xff]  ;;  %v176_v19 = vld [vmem:[#allocation9 + $0x50] sm:$0xff] }
  0x4b   :  { %v177_v20 = vld [vmem:[#allocation9 + $0x58] sm:$0xff]  ;;  %v260_v22 = vld [vmem:[%s5315_s2 + $0x30] sm:$0xff]  ;;  %v262_v24 = vld [vmem:[%s5315_s2 + $0x40] sm:$0xff] }
  0x4c   :  { %v261_v23 = vld [vmem:[%s5315_s2 + $0x38] sm:$0xff]  ;;  %v178_v25 = vld [vmem:[#allocation9 + $0x60] sm:$0xff]  ;;  %v179_v26 = vld [vmem:[#allocation9 + $0x68] sm:$0xff]  ;;  %v282_v31 = vadd.f32 %v260_v22, %v254_v9  ;;  %v298_v33 = vadd.f32 %v262_v24, %v256_v11 }
  0x4d   :  { %v263_v28 = vld [vmem:[%s5315_s2 + $0x48] sm:$0xff]  ;;  %v264_v29 = vld [vmem:[%s5315_s2 + $0x50] sm:$0xff]  ;;  %v265_v30 = vld [vmem:[%s5315_s2 + $0x58] sm:$0xff]  ;;  %v290_v32 = vadd.f32 %v261_v23, %v255_v10 }
  0x4e   :  { %v183_v2 = vstv %s182_s13  ;;  %v189_v3 = vstv %s4270_s14  ;;  %v266_v34 = vld [vmem:[%s5315_s2 + $0x60] sm:$0xff]  ;;  %v267_v35 = vld [vmem:[%s5315_s2 + $0x68] sm:$0xff]  ;;  %v306_v37 = vadd.f32 %v263_v28, %v257_v14  ;;  %v314_v38 = vadd.f32 %v264_v29, %v258_v15 }
  0x4f   :  { %vm184_vm0 = vcmp.eq.s32.totalorder %v4646_v1, %v183_v2  ;;  %vm190_vm1 = vcmp.eq.s32.totalorder %v4646_v1, %v189_v3  ;;  %v195_v4 = vstv %s4272_s15  ;;  %v201_v5 = vstv %s4274_s16  ;;  %v268_v36 = vld [vmem:[%s5315_s2 + $0x70] sm:$0xff]  ;;  %v269_v41 = vld [vmem:[%s5315_s2 + $0x78] sm:$0xff] }
  0x50   :  { %v4269_v7 = vsel %vm184_vm0, 1.0, %v4527_v6  ;;  %v4271_v8 = vsel %vm190_vm1, 1.0, %v4527_v6  ;;  %vm196_vm2 = vcmp.eq.s32.totalorder %v4646_v1, %v195_v4  ;;  %vm202_vm3 = vcmp.eq.s32.totalorder %v4646_v1, %v201_v5  ;;  %v270_v42 = vld [vmem:[%s5315_s2 + $0x80] sm:$0xff]  ;;  %v271_v43 = vld [vmem:[%s5315_s2 + $0x88] sm:$0xff] }
  0x51   :  { %v193_v12 = vadd.f32 %v4271_v8, %v4269_v7  ;;  %v4273_v13 = vsel %vm196_vm2, 1.0, %v4527_v6  ;;  %v4275_v21 = vsel %vm202_vm3, 1.0, %v4527_v6  ;;  %v322_v39 = vadd.f32 %v265_v30, %v259_v16  ;;  %v4276_v54 = vld [vmem:[%s5315_s2 + $0x93] ss:$8 sm:$0xf] }
  0x52   :  { %v283_v44 = vadd.f32 %v282_v31, %v266_v34  ;;  %v291_v45 = vadd.f32 %v290_v32, %v267_v35  ;;  %v4706_v46 = vadd.f32 %v298_v33, %v268_v36  ;;  %v4708_v47 = vadd.f32 %v306_v37, %v269_v41  ;;  %v4277_v55 = vld [vmem:[%s5315_s2 + $0x93] ss:$8 sm:$0x30]  ;;  %v272_v41 = vld [vmem:[%s5315_s2 + $0x90] sm:$0x7] }
  0x53   :  { %v199_v27 = vadd.f32 %v4273_v13, %v193_v12  ;;  %v4716_v56 = vadd.f32 %v314_v38, %v270_v42  ;;  %v4718_v57 = vadd.f32 %v322_v39, %v271_v43  ;;  %v4720_v0 = vor.u32 %v4277_v55, %v4276_v54  ;;  %v273_v42 = vld [vmem:[%s5315_s2 + $0x98] sm:$0x7]  ;;  %v275_v54 = vld [vmem:[%s5315_s2 + $0xa8] sm:$0x7] }
  0x54   :  { %v284_v2 = vrot.slane %v283_v44, 4  ;;  %v292_v10 = vrot.slane %v291_v45, 4 }
  0x55   :  { %v205_v40 = vadd.f32 %v4275_v21, %v199_v27 }
  0x56   :  { %v285_v9 = vadd.f32 %v284_v2, %v283_v44 }
  0x57   :  { %v206_v48 = vmul.f32 %v205_v40, %v174_v17  ;;  %v207_v49 = vmul.f32 %v205_v40, %v175_v18  ;;  %v208_v50 = vmul.f32 %v205_v40, %v176_v19  ;;  %v209_v51 = vmul.f32 %v205_v40, %v177_v20 }
  0x58   :  { %v210_v52 = vmul.f32 %v205_v40, %v178_v25  ;;  %v211_v53 = vmul.f32 %v205_v40, %v179_v26  ;;  %v286_v17 = vrot.slane %v285_v9, 2  ;;  %v293_v18 = vadd.f32 %v292_v10, %v291_v45 }
  0x59   :  { %v212_v58 = vrot.slane %v206_v48, 4  ;;  %v218_v59 = vrot.slane %v207_v49, 4  ;;  %v224_v60 = vrot.slane %v208_v50, 4  ;;  %v230_v61 = vrot.slane %v209_v51, 4 }
  0x5a   :  { %v236_v62 = vrot.slane %v210_v52, 4  ;;  %v242_v63 = vrot.slane %v211_v53, 4  ;;  %v287_v25 = vadd.f32 %v286_v17, %v285_v9  ;;  %v294_v26 = vrot.slane %v293_v18, 2 }
  0x5b   :  { %v213_v3 = vadd.f32 %v212_v58, %v206_v48  ;;  %v219_v4 = vadd.f32 %v218_v59, %v207_v49  ;;  %v225_v5 = vadd.f32 %v224_v60, %v208_v50  ;;  %v231_v6 = vadd.f32 %v230_v61, %v209_v51  ;;  %v274_v51 = vld [vmem:[%s5315_s2 + $0xa0] sm:$0x7] }
  0x5c   :  { %v237_v7 = vadd.f32 %v236_v62, %v210_v52  ;;  %v243_v8 = vadd.f32 %v242_v63, %v211_v53  ;;  %v288_v33 = vrot.slane %v287_v25, 1  ;;  %v295_v34 = vadd.f32 %v294_v26, %v293_v18 }
  0x5d   :  { %v214_v11 = vrot.slane %v213_v3, 2  ;;  %v220_v12 = vrot.slane %v219_v4, 2  ;;  %v226_v13 = vrot.slane %v225_v5, 2  ;;  %v232_v14 = vrot.slane %v231_v6, 2 }
  0x5e   :  { %v238_v15 = vrot.slane %v237_v7, 2  ;;  %v244_v16 = vrot.slane %v243_v8, 2  ;;  %v289_v43 = vadd.f32 %v288_v33, %v287_v25  ;;  %v296_v44 = vrot.slane %v295_v34, 1 }
  0x5f   :  { %v215_v19 = vadd.f32 %v214_v11, %v213_v3  ;;  %v221_v20 = vadd.f32 %v220_v12, %v219_v4  ;;  %v227_v21 = vadd.f32 %v226_v13, %v225_v5  ;;  %v233_v22 = vadd.f32 %v232_v14, %v231_v6 }
  0x60   :  { %v239_v23 = vadd.f32 %v238_v15, %v237_v7  ;;  %v245_v24 = vadd.f32 %v244_v16, %v243_v8  ;;  %v297_v55 = vadd.f32 %v296_v44, %v295_v34  ;;  %v300_v58 = vrot.slane %v4706_v46, 4  ;;  %v277_v34 = vld [vmem:[%s5315_s2 + $0xb8] sm:$0x7]  ;;  %v393_v44 = vld [vmem:[#allocation9 + $0x4] ss:$8 sm:$0x30] }
  0x61   :  { %v216_v27 = vrot.slane %v215_v19, 1  ;;  %v222_v28 = vrot.slane %v221_v20, 1  ;;  %v228_v29 = vrot.slane %v227_v21, 1  ;;  %v234_v30 = vrot.slane %v233_v22, 1 }
  0x62   :  { %v240_v31 = vrot.slane %v239_v23, 1  ;;  %v246_v32 = vrot.slane %v245_v24, 1  ;;  %v308_v59 = vrot.slane %v4708_v47, 4  ;;  %v316_v60 = vrot.slane %v4716_v56, 4 }
  0x63   :  { %v217_v35 = vadd.f32 %v216_v27, %v215_v19  ;;  %v223_v36 = vadd.f32 %v222_v28, %v221_v20  ;;  %v229_v37 = vadd.f32 %v228_v29, %v227_v21  ;;  %v235_v38 = vadd.f32 %v234_v30, %v233_v22  ;;  %v276_v29 = vld [vmem:[%s5315_s2 + $0xb0] sm:$0x7] }
  0x64   :  { %v241_v39 = vadd.f32 %v240_v31, %v239_v23  ;;  %v247_v40 = vadd.f32 %v246_v32, %v245_v24  ;;  %v324_v61 = vrot.slane %v4718_v57, 4  ;;  %v4750_v62 = vmul.f32 0.041666668, %v289_v43 }
  0x65   :  { %v4728_v45 = vmul.f32 0.25, %v217_v35  ;;  %v4730_v48 = vmul.f32 0.25, %v223_v36  ;;  %v4732_v49 = vmul.f32 0.25, %v229_v37  ;;  %v4734_v50 = vmul.f32 0.25, %v235_v38 }
  0x66   :  { %v4739_v52 = vmul.f32 0.25, %v241_v39  ;;  %v4741_v53 = vmul.f32 0.25, %v247_v40  ;;  %5321 = vst [vmem:[#allocation25_spill] sm:$0xff] %v4750_v62  ;;  %v301_v63 = vadd.f32 %v300_v58, %v4706_v46  ;;  %v4753_v2 = vmul.f32 0.041666668, %v297_v55 }
  0x67   :  { %v337_v3 = vsel %vm336_vm4, %v272_v41, 0.0  ;;  %v344_v4 = vsel %vm336_vm4, %v273_v42, 0.0  ;;  %v309_v5 = vadd.f32 %v308_v59, %v4708_v47  ;;  %v317_v6 = vadd.f32 %v316_v60, %v4716_v56  ;;  %v392_v39 = vld [vmem:[#allocation9 + $0x4] ss:$8 sm:$0xf] }
  0x68   :  { %5322 = vst [vmem:[#allocation26_spill] sm:$0xff] %v4753_v2  ;;  %v325_v7 = vadd.f32 %v324_v61, %v4718_v57  ;;  %v338_v8 = vrot.slane %v337_v3, 4  ;;  %v302_v9 = vrot.slane %v301_v63, 2  ;;  %v345_v10 = vrot.slane %v344_v4, 4 }
  0x69   :  { %v351_v11 = vsel %vm336_vm4, %v274_v51, 0.0  ;;  %v358_v12 = vsel %vm336_vm4, %v275_v54, 0.0  ;;  %v310_v46 = vrot.slane %v309_v5, 2  ;;  %v318_v13 = vrot.slane %v317_v6, 2 }
  0x6a   :  { %v326_v14 = vrot.slane %v325_v7, 2  ;;  %v339_v15 = vadd.f32 %v338_v8, %v337_v3  ;;  %v303_v16 = vadd.f32 %v302_v9, %v301_v63  ;;  %v346_v17 = vadd.f32 %v345_v10, %v344_v4 }
  0x6b   :  { %v352_v18 = vrot.slane %v351_v11, 4  ;;  %v359_v19 = vrot.slane %v358_v12, 4  ;;  %v311_v47 = vadd.f32 %v310_v46, %v309_v5  ;;  %v319_v20 = vadd.f32 %v318_v13, %v317_v6 }
  0x6c   :  { %v327_v56 = vadd.f32 %v326_v14, %v325_v7  ;;  %v340_v21 = vrot.slane %v339_v15, 2  ;;  %v304_v57 = vrot.slane %v303_v16, 1  ;;  %v347_v22 = vrot.slane %v346_v17, 2 }
  0x6d   :  { %v353_v23 = vadd.f32 %v352_v18, %v351_v11  ;;  %v360_v24 = vadd.f32 %v359_v19, %v358_v12  ;;  %v312_v25 = vrot.slane %v311_v47, 1  ;;  %v320_v26 = vrot.slane %v319_v20, 1 }
  0x6e   :  { %v328_v27 = vrot.slane %v327_v56, 1  ;;  %v341_v28 = vadd.f32 %v340_v21, %v339_v15  ;;  %v305_v30 = vadd.f32 %v304_v57, %v303_v16  ;;  %v348_v31 = vadd.f32 %v347_v22, %v346_v17 }
  0x6f   :  { %v354_v32 = vrot.slane %v353_v23, 2  ;;  %v361_v33 = vrot.slane %v360_v24, 2  ;;  %v313_v35 = vadd.f32 %v312_v25, %v311_v47  ;;  %v321_v36 = vadd.f32 %v320_v26, %v319_v20 }
  0x70   :  { %v329_v37 = vadd.f32 %v328_v27, %v327_v56  ;;  %v342_v38 = vrot.slane %v341_v28, 1  ;;  %v4768_v40 = vmul.f32 0.041666668, %v305_v30  ;;  %v349_v41 = vrot.slane %v348_v31, 1 }
  0x71   :  { %v355_v42 = vadd.f32 %v354_v32, %v353_v23  ;;  %v362_v43 = vadd.f32 %v361_v33, %v360_v24  ;;  %v4770_v51 = vmul.f32 0.041666668, %v313_v35  ;;  %v4772_v54 = vmul.f32 0.041666668, %v321_v36 }
  0x72   :  { %5323 = vst [vmem:[#allocation27_spill] sm:$0xff] %v4768_v40  ;;  %v4774_v55 = vmul.f32 0.041666668, %v329_v37  ;;  %v343_v58 = vadd.f32 %v342_v38, %v341_v28  ;;  %v350_v59 = vadd.f32 %v349_v41, %v348_v31  ;;  %v365_v63 = vsel %vm336_vm4, %v276_v29, 0.0 }
  0x73   :  { %5324 = vst [vmem:[#allocation28_spill] sm:$0xff] %v4770_v51  ;;  %5325 = vst [vmem:[#allocation29_spill] sm:$0xff] %v4772_v54  ;;  %v356_v60 = vrot.slane %v355_v42, 1  ;;  %v363_v61 = vrot.slane %v362_v43, 1  ;;  %v366_v3 = vrot.slane %v365_v63, 4  ;;  %v372_v4 = vsel %vm336_vm4, %v277_v34, 0.0 }
  0x74   :  { %5326 = vst [vmem:[#allocation30_spill] sm:$0xff] %v4774_v55  ;;  %v4778_v5 = vmul.f32 0.33333334, %v343_v58  ;;  %v4780_v6 = vor.u32 %v393_v44, %v392_v39  ;;  %v373_v9 = vrot.slane %v372_v4, 4  ;;  %v4782_v10 = vmul.f32 0.33333334, %v350_v59 }
  0x75   :  { %v357_v7 = vadd.f32 %v356_v60, %v355_v42  ;;  %v364_v8 = vadd.f32 %v363_v61, %v362_v43  ;;  %v367_v11 = vadd.f32 %v366_v3, %v365_v63 }
  0x76   :  { %v385_v12 = vsub.f32 0.03608439, %v4778_v5  ;;  %v374_v46 = vadd.f32 %v373_v9, %v372_v4  ;;  %v386_v15 = vsub.f32 0.03608439, %v4782_v10 }
  0x77   :  { %v4785_v13 = vmul.f32 0.33333334, %v357_v7  ;;  %v4787_v14 = vmul.f32 0.33333334, %v364_v8  ;;  %v368_v16 = vrot.slane %v367_v11, 2 }
  0x78   :  { %v375_v17 = vrot.slane %v374_v46, 2 }
  0x79   :  { %v387_v18 = vsub.f32 0.03608439, %v4785_v13  ;;  %v388_v19 = vsub.f32 0.03608439, %v4787_v14  ;;  %v369_v47 = vadd.f32 %v368_v16, %v367_v11 }
  0x7a   :  { %v376_v20 = vadd.f32 %v375_v17, %v374_v46 }
  0x7b   :  { %v370_v56 = vrot.slane %v369_v47, 1 }
  0x7c   :  { %v377_v21 = vrot.slane %v376_v20, 1 }
  0x7d   :  { %v371_v57 = vadd.f32 %v370_v56, %v369_v47 }
  0x7e   :  { %v378_v22 = vadd.f32 %v377_v21, %v376_v20 }
  0x7f   :  { %v4792_v23 = vmul.f32 0.33333334, %v371_v57 }
  0x80   :  { %v4794_v24 = vmul.f32 0.33333334, %v378_v22 }
  0x81   :  { %v389_v25 = vsub.f32 0.03608439, %v4792_v23 }
  0x82   :  { %v390_v26 = vsub.f32 0.03608439, %v4794_v24 }
  0x83   :  { %4494 = dma.done.wait [#allocation6], 36864 }
  0x84   :  { %4495 = vsyncadd [#allocation6], 4294930432  ;;  %v4800_v27 = vpack.c.bf16 %v4730_v48, %v4730_v48  ;;  %v4805_v28 = vpack.c.bf16 %v4741_v53, %v4741_v53  ;;  %v406_v29 = vld [vmem:[#allocation2 + $0x8] sm:$0xff]  ;;  %v405_v30 = vld [vmem:[#allocation2] sm:$0xff] }
  0x85   :  { %v412_v31 = vld [vmem:[#allocation2 + $0x38] sm:$0xff]  ;;  %724 = vmatprep.subr.bf16.mxu1 %v406_v29  ;;  %v411_v32 = vld [vmem:[#allocation2 + $0x30] sm:$0xff]  ;;  %v418_v33 = vld [vmem:[#allocation2 + $0x68] sm:$0xff] }
  0x86   :  { %756 = vmatprep.mubr.bf16.mxu1 %v4800_v27  ;;  %838 = vmatprep.mubr.bf16.mxu0 %v4805_v28  ;;  %v417_v48 = vld [vmem:[#allocation2 + $0x60] sm:$0xff]  ;;  %v424_v34 = vld [vmem:[#allocation2 + $0x98] sm:$0xff]  ;;  %v598_v35 = vld [vmem:[#allocation2 + $0x608] sm:$0xff] }
  0x87   :  { %725 = vmatpush1.bf16.msra.mxu1 %v405_v30  ;;  %v423_v36 = vld [vmem:[#allocation2 + $0x90] sm:$0xff]  ;;  %806 = vmatprep.subr.bf16.mxu0 %v598_v35  ;;  %v597_v53 = vld [vmem:[#allocation2 + $0x600] sm:$0xff]  ;;  %v430_v37 = vld [vmem:[#allocation2 + $0xc8] sm:$0xff] }
  0x88   :  { %726 = vmatprep.subr.bf16.mxu1 %v412_v31  ;;  %807 = vmatpush1.bf16.msra.mxu0 %v597_v53  ;;  %v604_v38 = vld [vmem:[#allocation2 + $0x638] sm:$0xff]  ;;  %v603_v39 = vld [vmem:[#allocation2 + $0x630] sm:$0xff]  ;;  %v610_v41 = vld [vmem:[#allocation2 + $0x668] sm:$0xff] }
  0x89   :  { %808 = vmatprep.subr.bf16.mxu0 %v604_v38  ;;  %v429_v42 = vld [vmem:[#allocation2 + $0xc0] sm:$0xff]  ;;  %v436_v43 = vld [vmem:[#allocation2 + $0xf8] sm:$0xff]  ;;  %v435_v59 = vld [vmem:[#allocation2 + $0xf0] sm:$0xff] }
  0x8a   :  { %v609_v44 = vld [vmem:[#allocation2 + $0x660] sm:$0xff]  ;;  %v616_v58 = vld [vmem:[#allocation2 + $0x698] sm:$0xff]  ;;  %v442_v60 = vld [vmem:[#allocation2 + $0x128] sm:$0xff] }
  0x8b   :  { %727 = vmatpush1.bf16.msra.mxu1 %v411_v32  ;;  %v615_v61 = vld [vmem:[#allocation2 + $0x690] sm:$0xff]  ;;  %v622_v63 = vld [vmem:[#allocation2 + $0x6c8] sm:$0xff]  ;;  %v441_v3 = vld [vmem:[#allocation2 + $0x120] sm:$0xff] }
  0x8c   :  { %728 = vmatprep.subr.bf16.mxu1 %v418_v33  ;;  %809 = vmatpush1.bf16.msra.mxu0 %v603_v39  ;;  %v448_v4 = vld [vmem:[#allocation2 + $0x158] sm:$0xff]  ;;  %v621_v7 = vld [vmem:[#allocation2 + $0x6c0] sm:$0xff]  ;;  %v447_v9 = vld [vmem:[#allocation2 + $0x150] sm:$0xff] }
  0x8d   :  { %810 = vmatprep.subr.bf16.mxu0 %v610_v41  ;;  %v628_v8 = vld [vmem:[#allocation2 + $0x6f8] sm:$0xff]  ;;  %v454_v11 = vld [vmem:[#allocation2 + $0x188] sm:$0xff]  ;;  %v627_v46 = vld [vmem:[#allocation2 + $0x6f0] sm:$0xff] }
  0x8e   :  { %v634_v16 = vld [vmem:[#allocation2 + $0x728] sm:$0xff]  ;;  %v453_v17 = vld [vmem:[#allocation2 + $0x180] sm:$0xff]  ;;  %v460_v47 = vld [vmem:[#allocation2 + $0x1b8] sm:$0xff] }
  0x8f   :  { %729 = vmatpush1.bf16.msra.mxu1 %v417_v48  ;;  %v633_v20 = vld [vmem:[#allocation2 + $0x720] sm:$0xff]  ;;  %v640_v56 = vld [vmem:[#allocation2 + $0x758] sm:$0xff]  ;;  %v459_v21 = vld [vmem:[#allocation2 + $0x1b0] sm:$0xff] }
  0x90   :  { %730 = vmatprep.subr.bf16.mxu1 %v424_v34  ;;  %811 = vmatpush1.bf16.msra.mxu0 %v609_v44  ;;  %v466_v57 = vld [vmem:[#allocation2 + $0x1e8] sm:$0xff]  ;;  %v639_v22 = vld [vmem:[#allocation2 + $0x750] sm:$0xff]  ;;  %v465_v30 = vld [vmem:[#allocation2 + $0x1e0] sm:$0xff] }
  0x91   :  { %812 = vmatprep.subr.bf16.mxu0 %v616_v58  ;;  %v646_v29 = vld [vmem:[#allocation2 + $0x788] sm:$0xff]  ;;  %v472_v31 = vld [vmem:[#allocation2 + $0x218] sm:$0xff]  ;;  %v645_v32 = vld [vmem:[#allocation2 + $0x780] sm:$0xff] }
  0x92   :  { %v652_v33 = vld [vmem:[#allocation2 + $0x7b8] sm:$0xff]  ;;  %v471_v48 = vld [vmem:[#allocation2 + $0x210] sm:$0xff]  ;;  %v478_v34 = vld [vmem:[#allocation2 + $0x248] sm:$0xff] }
  0x93   :  { %731 = vmatpush1.bf16.msra.mxu1 %v423_v36  ;;  %v651_v35 = vld [vmem:[#allocation2 + $0x7b0] sm:$0xff]  ;;  %v658_v36 = vld [vmem:[#allocation2 + $0x7e8] sm:$0xff]  ;;  %v477_v53 = vld [vmem:[#allocation2 + $0x240] sm:$0xff] }
  0x94   :  { %732 = vmatprep.subr.bf16.mxu1 %v430_v37  ;;  %813 = vmatpush1.bf16.msra.mxu0 %v615_v61  ;;  %v484_v37 = vld [vmem:[#allocation2 + $0x278] sm:$0xff]  ;;  %v657_v38 = vld [vmem:[#allocation2 + $0x7e0] sm:$0xff]  ;;  %v483_v41 = vld [vmem:[#allocation2 + $0x270] sm:$0xff] }
  0x95   :  { %814 = vmatprep.subr.bf16.mxu0 %v622_v63  ;;  %v664_v39 = vld [vmem:[#allocation2 + $0x818] sm:$0xff]  ;;  %v670_v44 = vld [vmem:[#allocation2 + $0x848] sm:$0xff]  ;;  %v489_v58 = vld [vmem:[#allocation2 + $0x2a0] sm:$0xff] }
  0x96   :  { %v676_v61 = vld [vmem:[#allocation2 + $0x878] sm:$0xff]  ;;  %v495_v63 = vld [vmem:[#allocation2 + $0x2d0] sm:$0xff] }
  0x97   :  { %733 = vmatpush1.bf16.msra.mxu1 %v429_v42  ;;  %v490_v42 = vld [vmem:[#allocation2 + $0x2a8] sm:$0xff] }
  0x98   :  { %734 = vmatprep.subr.bf16.mxu1 %v436_v43  ;;  %815 = vmatpush1.bf16.msra.mxu0 %v621_v7  ;;  %v663_v43 = vld [vmem:[#allocation2 + $0x810] sm:$0xff] }
  0x99   :  { %816 = vmatprep.subr.bf16.mxu0 %v628_v8  ;;  %v675_v7 = vld [vmem:[#allocation2 + $0x870] sm:$0xff]  ;;  %v682_v8 = vld [vmem:[#allocation2 + $0x8a8] sm:$0xff] }
  0x9b   :  { %735 = vmatpush1.bf16.msra.mxu1 %v435_v59  ;;  %v496_v59 = vld [vmem:[#allocation2 + $0x2d8] sm:$0xff] }
  0x9c   :  { %736 = vmatprep.subr.bf16.mxu1 %v442_v60  ;;  %817 = vmatpush1.bf16.msra.mxu0 %v627_v46  ;;  %v669_v60 = vld [vmem:[#allocation2 + $0x840] sm:$0xff]  ;;  %v508_v46 = vld [vmem:[#allocation2 + $0x338] sm:$0xff] }
  0x9d   :  { %818 = vmatprep.subr.bf16.mxu0 %v634_v16  ;;  %v681_v16 = vld [vmem:[#allocation2 + $0x8a0] sm:$0xff] }
  0x9f   :  { %737 = vmatpush1.bf16.msra.mxu1 %v441_v3  ;;  %v502_v3 = vld [vmem:[#allocation2 + $0x308] sm:$0xff] }
  0xa0   :  { %738 = vmatprep.subr.bf16.mxu1 %v448_v4  ;;  %819 = vmatpush1.bf16.msra.mxu0 %v633_v20  ;;  %v4810_v4 = vpack.c.bf16 %v4728_v45, %v4728_v45  ;;  %v507_v45 = vld [vmem:[#allocation2 + $0x330] sm:$0xff] }
  0xa1   :  { %820 = vmatprep.subr.bf16.mxu0 %v640_v56  ;;  %v687_v20 = vld [vmem:[#allocation2 + $0x8d0] sm:$0xff]  ;;  %v513_v56 = vld [vmem:[#allocation2 + $0x360] sm:$0xff] }
  0xa3   :  { %739 = vmatpush1.bf16.msra.mxu1 %v447_v9  ;;  %v4814_v9 = vpack.c.bf16 %v4734_v50, %v4734_v50  ;;  %v504_v50 = vld [vmem:[#allocation2 + $0x318] sm:$0xff] }
  0xa4   :  { %740 = vmatprep.subr.bf16.mxu1 %v454_v11  ;;  %821 = vmatpush1.bf16.msra.mxu0 %v639_v22  ;;  %v501_v11 = vld [vmem:[#allocation2 + $0x300] sm:$0xff]  ;;  %v503_v22 = vld [vmem:[#allocation2 + $0x310] sm:$0xff] }
  0xa5   :  { %822 = vmatprep.subr.bf16.mxu0 %v646_v29  ;;  %v510_v29 = vld [vmem:[#allocation2 + $0x348] sm:$0xff] }
  0xa7   :  { %741 = vmatpush1.bf16.msra.mxu1 %v453_v17  ;;  %v688_v17 = vld [vmem:[#allocation2 + $0x8d8] sm:$0xff] }
  0xa8   :  { %742 = vmatprep.subr.bf16.mxu1 %v460_v47  ;;  %823 = vmatpush1.bf16.msra.mxu0 %v645_v32  ;;  %v514_v47 = vld [vmem:[#allocation2 + $0x368] sm:$0xff]  ;;  %v509_v32 = vld [vmem:[#allocation2 + $0x340] sm:$0xff] }
  0xa9   :  { %824 = vmatprep.subr.bf16.mxu0 %v652_v33  ;;  %v516_v33 = vld [vmem:[#allocation2 + $0x378] sm:$0xff] }
  0xab   :  { %743 = vmatpush1.bf16.msra.mxu1 %v459_v21  ;;  %v4820_v21 = vpack.c.bf16 %v4739_v52, %v4739_v52  ;;  %v525_v52 = vld [vmem:[#allocation2 + $0x3c0] sm:$0xff] }
  0xac   :  { %744 = vmatprep.subr.bf16.mxu1 %v466_v57  ;;  %825 = vmatpush1.bf16.msra.mxu0 %v651_v35  ;;  %v520_v57 = vld [vmem:[#allocation2 + $0x398] sm:$0xff]  ;;  %v522_v35 = vld [vmem:[#allocation2 + $0x3a8] sm:$0xff] }
  0xad   :  { %826 = vmatprep.subr.bf16.mxu0 %v658_v36  ;;  %v531_v36 = vld [vmem:[#allocation2 + $0x3f0] sm:$0xff] }
  0xaf   :  { %745 = vmatpush1.bf16.msra.mxu1 %v465_v30  ;;  %v519_v30 = vld [vmem:[#allocation2 + $0x390] sm:$0xff] }
  0xb0   :  { %746 = vmatprep.subr.bf16.mxu1 %v472_v31  ;;  %827 = vmatpush1.bf16.msra.mxu0 %v657_v38  ;;  %v526_v31 = vld [vmem:[#allocation2 + $0x3c8] sm:$0xff]  ;;  %v528_v38 = vld [vmem:[#allocation2 + $0x3d8] sm:$0xff] }
  0xb1   :  { %828 = vmatprep.subr.bf16.mxu0 %v664_v39  ;;  %v537_v39 = vld [vmem:[#allocation2 + $0x420] sm:$0xff] }
  0xb3   :  { %747 = vmatpush1.bf16.msra.mxu1 %v471_v48  ;;  %v532_v48 = vld [vmem:[#allocation2 + $0x3f8] sm:$0xff] }
  0xb4   :  { %748 = vmatprep.subr.bf16.mxu1 %v478_v34  ;;  %829 = vmatpush1.bf16.msra.mxu0 %v663_v43  ;;  %v515_v34 = vld [vmem:[#allocation2 + $0x370] sm:$0xff]  ;;  %v534_v43 = vld [vmem:[#allocation2 + $0x408] sm:$0xff] }
  0xb5   :  { %830 = vmatprep.subr.bf16.mxu0 %v670_v44  ;;  %v543_v44 = vld [vmem:[#allocation2 + $0x450] sm:$0xff] }
  0xb7   :  { %749 = vmatpush1.bf16.msra.mxu1 %v477_v53  ;;  %v538_v53 = vld [vmem:[#allocation2 + $0x428] sm:$0xff] }
  0xb8   :  { %750 = vmatprep.subr.bf16.mxu1 %v484_v37  ;;  %831 = vmatpush1.bf16.msra.mxu0 %v669_v60  ;;  %v521_v37 = vld [vmem:[#allocation2 + $0x3a0] sm:$0xff]  ;;  %v540_v60 = vld [vmem:[#allocation2 + $0x438] sm:$0xff] }
  0xb9   :  { %832 = vmatprep.subr.bf16.mxu0 %v676_v61  ;;  %v549_v61 = vld [vmem:[#allocation2 + $0x480] sm:$0xff] }
  0xbb   :  { %751 = vmatpush1.bf16.msra.mxu1 %v483_v41  ;;  %v544_v41 = vld [vmem:[#allocation2 + $0x458] sm:$0xff] }
  0xbc   :  { %752 = vmatprep.subr.bf16.mxu1 %v490_v42  ;;  %833 = vmatpush1.bf16.msra.mxu0 %v675_v7  ;;  %v527_v42 = vld [vmem:[#allocation2 + $0x3d0] sm:$0xff]  ;;  %v546_v7 = vld [vmem:[#allocation2 + $0x468] sm:$0xff] }
  0xbd   :  { %834 = vmatprep.subr.bf16.mxu0 %v682_v8  ;;  %v555_v8 = vld [vmem:[#allocation2 + $0x4b0] sm:$0xff] }
  0xbf   :  { %753 = vmatpush1.bf16.msra.mxu1 %v489_v58  ;;  %v550_v58 = vld [vmem:[#allocation2 + $0x488] sm:$0xff] }
  0xc0   :  { %754 = vmatprep.subr.bf16.mxu1 %v496_v59  ;;  %835 = vmatpush1.bf16.msra.mxu0 %v681_v16  ;;  %v533_v59 = vld [vmem:[#allocation2 + $0x400] sm:$0xff]  ;;  %v552_v16 = vld [vmem:[#allocation2 + $0x498] sm:$0xff] }
  0xc1   :  { %836 = vmatprep.subr.bf16.mxu0 %v688_v17  ;;  %v561_v17 = vld [vmem:[#allocation2 + $0x4e0] sm:$0xff] }
  0xc3   :  { %755 = vmatpush1.bf16.msra.mxu1 %v495_v63  ;;  %v556_v63 = vld [vmem:[#allocation2 + $0x4b8] sm:$0xff] }
  0xc4   :  { %765 = vmatprep.subr.bf16.mxu1 %v502_v3  ;;  %837 = vmatpush1.bf16.msra.mxu0 %v687_v20  ;;  %v539_v3 = vld [vmem:[#allocation2 + $0x430] sm:$0xff]  ;;  %v558_v20 = vld [vmem:[#allocation2 + $0x4c8] sm:$0xff] }
  0xc5   :  { %888 = vmatprep.subr.bf16.mxu0 %v504_v50  ;;  %v567_v50 = vld [vmem:[#allocation2 + $0x510] sm:$0xff] }
  0xc6   :  { %757 = vmatmul.mubr.bf16.vlgmr.msra.gmra.mrb[0].mxu1 %v4810_v4 }
  0xc7   :  { %766 = vmatpush1.bf16.msra.mxu1 %v501_v11  ;;  %797 = vmatprep.mubr.bf16.mxu1 %v4814_v9  ;;  %v562_v11 = vld [vmem:[#allocation2 + $0x4e8] sm:$0xff] }
  0xc8   :  { %767 = vmatprep.subr.bf16.mxu1 %v508_v46  ;;  %839 = vmatmul.mubr.bf16.vlgmr.msra.gmra.mrb[0].mxu0 %v4820_v21  ;;  %v545_v46 = vld [vmem:[#allocation2 + $0x460] sm:$0xff] }
  0xc9   :  { %889 = vmatpush1.bf16.msra.mxu0 %v503_v22  ;;  %920 = vmatprep.mubr.bf16.mxu0 %v4814_v9  ;;  %v564_v22 = vld [vmem:[#allocation2 + $0x4f8] sm:$0xff] }
  0xca   :  { %890 = vmatprep.subr.bf16.mxu0 %v510_v29  ;;  %v573_v29 = vld [vmem:[#allocation2 + $0x540] sm:$0xff] }
  0xcb   :  { %768 = vmatpush1.bf16.msra.mxu1 %v507_v45  ;;  %v568_v45 = vld [vmem:[#allocation2 + $0x518] sm:$0xff] }
  0xcc   :  { %769 = vmatprep.subr.bf16.mxu1 %v514_v47  ;;  %v551_v47 = vld [vmem:[#allocation2 + $0x490] sm:$0xff] }
  0xcd   :  { %891 = vmatpush1.bf16.msra.mxu0 %v509_v32  ;;  %v570_v32 = vld [vmem:[#allocation2 + $0x528] sm:$0xff] }
  0xce   :  { %892 = vmatprep.subr.bf16.mxu0 %v516_v33  ;;  %v579_v33 = vld [vmem:[#allocation2 + $0x570] sm:$0xff] }
  0xcf   :  { %770 = vmatpush1.bf16.msra.mxu1 %v513_v56  ;;  %v574_v56 = vld [vmem:[#allocation2 + $0x548] sm:$0xff] }
  0xd0   :  { %771 = vmatprep.subr.bf16.mxu1 %v520_v57  ;;  %v557_v57 = vld [vmem:[#allocation2 + $0x4c0] sm:$0xff] }
  0xd1   :  { %893 = vmatpush1.bf16.msra.mxu0 %v515_v34  ;;  %v576_v34 = vld [vmem:[#allocation2 + $0x558] sm:$0xff] }
  0xd2   :  { %894 = vmatprep.subr.bf16.mxu0 %v522_v35  ;;  %v585_v35 = vld [vmem:[#allocation2 + $0x5a0] sm:$0xff] }
  0xd3   :  { %772 = vmatpush1.bf16.msra.mxu1 %v519_v30  ;;  %v580_v30 = vld [vmem:[#allocation2 + $0x578] sm:$0xff] }
  0xd4   :  { %773 = vmatprep.subr.bf16.mxu1 %v526_v31  ;;  %v563_v31 = vld [vmem:[#allocation2 + $0x4f0] sm:$0xff] }
  0xd5   :  { %895 = vmatpush1.bf16.msra.mxu0 %v521_v37  ;;  %v582_v37 = vld [vmem:[#allocation2 + $0x588] sm:$0xff] }
  0xd6   :  { %896 = vmatprep.subr.bf16.mxu0 %v528_v38  ;;  %v591_v38 = vld [vmem:[#allocation2 + $0x5d0] sm:$0xff] }
  0xd7   :  { %774 = vmatpush1.bf16.msra.mxu1 %v525_v52  ;;  %v586_v52 = vld [vmem:[#allocation2 + $0x5a8] sm:$0xff] }
  0xd8   :  { %775 = vmatprep.subr.bf16.mxu1 %v532_v48  ;;  %v569_v48 = vld [vmem:[#allocation2 + $0x520] sm:$0xff] }
  0xd9   :  { %897 = vmatpush1.bf16.msra.mxu0 %v527_v42  ;;  %v581_v42 = vld [vmem:[#allocation2 + $0x580] sm:$0xff] }
  0xda   :  { %898 = vmatprep.subr.bf16.mxu0 %v534_v43  ;;  %v588_v43 = vld [vmem:[#allocation2 + $0x5b8] sm:$0xff] }
  0xdb   :  { %776 = vmatpush1.bf16.msra.mxu1 %v531_v36  ;;  %v592_v36 = vld [vmem:[#allocation2 + $0x5d8] sm:$0xff] }
  0xdc   :  { %777 = vmatprep.subr.bf16.mxu1 %v538_v53  ;;  %v575_v53 = vld [vmem:[#allocation2 + $0x550] sm:$0xff] }
  0xdd   :  { %899 = vmatpush1.bf16.msra.mxu0 %v533_v59  ;;  %v587_v59 = vld [vmem:[#allocation2 + $0x5b0] sm:$0xff] }
  0xde   :  { %900 = vmatprep.subr.bf16.mxu0 %v540_v60  ;;  %v594_v60 = vld [vmem:[#allocation2 + $0x5e8] sm:$0xff] }
  0xdf   :  { %778 = vmatpush1.bf16.msra.mxu1 %v537_v39  ;;  %v408_v39 = vld [vmem:[#allocation2 + $0x18] sm:$0xff] }
  0xe0   :  { %779 = vmatprep.subr.bf16.mxu1 %v544_v41  ;;  %v4826_v41 = vpack.c.bf16 %v4732_v49, %v4732_v49  ;;  %v420_v49 = vld [vmem:[#allocation2 + $0x78] sm:$0xff] }
  0xe1   :  { %901 = vmatpush1.bf16.msra.mxu0 %v539_v3  ;;  %v410_v3 = vld [vmem:[#allocation2 + $0x28] sm:$0xff] }
  0xe2   :  { %902 = vmatprep.subr.bf16.mxu0 %v546_v7  ;;  %v419_v7 = vld [vmem:[#allocation2 + $0x70] sm:$0xff] }
  0xe3   :  { %780 = vmatpush1.bf16.msra.mxu1 %v543_v44  ;;  %v407_v44 = vld [vmem:[#allocation2 + $0x10] sm:$0xff] }
  0xe4   :  { %781 = vmatprep.subr.bf16.mxu1 %v550_v58  ;;  %v414_v58 = vld [vmem:[#allocation2 + $0x48] sm:$0xff] }
  0xe5   :  { %903 = vmatpush1.bf16.msra.mxu0 %v545_v46  ;;  %v416_v46 = vld [vmem:[#allocation2 + $0x58] sm:$0xff] }
  0xe6   :  { %904 = vmatprep.subr.bf16.mxu0 %v552_v16  ;;  %v425_v16 = vld [vmem:[#allocation2 + $0xa0] sm:$0xff] }
  0xe7   :  { %782 = vmatpush1.bf16.msra.mxu1 %v549_v61  ;;  %v413_v61 = vld [vmem:[#allocation2 + $0x40] sm:$0xff] }
  0xe8   :  { %783 = vmatprep.subr.bf16.mxu1 %v556_v63  ;;  %v593_v63 = vld [vmem:[#allocation2 + $0x5e0] sm:$0xff] }
  0xe9   :  { %905 = vmatpush1.bf16.msra.mxu0 %v551_v47  ;;  %v422_v47 = vld [vmem:[#allocation2 + $0x88] sm:$0xff] }
  0xea   :  { %906 = vmatprep.subr.bf16.mxu0 %v558_v20  ;;  %v431_v20 = vld [vmem:[#allocation2 + $0xd0] sm:$0xff] }
  0xeb   :  { %784 = vmatpush1.bf16.msra.mxu1 %v555_v8  ;;  %v426_v8 = vld [vmem:[#allocation2 + $0xa8] sm:$0xff] }
  0xec   :  { %785 = vmatprep.subr.bf16.mxu1 %v562_v11  ;;  %v409_v11 = vld [vmem:[#allocation2 + $0x20] sm:$0xff] }
  0xed   :  { %907 = vmatpush1.bf16.msra.mxu0 %v557_v57  ;;  %v428_v57 = vld [vmem:[#allocation2 + $0xb8] sm:$0xff] }
  0xee   :  { %908 = vmatprep.subr.bf16.mxu0 %v564_v22  ;;  %v437_v22 = vld [vmem:[#allocation2 + $0x100] sm:$0xff] }
  0xef   :  { %786 = vmatpush1.bf16.msra.mxu1 %v561_v17  ;;  %v432_v17 = vld [vmem:[#allocation2 + $0xd8] sm:$0xff] }
  0xf0   :  { %787 = vmatprep.subr.bf16.mxu1 %v568_v45  ;;  %v415_v45 = vld [vmem:[#allocation2 + $0x50] sm:$0xff] }
  0xf1   :  { %909 = vmatpush1.bf16.msra.mxu0 %v563_v31  ;;  %v443_v31 = vld [vmem:[#allocation2 + $0x130] sm:$0xff] }
  0xf2   :  { %910 = vmatprep.subr.bf16.mxu0 %v570_v32  ;;  %v450_v32 = vld [vmem:[#allocation2 + $0x168] sm:$0xff] }
  0xf3   :  { %788 = vmatpush1.bf16.msra.mxu1 %v567_v50  ;;  %v438_v50 = vld [vmem:[#allocation2 + $0x108] sm:$0xff] }
  0xf4   :  { %789 = vmatprep.subr.bf16.mxu1 %v574_v56  ;;  %v421_v56 = vld [vmem:[#allocation2 + $0x80] sm:$0xff] }
  0xf5   :  { %911 = vmatpush1.bf16.msra.mxu0 %v569_v48  ;;  %v449_v48 = vld [vmem:[#allocation2 + $0x160] sm:$0xff] }
  0xf6   :  { %912 = vmatprep.subr.bf16.mxu0 %v576_v34  ;;  %v456_v34 = vld [vmem:[#allocation2 + $0x198] sm:$0xff] }
  0xf7   :  { %790 = vmatpush1.bf16.msra.mxu1 %v573_v29  ;;  %v444_v29 = vld [vmem:[#allocation2 + $0x138] sm:$0xff] }
  0xf8   :  { %791 = vmatprep.subr.bf16.mxu1 %v580_v30  ;;  %v427_v30 = vld [vmem:[#allocation2 + $0xb0] sm:$0xff] }
  0xf9   :  { %913 = vmatpush1.bf16.msra.mxu0 %v575_v53  ;;  %v455_v53 = vld [vmem:[#allocation2 + $0x190] sm:$0xff] }
  0xfa   :  { %914 = vmatprep.subr.bf16.mxu0 %v582_v37  ;;  %v462_v37 = vld [vmem:[#allocation2 + $0x1c8] sm:$0xff] }
  0xfb   :  { %792 = vmatpush1.bf16.msra.mxu1 %v579_v33  ;;  %v433_v33 = vld [vmem:[#allocation2 + $0xe0] sm:$0xff] }
  0xfc   :  { %793 = vmatprep.subr.bf16.mxu1 %v586_v52  ;;  %v440_v52 = vld [vmem:[#allocation2 + $0x118] sm:$0xff] }
  0xfd   :  { %915 = vmatpush1.bf16.msra.mxu0 %v581_v42  ;;  %v461_v42 = vld [vmem:[#allocation2 + $0x1c0] sm:$0xff] }
  0xfe   :  { %916 = vmatprep.subr.bf16.mxu0 %v588_v43  ;;  %v468_v43 = vld [vmem:[#allocation2 + $0x1f8] sm:$0xff] }
  0xff   :  { %794 = vmatpush1.bf16.msra.mxu1 %v585_v35  ;;  %v439_v35 = vld [vmem:[#allocation2 + $0x110] sm:$0xff] }
 0x100   :  { %795 = vmatprep.subr.bf16.mxu1 %v592_v36  ;;  %v446_v36 = vld [vmem:[#allocation2 + $0x148] sm:$0xff] }
 0x101   :  { %917 = vmatpush1.bf16.msra.mxu0 %v587_v59  ;;  %v467_v59 = vld [vmem:[#allocation2 + $0x1f0] sm:$0xff] }
 0x102   :  { %918 = vmatprep.subr.bf16.mxu0 %v594_v60  ;;  %v474_v60 = vld [vmem:[#allocation2 + $0x228] sm:$0xff] }
 0x103   :  { %796 = vmatpush1.bf16.msra.mxu1 %v591_v38  ;;  %v445_v38 = vld [vmem:[#allocation2 + $0x140] sm:$0xff] }
 0x104   :  { %847 = vmatprep.subr.bf16.mxu1 %v408_v39  ;;  %v452_v39 = vld [vmem:[#allocation2 + $0x178] sm:$0xff] }
 0x105   :  { %919 = vmatpush1.bf16.msra.mxu0 %v593_v63  ;;  %v473_v63 = vld [vmem:[#allocation2 + $0x220] sm:$0xff] }
 0x106   :  { %798 = vmatmul.mubr.bf16.vlgmr.msra.gmra.mrb[4].mxu1 %v4826_v41  ;;  %970 = vmatprep.subr.bf16.mxu0 %v410_v3  ;;  %v480_v3 = vld [vmem:[#allocation2 + $0x258] sm:$0xff] }
 0x107   :  { %848 = vmatpush1.bf16.msra.mxu1 %v407_v44  ;;  %879 = vmatprep.mubr.bf16.mxu1 %v4800_v27  ;;  %v451_v44 = vld [vmem:[#allocation2 + $0x170] sm:$0xff] }
 0x108   :  { %849 = vmatprep.subr.bf16.mxu1 %v414_v58  ;;  %921 = vmatmul.mubr.bf16.vlgmr.msra.gmra.mrb[4].mxu0 %v4826_v41  ;;  %v458_v58 = vld [vmem:[#allocation2 + $0x1a8] sm:$0xff] }
 0x109   :  { %971 = vmatpush1.bf16.msra.mxu0 %v409_v11  ;;  %1002 = vmatprep.mubr.bf16.mxu0 %v4800_v27  ;;  %v434_v27 = vld [vmem:[#allocation2 + $0xe8] sm:$0xff]  ;;  %v479_v11 = vld [vmem:[#allocation2 + $0x250] sm:$0xff] }
 0x10a   :  { %972 = vmatprep.subr.bf16.mxu0 %v416_v46  ;;  %v486_v46 = vld [vmem:[#allocation2 + $0x288] sm:$0xff] }
 0x10b   :  { %850 = vmatpush1.bf16.msra.mxu1 %v413_v61  ;;  %v457_v61 = vld [vmem:[#allocation2 + $0x1a0] sm:$0xff] }
 0x10c   :  { %851 = vmatprep.subr.bf16.mxu1 %v420_v49  ;;  %v464_v49 = vld [vmem:[#allocation2 + $0x1d8] sm:$0xff] }
 0x10d   :  { %973 = vmatpush1.bf16.msra.mxu0 %v415_v45  ;;  %v485_v45 = vld [vmem:[#allocation2 + $0x280] sm:$0xff] }
 0x10e   :  { %974 = vmatprep.subr.bf16.mxu0 %v422_v47  ;;  %v492_v47 = vld [vmem:[#allocation2 + $0x2b8] sm:$0xff] }
 0x10f   :  { %852 = vmatpush1.bf16.msra.mxu1 %v419_v7  ;;  %v463_v7 = vld [vmem:[#allocation2 + $0x1d0] sm:$0xff] }
 0x110   :  { %853 = vmatprep.subr.bf16.mxu1 %v426_v8  ;;  %v470_v8 = vld [vmem:[#allocation2 + $0x208] sm:$0xff] }
 0x111   :  { %975 = vmatpush1.bf16.msra.mxu0 %v421_v56  ;;  %v491_v56 = vld [vmem:[#allocation2 + $0x2b0] sm:$0xff] }
 0x112   :  { %976 = vmatprep.subr.bf16.mxu0 %v428_v57  ;;  %v498_v57 = vld [vmem:[#allocation2 + $0x2e8] sm:$0xff] }
 0x113   :  { %854 = vmatpush1.bf16.msra.mxu1 %v425_v16  ;;  %v469_v16 = vld [vmem:[#allocation2 + $0x200] sm:$0xff] }
 0x114   :  { %855 = vmatprep.subr.bf16.mxu1 %v432_v17  ;;  %v476_v17 = vld [vmem:[#allocation2 + $0x238] sm:$0xff] }
 0x115   :  { %977 = vmatpush1.bf16.msra.mxu0 %v427_v30  ;;  %v497_v30 = vld [vmem:[#allocation2 + $0x2e0] sm:$0xff] }
 0x116   :  { %978 = vmatprep.subr.bf16.mxu0 %v434_v27  ;;  %v600_v27 = vld [vmem:[#allocation2 + $0x618] sm:$0xff] }
 0x117   :  { %856 = vmatpush1.bf16.msra.mxu1 %v431_v20  ;;  %v475_v20 = vld [vmem:[#allocation2 + $0x230] sm:$0xff] }
 0x118   :  { %857 = vmatprep.subr.bf16.mxu1 %v438_v50  ;;  %v482_v50 = vld [vmem:[#allocation2 + $0x268] sm:$0xff] }
 0x119   :  { %979 = vmatpush1.bf16.msra.mxu0 %v433_v33  ;;  %v599_v33 = vld [vmem:[#allocation2 + $0x610] sm:$0xff] }
 0x11a   :  { %980 = vmatprep.subr.bf16.mxu0 %v440_v52  ;;  %v606_v52 = vld [vmem:[#allocation2 + $0x648] sm:$0xff] }
 0x11b   :  { %858 = vmatpush1.bf16.msra.mxu1 %v437_v22  ;;  %v481_v22 = vld [vmem:[#allocation2 + $0x260] sm:$0xff] }
 0x11c   :  { %859 = vmatprep.subr.bf16.mxu1 %v444_v29  ;;  %v488_v29 = vld [vmem:[#allocation2 + $0x298] sm:$0xff] }
 0x11d   :  { %981 = vmatpush1.bf16.msra.mxu0 %v439_v35  ;;  %v605_v35 = vld [vmem:[#allocation2 + $0x640] sm:$0xff] }
 0x11e   :  { %982 = vmatprep.subr.bf16.mxu0 %v446_v36  ;;  %v612_v36 = vld [vmem:[#allocation2 + $0x678] sm:$0xff] }
 0x11f   :  { %860 = vmatpush1.bf16.msra.mxu1 %v443_v31  ;;  %v487_v31 = vld [vmem:[#allocation2 + $0x290] sm:$0xff] }
 0x120   :  { %861 = vmatprep.subr.bf16.mxu1 %v450_v32  ;;  %v494_v32 = vld [vmem:[#allocation2 + $0x2c8] sm:$0xff] }
 0x121   :  { %983 = vmatpush1.bf16.msra.mxu0 %v445_v38  ;;  %v611_v38 = vld [vmem:[#allocation2 + $0x670] sm:$0xff] }
 0x122   :  { %984 = vmatprep.subr.bf16.mxu0 %v452_v39  ;;  %v618_v39 = vld [vmem:[#allocation2 + $0x6a8] sm:$0xff] }
 0x123   :  { %862 = vmatpush1.bf16.msra.mxu1 %v449_v48  ;;  %v493_v48 = vld [vmem:[#allocation2 + $0x2c0] sm:$0xff] }
 0x124   :  { %863 = vmatprep.subr.bf16.mxu1 %v456_v34  ;;  %v500_v34 = vld [vmem:[#allocation2 + $0x2f8] sm:$0xff] }
 0x125   :  { %985 = vmatpush1.bf16.msra.mxu0 %v451_v44  ;;  %v617_v44 = vld [vmem:[#allocation2 + $0x6a0] sm:$0xff] }
 0x126   :  { %986 = vmatprep.subr.bf16.mxu0 %v458_v58  ;;  %v624_v58 = vld [vmem:[#allocation2 + $0x6d8] sm:$0xff] }
 0x127   :  { %864 = vmatpush1.bf16.msra.mxu1 %v455_v53  ;;  %v499_v53 = vld [vmem:[#allocation2 + $0x2f0] sm:$0xff] }
 0x128   :  { %865 = vmatprep.subr.bf16.mxu1 %v462_v37  ;;  %v602_v37 = vld [vmem:[#allocation2 + $0x628] sm:$0xff] }
 0x129   :  { %987 = vmatpush1.bf16.msra.mxu0 %v457_v61  ;;  %v623_v61 = vld [vmem:[#allocation2 + $0x6d0] sm:$0xff] }
 0x12a   :  { %988 = vmatprep.subr.bf16.mxu0 %v464_v49  ;;  %v630_v49 = vld [vmem:[#allocation2 + $0x708] sm:$0xff] }
 0x12b   :  { %866 = vmatpush1.bf16.msra.mxu1 %v461_v42  ;;  %v601_v42 = vld [vmem:[#allocation2 + $0x620] sm:$0xff] }
 0x12c   :  { %867 = vmatprep.subr.bf16.mxu1 %v468_v43  ;;  %v608_v43 = vld [vmem:[#allocation2 + $0x658] sm:$0xff] }
 0x12d   :  { %989 = vmatpush1.bf16.msra.mxu0 %v463_v7  ;;  %v629_v7 = vld [vmem:[#allocation2 + $0x700] sm:$0xff] }
 0x12e   :  { %990 = vmatprep.subr.bf16.mxu0 %v470_v8  ;;  %v636_v8 = vld [vmem:[#allocation2 + $0x738] sm:$0xff] }
 0x12f   :  { %868 = vmatpush1.bf16.msra.mxu1 %v467_v59  ;;  %v607_v59 = vld [vmem:[#allocation2 + $0x650] sm:$0xff] }
 0x130   :  { %869 = vmatprep.subr.bf16.mxu1 %v474_v60  ;;  %v614_v60 = vld [vmem:[#allocation2 + $0x688] sm:$0xff] }
 0x131   :  { %991 = vmatpush1.bf16.msra.mxu0 %v469_v16  ;;  %v625_v16 = vld [vmem:[#allocation2 + $0x6e0] sm:$0xff] }
 0x132   :  { %992 = vmatprep.subr.bf16.mxu0 %v476_v17  ;;  %v632_v17 = vld [vmem:[#allocation2 + $0x718] sm:$0xff] }
 0x133   :  { %870 = vmatpush1.bf16.msra.mxu1 %v473_v63  ;;  %v613_v63 = vld [vmem:[#allocation2 + $0x680] sm:$0xff] }
 0x134   :  { %871 = vmatprep.subr.bf16.mxu1 %v480_v3  ;;  %v620_v3 = vld [vmem:[#allocation2 + $0x6b8] sm:$0xff] }
 0x135   :  { %993 = vmatpush1.bf16.msra.mxu0 %v475_v20  ;;  %v631_v20 = vld [vmem:[#allocation2 + $0x710] sm:$0xff] }
 0x136   :  { %994 = vmatprep.subr.bf16.mxu0 %v482_v50  ;;  %v638_v50 = vld [vmem:[#allocation2 + $0x748] sm:$0xff] }
 0x137   :  { %872 = vmatpush1.bf16.msra.mxu1 %v479_v11  ;;  %v635_v11 = vld [vmem:[#allocation2 + $0x730] sm:$0xff] }
 0x138   :  { %873 = vmatprep.subr.bf16.mxu1 %v486_v46  ;;  %v642_v46 = vld [vmem:[#allocation2 + $0x768] sm:$0xff] }
 0x139   :  { %995 = vmatpush1.bf16.msra.mxu0 %v481_v22  ;;  %v637_v22 = vld [vmem:[#allocation2 + $0x740] sm:$0xff] }
 0x13a   :  { %996 = vmatprep.subr.bf16.mxu0 %v488_v29  ;;  %v644_v29 = vld [vmem:[#allocation2 + $0x778] sm:$0xff] }
 0x13b   :  { %874 = vmatpush1.bf16.msra.mxu1 %v485_v45  ;;  %v641_v45 = vld [vmem:[#allocation2 + $0x760] sm:$0xff] }
 0x13c   :  { %875 = vmatprep.subr.bf16.mxu1 %v492_v47  ;;  %v648_v47 = vld [vmem:[#allocation2 + $0x798] sm:$0xff] }
 0x13d   :  { %997 = vmatpush1.bf16.msra.mxu0 %v487_v31  ;;  %v643_v31 = vld [vmem:[#allocation2 + $0x770] sm:$0xff] }
 0x13e   :  { %998 = vmatprep.subr.bf16.mxu0 %v494_v32  ;;  %v650_v32 = vld [vmem:[#allocation2 + $0x7a8] sm:$0xff] }
 0x13f   :  { %876 = vmatpush1.bf16.msra.mxu1 %v491_v56  ;;  %v647_v56 = vld [vmem:[#allocation2 + $0x790] sm:$0xff] }
 0x140   :  { %877 = vmatprep.subr.bf16.mxu1 %v498_v57  ;;  %v654_v57 = vld [vmem:[#allocation2 + $0x7c8] sm:$0xff] }
 0x141   :  { %999 = vmatpush1.bf16.msra.mxu0 %v493_v48  ;;  %v649_v48 = vld [vmem:[#allocation2 + $0x7a0] sm:$0xff] }
 0x142   :  { %1000 = vmatprep.subr.bf16.mxu0 %v500_v34  ;;  %v656_v34 = vld [vmem:[#allocation2 + $0x7d8] sm:$0xff] }
 0x143   :  { %878 = vmatpush1.bf16.msra.mxu1 %v497_v30  ;;  %v653_v30 = vld [vmem:[#allocation2 + $0x7c0] sm:$0xff] }
 0x144   :  { %929 = vmatprep.subr.bf16.mxu1 %v600_v27  ;;  %v660_v27 = vld [vmem:[#allocation2 + $0x7f8] sm:$0xff] }
 0x145   :  { %1001 = vmatpush1.bf16.msra.mxu0 %v499_v53  ;;  %v655_v53 = vld [vmem:[#allocation2 + $0x7d0] sm:$0xff] }
 0x146   :  { %880 = vmatmul.mubr.bf16.vlgmr.msra.gmra.mrb[8].mxu1 %v4810_v4  ;;  %1052 = vmatprep.subr.bf16.mxu0 %v602_v37  ;;  %v662_v37 = vld [vmem:[#allocation2 + $0x808] sm:$0xff] }
 0x147   :  { %930 = vmatpush1.bf16.msra.mxu1 %v599_v33  ;;  %961 = vmatprep.mubr.bf16.mxu1 %v4805_v28  ;;  %v659_v33 = vld [vmem:[#allocation2 + $0x7f0] sm:$0xff] }
 0x148   :  { %931 = vmatprep.subr.bf16.mxu1 %v606_v52  ;;  %1003 = vmatmul.mubr.bf16.vlgmr.msra.gmra.mrb[8].mxu0 %v4810_v4  ;;  %v619_v4 = vld [vmem:[#allocation2 + $0x6b0] sm:$0xff]  ;;  %v666_v52 = vld [vmem:[#allocation2 + $0x828] sm:$0xff] }
 0x149   :  { %1053 = vmatpush1.bf16.msra.mxu0 %v601_v42  ;;  %1084 = vmatprep.mubr.bf16.mxu0 %v4805_v28  ;;  %v626_v28 = vld [vmem:[#allocation2 + $0x6e8] sm:$0xff]  ;;  %v661_v42 = vld [vmem:[#allocation2 + $0x800] sm:$0xff] }
 0x14a   :  { %1054 = vmatprep.subr.bf16.mxu0 %v608_v43  ;;  %v668_v43 = vld [vmem:[#allocation2 + $0x838] sm:$0xff] }
 0x14b   :  { %932 = vmatpush1.bf16.msra.mxu1 %v605_v35  ;;  %v665_v35 = vld [vmem:[#allocation2 + $0x820] sm:$0xff] }
 0x14c   :  { %933 = vmatprep.subr.bf16.mxu1 %v612_v36  ;;  %v672_v36 = vld [vmem:[#allocation2 + $0x858] sm:$0xff] }
 0x14d   :  { %1055 = vmatpush1.bf16.msra.mxu0 %v607_v59  ;;  %v667_v59 = vld [vmem:[#allocation2 + $0x830] sm:$0xff] }
 0x14e   :  { %1056 = vmatprep.subr.bf16.mxu0 %v614_v60  ;;  %v674_v60 = vld [vmem:[#allocation2 + $0x868] sm:$0xff] }
 0x14f   :  { %934 = vmatpush1.bf16.msra.mxu1 %v611_v38  ;;  %v671_v38 = vld [vmem:[#allocation2 + $0x850] sm:$0xff] }
 0x150   :  { %935 = vmatprep.subr.bf16.mxu1 %v618_v39  ;;  %v678_v39 = vld [vmem:[#allocation2 + $0x888] sm:$0xff] }
 0x151   :  { %1057 = vmatpush1.bf16.msra.mxu0 %v613_v63  ;;  %v673_v63 = vld [vmem:[#allocation2 + $0x860] sm:$0xff] }
 0x152   :  { %1058 = vmatprep.subr.bf16.mxu0 %v620_v3  ;;  %v680_v3 = vld [vmem:[#allocation2 + $0x898] sm:$0xff] }
 0x153   :  { %936 = vmatpush1.bf16.msra.mxu1 %v617_v44  ;;  %v677_v44 = vld [vmem:[#allocation2 + $0x880] sm:$0xff] }
 0x154   :  { %937 = vmatprep.subr.bf16.mxu1 %v624_v58  ;;  %v684_v58 = vld [vmem:[#allocation2 + $0x8b8] sm:$0xff] }
 0x155   :  { %1059 = vmatpush1.bf16.msra.mxu0 %v619_v4  ;;  %v679_v4 = vld [vmem:[#allocation2 + $0x890] sm:$0xff] }
 0x156   :  { %1060 = vmatprep.subr.bf16.mxu0 %v626_v28  ;;  %v686_v28 = vld [vmem:[#allocation2 + $0x8c8] sm:$0xff] }
 0x157   :  { %938 = vmatpush1.bf16.msra.mxu1 %v623_v61  ;;  %v683_v61 = vld [vmem:[#allocation2 + $0x8b0] sm:$0xff] }
 0x158   :  { %939 = vmatprep.subr.bf16.mxu1 %v630_v49  ;;  %v690_v49 = vld [vmem:[#allocation2 + $0x8e8] sm:$0xff] }
 0x159   :  { %1061 = vmatpush1.bf16.msra.mxu0 %v625_v16  ;;  %v685_v16 = vld [vmem:[#allocation2 + $0x8c0] sm:$0xff] }
 0x15a   :  { %1062 = vmatprep.subr.bf16.mxu0 %v632_v17  ;;  %v692_v17 = vld [vmem:[#allocation2 + $0x8f8] sm:$0xff] }
 0x15b   :  { %940 = vmatpush1.bf16.msra.mxu1 %v629_v7  ;;  %v689_v7 = vld [vmem:[#allocation2 + $0x8e0] sm:$0xff] }
 0x15c   :  { %941 = vmatprep.subr.bf16.mxu1 %v636_v8  ;;  %v506_v8 = vld [vmem:[#allocation2 + $0x328] sm:$0xff] }
 0x15d   :  { %1063 = vmatpush1.bf16.msra.mxu0 %v631_v20  ;;  %v691_v20 = vld [vmem:[#allocation2 + $0x8f0] sm:$0xff] }
 0x15e   :  { %1064 = vmatprep.subr.bf16.mxu0 %v638_v50  ;;  %v517_v50 = vld [vmem:[#allocation2 + $0x380] sm:$0xff] }
 0x15f   :  { %942 = vmatpush1.bf16.msra.mxu1 %v635_v11  ;;  %v505_v11 = vld [vmem:[#allocation2 + $0x320] sm:$0xff] }
 0x160   :  { %943 = vmatprep.subr.bf16.mxu1 %v642_v46  ;;  %v512_v46 = vld [vmem:[#allocation2 + $0x358] sm:$0xff] }
 0x161   :  { %1065 = vmatpush1.bf16.msra.mxu0 %v637_v22  ;;  %v530_v22 = vld [vmem:[#allocation2 + $0x3e8] sm:$0xff] }
 0x162   :  { %1066 = vmatprep.subr.bf16.mxu0 %v644_v29  ;;  %v536_v29 = vld [vmem:[#allocation2 + $0x418] sm:$0xff] }
 0x163   :  { %944 = vmatpush1.bf16.msra.mxu1 %v641_v45  ;;  %v511_v45 = vld [vmem:[#allocation2 + $0x350] sm:$0xff] }
 0x164   :  { %945 = vmatprep.subr.bf16.mxu1 %v648_v47  ;;  %v518_v47 = vld [vmem:[#allocation2 + $0x388] sm:$0xff] }
 0x165   :  { %1067 = vmatpush1.bf16.msra.mxu0 %v643_v31  ;;  %v542_v31 = vld [vmem:[#allocation2 + $0x448] sm:$0xff] }
 0x166   :  { %1068 = vmatprep.subr.bf16.mxu0 %v650_v32 }
 0x167   :  { %946 = vmatpush1.bf16.msra.mxu1 %v647_v56  ;;  %v524_v56 = vld [vmem:[#allocation2 + $0x3b8] sm:$0xff] }
 0x168   :  { %947 = vmatprep.subr.bf16.mxu1 %v654_v57  ;;  %v523_v57 = vld [vmem:[#allocation2 + $0x3b0] sm:$0xff] }
 0x169   :  { %1069 = vmatpush1.bf16.msra.mxu0 %v649_v48  ;;  %v541_v48 = vld [vmem:[#allocation2 + $0x440] sm:$0xff] }
 0x16a   :  { %1070 = vmatprep.subr.bf16.mxu0 %v656_v34  ;;  %v548_v34 = vld [vmem:[#allocation2 + $0x478] sm:$0xff] }
 0x16b   :  { %948 = vmatpush1.bf16.msra.mxu1 %v653_v30  ;;  %v535_v30 = vld [vmem:[#allocation2 + $0x410] sm:$0xff] }
 0x16c   :  { %949 = vmatprep.subr.bf16.mxu1 %v660_v27 }
 0x16d   :  { %1071 = vmatpush1.bf16.msra.mxu0 %v655_v53  ;;  %v553_v53 = vld [vmem:[#allocation2 + $0x4a0] sm:$0xff] }
 0x16e   :  { %1072 = vmatprep.subr.bf16.mxu0 %v662_v37 }
 0x16f   :  { %950 = vmatpush1.bf16.msra.mxu1 %v659_v33 }
 0x170   :  { %951 = vmatprep.subr.bf16.mxu1 %v666_v52 }
 0x171   :  { %1073 = vmatpush1.bf16.msra.mxu0 %v661_v42 }
 0x172   :  { %1074 = vmatprep.subr.bf16.mxu0 %v668_v43  ;;  %v559_v43 = vld [vmem:[#allocation2 + $0x4d0] sm:$0xff] }
 0x173   :  { %952 = vmatpush1.bf16.msra.mxu1 %v665_v35  ;;  %v554_v35 = vld [vmem:[#allocation2 + $0x4a8] sm:$0xff] }
 0x174   :  { %953 = vmatprep.subr.bf16.mxu1 %v672_v36 }
 0x175   :  { %1075 = vmatpush1.bf16.msra.mxu0 %v667_v59  ;;  %v572_v59 = vld [vmem:[#allocation2 + $0x538] sm:$0xff] }
 0x176   :  { %1076 = vmatprep.subr.bf16.mxu0 %v674_v60  ;;  %v571_v60 = vld [vmem:[#allocation2 + $0x530] sm:$0xff] }
 0x177   :  { %954 = vmatpush1.bf16.msra.mxu1 %v671_v38  ;;  %v560_v38 = vld [vmem:[#allocation2 + $0x4d8] sm:$0xff] }
 0x178   :  { %955 = vmatprep.subr.bf16.mxu1 %v678_v39 }
 0x179   :  { %1077 = vmatpush1.bf16.msra.mxu0 %v673_v63  ;;  %v584_v63 = vld [vmem:[#allocation2 + $0x598] sm:$0xff] }
 0x17a   :  { %1078 = vmatprep.subr.bf16.mxu0 %v680_v3  ;;  %v583_v3 = vld [vmem:[#allocation2 + $0x590] sm:$0xff] }
 0x17b   :  { %956 = vmatpush1.bf16.msra.mxu1 %v677_v44  ;;  %v566_v44 = vld [vmem:[#allocation2 + $0x508] sm:$0xff] }
 0x17c   :  { %957 = vmatprep.subr.bf16.mxu1 %v684_v58  ;;  %v565_v58 = vld [vmem:[#allocation2 + $0x500] sm:$0xff] }
 0x17d   :  { %1079 = vmatpush1.bf16.msra.mxu0 %v679_v4  ;;  %v596_v4 = vld [vmem:[#allocation2 + $0x5f8] sm:$0xff] }
 0x17e   :  { %1080 = vmatprep.subr.bf16.mxu0 %v686_v28  ;;  %v595_v28 = vld [vmem:[#allocation2 + $0x5f0] sm:$0xff] }
 0x17f   :  { %958 = vmatpush1.bf16.msra.mxu1 %v683_v61  ;;  %v578_v61 = vld [vmem:[#allocation2 + $0x568] sm:$0xff] }
 0x180   :  { %959 = vmatprep.subr.bf16.mxu1 %v690_v49  ;;  %v577_v49 = vld [vmem:[#allocation2 + $0x560] sm:$0xff] }
 0x181   :  { %1081 = vmatpush1.bf16.msra.mxu0 %v685_v16 }
 0x182   :  { %1082 = vmatprep.subr.bf16.mxu0 %v692_v17 }
 0x183   :  { %960 = vmatpush1.bf16.msra.mxu1 %v689_v7  ;;  %v590_v7 = vld [vmem:[#allocation2 + $0x5c8] sm:$0xff] }
 0x184   :  { %1011 = vmatprep.subr.bf16.mxu1 %v506_v8  ;;  %v589_v8 = vld [vmem:[#allocation2 + $0x5c0] sm:$0xff] }
 0x185   :  { %1083 = vmatpush1.bf16.msra.mxu0 %v691_v20 }
 0x186   :  { %962 = vmatmul.mubr.bf16.vlgmr.msra.gmra.mrb[12].mxu1 %v4820_v21 }
 0x187   :  { %1012 = vmatpush1.bf16.msra.mxu1 %v505_v11  ;;  %1043 = vmatprep.mubr.bf16.mxu1 %v4814_v9  ;;  %v529_v9 = vld [vmem:[#allocation2 + $0x3e0] sm:$0xff]  ;;  %v4841_v11 = vsub.s32 0, %v4646_v1 }
 0x188   :  { %1013 = vmatprep.subr.bf16.mxu1 %v512_v46  ;;  %1085 = vmatmul.mubr.bf16.vlgmr.msra.gmra.mrb[12].mxu0 %v4820_v21  ;;  %v547_v21 = vld [vmem:[#allocation2 + $0x470] sm:$0xff]  ;;  %v4844_v46 = vsub.s32 1, %v4646_v1 }
 0x189   :  { %v4848_v16 = vrot.slane %v4780_v6, %v4841_v11 }
 0x18a   :  { %v4852_v17 = vrot.slane %v4780_v6, %v4844_v46 }
 0x18b   :  { %1014 = vmatpush1.bf16.msra.mxu1 %v511_v45 }
 0x18c   :  { %1015 = vmatprep.subr.bf16.mxu1 %v518_v47 }
 0x18f   :  { %1016 = vmatpush1.bf16.msra.mxu1 %v517_v50 }
 0x190   :  { %1017 = vmatprep.subr.bf16.mxu1 %v524_v56 }
 0x193   :  { %1018 = vmatpush1.bf16.msra.mxu1 %v523_v57 }
 0x194   :  { %1019 = vmatprep.subr.bf16.mxu1 %v530_v22 }
 0x197   :  { %1020 = vmatpush1.bf16.msra.mxu1 %v529_v9 }
 0x198   :  { %1021 = vmatprep.subr.bf16.mxu1 %v536_v29 }
 0x199   :  { %v758_v27 = vpop.f32.mrb[0].mxu1 }
 0x19a   :  { %v760_v32 = vpop.f32.mrb[1].mxu1  ;;  %v759_v45 = vadd.f32 %v758_v27, %v4848_v16  ;;  %v4864_v27 = vsub.s32 3, %v4646_v1 }
 0x19b   :  { %v762_v33 = vpop.f32.mrb[2].mxu1  ;;  %1022 = vmatpush1.bf16.msra.mxu1 %v535_v30  ;;  %v840_v36 = vpop.f32.mrb[0].mxu0  ;;  %v761_v47 = vadd.f32 %v760_v32, %v4852_v17 }
 0x19c   :  { %v763_v52 = vpop.f32.mrb[3].mxu1  ;;  %1023 = vmatprep.subr.bf16.mxu1 %v542_v31  ;;  %v842_v37 = vpop.f32.mrb[1].mxu0 }
 0x19d   :  { %v844_v39 = vpop.f32.mrb[2].mxu0 }
 0x19e   :  { %v845_v42 = vpop.f32.mrb[3].mxu0 }
 0x19f   :  { %1024 = vmatpush1.bf16.msra.mxu1 %v541_v48  ;;  %v4861_v48 = vsub.s32 2, %v4646_v1 }
 0x1a0   :  { %1025 = vmatprep.subr.bf16.mxu1 %v548_v34  ;;  %v4872_v34 = vrot.slane %v4780_v6, %v4864_v27 }
 0x1a1   :  { %v4868_v32 = vrot.slane %v4780_v6, %v4861_v48 }
 0x1a3   :  { %1026 = vmatpush1.bf16.msra.mxu1 %v547_v21 }
 0x1a4   :  { %1027 = vmatprep.subr.bf16.mxu1 %v554_v35 }
 0x1a7   :  { %1028 = vmatpush1.bf16.msra.mxu1 %v553_v53 }
 0x1a8   :  { %1029 = vmatprep.subr.bf16.mxu1 %v560_v38 }
 0x1ab   :  { %1030 = vmatpush1.bf16.msra.mxu1 %v559_v43 }
 0x1ac   :  { %1031 = vmatprep.subr.bf16.mxu1 %v566_v44 }
 0x1af   :  { %1032 = vmatpush1.bf16.msra.mxu1 %v565_v58 }
 0x1b0   :  { %1033 = vmatprep.subr.bf16.mxu1 %v572_v59 }
 0x1b3   :  { %1034 = vmatpush1.bf16.msra.mxu1 %v571_v60 }
 0x1b4   :  { %1035 = vmatprep.subr.bf16.mxu1 %v578_v61 }
 0x1b7   :  { %1036 = vmatpush1.bf16.msra.mxu1 %v577_v49 }
 0x1b8   :  { %1037 = vmatprep.subr.bf16.mxu1 %v584_v63 }
 0x1bb   :  { %1038 = vmatpush1.bf16.msra.mxu1 %v583_v3 }
 0x1bc   :  { %1039 = vmatprep.subr.bf16.mxu1 %v590_v7 }
 0x1bf   :  { %1040 = vmatpush1.bf16.msra.mxu1 %v589_v8 }
 0x1c0   :  { %1041 = vmatprep.subr.bf16.mxu1 %v596_v4 }
 0x1c3   :  { %1042 = vmatpush1.bf16.msra.mxu1 %v595_v28 }
 0x1c6   :  { %1044 = vmatmul.mubr.bf16.vlgmr.msra.gmra.mrb[16].mxu1 %v4826_v41 }
 0x1d9   :  { %v799_v20 = vpop.f32.mrb[4].mxu1 }
 0x1da   :  { %v800_v41 = vadd.f32 %v799_v20, %v759_v45  ;;  %v801_v50 = vpop.f32.mrb[5].mxu1  ;;  %v4884_v20 = vsub.s32 5, %v4646_v1 }
 0x1db   :  { %v802_v56 = vadd.f32 %v801_v50, %v761_v47  ;;  %v803_v57 = vpop.f32.mrb[6].mxu1  ;;  %v922_v30 = vpop.f32.mrb[4].mxu0  ;;  %v4881_v47 = vsub.s32 4, %v4646_v1 }
 0x1dc   :  { %v4856_v22 = vadd.f32 %v840_v36, %v800_v41  ;;  %v804_v9 = vpop.f32.mrb[7].mxu1  ;;  %v924_v31 = vpop.f32.mrb[5].mxu0  ;;  %v4892_v50 = vrot.slane %v4780_v6, %v4884_v20 }
 0x1dd   :  { %v4858_v29 = vadd.f32 %v842_v37, %v802_v56  ;;  %v926_v33 = vpop.f32.mrb[6].mxu0  ;;  %v4888_v41 = vrot.slane %v4780_v6, %v4881_v47 }
 0x1de   :  { %v927_v52 = vpop.f32.mrb[7].mxu0 }
 0x219   :  { %v881_v21 = vpop.f32.mrb[8].mxu1 }
 0x21a   :  { %v882_v35 = vadd.f32 %v881_v21, %v4868_v32  ;;  %v883_v36 = vpop.f32.mrb[9].mxu1 }
 0x21b   :  { %v884_v53 = vadd.f32 %v883_v36, %v4872_v34  ;;  %v885_v37 = vpop.f32.mrb[10].mxu1  ;;  %v1004_v43 = vpop.f32.mrb[8].mxu0 }
 0x21c   :  { %v886_v38 = vpop.f32.mrb[11].mxu1  ;;  %v923_v39 = vadd.f32 %v922_v30, %v882_v35  ;;  %v1006_v44 = vpop.f32.mrb[9].mxu0  ;;  %v1005_v56 = vadd.f32 %v1004_v43, %v4888_v41 }
 0x21d   :  { %v925_v42 = vadd.f32 %v924_v31, %v884_v53  ;;  %v1008_v58 = vpop.f32.mrb[10].mxu0  ;;  %v1007_v57 = vadd.f32 %v1006_v44, %v4892_v50 }
 0x21e   :  { %v1009_v59 = vpop.f32.mrb[11].mxu0 }
 0x259   :  { %v963_v60 = vpop.f32.mrb[12].mxu1 }
 0x25a   :  { %v4876_v61 = vadd.f32 %v963_v60, %v923_v39  ;;  %v965_v49 = vpop.f32.mrb[13].mxu1 }
 0x25b   :  { %v4878_v63 = vadd.f32 %v965_v49, %v925_v42  ;;  %v967_v3 = vpop.f32.mrb[14].mxu1  ;;  %v1086_v8 = vpop.f32.mrb[12].mxu0 }
 0x25c   :  { %v968_v7 = vpop.f32.mrb[15].mxu1  ;;  %v1088_v4 = vpop.f32.mrb[13].mxu0 }
 0x25d   :  { %v1090_v28 = vpop.f32.mrb[14].mxu0 }
 0x25e   :  { %v1091_v45 = vpop.f32.mrb[15].mxu0 }
 0x299   :  { %v1045_v9 = vpop.f32.mrb[16].mxu1 }
 0x29a   :  { %v1046_v30 = vadd.f32 %v1045_v9, %v1005_v56  ;;  %v1047_v31 = vpop.f32.mrb[17].mxu1 }
 0x29b   :  { %v1048_v33 = vadd.f32 %v1047_v31, %v1007_v57  ;;  %v1049_v52 = vpop.f32.mrb[18].mxu1 }
 0x29c   :  { %v4896_v21 = vadd.f32 %v1086_v8, %v1046_v30  ;;  %v1050_v35 = vpop.f32.mrb[19].mxu1 }
 0x29d   :  { %v4898_v36 = vadd.f32 %v1088_v4, %v1048_v33 }
 0x29e   :  { %4496 = dma.done.wait [#allocation6 + $0x1], 49152 }
 0x29f   :  { %4497 = vsyncadd [#allocation6 + $0x1], 4294918144  ;;  %v4903_v6 = vpack.c.bf16 %v386_v15, %v386_v15  ;;  %v1103_v53 = vld [vmem:[#allocation3 + $0x8] sm:$0xff]  ;;  %v1105_v37 = vld [vmem:[#allocation3 + $0x18] sm:$0xff]  ;;  %vm2022_vm5 = vcmask 1040384  }
 0x2a0   :  { %v1102_v38 = vld [vmem:[#allocation3] sm:$0xff]  ;;  %1530 = vmatprep.subr.bf16.mxu1 %v1103_v53  ;;  %1653 = vmatprep.subr.bf16.mxu0 %v1105_v37  ;;  %v1104_v39 = vld [vmem:[#allocation3 + $0x10] sm:$0xff]  ;;  %v1111_v42 = vld [vmem:[#allocation3 + $0x48] sm:$0xff] }
 0x2a1   :  { %1562 = vmatprep.mubr.bf16.mxu1 %v4903_v6  ;;  %1685 = vmatprep.mubr.bf16.mxu0 %v4903_v6  ;;  %v1113_v43 = vld [vmem:[#allocation3 + $0x58] sm:$0xff]  ;;  %v1110_v10 = vld [vmem:[#allocation3 + $0x40] sm:$0xff]  ;;  %v1112_v44 = vld [vmem:[#allocation3 + $0x50] sm:$0xff] }
 0x2a2   :  { %1531 = vmatpush1.bf16.msra.mxu1 %v1102_v38  ;;  %1654 = vmatpush1.bf16.msra.mxu0 %v1104_v39  ;;  %v1119_v15 = vld [vmem:[#allocation3 + $0x88] sm:$0xff]  ;;  %v1121_v58 = vld [vmem:[#allocation3 + $0x98] sm:$0xff]  ;;  %v1118_v59 = vld [vmem:[#allocation3 + $0x80] sm:$0xff] }
 0x2a3   :  { %1532 = vmatprep.subr.bf16.mxu1 %v1111_v42  ;;  %1655 = vmatprep.subr.bf16.mxu0 %v1113_v43  ;;  %v1120_v60 = vld [vmem:[#allocation3 + $0x90] sm:$0xff]  ;;  %v1127_v49 = vld [vmem:[#allocation3 + $0xc8] sm:$0xff]  ;;  %v1129_v3 = vld [vmem:[#allocation3 + $0xd8] sm:$0xff] }
 0x2a4   :  { %v1126_v7 = vld [vmem:[#allocation3 + $0xc0] sm:$0xff]  ;;  %v1128_v8 = vld [vmem:[#allocation3 + $0xd0] sm:$0xff]  ;;  %v1135_v4 = vld [vmem:[#allocation3 + $0x108] sm:$0xff] }
 0x2a5   :  { %v1137_v28 = vld [vmem:[#allocation3 + $0x118] sm:$0xff]  ;;  %v1134_v45 = vld [vmem:[#allocation3 + $0x100] sm:$0xff]  ;;  %v1136_v56 = vld [vmem:[#allocation3 + $0x110] sm:$0xff] }
 0x2a6   :  { %1533 = vmatpush1.bf16.msra.mxu1 %v1110_v10  ;;  %1656 = vmatpush1.bf16.msra.mxu0 %v1112_v44  ;;  %v1143_v57 = vld [vmem:[#allocation3 + $0x148] sm:$0xff]  ;;  %v1145_v9 = vld [vmem:[#allocation3 + $0x158] sm:$0xff]  ;;  %v1142_v30 = vld [vmem:[#allocation3 + $0x140] sm:$0xff] }
 0x2a7   :  { %1534 = vmatprep.subr.bf16.mxu1 %v1119_v15  ;;  %1657 = vmatprep.subr.bf16.mxu0 %v1121_v58  ;;  %v1144_v31 = vld [vmem:[#allocation3 + $0x150] sm:$0xff]  ;;  %v1151_v33 = vld [vmem:[#allocation3 + $0x188] sm:$0xff]  ;;  %v1153_v52 = vld [vmem:[#allocation3 + $0x198] sm:$0xff] }
 0x2a8   :  { %v1150_v35 = vld [vmem:[#allocation3 + $0x180] sm:$0xff]  ;;  %v1152_v53 = vld [vmem:[#allocation3 + $0x190] sm:$0xff]  ;;  %v1159_v37 = vld [vmem:[#allocation3 + $0x1c8] sm:$0xff] }
 0x2a9   :  { %v1161_v38 = vld [vmem:[#allocation3 + $0x1d8] sm:$0xff]  ;;  %v1158_v39 = vld [vmem:[#allocation3 + $0x1c0] sm:$0xff]  ;;  %v1160_v42 = vld [vmem:[#allocation3 + $0x1d0] sm:$0xff] }
 0x2aa   :  { %1535 = vmatpush1.bf16.msra.mxu1 %v1118_v59  ;;  %1658 = vmatpush1.bf16.msra.mxu0 %v1120_v60  ;;  %v1167_v43 = vld [vmem:[#allocation3 + $0x208] sm:$0xff]  ;;  %v1169_v10 = vld [vmem:[#allocation3 + $0x218] sm:$0xff]  ;;  %v1166_v44 = vld [vmem:[#allocation3 + $0x200] sm:$0xff] }
 0x2ab   :  { %1536 = vmatprep.subr.bf16.mxu1 %v1127_v49  ;;  %1659 = vmatprep.subr.bf16.mxu0 %v1129_v3  ;;  %v1168_v15 = vld [vmem:[#allocation3 + $0x210] sm:$0xff]  ;;  %v1175_v58 = vld [vmem:[#allocation3 + $0x248] sm:$0xff]  ;;  %v1177_v59 = vld [vmem:[#allocation3 + $0x258] sm:$0xff] }
 0x2ac   :  { %v1174_v60 = vld [vmem:[#allocation3 + $0x240] sm:$0xff]  ;;  %v1176_v49 = vld [vmem:[#allocation3 + $0x250] sm:$0xff]  ;;  %v1183_v3 = vld [vmem:[#allocation3 + $0x288] sm:$0xff] }
 0x2ad   :  { %v1238_v5 = vld [vmem:[#allocation3 + $0x440] sm:$0xff] }
 0x2ae   :  { %1537 = vmatpush1.bf16.msra.mxu1 %v1126_v7  ;;  %1660 = vmatpush1.bf16.msra.mxu0 %v1128_v8  ;;  %v1185_v7 = vld [vmem:[#allocation3 + $0x298] sm:$0xff]  ;;  %v1182_v8 = vld [vmem:[#allocation3 + $0x280] sm:$0xff] }
 0x2af   :  { %1538 = vmatprep.subr.bf16.mxu1 %v1135_v4  ;;  %1661 = vmatprep.subr.bf16.mxu0 %v1137_v28  ;;  %v1184_v4 = vld [vmem:[#allocation3 + $0x290] sm:$0xff]  ;;  %v1191_v28 = vld [vmem:[#allocation3 + $0x2c8] sm:$0xff]  ;;  %v1246_v14 = vld [vmem:[#allocation3 + $0x480] sm:$0xff] }
 0x2b0   :  { %v1366_v13 = vld [vmem:[#allocation3 + $0x840] sm:$0xff] }
 0x2b1   :  { %v1374_v24 = vld [vmem:[#allocation3 + $0x880] sm:$0xff] }
 0x2b2   :  { %1539 = vmatpush1.bf16.msra.mxu1 %v1134_v45  ;;  %1662 = vmatpush1.bf16.msra.mxu0 %v1136_v56  ;;  %v1193_v45 = vld [vmem:[#allocation3 + $0x2d8] sm:$0xff]  ;;  %v1190_v56 = vld [vmem:[#allocation3 + $0x2c0] sm:$0xff] }
 0x2b3   :  { %1540 = vmatprep.subr.bf16.mxu1 %v1143_v57  ;;  %1663 = vmatprep.subr.bf16.mxu0 %v1145_v9  ;;  %v1192_v57 = vld [vmem:[#allocation3 + $0x2d0] sm:$0xff]  ;;  %v1199_v9 = vld [vmem:[#allocation3 + $0x308] sm:$0xff]  ;;  %v1114_v23 = vld [vmem:[#allocation3 + $0x60] sm:$0xff] }
 0x2b6   :  { %1541 = vmatpush1.bf16.msra.mxu1 %v1142_v30  ;;  %1664 = vmatpush1.bf16.msra.mxu0 %v1144_v31  ;;  %v1201_v30 = vld [vmem:[#allocation3 + $0x318] sm:$0xff]  ;;  %v1198_v31 = vld [vmem:[#allocation3 + $0x300] sm:$0xff] }
 0x2b7   :  { %1542 = vmatprep.subr.bf16.mxu1 %v1151_v33  ;;  %1665 = vmatprep.subr.bf16.mxu0 %v1153_v52  ;;  %v1200_v33 = vld [vmem:[#allocation3 + $0x310] sm:$0xff]  ;;  %v1207_v52 = vld [vmem:[#allocation3 + $0x348] sm:$0xff] }
 0x2ba   :  { %1543 = vmatpush1.bf16.msra.mxu1 %v1150_v35  ;;  %1666 = vmatpush1.bf16.msra.mxu0 %v1152_v53  ;;  %v1209_v35 = vld [vmem:[#allocation3 + $0x358] sm:$0xff]  ;;  %v1206_v53 = vld [vmem:[#allocation3 + $0x340] sm:$0xff] }
 0x2bb   :  { %1544 = vmatprep.subr.bf16.mxu1 %v1159_v37  ;;  %1667 = vmatprep.subr.bf16.mxu0 %v1161_v38  ;;  %v1208_v37 = vld [vmem:[#allocation3 + $0x350] sm:$0xff]  ;;  %v1215_v38 = vld [vmem:[#allocation3 + $0x388] sm:$0xff] }
 0x2be   :  { %1545 = vmatpush1.bf16.msra.mxu1 %v1158_v39  ;;  %1668 = vmatpush1.bf16.msra.mxu0 %v1160_v42  ;;  %v1217_v39 = vld [vmem:[#allocation3 + $0x398] sm:$0xff]  ;;  %v1214_v42 = vld [vmem:[#allocation3 + $0x380] sm:$0xff] }
 0x2bf   :  { %1546 = vmatprep.subr.bf16.mxu1 %v1167_v43  ;;  %1669 = vmatprep.subr.bf16.mxu0 %v1169_v10  ;;  %v1216_v43 = vld [vmem:[#allocation3 + $0x390] sm:$0xff]  ;;  %v1223_v10 = vld [vmem:[#allocation3 + $0x3c8] sm:$0xff] }
 0x2c2   :  { %1547 = vmatpush1.bf16.msra.mxu1 %v1166_v44  ;;  %1670 = vmatpush1.bf16.msra.mxu0 %v1168_v15  ;;  %v1225_v44 = vld [vmem:[#allocation3 + $0x3d8] sm:$0xff]  ;;  %v1222_v15 = vld [vmem:[#allocation3 + $0x3c0] sm:$0xff] }
 0x2c3   :  { %1548 = vmatprep.subr.bf16.mxu1 %v1175_v58  ;;  %1671 = vmatprep.subr.bf16.mxu0 %v1177_v59  ;;  %v1224_v58 = vld [vmem:[#allocation3 + $0x3d0] sm:$0xff]  ;;  %v1231_v59 = vld [vmem:[#allocation3 + $0x408] sm:$0xff] }
 0x2c6   :  { %1549 = vmatpush1.bf16.msra.mxu1 %v1174_v60  ;;  %1672 = vmatpush1.bf16.msra.mxu0 %v1176_v49  ;;  %v1233_v60 = vld [vmem:[#allocation3 + $0x418] sm:$0xff]  ;;  %v4910_v49 = vpack.c.bf16 %v385_v12, %v385_v12  ;;  %v1240_v12 = vld [vmem:[#allocation3 + $0x450] sm:$0xff] }
 0x2c7   :  { %1550 = vmatprep.subr.bf16.mxu1 %v1183_v3  ;;  %1673 = vmatprep.subr.bf16.mxu0 %v1185_v7  ;;  %v1230_v3 = vld [vmem:[#allocation3 + $0x400] sm:$0xff]  ;;  %v1232_v7 = vld [vmem:[#allocation3 + $0x410] sm:$0xff] }
 0x2ca   :  { %1551 = vmatpush1.bf16.msra.mxu1 %v1182_v8  ;;  %1674 = vmatpush1.bf16.msra.mxu0 %v1184_v4  ;;  %v1239_v8 = vld [vmem:[#allocation3 + $0x448] sm:$0xff]  ;;  %v1241_v4 = vld [vmem:[#allocation3 + $0x458] sm:$0xff] }
 0x2cb   :  { %1552 = vmatprep.subr.bf16.mxu1 %v1191_v28  ;;  %1675 = vmatprep.subr.bf16.mxu0 %v1193_v45  ;;  %v4915_v28 = vpack.c.bf16 %v388_v19, %v388_v19  ;;  %v1247_v45 = vld [vmem:[#allocation3 + $0x488] sm:$0xff]  ;;  %v1248_v19 = vld [vmem:[#allocation3 + $0x490] sm:$0xff] }
 0x2ce   :  { %1553 = vmatpush1.bf16.msra.mxu1 %v1190_v56  ;;  %1676 = vmatpush1.bf16.msra.mxu0 %v1192_v57  ;;  %v1249_v56 = vld [vmem:[#allocation3 + $0x498] sm:$0xff]  ;;  %v1255_v57 = vld [vmem:[#allocation3 + $0x4c8] sm:$0xff] }
 0x2cf   :  { %1554 = vmatprep.subr.bf16.mxu1 %v1199_v9  ;;  %1677 = vmatprep.subr.bf16.mxu0 %v1201_v30  ;;  %v1257_v9 = vld [vmem:[#allocation3 + $0x4d8] sm:$0xff]  ;;  %v1254_v30 = vld [vmem:[#allocation3 + $0x4c0] sm:$0xff] }
 0x2d2   :  { %1555 = vmatpush1.bf16.msra.mxu1 %v1198_v31  ;;  %1678 = vmatpush1.bf16.msra.mxu0 %v1200_v33  ;;  %v1256_v31 = vld [vmem:[#allocation3 + $0x4d0] sm:$0xff]  ;;  %v1263_v33 = vld [vmem:[#allocation3 + $0x508] sm:$0xff] }
 0x2d3   :  { %1556 = vmatprep.subr.bf16.mxu1 %v1207_v52  ;;  %1679 = vmatprep.subr.bf16.mxu0 %v1209_v35  ;;  %v1265_v52 = vld [vmem:[#allocation3 + $0x518] sm:$0xff]  ;;  %v1262_v35 = vld [vmem:[#allocation3 + $0x500] sm:$0xff] }
 0x2d6   :  { %1557 = vmatpush1.bf16.msra.mxu1 %v1206_v53  ;;  %1680 = vmatpush1.bf16.msra.mxu0 %v1208_v37  ;;  %v1264_v53 = vld [vmem:[#allocation3 + $0x510] sm:$0xff]  ;;  %v1271_v37 = vld [vmem:[#allocation3 + $0x548] sm:$0xff] }
 0x2d7   :  { %1558 = vmatprep.subr.bf16.mxu1 %v1215_v38  ;;  %1681 = vmatprep.subr.bf16.mxu0 %v1217_v39  ;;  %v1273_v38 = vld [vmem:[#allocation3 + $0x558] sm:$0xff]  ;;  %v1270_v39 = vld [vmem:[#allocation3 + $0x540] sm:$0xff] }
 0x2da   :  { %1559 = vmatpush1.bf16.msra.mxu1 %v1214_v42  ;;  %1682 = vmatpush1.bf16.msra.mxu0 %v1216_v43  ;;  %v1272_v42 = vld [vmem:[#allocation3 + $0x550] sm:$0xff]  ;;  %v1279_v43 = vld [vmem:[#allocation3 + $0x588] sm:$0xff] }
 0x2db   :  { %1560 = vmatprep.subr.bf16.mxu1 %v1223_v10  ;;  %1683 = vmatprep.subr.bf16.mxu0 %v1225_v44  ;;  %v1281_v10 = vld [vmem:[#allocation3 + $0x598] sm:$0xff]  ;;  %v1278_v44 = vld [vmem:[#allocation3 + $0x580] sm:$0xff] }
 0x2de   :  { %1561 = vmatpush1.bf16.msra.mxu1 %v1222_v15  ;;  %1684 = vmatpush1.bf16.msra.mxu0 %v1224_v58  ;;  %v1280_v15 = vld [vmem:[#allocation3 + $0x590] sm:$0xff]  ;;  %v1287_v58 = vld [vmem:[#allocation3 + $0x5c8] sm:$0xff] }
 0x2df   :  { %1571 = vmatprep.subr.bf16.mxu1 %v1231_v59  ;;  %1694 = vmatprep.subr.bf16.mxu0 %v1233_v60  ;;  %v1289_v59 = vld [vmem:[#allocation3 + $0x5d8] sm:$0xff]  ;;  %v1286_v60 = vld [vmem:[#allocation3 + $0x5c0] sm:$0xff] }
 0x2e1   :  { %1563 = vmatmul.mubr.bf16.vlgmr.msra.gmra.mrb[20].mxu1 %v4910_v49  ;;  %1686 = vmatmul.mubr.bf16.vlgmr.msra.gmra.mrb[16].mxu0 %v4910_v49 }
 0x2e2   :  { %1572 = vmatpush1.bf16.msra.mxu1 %v1230_v3  ;;  %1695 = vmatpush1.bf16.msra.mxu0 %v1232_v7  ;;  %v1288_v3 = vld [vmem:[#allocation3 + $0x5d0] sm:$0xff]  ;;  %v1295_v7 = vld [vmem:[#allocation3 + $0x608] sm:$0xff] }
 0x2e3   :  { %1573 = vmatprep.subr.bf16.mxu1 %v1239_v8  ;;  %1696 = vmatprep.subr.bf16.mxu0 %v1241_v4  ;;  %v1297_v8 = vld [vmem:[#allocation3 + $0x618] sm:$0xff]  ;;  %v1294_v4 = vld [vmem:[#allocation3 + $0x600] sm:$0xff] }
 0x2e4   :  { %1603 = vmatprep.mubr.bf16.mxu1 %v4915_v28  ;;  %1726 = vmatprep.mubr.bf16.mxu0 %v4915_v28 }
 0x2e6   :  { %1574 = vmatpush1.bf16.msra.mxu1 %v1238_v5  ;;  %1697 = vmatpush1.bf16.msra.mxu0 %v1240_v12  ;;  %v1296_v5 = vld [vmem:[#allocation3 + $0x610] sm:$0xff]  ;;  %v1303_v12 = vld [vmem:[#allocation3 + $0x648] sm:$0xff] }
 0x2e7   :  { %1575 = vmatprep.subr.bf16.mxu1 %v1247_v45  ;;  %1698 = vmatprep.subr.bf16.mxu0 %v1249_v56  ;;  %v1305_v45 = vld [vmem:[#allocation3 + $0x658] sm:$0xff]  ;;  %v1302_v56 = vld [vmem:[#allocation3 + $0x640] sm:$0xff] }
 0x2ea   :  { %1576 = vmatpush1.bf16.msra.mxu1 %v1246_v14  ;;  %1699 = vmatpush1.bf16.msra.mxu0 %v1248_v19  ;;  %v1304_v14 = vld [vmem:[#allocation3 + $0x650] sm:$0xff]  ;;  %v1311_v19 = vld [vmem:[#allocation3 + $0x688] sm:$0xff] }
 0x2eb   :  { %1577 = vmatprep.subr.bf16.mxu1 %v1255_v57  ;;  %1700 = vmatprep.subr.bf16.mxu0 %v1257_v9  ;;  %v1313_v57 = vld [vmem:[#allocation3 + $0x698] sm:$0xff]  ;;  %v1310_v9 = vld [vmem:[#allocation3 + $0x680] sm:$0xff] }
 0x2ee   :  { %1578 = vmatpush1.bf16.msra.mxu1 %v1254_v30  ;;  %1701 = vmatpush1.bf16.msra.mxu0 %v1256_v31  ;;  %v1312_v30 = vld [vmem:[#allocation3 + $0x690] sm:$0xff]  ;;  %v1319_v31 = vld [vmem:[#allocation3 + $0x6c8] sm:$0xff] }
 0x2ef   :  { %1579 = vmatprep.subr.bf16.mxu1 %v1263_v33  ;;  %1702 = vmatprep.subr.bf16.mxu0 %v1265_v52  ;;  %v1321_v33 = vld [vmem:[#allocation3 + $0x6d8] sm:$0xff]  ;;  %v1318_v52 = vld [vmem:[#allocation3 + $0x6c0] sm:$0xff] }
 0x2f2   :  { %1580 = vmatpush1.bf16.msra.mxu1 %v1262_v35  ;;  %1703 = vmatpush1.bf16.msra.mxu0 %v1264_v53  ;;  %v1320_v35 = vld [vmem:[#allocation3 + $0x6d0] sm:$0xff]  ;;  %v1327_v53 = vld [vmem:[#allocation3 + $0x708] sm:$0xff] }
 0x2f3   :  { %1581 = vmatprep.subr.bf16.mxu1 %v1271_v37  ;;  %1704 = vmatprep.subr.bf16.mxu0 %v1273_v38  ;;  %v1329_v37 = vld [vmem:[#allocation3 + $0x718] sm:$0xff]  ;;  %v1326_v38 = vld [vmem:[#allocation3 + $0x700] sm:$0xff] }
 0x2f6   :  { %1582 = vmatpush1.bf16.msra.mxu1 %v1270_v39  ;;  %1705 = vmatpush1.bf16.msra.mxu0 %v1272_v42  ;;  %v1328_v39 = vld [vmem:[#allocation3 + $0x710] sm:$0xff]  ;;  %v1335_v42 = vld [vmem:[#allocation3 + $0x748] sm:$0xff] }
 0x2f7   :  { %1583 = vmatprep.subr.bf16.mxu1 %v1279_v43  ;;  %1706 = vmatprep.subr.bf16.mxu0 %v1281_v10  ;;  %v1337_v43 = vld [vmem:[#allocation3 + $0x758] sm:$0xff]  ;;  %v1334_v10 = vld [vmem:[#allocation3 + $0x740] sm:$0xff] }
 0x2fa   :  { %1584 = vmatpush1.bf16.msra.mxu1 %v1278_v44  ;;  %1707 = vmatpush1.bf16.msra.mxu0 %v1280_v15  ;;  %v1336_v44 = vld [vmem:[#allocation3 + $0x750] sm:$0xff]  ;;  %v1343_v15 = vld [vmem:[#allocation3 + $0x788] sm:$0xff] }
 0x2fb   :  { %1585 = vmatprep.subr.bf16.mxu1 %v1287_v58  ;;  %1708 = vmatprep.subr.bf16.mxu0 %v1289_v59  ;;  %v1345_v58 = vld [vmem:[#allocation3 + $0x798] sm:$0xff]  ;;  %v1342_v59 = vld [vmem:[#allocation3 + $0x780] sm:$0xff] }
 0x2fe   :  { %1586 = vmatpush1.bf16.msra.mxu1 %v1286_v60  ;;  %1709 = vmatpush1.bf16.msra.mxu0 %v1288_v3  ;;  %v1344_v60 = vld [vmem:[#allocation3 + $0x790] sm:$0xff]  ;;  %v1351_v3 = vld [vmem:[#allocation3 + $0x7c8] sm:$0xff] }
 0x2ff   :  { %1587 = vmatprep.subr.bf16.mxu1 %v1295_v7  ;;  %1710 = vmatprep.subr.bf16.mxu0 %v1297_v8  ;;  %v1353_v7 = vld [vmem:[#allocation3 + $0x7d8] sm:$0xff]  ;;  %v1350_v8 = vld [vmem:[#allocation3 + $0x7c0] sm:$0xff] }
 0x302   :  { %1588 = vmatpush1.bf16.msra.mxu1 %v1294_v4  ;;  %1711 = vmatpush1.bf16.msra.mxu0 %v1296_v5  ;;  %v1352_v4 = vld [vmem:[#allocation3 + $0x7d0] sm:$0xff]  ;;  %v1359_v5 = vld [vmem:[#allocation3 + $0x808] sm:$0xff] }
 0x303   :  { %1589 = vmatprep.subr.bf16.mxu1 %v1303_v12  ;;  %1712 = vmatprep.subr.bf16.mxu0 %v1305_v45  ;;  %v1361_v12 = vld [vmem:[#allocation3 + $0x818] sm:$0xff]  ;;  %v4924_v45 = vpack.c.bf16 %v387_v18, %v387_v18  ;;  %v1368_v18 = vld [vmem:[#allocation3 + $0x850] sm:$0xff] }
 0x306   :  { %1590 = vmatpush1.bf16.msra.mxu1 %v1302_v56  ;;  %1713 = vmatpush1.bf16.msra.mxu0 %v1304_v14  ;;  %v1358_v56 = vld [vmem:[#allocation3 + $0x800] sm:$0xff]  ;;  %v1360_v14 = vld [vmem:[#allocation3 + $0x810] sm:$0xff] }
 0x307   :  { %1591 = vmatprep.subr.bf16.mxu1 %v1311_v19  ;;  %1714 = vmatprep.subr.bf16.mxu0 %v1313_v57  ;;  %v1367_v19 = vld [vmem:[#allocation3 + $0x848] sm:$0xff]  ;;  %v1369_v57 = vld [vmem:[#allocation3 + $0x858] sm:$0xff] }
 0x30a   :  { %1592 = vmatpush1.bf16.msra.mxu1 %v1310_v9  ;;  %1715 = vmatpush1.bf16.msra.mxu0 %v1312_v30  ;;  %v4929_v9 = vpack.c.bf16 %v390_v26, %v390_v26  ;;  %v1375_v30 = vld [vmem:[#allocation3 + $0x888] sm:$0xff]  ;;  %v1376_v26 = vld [vmem:[#allocation3 + $0x890] sm:$0xff] }
 0x30b   :  { %1593 = vmatprep.subr.bf16.mxu1 %v1319_v31  ;;  %1716 = vmatprep.subr.bf16.mxu0 %v1321_v33  ;;  %v1377_v31 = vld [vmem:[#allocation3 + $0x898] sm:$0xff]  ;;  %v1383_v33 = vld [vmem:[#allocation3 + $0x8c8] sm:$0xff] }
 0x30e   :  { %1594 = vmatpush1.bf16.msra.mxu1 %v1318_v52  ;;  %1717 = vmatpush1.bf16.msra.mxu0 %v1320_v35  ;;  %v1385_v52 = vld [vmem:[#allocation3 + $0x8d8] sm:$0xff]  ;;  %v1382_v35 = vld [vmem:[#allocation3 + $0x8c0] sm:$0xff] }
 0x30f   :  { %1595 = vmatprep.subr.bf16.mxu1 %v1327_v53  ;;  %1718 = vmatprep.subr.bf16.mxu0 %v1329_v37  ;;  %v1384_v53 = vld [vmem:[#allocation3 + $0x8d0] sm:$0xff]  ;;  %v1391_v37 = vld [vmem:[#allocation3 + $0x908] sm:$0xff] }
 0x312   :  { %1596 = vmatpush1.bf16.msra.mxu1 %v1326_v38  ;;  %1719 = vmatpush1.bf16.msra.mxu0 %v1328_v39  ;;  %v1393_v38 = vld [vmem:[#allocation3 + $0x918] sm:$0xff]  ;;  %v1390_v39 = vld [vmem:[#allocation3 + $0x900] sm:$0xff] }
 0x313   :  { %1597 = vmatprep.subr.bf16.mxu1 %v1335_v42  ;;  %1720 = vmatprep.subr.bf16.mxu0 %v1337_v43  ;;  %v1392_v42 = vld [vmem:[#allocation3 + $0x910] sm:$0xff]  ;;  %v1399_v43 = vld [vmem:[#allocation3 + $0x948] sm:$0xff] }
 0x316   :  { %1598 = vmatpush1.bf16.msra.mxu1 %v1334_v10  ;;  %1721 = vmatpush1.bf16.msra.mxu0 %v1336_v44  ;;  %v1401_v10 = vld [vmem:[#allocation3 + $0x958] sm:$0xff]  ;;  %v1398_v44 = vld [vmem:[#allocation3 + $0x940] sm:$0xff] }
 0x317   :  { %1599 = vmatprep.subr.bf16.mxu1 %v1343_v15  ;;  %1722 = vmatprep.subr.bf16.mxu0 %v1345_v58  ;;  %v1400_v15 = vld [vmem:[#allocation3 + $0x950] sm:$0xff]  ;;  %v1407_v58 = vld [vmem:[#allocation3 + $0x988] sm:$0xff] }
 0x31a   :  { %1600 = vmatpush1.bf16.msra.mxu1 %v1342_v59  ;;  %1723 = vmatpush1.bf16.msra.mxu0 %v1344_v60  ;;  %v1409_v59 = vld [vmem:[#allocation3 + $0x998] sm:$0xff]  ;;  %v1406_v60 = vld [vmem:[#allocation3 + $0x980] sm:$0xff] }
 0x31b   :  { %1601 = vmatprep.subr.bf16.mxu1 %v1351_v3  ;;  %1724 = vmatprep.subr.bf16.mxu0 %v1353_v7  ;;  %v1408_v3 = vld [vmem:[#allocation3 + $0x990] sm:$0xff]  ;;  %v1415_v7 = vld [vmem:[#allocation3 + $0x9c8] sm:$0xff] }
 0x31e   :  { %1602 = vmatpush1.bf16.msra.mxu1 %v1350_v8  ;;  %1725 = vmatpush1.bf16.msra.mxu0 %v1352_v4  ;;  %v1417_v8 = vld [vmem:[#allocation3 + $0x9d8] sm:$0xff]  ;;  %v1414_v4 = vld [vmem:[#allocation3 + $0x9c0] sm:$0xff] }
 0x31f   :  { %1612 = vmatprep.subr.bf16.mxu1 %v1359_v5  ;;  %1735 = vmatprep.subr.bf16.mxu0 %v1361_v12  ;;  %v1416_v5 = vld [vmem:[#allocation3 + $0x9d0] sm:$0xff]  ;;  %v1423_v12 = vld [vmem:[#allocation3 + $0xa08] sm:$0xff] }
 0x321   :  { %1604 = vmatmul.mubr.bf16.vlgmr.msra.gmra.mrb[20].mxu1 %v4924_v45  ;;  %1727 = vmatmul.mubr.bf16.vlgmr.msra.gmra.mrb[16].mxu0 %v4924_v45 }
 0x322   :  { %1613 = vmatpush1.bf16.msra.mxu1 %v1358_v56  ;;  %1736 = vmatpush1.bf16.msra.mxu0 %v1360_v14  ;;  %v1425_v56 = vld [vmem:[#allocation3 + $0xa18] sm:$0xff]  ;;  %v1422_v14 = vld [vmem:[#allocation3 + $0xa00] sm:$0xff] }
 0x323   :  { %1614 = vmatprep.subr.bf16.mxu1 %v1367_v19  ;;  %1737 = vmatprep.subr.bf16.mxu0 %v1369_v57  ;;  %v1424_v19 = vld [vmem:[#allocation3 + $0xa10] sm:$0xff]  ;;  %v1431_v57 = vld [vmem:[#allocation3 + $0xa48] sm:$0xff] }
 0x324   :  { %1644 = vmatprep.mubr.bf16.mxu1 %v4929_v9  ;;  %1767 = vmatprep.mubr.bf16.mxu0 %v4929_v9 }
 0x326   :  { %1615 = vmatpush1.bf16.msra.mxu1 %v1366_v13  ;;  %1738 = vmatpush1.bf16.msra.mxu0 %v1368_v18  ;;  %v1433_v13 = vld [vmem:[#allocation3 + $0xa58] sm:$0xff]  ;;  %v1430_v18 = vld [vmem:[#allocation3 + $0xa40] sm:$0xff] }
 0x327   :  { %1616 = vmatprep.subr.bf16.mxu1 %v1375_v30  ;;  %1739 = vmatprep.subr.bf16.mxu0 %v1377_v31  ;;  %v1432_v30 = vld [vmem:[#allocation3 + $0xa50] sm:$0xff]  ;;  %v1439_v31 = vld [vmem:[#allocation3 + $0xa88] sm:$0xff] }
 0x32a   :  { %1617 = vmatpush1.bf16.msra.mxu1 %v1374_v24  ;;  %1740 = vmatpush1.bf16.msra.mxu0 %v1376_v26  ;;  %v1441_v24 = vld [vmem:[#allocation3 + $0xa98] sm:$0xff]  ;;  %v1438_v26 = vld [vmem:[#allocation3 + $0xa80] sm:$0xff] }
 0x32b   :  { %1618 = vmatprep.subr.bf16.mxu1 %v1383_v33  ;;  %1741 = vmatprep.subr.bf16.mxu0 %v1385_v52  ;;  %v1440_v33 = vld [vmem:[#allocation3 + $0xa90] sm:$0xff]  ;;  %v1447_v52 = vld [vmem:[#allocation3 + $0xac8] sm:$0xff] }
 0x32e   :  { %1619 = vmatpush1.bf16.msra.mxu1 %v1382_v35  ;;  %1742 = vmatpush1.bf16.msra.mxu0 %v1384_v53  ;;  %v1449_v35 = vld [vmem:[#allocation3 + $0xad8] sm:$0xff]  ;;  %v1446_v53 = vld [vmem:[#allocation3 + $0xac0] sm:$0xff] }
 0x32f   :  { %1620 = vmatprep.subr.bf16.mxu1 %v1391_v37  ;;  %1743 = vmatprep.subr.bf16.mxu0 %v1393_v38  ;;  %v1448_v37 = vld [vmem:[#allocation3 + $0xad0] sm:$0xff]  ;;  %v1455_v38 = vld [vmem:[#allocation3 + $0xb08] sm:$0xff] }
 0x332   :  { %1621 = vmatpush1.bf16.msra.mxu1 %v1390_v39  ;;  %1744 = vmatpush1.bf16.msra.mxu0 %v1392_v42  ;;  %v1457_v39 = vld [vmem:[#allocation3 + $0xb18] sm:$0xff]  ;;  %v1454_v42 = vld [vmem:[#allocation3 + $0xb00] sm:$0xff] }
 0x333   :  { %1622 = vmatprep.subr.bf16.mxu1 %v1399_v43  ;;  %1745 = vmatprep.subr.bf16.mxu0 %v1401_v10  ;;  %v1456_v43 = vld [vmem:[#allocation3 + $0xb10] sm:$0xff]  ;;  %v1463_v10 = vld [vmem:[#allocation3 + $0xb48] sm:$0xff] }
 0x336   :  { %1623 = vmatpush1.bf16.msra.mxu1 %v1398_v44  ;;  %1746 = vmatpush1.bf16.msra.mxu0 %v1400_v15  ;;  %v1465_v44 = vld [vmem:[#allocation3 + $0xb58] sm:$0xff]  ;;  %v1462_v15 = vld [vmem:[#allocation3 + $0xb40] sm:$0xff] }
 0x337   :  { %1624 = vmatprep.subr.bf16.mxu1 %v1407_v58  ;;  %1747 = vmatprep.subr.bf16.mxu0 %v1409_v59  ;;  %v1464_v58 = vld [vmem:[#allocation3 + $0xb50] sm:$0xff]  ;;  %v1471_v59 = vld [vmem:[#allocation3 + $0xb88] sm:$0xff] }
 0x33a   :  { %1625 = vmatpush1.bf16.msra.mxu1 %v1406_v60  ;;  %1748 = vmatpush1.bf16.msra.mxu0 %v1408_v3  ;;  %v1473_v60 = vld [vmem:[#allocation3 + $0xb98] sm:$0xff]  ;;  %v1470_v3 = vld [vmem:[#allocation3 + $0xb80] sm:$0xff] }
 0x33b   :  { %1626 = vmatprep.subr.bf16.mxu1 %v1415_v7  ;;  %1749 = vmatprep.subr.bf16.mxu0 %v1417_v8  ;;  %v1472_v7 = vld [vmem:[#allocation3 + $0xb90] sm:$0xff]  ;;  %v1479_v8 = vld [vmem:[#allocation3 + $0xbc8] sm:$0xff] }
 0x33e   :  { %1627 = vmatpush1.bf16.msra.mxu1 %v1414_v4  ;;  %1750 = vmatpush1.bf16.msra.mxu0 %v1416_v5  ;;  %v1481_v4 = vld [vmem:[#allocation3 + $0xbd8] sm:$0xff]  ;;  %v1478_v5 = vld [vmem:[#allocation3 + $0xbc0] sm:$0xff] }
 0x33f   :  { %1628 = vmatprep.subr.bf16.mxu1 %v1423_v12  ;;  %1751 = vmatprep.subr.bf16.mxu0 %v1425_v56  ;;  %v1480_v12 = vld [vmem:[#allocation3 + $0xbd0] sm:$0xff]  ;;  %v1107_v56 = vld [vmem:[#allocation3 + $0x28] sm:$0xff] }
 0x342   :  { %1629 = vmatpush1.bf16.msra.mxu1 %v1422_v14  ;;  %1752 = vmatpush1.bf16.msra.mxu0 %v1424_v19  ;;  %v1109_v14 = vld [vmem:[#allocation3 + $0x38] sm:$0xff]  ;;  %v4938_v19 = vpack.c.bf16 %v389_v25, %v389_v25  ;;  %v1123_v25 = vld [vmem:[#allocation3 + $0xa8] sm:$0xff] }
 0x343   :  { %1630 = vmatprep.subr.bf16.mxu1 %v1431_v57  ;;  %1753 = vmatprep.subr.bf16.mxu0 %v1433_v13  ;;  %v1106_v57 = vld [vmem:[#allocation3 + $0x20] sm:$0xff]  ;;  %v1108_v13 = vld [vmem:[#allocation3 + $0x30] sm:$0xff] }
 0x346   :  { %1631 = vmatpush1.bf16.msra.mxu1 %v1430_v18  ;;  %1754 = vmatpush1.bf16.msra.mxu0 %v1432_v30  ;;  %v1115_v18 = vld [vmem:[#allocation3 + $0x68] sm:$0xff]  ;;  %v1117_v30 = vld [vmem:[#allocation3 + $0x78] sm:$0xff] }
 0x347   :  { %1632 = vmatprep.subr.bf16.mxu1 %v1439_v31  ;;  %1755 = vmatprep.subr.bf16.mxu0 %v1441_v24  ;;  %v1116_v31 = vld [vmem:[#allocation3 + $0x70] sm:$0xff]  ;;  %v1125_v24 = vld [vmem:[#allocation3 + $0xb8] sm:$0xff] }
 0x34a   :  { %1633 = vmatpush1.bf16.msra.mxu1 %v1438_v26  ;;  %1756 = vmatpush1.bf16.msra.mxu0 %v1440_v33  ;;  %v1122_v26 = vld [vmem:[#allocation3 + $0xa0] sm:$0xff]  ;;  %v1124_v33 = vld [vmem:[#allocation3 + $0xb0] sm:$0xff] }
 0x34b   :  { %1634 = vmatprep.subr.bf16.mxu1 %v1447_v52  ;;  %1757 = vmatprep.subr.bf16.mxu0 %v1449_v35  ;;  %v1131_v52 = vld [vmem:[#allocation3 + $0xe8] sm:$0xff]  ;;  %v1133_v35 = vld [vmem:[#allocation3 + $0xf8] sm:$0xff] }
 0x34e   :  { %1635 = vmatpush1.bf16.msra.mxu1 %v1446_v53  ;;  %1758 = vmatpush1.bf16.msra.mxu0 %v1448_v37  ;;  %v1130_v53 = vld [vmem:[#allocation3 + $0xe0] sm:$0xff]  ;;  %v1132_v37 = vld [vmem:[#allocation3 + $0xf0] sm:$0xff] }
 0x34f   :  { %1636 = vmatprep.subr.bf16.mxu1 %v1455_v38  ;;  %1759 = vmatprep.subr.bf16.mxu0 %v1457_v39  ;;  %v1139_v38 = vld [vmem:[#allocation3 + $0x128] sm:$0xff]  ;;  %v1141_v39 = vld [vmem:[#allocation3 + $0x138] sm:$0xff] }
 0x352   :  { %1637 = vmatpush1.bf16.msra.mxu1 %v1454_v42  ;;  %1760 = vmatpush1.bf16.msra.mxu0 %v1456_v43  ;;  %v1140_v42 = vld [vmem:[#allocation3 + $0x130] sm:$0xff]  ;;  %v1147_v43 = vld [vmem:[#allocation3 + $0x168] sm:$0xff] }
 0x353   :  { %1638 = vmatprep.subr.bf16.mxu1 %v1463_v10  ;;  %1761 = vmatprep.subr.bf16.mxu0 %v1465_v44  ;;  %v1149_v10 = vld [vmem:[#allocation3 + $0x178] sm:$0xff]  ;;  %v1146_v44 = vld [vmem:[#allocation3 + $0x160] sm:$0xff] }
 0x356   :  { %1639 = vmatpush1.bf16.msra.mxu1 %v1462_v15  ;;  %1762 = vmatpush1.bf16.msra.mxu0 %v1464_v58  ;;  %v1148_v15 = vld [vmem:[#allocation3 + $0x170] sm:$0xff]  ;;  %v1155_v58 = vld [vmem:[#allocation3 + $0x1a8] sm:$0xff] }
 0x357   :  { %1640 = vmatprep.subr.bf16.mxu1 %v1471_v59  ;;  %1763 = vmatprep.subr.bf16.mxu0 %v1473_v60  ;;  %v1157_v59 = vld [vmem:[#allocation3 + $0x1b8] sm:$0xff]  ;;  %v1154_v60 = vld [vmem:[#allocation3 + $0x1a0] sm:$0xff] }
 0x35a   :  { %1641 = vmatpush1.bf16.msra.mxu1 %v1470_v3  ;;  %1764 = vmatpush1.bf16.msra.mxu0 %v1472_v7  ;;  %v1156_v3 = vld [vmem:[#allocation3 + $0x1b0] sm:$0xff]  ;;  %v1163_v7 = vld [vmem:[#allocation3 + $0x1e8] sm:$0xff] }
 0x35b   :  { %1642 = vmatprep.subr.bf16.mxu1 %v1479_v8  ;;  %1765 = vmatprep.subr.bf16.mxu0 %v1481_v4  ;;  %v1165_v8 = vld [vmem:[#allocation3 + $0x1f8] sm:$0xff]  ;;  %v1162_v4 = vld [vmem:[#allocation3 + $0x1e0] sm:$0xff] }
 0x35e   :  { %1643 = vmatpush1.bf16.msra.mxu1 %v1478_v5  ;;  %1766 = vmatpush1.bf16.msra.mxu0 %v1480_v12  ;;  %v1164_v5 = vld [vmem:[#allocation3 + $0x1f0] sm:$0xff]  ;;  %v1171_v12 = vld [vmem:[#allocation3 + $0x228] sm:$0xff] }
 0x35f   :  { %1776 = vmatprep.subr.bf16.mxu1 %v1107_v56  ;;  %1899 = vmatprep.subr.bf16.mxu0 %v1109_v14  ;;  %v1173_v56 = vld [vmem:[#allocation3 + $0x238] sm:$0xff]  ;;  %v1170_v14 = vld [vmem:[#allocation3 + $0x220] sm:$0xff] }
 0x361   :  { %1645 = vmatmul.mubr.bf16.vlgmr.msra.gmra.mrb[20].mxu1 %v4938_v19  ;;  %1768 = vmatmul.mubr.bf16.vlgmr.msra.gmra.mrb[16].mxu0 %v4938_v19 }
 0x362   :  { %1777 = vmatpush1.bf16.msra.mxu1 %v1106_v57  ;;  %1900 = vmatpush1.bf16.msra.mxu0 %v1108_v13  ;;  %v1172_v57 = vld [vmem:[#allocation3 + $0x230] sm:$0xff]  ;;  %v1179_v13 = vld [vmem:[#allocation3 + $0x268] sm:$0xff] }
 0x363   :  { %1778 = vmatprep.subr.bf16.mxu1 %v1115_v18  ;;  %1901 = vmatprep.subr.bf16.mxu0 %v1117_v30  ;;  %v1181_v18 = vld [vmem:[#allocation3 + $0x278] sm:$0xff]  ;;  %v1178_v30 = vld [vmem:[#allocation3 + $0x260] sm:$0xff] }
 0x364   :  { %1808 = vmatprep.mubr.bf16.mxu1 %v4903_v6  ;;  %1931 = vmatprep.mubr.bf16.mxu0 %v4903_v6  ;;  %v1138_v6 = vld [vmem:[#allocation3 + $0x120] sm:$0xff] }
 0x366   :  { %1779 = vmatpush1.bf16.msra.mxu1 %v1114_v23  ;;  %1902 = vmatpush1.bf16.msra.mxu0 %v1116_v31  ;;  %v1180_v23 = vld [vmem:[#allocation3 + $0x270] sm:$0xff]  ;;  %v1187_v31 = vld [vmem:[#allocation3 + $0x2a8] sm:$0xff] }
 0x367   :  { %1780 = vmatprep.subr.bf16.mxu1 %v1123_v25  ;;  %1903 = vmatprep.subr.bf16.mxu0 %v1125_v24  ;;  %v1189_v25 = vld [vmem:[#allocation3 + $0x2b8] sm:$0xff]  ;;  %v1186_v24 = vld [vmem:[#allocation3 + $0x2a0] sm:$0xff] }
 0x36a   :  { %1781 = vmatpush1.bf16.msra.mxu1 %v1122_v26  ;;  %1904 = vmatpush1.bf16.msra.mxu0 %v1124_v33  ;;  %v1188_v26 = vld [vmem:[#allocation3 + $0x2b0] sm:$0xff]  ;;  %v1195_v33 = vld [vmem:[#allocation3 + $0x2e8] sm:$0xff] }
 0x36b   :  { %1782 = vmatprep.subr.bf16.mxu1 %v1131_v52  ;;  %1905 = vmatprep.subr.bf16.mxu0 %v1133_v35  ;;  %v1197_v52 = vld [vmem:[#allocation3 + $0x2f8] sm:$0xff]  ;;  %v1194_v35 = vld [vmem:[#allocation3 + $0x2e0] sm:$0xff] }
 0x36e   :  { %1783 = vmatpush1.bf16.msra.mxu1 %v1130_v53  ;;  %1906 = vmatpush1.bf16.msra.mxu0 %v1132_v37  ;;  %v1196_v53 = vld [vmem:[#allocation3 + $0x2f0] sm:$0xff]  ;;  %v1203_v37 = vld [vmem:[#allocation3 + $0x328] sm:$0xff] }
 0x36f   :  { %1784 = vmatprep.subr.bf16.mxu1 %v1139_v38  ;;  %1907 = vmatprep.subr.bf16.mxu0 %v1141_v39  ;;  %v1205_v38 = vld [vmem:[#allocation3 + $0x338] sm:$0xff]  ;;  %v1202_v39 = vld [vmem:[#allocation3 + $0x320] sm:$0xff] }
 0x372   :  { %1785 = vmatpush1.bf16.msra.mxu1 %v1138_v6  ;;  %1908 = vmatpush1.bf16.msra.mxu0 %v1140_v42  ;;  %v1204_v6 = vld [vmem:[#allocation3 + $0x330] sm:$0xff]  ;;  %v1211_v42 = vld [vmem:[#allocation3 + $0x368] sm:$0xff] }
 0x373   :  { %1786 = vmatprep.subr.bf16.mxu1 %v1147_v43  ;;  %1909 = vmatprep.subr.bf16.mxu0 %v1149_v10  ;;  %v1213_v43 = vld [vmem:[#allocation3 + $0x378] sm:$0xff]  ;;  %v1210_v10 = vld [vmem:[#allocation3 + $0x360] sm:$0xff] }
 0x376   :  { %1787 = vmatpush1.bf16.msra.mxu1 %v1146_v44  ;;  %1910 = vmatpush1.bf16.msra.mxu0 %v1148_v15  ;;  %v1212_v44 = vld [vmem:[#allocation3 + $0x370] sm:$0xff]  ;;  %v1219_v15 = vld [vmem:[#allocation3 + $0x3a8] sm:$0xff] }
 0x377   :  { %1788 = vmatprep.subr.bf16.mxu1 %v1155_v58  ;;  %1911 = vmatprep.subr.bf16.mxu0 %v1157_v59  ;;  %v1221_v58 = vld [vmem:[#allocation3 + $0x3b8] sm:$0xff]  ;;  %v1218_v59 = vld [vmem:[#allocation3 + $0x3a0] sm:$0xff] }
 0x37a   :  { %1789 = vmatpush1.bf16.msra.mxu1 %v1154_v60  ;;  %1912 = vmatpush1.bf16.msra.mxu0 %v1156_v3  ;;  %v1220_v60 = vld [vmem:[#allocation3 + $0x3b0] sm:$0xff]  ;;  %v1227_v3 = vld [vmem:[#allocation3 + $0x3e8] sm:$0xff] }
 0x37b   :  { %1790 = vmatprep.subr.bf16.mxu1 %v1163_v7  ;;  %1913 = vmatprep.subr.bf16.mxu0 %v1165_v8  ;;  %v1229_v7 = vld [vmem:[#allocation3 + $0x3f8] sm:$0xff]  ;;  %v1226_v8 = vld [vmem:[#allocation3 + $0x3e0] sm:$0xff] }
 0x37e   :  { %1791 = vmatpush1.bf16.msra.mxu1 %v1162_v4  ;;  %1914 = vmatpush1.bf16.msra.mxu0 %v1164_v5  ;;  %v1228_v4 = vld [vmem:[#allocation3 + $0x3f0] sm:$0xff]  ;;  %v1235_v5 = vld [vmem:[#allocation3 + $0x428] sm:$0xff] }
 0x37f   :  { %1792 = vmatprep.subr.bf16.mxu1 %v1171_v12  ;;  %1915 = vmatprep.subr.bf16.mxu0 %v1173_v56  ;;  %v1237_v12 = vld [vmem:[#allocation3 + $0x438] sm:$0xff]  ;;  %v1234_v56 = vld [vmem:[#allocation3 + $0x420] sm:$0xff] }
 0x382   :  { %1793 = vmatpush1.bf16.msra.mxu1 %v1170_v14  ;;  %1916 = vmatpush1.bf16.msra.mxu0 %v1172_v57  ;;  %v1236_v14 = vld [vmem:[#allocation3 + $0x430] sm:$0xff]  ;;  %v1243_v57 = vld [vmem:[#allocation3 + $0x468] sm:$0xff] }
 0x383   :  { %1794 = vmatprep.subr.bf16.mxu1 %v1179_v13  ;;  %1917 = vmatprep.subr.bf16.mxu0 %v1181_v18  ;;  %v1245_v13 = vld [vmem:[#allocation3 + $0x478] sm:$0xff]  ;;  %v1242_v18 = vld [vmem:[#allocation3 + $0x460] sm:$0xff] }
 0x386   :  { %1795 = vmatpush1.bf16.msra.mxu1 %v1178_v30  ;;  %1918 = vmatpush1.bf16.msra.mxu0 %v1180_v23  ;;  %v1244_v30 = vld [vmem:[#allocation3 + $0x470] sm:$0xff]  ;;  %v1251_v23 = vld [vmem:[#allocation3 + $0x4a8] sm:$0xff] }
 0x387   :  { %1796 = vmatprep.subr.bf16.mxu1 %v1187_v31  ;;  %1919 = vmatprep.subr.bf16.mxu0 %v1189_v25  ;;  %v1253_v31 = vld [vmem:[#allocation3 + $0x4b8] sm:$0xff]  ;;  %v1250_v25 = vld [vmem:[#allocation3 + $0x4a0] sm:$0xff] }
 0x38a   :  { %1797 = vmatpush1.bf16.msra.mxu1 %v1186_v24  ;;  %1920 = vmatpush1.bf16.msra.mxu0 %v1188_v26  ;;  %v1252_v24 = vld [vmem:[#allocation3 + $0x4b0] sm:$0xff]  ;;  %v1259_v26 = vld [vmem:[#allocation3 + $0x4e8] sm:$0xff] }
 0x38b   :  { %1798 = vmatprep.subr.bf16.mxu1 %v1195_v33  ;;  %1921 = vmatprep.subr.bf16.mxu0 %v1197_v52  ;;  %v1258_v33 = vld [vmem:[#allocation3 + $0x4e0] sm:$0xff]  ;;  %v1260_v52 = vld [vmem:[#allocation3 + $0x4f0] sm:$0xff] }
 0x38e   :  { %1799 = vmatpush1.bf16.msra.mxu1 %v1194_v35  ;;  %1922 = vmatpush1.bf16.msra.mxu0 %v1196_v53  ;;  %v1267_v35 = vld [vmem:[#allocation3 + $0x528] sm:$0xff]  ;;  %v1269_v53 = vld [vmem:[#allocation3 + $0x538] sm:$0xff] }
 0x38f   :  { %1800 = vmatprep.subr.bf16.mxu1 %v1203_v37  ;;  %1923 = vmatprep.subr.bf16.mxu0 %v1205_v38  ;;  %v1268_v37 = vld [vmem:[#allocation3 + $0x530] sm:$0xff]  ;;  %v1275_v38 = vld [vmem:[#allocation3 + $0x568] sm:$0xff] }
 0x392   :  { %1801 = vmatpush1.bf16.msra.mxu1 %v1202_v39  ;;  %1924 = vmatpush1.bf16.msra.mxu0 %v1204_v6  ;;  %v1277_v39 = vld [vmem:[#allocation3 + $0x578] sm:$0xff]  ;;  %v1274_v6 = vld [vmem:[#allocation3 + $0x560] sm:$0xff] }
 0x393   :  { %1802 = vmatprep.subr.bf16.mxu1 %v1211_v42  ;;  %1925 = vmatprep.subr.bf16.mxu0 %v1213_v43  ;;  %v1276_v42 = vld [vmem:[#allocation3 + $0x570] sm:$0xff]  ;;  %v1283_v43 = vld [vmem:[#allocation3 + $0x5a8] sm:$0xff] }
 0x396   :  { %1803 = vmatpush1.bf16.msra.mxu1 %v1210_v10  ;;  %1926 = vmatpush1.bf16.msra.mxu0 %v1212_v44  ;;  %v1285_v10 = vld [vmem:[#allocation3 + $0x5b8] sm:$0xff]  ;;  %v1282_v44 = vld [vmem:[#allocation3 + $0x5a0] sm:$0xff] }
 0x397   :  { %1804 = vmatprep.subr.bf16.mxu1 %v1219_v15  ;;  %1927 = vmatprep.subr.bf16.mxu0 %v1221_v58  ;;  %v1284_v15 = vld [vmem:[#allocation3 + $0x5b0] sm:$0xff]  ;;  %v1291_v58 = vld [vmem:[#allocation3 + $0x5e8] sm:$0xff] }
 0x39a   :  { %1805 = vmatpush1.bf16.msra.mxu1 %v1218_v59  ;;  %1928 = vmatpush1.bf16.msra.mxu0 %v1220_v60  ;;  %v1293_v59 = vld [vmem:[#allocation3 + $0x5f8] sm:$0xff]  ;;  %v1290_v60 = vld [vmem:[#allocation3 + $0x5e0] sm:$0xff] }
 0x39b   :  { %1806 = vmatprep.subr.bf16.mxu1 %v1227_v3  ;;  %1929 = vmatprep.subr.bf16.mxu0 %v1229_v7  ;;  %v1292_v3 = vld [vmem:[#allocation3 + $0x5f0] sm:$0xff]  ;;  %v1299_v7 = vld [vmem:[#allocation3 + $0x628] sm:$0xff] }
 0x39e   :  { %1807 = vmatpush1.bf16.msra.mxu1 %v1226_v8  ;;  %1930 = vmatpush1.bf16.msra.mxu0 %v1228_v4  ;;  %v1301_v8 = vld [vmem:[#allocation3 + $0x638] sm:$0xff]  ;;  %v1298_v4 = vld [vmem:[#allocation3 + $0x620] sm:$0xff] }
 0x39f   :  { %1817 = vmatprep.subr.bf16.mxu1 %v1235_v5  ;;  %1940 = vmatprep.subr.bf16.mxu0 %v1237_v12  ;;  %v1300_v5 = vld [vmem:[#allocation3 + $0x630] sm:$0xff]  ;;  %v1307_v12 = vld [vmem:[#allocation3 + $0x668] sm:$0xff] }
 0x3a1   :  { %1809 = vmatmul.mubr.bf16.vlgmr.msra.gmra.mrb[24].mxu1 %v4910_v49  ;;  %1932 = vmatmul.mubr.bf16.vlgmr.msra.gmra.mrb[20].mxu0 %v4910_v49  ;;  %v1261_v49 = vld [vmem:[#allocation3 + $0x4f8] sm:$0xff] }
 0x3a2   :  { %1818 = vmatpush1.bf16.msra.mxu1 %v1234_v56  ;;  %1941 = vmatpush1.bf16.msra.mxu0 %v1236_v14  ;;  %v1309_v56 = vld [vmem:[#allocation3 + $0x678] sm:$0xff]  ;;  %v1306_v14 = vld [vmem:[#allocation3 + $0x660] sm:$0xff] }
 0x3a3   :  { %1819 = vmatprep.subr.bf16.mxu1 %v1243_v57  ;;  %1942 = vmatprep.subr.bf16.mxu0 %v1245_v13  ;;  %v1308_v57 = vld [vmem:[#allocation3 + $0x670] sm:$0xff]  ;;  %v1315_v13 = vld [vmem:[#allocation3 + $0x6a8] sm:$0xff] }
 0x3a4   :  { %1849 = vmatprep.mubr.bf16.mxu1 %v4915_v28  ;;  %1972 = vmatprep.mubr.bf16.mxu0 %v4915_v28  ;;  %v1266_v28 = vld [vmem:[#allocation3 + $0x520] sm:$0xff] }
 0x3a6   :  { %1820 = vmatpush1.bf16.msra.mxu1 %v1242_v18  ;;  %1943 = vmatpush1.bf16.msra.mxu0 %v1244_v30  ;;  %v1317_v18 = vld [vmem:[#allocation3 + $0x6b8] sm:$0xff]  ;;  %v1314_v30 = vld [vmem:[#allocation3 + $0x6a0] sm:$0xff] }
 0x3a7   :  { %1821 = vmatprep.subr.bf16.mxu1 %v1251_v23  ;;  %1944 = vmatprep.subr.bf16.mxu0 %v1253_v31  ;;  %v1316_v23 = vld [vmem:[#allocation3 + $0x6b0] sm:$0xff]  ;;  %v1323_v31 = vld [vmem:[#allocation3 + $0x6e8] sm:$0xff] }
 0x3aa   :  { %1822 = vmatpush1.bf16.msra.mxu1 %v1250_v25  ;;  %1945 = vmatpush1.bf16.msra.mxu0 %v1252_v24  ;;  %v1325_v25 = vld [vmem:[#allocation3 + $0x6f8] sm:$0xff]  ;;  %v1322_v24 = vld [vmem:[#allocation3 + $0x6e0] sm:$0xff] }
 0x3ab   :  { %1823 = vmatprep.subr.bf16.mxu1 %v1259_v26  ;;  %1946 = vmatprep.subr.bf16.mxu0 %v1261_v49  ;;  %v1324_v26 = vld [vmem:[#allocation3 + $0x6f0] sm:$0xff]  ;;  %v1331_v49 = vld [vmem:[#allocation3 + $0x728] sm:$0xff] }
 0x3ae   :  { %1824 = vmatpush1.bf16.msra.mxu1 %v1258_v33  ;;  %1947 = vmatpush1.bf16.msra.mxu0 %v1260_v52  ;;  %v1333_v33 = vld [vmem:[#allocation3 + $0x738] sm:$0xff]  ;;  %v1330_v52 = vld [vmem:[#allocation3 + $0x720] sm:$0xff] }
 0x3af   :  { %1825 = vmatprep.subr.bf16.mxu1 %v1267_v35  ;;  %1948 = vmatprep.subr.bf16.mxu0 %v1269_v53  ;;  %v1332_v35 = vld [vmem:[#allocation3 + $0x730] sm:$0xff]  ;;  %v1339_v53 = vld [vmem:[#allocation3 + $0x768] sm:$0xff] }
 0x3b2   :  { %1826 = vmatpush1.bf16.msra.mxu1 %v1266_v28  ;;  %1949 = vmatpush1.bf16.msra.mxu0 %v1268_v37  ;;  %v1341_v28 = vld [vmem:[#allocation3 + $0x778] sm:$0xff]  ;;  %v1338_v37 = vld [vmem:[#allocation3 + $0x760] sm:$0xff] }
 0x3b3   :  { %1827 = vmatprep.subr.bf16.mxu1 %v1275_v38  ;;  %1950 = vmatprep.subr.bf16.mxu0 %v1277_v39  ;;  %v1340_v38 = vld [vmem:[#allocation3 + $0x770] sm:$0xff]  ;;  %v1347_v39 = vld [vmem:[#allocation3 + $0x7a8] sm:$0xff] }
 0x3b6   :  { %1828 = vmatpush1.bf16.msra.mxu1 %v1274_v6  ;;  %1951 = vmatpush1.bf16.msra.mxu0 %v1276_v42  ;;  %v1349_v6 = vld [vmem:[#allocation3 + $0x7b8] sm:$0xff]  ;;  %v1346_v42 = vld [vmem:[#allocation3 + $0x7a0] sm:$0xff] }
 0x3b7   :  { %1829 = vmatprep.subr.bf16.mxu1 %v1283_v43  ;;  %1952 = vmatprep.subr.bf16.mxu0 %v1285_v10  ;;  %v1348_v43 = vld [vmem:[#allocation3 + $0x7b0] sm:$0xff]  ;;  %v1355_v10 = vld [vmem:[#allocation3 + $0x7e8] sm:$0xff] }
 0x3ba   :  { %1830 = vmatpush1.bf16.msra.mxu1 %v1282_v44  ;;  %1953 = vmatpush1.bf16.msra.mxu0 %v1284_v15  ;;  %v1357_v44 = vld [vmem:[#allocation3 + $0x7f8] sm:$0xff]  ;;  %v1354_v15 = vld [vmem:[#allocation3 + $0x7e0] sm:$0xff] }
 0x3bb   :  { %1831 = vmatprep.subr.bf16.mxu1 %v1291_v58  ;;  %1954 = vmatprep.subr.bf16.mxu0 %v1293_v59  ;;  %v1356_v58 = vld [vmem:[#allocation3 + $0x7f0] sm:$0xff]  ;;  %v1363_v59 = vld [vmem:[#allocation3 + $0x828] sm:$0xff] }
 0x3be   :  { %1832 = vmatpush1.bf16.msra.mxu1 %v1290_v60  ;;  %1955 = vmatpush1.bf16.msra.mxu0 %v1292_v3  ;;  %v1365_v60 = vld [vmem:[#allocation3 + $0x838] sm:$0xff]  ;;  %v1362_v3 = vld [vmem:[#allocation3 + $0x820] sm:$0xff] }
 0x3bf   :  { %1833 = vmatprep.subr.bf16.mxu1 %v1299_v7  ;;  %1956 = vmatprep.subr.bf16.mxu0 %v1301_v8  ;;  %v1364_v7 = vld [vmem:[#allocation3 + $0x830] sm:$0xff]  ;;  %v1371_v8 = vld [vmem:[#allocation3 + $0x868] sm:$0xff] }
 0x3c2   :  { %1834 = vmatpush1.bf16.msra.mxu1 %v1298_v4  ;;  %1957 = vmatpush1.bf16.msra.mxu0 %v1300_v5  ;;  %v1373_v4 = vld [vmem:[#allocation3 + $0x878] sm:$0xff]  ;;  %v1370_v5 = vld [vmem:[#allocation3 + $0x860] sm:$0xff] }
 0x3c3   :  { %1835 = vmatprep.subr.bf16.mxu1 %v1307_v12  ;;  %1958 = vmatprep.subr.bf16.mxu0 %v1309_v56  ;;  %v1372_v12 = vld [vmem:[#allocation3 + $0x870] sm:$0xff]  ;;  %v1379_v56 = vld [vmem:[#allocation3 + $0x8a8] sm:$0xff] }
 0x3c6   :  { %1836 = vmatpush1.bf16.msra.mxu1 %v1306_v14  ;;  %1959 = vmatpush1.bf16.msra.mxu0 %v1308_v57  ;;  %v1381_v14 = vld [vmem:[#allocation3 + $0x8b8] sm:$0xff]  ;;  %v1378_v57 = vld [vmem:[#allocation3 + $0x8a0] sm:$0xff] }
 0x3c7   :  { %1837 = vmatprep.subr.bf16.mxu1 %v1315_v13  ;;  %1960 = vmatprep.subr.bf16.mxu0 %v1317_v18  ;;  %v1380_v13 = vld [vmem:[#allocation3 + $0x8b0] sm:$0xff]  ;;  %v1387_v18 = vld [vmem:[#allocation3 + $0x8e8] sm:$0xff] }
 0x3ca   :  { %1838 = vmatpush1.bf16.msra.mxu1 %v1314_v30  ;;  %1961 = vmatpush1.bf16.msra.mxu0 %v1316_v23  ;;  %v1386_v30 = vld [vmem:[#allocation3 + $0x8e0] sm:$0xff]  ;;  %v1388_v23 = vld [vmem:[#allocation3 + $0x8f0] sm:$0xff] }
 0x3cb   :  { %1839 = vmatprep.subr.bf16.mxu1 %v1323_v31  ;;  %1962 = vmatprep.subr.bf16.mxu0 %v1325_v25  ;;  %v1395_v31 = vld [vmem:[#allocation3 + $0x928] sm:$0xff]  ;;  %v1397_v25 = vld [vmem:[#allocation3 + $0x938] sm:$0xff] }
 0x3ce   :  { %1840 = vmatpush1.bf16.msra.mxu1 %v1322_v24  ;;  %1963 = vmatpush1.bf16.msra.mxu0 %v1324_v26  ;;  %v1396_v24 = vld [vmem:[#allocation3 + $0x930] sm:$0xff]  ;;  %v1403_v26 = vld [vmem:[#allocation3 + $0x968] sm:$0xff] }
 0x3cf   :  { %1841 = vmatprep.subr.bf16.mxu1 %v1331_v49  ;;  %1964 = vmatprep.subr.bf16.mxu0 %v1333_v33  ;;  %v1405_v49 = vld [vmem:[#allocation3 + $0x978] sm:$0xff]  ;;  %v1402_v33 = vld [vmem:[#allocation3 + $0x960] sm:$0xff] }
 0x3d2   :  { %1842 = vmatpush1.bf16.msra.mxu1 %v1330_v52  ;;  %1965 = vmatpush1.bf16.msra.mxu0 %v1332_v35  ;;  %v1404_v52 = vld [vmem:[#allocation3 + $0x970] sm:$0xff]  ;;  %v1411_v35 = vld [vmem:[#allocation3 + $0x9a8] sm:$0xff] }
 0x3d3   :  { %1843 = vmatprep.subr.bf16.mxu1 %v1339_v53  ;;  %1966 = vmatprep.subr.bf16.mxu0 %v1341_v28  ;;  %v1413_v53 = vld [vmem:[#allocation3 + $0x9b8] sm:$0xff]  ;;  %v1410_v28 = vld [vmem:[#allocation3 + $0x9a0] sm:$0xff] }
 0x3d6   :  { %1844 = vmatpush1.bf16.msra.mxu1 %v1338_v37  ;;  %1967 = vmatpush1.bf16.msra.mxu0 %v1340_v38  ;;  %v1412_v37 = vld [vmem:[#allocation3 + $0x9b0] sm:$0xff]  ;;  %v1419_v38 = vld [vmem:[#allocation3 + $0x9e8] sm:$0xff] }
 0x3d7   :  { %1845 = vmatprep.subr.bf16.mxu1 %v1347_v39  ;;  %1968 = vmatprep.subr.bf16.mxu0 %v1349_v6  ;;  %v1421_v39 = vld [vmem:[#allocation3 + $0x9f8] sm:$0xff]  ;;  %v1418_v6 = vld [vmem:[#allocation3 + $0x9e0] sm:$0xff] }
 0x3da   :  { %1846 = vmatpush1.bf16.msra.mxu1 %v1346_v42  ;;  %1969 = vmatpush1.bf16.msra.mxu0 %v1348_v43  ;;  %v1420_v42 = vld [vmem:[#allocation3 + $0x9f0] sm:$0xff]  ;;  %v1427_v43 = vld [vmem:[#allocation3 + $0xa28] sm:$0xff] }
 0x3db   :  { %1847 = vmatprep.subr.bf16.mxu1 %v1355_v10  ;;  %1970 = vmatprep.subr.bf16.mxu0 %v1357_v44  ;;  %v1429_v10 = vld [vmem:[#allocation3 + $0xa38] sm:$0xff]  ;;  %v1426_v44 = vld [vmem:[#allocation3 + $0xa20] sm:$0xff] }
 0x3de   :  { %1848 = vmatpush1.bf16.msra.mxu1 %v1354_v15  ;;  %1971 = vmatpush1.bf16.msra.mxu0 %v1356_v58  ;;  %v1428_v15 = vld [vmem:[#allocation3 + $0xa30] sm:$0xff]  ;;  %v1435_v58 = vld [vmem:[#allocation3 + $0xa68] sm:$0xff] }
 0x3df   :  { %1858 = vmatprep.subr.bf16.mxu1 %v1363_v59  ;;  %1981 = vmatprep.subr.bf16.mxu0 %v1365_v60  ;;  %v1437_v59 = vld [vmem:[#allocation3 + $0xa78] sm:$0xff]  ;;  %v1434_v60 = vld [vmem:[#allocation3 + $0xa60] sm:$0xff] }
 0x3e1   :  { %1850 = vmatmul.mubr.bf16.vlgmr.msra.gmra.mrb[24].mxu1 %v4924_v45  ;;  %1973 = vmatmul.mubr.bf16.vlgmr.msra.gmra.mrb[20].mxu0 %v4924_v45  ;;  %v1389_v45 = vld [vmem:[#allocation3 + $0x8f8] sm:$0xff] }
 0x3e2   :  { %1859 = vmatpush1.bf16.msra.mxu1 %v1362_v3  ;;  %1982 = vmatpush1.bf16.msra.mxu0 %v1364_v7  ;;  %v1436_v3 = vld [vmem:[#allocation3 + $0xa70] sm:$0xff]  ;;  %v1443_v7 = vld [vmem:[#allocation3 + $0xaa8] sm:$0xff] }
 0x3e3   :  { %1860 = vmatprep.subr.bf16.mxu1 %v1371_v8  ;;  %1983 = vmatprep.subr.bf16.mxu0 %v1373_v4  ;;  %v1445_v8 = vld [vmem:[#allocation3 + $0xab8] sm:$0xff]  ;;  %v1442_v4 = vld [vmem:[#allocation3 + $0xaa0] sm:$0xff] }
 0x3e4   :  { %1890 = vmatprep.mubr.bf16.mxu1 %v4929_v9  ;;  %2013 = vmatprep.mubr.bf16.mxu0 %v4929_v9  ;;  %v1394_v9 = vld [vmem:[#allocation3 + $0x920] sm:$0xff] }
 0x3e6   :  { %1861 = vmatpush1.bf16.msra.mxu1 %v1370_v5  ;;  %1984 = vmatpush1.bf16.msra.mxu0 %v1372_v12  ;;  %v1444_v5 = vld [vmem:[#allocation3 + $0xab0] sm:$0xff]  ;;  %v1451_v12 = vld [vmem:[#allocation3 + $0xae8] sm:$0xff] }
 0x3e7   :  { %1862 = vmatprep.subr.bf16.mxu1 %v1379_v56  ;;  %1985 = vmatprep.subr.bf16.mxu0 %v1381_v14  ;;  %v1453_v56 = vld [vmem:[#allocation3 + $0xaf8] sm:$0xff]  ;;  %v1450_v14 = vld [vmem:[#allocation3 + $0xae0] sm:$0xff] }
 0x3ea   :  { %1863 = vmatpush1.bf16.msra.mxu1 %v1378_v57  ;;  %1986 = vmatpush1.bf16.msra.mxu0 %v1380_v13  ;;  %v1452_v57 = vld [vmem:[#allocation3 + $0xaf0] sm:$0xff]  ;;  %v1459_v13 = vld [vmem:[#allocation3 + $0xb28] sm:$0xff] }
 0x3eb   :  { %1864 = vmatprep.subr.bf16.mxu1 %v1387_v18  ;;  %1987 = vmatprep.subr.bf16.mxu0 %v1389_v45  ;;  %v1461_v18 = vld [vmem:[#allocation3 + $0xb38] sm:$0xff]  ;;  %v1458_v45 = vld [vmem:[#allocation3 + $0xb20] sm:$0xff] }
 0x3ee   :  { %1865 = vmatpush1.bf16.msra.mxu1 %v1386_v30  ;;  %1988 = vmatpush1.bf16.msra.mxu0 %v1388_v23  ;;  %v1460_v30 = vld [vmem:[#allocation3 + $0xb30] sm:$0xff]  ;;  %v1467_v23 = vld [vmem:[#allocation3 + $0xb68] sm:$0xff] }
 0x3ef   :  { %1866 = vmatprep.subr.bf16.mxu1 %v1395_v31  ;;  %1989 = vmatprep.subr.bf16.mxu0 %v1397_v25  ;;  %v1469_v31 = vld [vmem:[#allocation3 + $0xb78] sm:$0xff]  ;;  %v1466_v25 = vld [vmem:[#allocation3 + $0xb60] sm:$0xff] }
 0x3f2   :  { %1867 = vmatpush1.bf16.msra.mxu1 %v1394_v9  ;;  %1990 = vmatpush1.bf16.msra.mxu0 %v1396_v24  ;;  %v1468_v9 = vld [vmem:[#allocation3 + $0xb70] sm:$0xff]  ;;  %v1475_v24 = vld [vmem:[#allocation3 + $0xba8] sm:$0xff] }
 0x3f3   :  { %1868 = vmatprep.subr.bf16.mxu1 %v1403_v26  ;;  %1991 = vmatprep.subr.bf16.mxu0 %v1405_v49  ;;  %v1477_v26 = vld [vmem:[#allocation3 + $0xbb8] sm:$0xff]  ;;  %v1474_v49 = vld [vmem:[#allocation3 + $0xba0] sm:$0xff] }
 0x3f6   :  { %1869 = vmatpush1.bf16.msra.mxu1 %v1402_v33  ;;  %1992 = vmatpush1.bf16.msra.mxu0 %v1404_v52  ;;  %v1476_v33 = vld [vmem:[#allocation3 + $0xbb0] sm:$0xff]  ;;  %v1483_v52 = vld [vmem:[#allocation3 + $0xbe8] sm:$0xff] }
 0x3f7   :  { %1870 = vmatprep.subr.bf16.mxu1 %v1411_v35  ;;  %1993 = vmatprep.subr.bf16.mxu0 %v1413_v53  ;;  %v1485_v35 = vld [vmem:[#allocation3 + $0xbf8] sm:$0xff]  ;;  %v1482_v53 = vld [vmem:[#allocation3 + $0xbe0] sm:$0xff] }
 0x3fa   :  { %1871 = vmatpush1.bf16.msra.mxu1 %v1410_v28  ;;  %1994 = vmatpush1.bf16.msra.mxu0 %v1412_v37  ;;  %v1484_v28 = vld [vmem:[#allocation3 + $0xbf0] sm:$0xff] }
 0x3fb   :  { %1872 = vmatprep.subr.bf16.mxu1 %v1419_v38  ;;  %1995 = vmatprep.subr.bf16.mxu0 %v1421_v39 }
 0x3fe   :  { %1873 = vmatpush1.bf16.msra.mxu1 %v1418_v6  ;;  %1996 = vmatpush1.bf16.msra.mxu0 %v1420_v42 }
 0x3ff   :  { %1874 = vmatprep.subr.bf16.mxu1 %v1427_v43  ;;  %1997 = vmatprep.subr.bf16.mxu0 %v1429_v10 }
 0x402   :  { %1875 = vmatpush1.bf16.msra.mxu1 %v1426_v44  ;;  %1998 = vmatpush1.bf16.msra.mxu0 %v1428_v15  ;;  %v1486_v15 = vld [vmem:[#allocation9] ss:$8 sm:$0xf] }
 0x403   :  { %1876 = vmatprep.subr.bf16.mxu1 %v1435_v58  ;;  %1999 = vmatprep.subr.bf16.mxu0 %v1437_v59  ;;  %v1487_v58 = vld [vmem:[#allocation9] ss:$8 sm:$0xf0] }
 0x404   :  { %v1488_v59 = vor.u32 %v1487_v58, %v1486_v15 }
 0x406   :  { %1877 = vmatpush1.bf16.msra.mxu1 %v1434_v60  ;;  %2000 = vmatpush1.bf16.msra.mxu0 %v1436_v3  ;;  %v1493_v60 = vrot.slane %v1488_v59, %v4841_v11  ;;  %v1497_v3 = vrot.slane %v1488_v59, %v4844_v46 }
 0x407   :  { %1878 = vmatprep.subr.bf16.mxu1 %v1443_v7  ;;  %2001 = vmatprep.subr.bf16.mxu0 %v1445_v8 }
 0x40a   :  { %1879 = vmatpush1.bf16.msra.mxu1 %v1442_v4  ;;  %2002 = vmatpush1.bf16.msra.mxu0 %v1444_v5 }
 0x40b   :  { %1880 = vmatprep.subr.bf16.mxu1 %v1451_v12  ;;  %2003 = vmatprep.subr.bf16.mxu0 %v1453_v56 }
 0x40e   :  { %1881 = vmatpush1.bf16.msra.mxu1 %v1450_v14  ;;  %2004 = vmatpush1.bf16.msra.mxu0 %v1452_v57  ;;  %v1505_v57 = vrot.slane %v1488_v59, %v4864_v27 }
 0x40f   :  { %1882 = vmatprep.subr.bf16.mxu1 %v1459_v13  ;;  %2005 = vmatprep.subr.bf16.mxu0 %v1461_v18 }
 0x412   :  { %1883 = vmatpush1.bf16.msra.mxu1 %v1458_v45  ;;  %2006 = vmatpush1.bf16.msra.mxu0 %v1460_v30  ;;  %v4975_v45 = vsub.s32 6, %v4646_v1 }
 0x413   :  { %1884 = vmatprep.subr.bf16.mxu1 %v1467_v23  ;;  %2007 = vmatprep.subr.bf16.mxu0 %v1469_v31 }
 0x416   :  { %1885 = vmatpush1.bf16.msra.mxu1 %v1466_v25  ;;  %2008 = vmatpush1.bf16.msra.mxu0 %v1468_v9 }
 0x417   :  { %1886 = vmatprep.subr.bf16.mxu1 %v1475_v24  ;;  %2009 = vmatprep.subr.bf16.mxu0 %v1477_v26  ;;  %v1509_v24 = vrot.slane %v1488_v59, %v4881_v47  ;;  %v1517_v26 = vrot.slane %v1488_v59, %v4975_v45 }
 0x41a   :  { %1887 = vmatpush1.bf16.msra.mxu1 %v1474_v49  ;;  %2010 = vmatpush1.bf16.msra.mxu0 %v1476_v33  ;;  %v4986_v49 = vsub.s32 7, %v4646_v1 }
 0x41b   :  { %1888 = vmatprep.subr.bf16.mxu1 %v1483_v52  ;;  %2011 = vmatprep.subr.bf16.mxu0 %v1485_v35  ;;  %v1513_v52 = vrot.slane %v1488_v59, %v4884_v20 }
 0x41e   :  { %1889 = vmatpush1.bf16.msra.mxu1 %v1482_v53  ;;  %2012 = vmatpush1.bf16.msra.mxu0 %v1484_v28 }
 0x421   :  { %1891 = vmatmul.mubr.bf16.vlgmr.msra.gmra.mrb[24].mxu1 %v4938_v19  ;;  %2014 = vmatmul.mubr.bf16.vlgmr.msra.gmra.mrb[20].mxu0 %v4938_v19  ;;  %v1501_v19 = vrot.slane %v1488_v59, %v4861_v48 }
 0x434   :  { %v1646_v37 = vpop.f32.mrb[20].mxu1  ;;  %v1769_v38 = vpop.f32.mrb[16].mxu0 }
 0x435   :  { %v1648_v39 = vpop.f32.mrb[21].mxu1  ;;  %v1771_v6 = vpop.f32.mrb[17].mxu0  ;;  %v4956_v7 = vadd.f32 %v1646_v37, %v1493_v60  ;;  %v4967_v56 = vadd.f32 %v1769_v38, %v1501_v19 }
 0x436   :  { %v1650_v42 = vpop.f32.mrb[22].mxu1  ;;  %v1773_v43 = vpop.f32.mrb[18].mxu0  ;;  %v4958_v8 = vadd.f32 %v1648_v39, %v1497_v3  ;;  %v4979_v31 = vadd.f32 %v1771_v6, %v1505_v57 }
 0x437   :  { %v1651_v10 = vpop.f32.mrb[23].mxu1  ;;  %v1774_v44 = vpop.f32.mrb[19].mxu0  ;;  %v2042_v4 = vmul.f32 %v4956_v7, %v4956_v7  ;;  %v2023_v12 = vsel %vm2022_vm5, %v4956_v7, 0.0  ;;  %v2044_v23 = vmul.f32 %v4967_v56, %v4967_v56  ;;  %v2026_v9 = vsel %vm2022_vm5, %v4967_v56, 0.0 }
 0x438   :  { %v2043_v5 = vmul.f32 %v4958_v8, %v4958_v8  ;;  %v2024_v14 = vsel %vm2022_vm5, %v4958_v8, 0.0  ;;  %v2045_v53 = vmul.f32 %v4979_v31, %v4979_v31  ;;  %v2028_v39 = vsel %vm2022_vm5, %v4979_v31, 0.0 }
 0x439   :  { %v2050_v13 = vsel %vm2022_vm5, %v2042_v4, 0.0  ;;  %v2025_v30 = vadd.f32 %v2024_v14, %v2023_v12  ;;  %v2053_v35 = vsel %vm2022_vm5, %v2044_v23, 0.0  ;;  %v1521_v43 = vrot.slane %v1488_v59, %v4986_v49 }
 0x43a   :  { %v2051_v18 = vsel %vm2022_vm5, %v2043_v5, 0.0  ;;  %v2055_v3 = vsel %vm2022_vm5, %v2045_v53, 0.0 }
 0x43b   :  { %v2052_v25 = vadd.f32 %v2051_v18, %v2050_v13  ;;  %v2027_v33 = vadd.f32 %v2026_v9, %v2025_v30 }
 0x43d   :  { %v2054_v28 = vadd.f32 %v2053_v35, %v2052_v25  ;;  %v2029_v44 = vadd.f32 %v2028_v39, %v2027_v33 }
 0x43f   :  { %v2056_v14 = vadd.f32 %v2055_v3, %v2054_v28 }
 0x4f4   :  { %v1892_v37 = vpop.f32.mrb[24].mxu1  ;;  %v2015_v38 = vpop.f32.mrb[20].mxu0 }
 0x4f5   :  { %v4994_v6 = vadd.f32 %v1892_v37, %v1509_v24  ;;  %v4996_v42 = vadd.f32 %v2015_v38, %v1517_v26  ;;  %v1894_v1 = vpop.f32.mrb[25].mxu1  ;;  %v2017_v10 = vpop.f32.mrb[21].mxu0 }
 0x4f6   :  { %v4999_v15 = vadd.f32 %v1894_v1, %v1513_v52  ;;  %v1896_v58 = vpop.f32.mrb[26].mxu1  ;;  %v2019_v60 = vpop.f32.mrb[22].mxu0  ;;  %v5013_v23 = vadd.f32 %v2017_v10, %v1521_v43 }
 0x4f7   :  { %v2030_v19 = vsel %vm2022_vm5, %v4994_v6, 0.0  ;;  %v2046_v4 = vmul.f32 %v4994_v6, %v4994_v6  ;;  %v1897_v5 = vpop.f32.mrb[27].mxu1  ;;  %v2020_v12 = vpop.f32.mrb[23].mxu0  ;;  %v2048_v30 = vmul.f32 %v4996_v42, %v4996_v42  ;;  %v2034_v26 = vsel %vm2022_vm5, %v4996_v42, 0.0 }
 0x4f8   :  { %v2047_v59 = vmul.f32 %v4999_v15, %v4999_v15  ;;  %v2031_v57 = vadd.f32 %v2030_v19, %v2029_v44  ;;  %v2032_v13 = vsel %vm2022_vm5, %v4999_v15, 0.0  ;;  %v2036_v35 = vsel %vm2022_vm5, %v5013_v23, 0.0  ;;  %v2089_v19 = vld [vmem:[#allocation9 + $0x1] ss:$8 sm:$0xf] }
 0x4f9   :  { %v2057_v18 = vsel %vm2022_vm5, %v2046_v4, 0.0  ;;  %v2049_v53 = vmul.f32 %v5013_v23, %v5013_v23  ;;  %v2061_v28 = vsel %vm2022_vm5, %v2048_v30, 0.0  ;;  %v2090_v4 = vld [vmem:[#allocation9 + $0x1] ss:$8 sm:$0xf0] }
 0x4fa   :  { %v2033_v25 = vadd.f32 %v2032_v13, %v2031_v57  ;;  %v2058_v9 = vadd.f32 %v2057_v18, %v2056_v14  ;;  %v2059_v24 = vsel %vm2022_vm5, %v2047_v59, 0.0  ;;  %v2142_v12 = vld [vmem:[#allocation9 + $0x2] ss:$8 sm:$0xf]  ;;  %v2091_v59 = vor.u32 %v2090_v4, %v2089_v19 }
 0x4fb   :  { %v2063_v39 = vsel %vm2022_vm5, %v2049_v53, 0.0  ;;  %v2143_v14 = vld [vmem:[#allocation9 + $0x2] ss:$8 sm:$0xf0] }
 0x4fc   :  { %v2035_v33 = vadd.f32 %v2034_v26, %v2033_v25  ;;  %v2060_v52 = vadd.f32 %v2059_v24, %v2058_v9  ;;  %v2144_v57 = vor.u32 %v2143_v14, %v2142_v12  ;;  %v2096_v13 = vrot.slane %v2091_v59, %v4841_v11 }
 0x4fd   :  { %v2100_v18 = vrot.slane %v2091_v59, %v4844_v46  ;;  %v2104_v30 = vrot.slane %v2091_v59, %v4861_v48  ;;  %v2108_v25 = vrot.slane %v2091_v59, %v4864_v27  ;;  %v2112_v9 = vrot.slane %v2091_v59, %v4881_v47 }
 0x4fe   :  { %v2037_v37 = vadd.f32 %v2036_v35, %v2035_v33  ;;  %v2062_v38 = vadd.f32 %v2061_v28, %v2060_v52  ;;  %v2116_v24 = vrot.slane %v2091_v59, %v4884_v20  ;;  %v2120_v26 = vrot.slane %v2091_v59, %v4975_v45 }
 0x4ff   :  { %v2149_v33 = vrot.slane %v2144_v57, %v4841_v11  ;;  %v2153_v52 = vrot.slane %v2144_v57, %v4844_v46  ;;  %v2157_v35 = vrot.slane %v2144_v57, %v4861_v48  ;;  %v2161_v53 = vrot.slane %v2144_v57, %v4864_v27 }
 0x500   :  { %2038 = vadd.xlane.f32.xlu0 %v2037_v37  ;;  %v2064_v1 = vadd.f32 %v2063_v39, %v2062_v38  ;;  %v2165_v28 = vrot.slane %v2144_v57, %v4881_v47  ;;  %v2169_v37 = vrot.slane %v2144_v57, %v4884_v20  ;;  %v2173_v38 = vrot.slane %v2144_v57, %v4975_v45 }
 0x501   :  { %v2124_v39 = vrot.slane %v2091_v59, %v4986_v49 }
 0x504   :  { %2065 = vadd.xlane.f32.xlu0 %v2064_v1  ;;  %v2177_v1 = vrot.slane %v2144_v57, %v4986_v49 }
 0x58d   :  { %v2039_v43 = vpop.xlane.xlu0 %2038 }
 0x58e   :  { %v2041_v10 = vmul.f32 0.0009765625, %v2039_v43 }
 0x590   :  { %v2076_v58 = vmul.f32 %v2041_v10, %v2041_v10  ;;  %v2068_v43 = vsub.f32 %v4956_v7, %v2041_v10  ;;  %v2072_v19 = vsub.f32 %v4994_v6, %v2041_v10  ;;  %v2073_v4 = vsub.f32 %v4999_v15, %v2041_v10 }
 0x591   :  { %v2066_v44 = vpop.xlane.xlu0 %2065  ;;  %v2075_v45 = vsub.f32 %v5013_v23, %v2041_v10 }
 0x592   :  { %v2067_v60 = vmul.f32 0.0009765625, %v2066_v44  ;;  %v2069_v44 = vsub.f32 %v4958_v8, %v2041_v10 }
 0x594   :  { %v2077_v3 = vsub.f32 %v2067_v60, %v2076_v58  ;;  %v2070_v58 = vsub.f32 %v4967_v56, %v2041_v10  ;;  %v2071_v60 = vsub.f32 %v4979_v31, %v2041_v10 }
 0x596   :  { %v2078_v5 = vadd.f32 1e-05, %v2077_v3 }
 0x598   :  { %4432 = vrsqrt.f32 %v2078_v5  ;;  %v2074_v5 = vsub.f32 %v4996_v42, %v2041_v10 }
 0x5a2   :  { %v4433_v3 = vpop.eup %4432 }
 0x5a3   :  { %v2080_v12 = vmul.f32 %v4433_v3, %v2068_v43  ;;  %v2081_v14 = vmul.f32 %v4433_v3, %v2069_v44  ;;  %v2082_v49 = vmul.f32 %v4433_v3, %v2070_v58  ;;  %v2083_v59 = vmul.f32 %v4433_v3, %v2071_v60 }
 0x5a4   :  { %v2084_v7 = vmul.f32 %v4433_v3, %v2072_v19  ;;  %v2085_v57 = vmul.f32 %v4433_v3, %v2073_v4  ;;  %v2086_v8 = vmul.f32 %v4433_v3, %v2074_v5  ;;  %v2087_v55 = vmul.f32 %v4433_v3, %v2075_v45 }
 0x5a5   :  { %v2133_v56 = vmul.f32 %v2096_v13, %v2080_v12  ;;  %v2134_v51 = vmul.f32 %v2100_v18, %v2081_v14  ;;  %v2135_v31 = vmul.f32 %v2104_v30, %v2082_v49  ;;  %v2136_v2 = vmul.f32 %v2108_v25, %v2083_v59 }
 0x5a6   :  { %v2137_v54 = vmul.f32 %v2112_v9, %v2084_v7  ;;  %v2138_v6 = vmul.f32 %v2116_v24, %v2085_v57  ;;  %v2139_v40 = vmul.f32 %v2120_v26, %v2086_v8  ;;  %v2140_v15 = vmul.f32 %v2124_v39, %v2087_v55 }
 0x5a7   :  { %v5048_v62 = vadd.f32 %v2149_v33, %v2133_v56  ;;  %v2187_v42 = vadd.f32 %v2153_v52, %v2134_v51  ;;  %v5050_v23 = vadd.f32 %v2157_v35, %v2135_v31  ;;  %v5052_v10 = vadd.f32 %v2161_v53, %v2136_v2 }
 0x5a8   :  { %v5054_v43 = vadd.f32 %v2165_v28, %v2137_v54  ;;  %v5056_v44 = vadd.f32 %v2169_v37, %v2138_v6  ;;  %v5058_v58 = vadd.f32 %v2173_v38, %v2139_v40  ;;  %v5060_v13 = vadd.f32 %v2177_v1, %v2140_v15 }
 0x5a9   :  { %v2194_v18 = vmax.f32 %v5048_v62, 0.0  ;;  %v2195_v30 = vmax.f32 %v2187_v42, 0.0  ;;  %v2196_v55 = vmax.f32 %v5050_v23, 0.0  ;;  %v2197_v25 = vmax.f32 %v5052_v10, 0.0 }
 0x5aa   :  { %v2198_v51 = vmax.f32 %v5054_v43, 0.0  ;;  %v2199_v2 = vmax.f32 %v5056_v44, 0.0  ;;  %v2200_v54 = vmax.f32 %v5058_v58, 0.0  ;;  %v2201_v9 = vmax.f32 %v5060_v13, 0.0 }
 0x5ab   :  { %4498 = dma.done.wait [#allocation6 + $0x2], 49152 }
 0x5ac   :  { %4499 = vsyncadd [#allocation6 + $0x2], 4294918144  ;;  %v5069_v40 = vpack.c.bf16 %v2195_v30, %v2195_v30  ;;  %v2215_v24 = vld [vmem:[#allocation4 + $0x8] sm:$0xff]  ;;  %v2214_v26 = vld [vmem:[#allocation4] sm:$0xff] }
 0x5ad   :  { %v2217_v33 = vld [vmem:[#allocation4 + $0x18] sm:$0xff]  ;;  %2633 = vmatprep.subr.bf16.mxu1 %v2215_v24  ;;  %v2216_v35 = vld [vmem:[#allocation4 + $0x10] sm:$0xff]  ;;  %v2223_v53 = vld [vmem:[#allocation4 + $0x48] sm:$0xff] }
 0x5ae   :  { %2665 = vmatprep.mubr.bf16.mxu1 %v5069_v40  ;;  %2829 = vmatprep.mubr.bf16.mxu0 %v5069_v40  ;;  %v2221_v52 = vld [vmem:[#allocation4 + $0x38] sm:$0xff]  ;;  %v2220_v28 = vld [vmem:[#allocation4 + $0x30] sm:$0xff]  ;;  %v2222_v37 = vld [vmem:[#allocation4 + $0x40] sm:$0xff] }
 0x5af   :  { %2797 = vmatprep.subr.bf16.mxu0 %v2217_v33  ;;  %2634 = vmatpush1.bf16.msra.mxu1 %v2214_v26  ;;  %v2227_v38 = vld [vmem:[#allocation4 + $0x68] sm:$0xff]  ;;  %v2229_v39 = vld [vmem:[#allocation4 + $0x78] sm:$0xff]  ;;  %v2226_v1 = vld [vmem:[#allocation4 + $0x60] sm:$0xff] }
 0x5b0   :  { %2798 = vmatpush1.bf16.msra.mxu0 %v2216_v35  ;;  %2635 = vmatprep.subr.bf16.mxu1 %v2221_v52  ;;  %v2228_v60 = vld [vmem:[#allocation4 + $0x70] sm:$0xff]  ;;  %v2233_v3 = vld [vmem:[#allocation4 + $0x98] sm:$0xff]  ;;  %v2235_v19 = vld [vmem:[#allocation4 + $0xa8] sm:$0xff] }
 0x5b1   :  { %2799 = vmatprep.subr.bf16.mxu0 %v2223_v53  ;;  %v2232_v4 = vld [vmem:[#allocation4 + $0x90] sm:$0xff]  ;;  %v2234_v5 = vld [vmem:[#allocation4 + $0xa0] sm:$0xff]  ;;  %v2239_v45 = vld [vmem:[#allocation4 + $0xc8] sm:$0xff] }
 0x5b2   :  { %v2241_v12 = vld [vmem:[#allocation4 + $0xd8] sm:$0xff]  ;;  %v2238_v14 = vld [vmem:[#allocation4 + $0xc0] sm:$0xff]  ;;  %v2240_v49 = vld [vmem:[#allocation4 + $0xd0] sm:$0xff] }
 0x5b3   :  { %2636 = vmatpush1.bf16.msra.mxu1 %v2220_v28  ;;  %v2245_v59 = vld [vmem:[#allocation4 + $0xf8] sm:$0xff]  ;;  %v2247_v7 = vld [vmem:[#allocation4 + $0x108] sm:$0xff]  ;;  %v2244_v57 = vld [vmem:[#allocation4 + $0xf0] sm:$0xff] }
 0x5b4   :  { %2800 = vmatpush1.bf16.msra.mxu0 %v2222_v37  ;;  %2637 = vmatprep.subr.bf16.mxu1 %v2227_v38  ;;  %v2246_v8 = vld [vmem:[#allocation4 + $0x100] sm:$0xff]  ;;  %v2251_v56 = vld [vmem:[#allocation4 + $0x128] sm:$0xff]  ;;  %v2253_v31 = vld [vmem:[#allocation4 + $0x138] sm:$0xff] }
 0x5b5   :  { %2801 = vmatprep.subr.bf16.mxu0 %v2229_v39  ;;  %v2250_v6 = vld [vmem:[#allocation4 + $0x120] sm:$0xff]  ;;  %v2252_v15 = vld [vmem:[#allocation4 + $0x130] sm:$0xff]  ;;  %v2257_v42 = vld [vmem:[#allocation4 + $0x158] sm:$0xff] }
 0x5b6   :  { %v2259_v30 = vld [vmem:[#allocation4 + $0x168] sm:$0xff]  ;;  %v2256_v24 = vld [vmem:[#allocation4 + $0x150] sm:$0xff]  ;;  %v2258_v26 = vld [vmem:[#allocation4 + $0x160] sm:$0xff] }
 0x5b7   :  { %2638 = vmatpush1.bf16.msra.mxu1 %v2226_v1  ;;  %v2263_v33 = vld [vmem:[#allocation4 + $0x188] sm:$0xff]  ;;  %v2265_v52 = vld [vmem:[#allocation4 + $0x198] sm:$0xff]  ;;  %v2262_v35 = vld [vmem:[#allocation4 + $0x180] sm:$0xff] }
 0x5b8   :  { %2802 = vmatpush1.bf16.msra.mxu0 %v2228_v60  ;;  %2639 = vmatprep.subr.bf16.mxu1 %v2233_v3  ;;  %v2264_v53 = vld [vmem:[#allocation4 + $0x190] sm:$0xff]  ;;  %v2269_v28 = vld [vmem:[#allocation4 + $0x1b8] sm:$0xff]  ;;  %v2271_v37 = vld [vmem:[#allocation4 + $0x1c8] sm:$0xff] }
 0x5b9   :  { %2803 = vmatprep.subr.bf16.mxu0 %v2235_v19  ;;  %v2268_v38 = vld [vmem:[#allocation4 + $0x1b0] sm:$0xff]  ;;  %v2270_v39 = vld [vmem:[#allocation4 + $0x1c0] sm:$0xff]  ;;  %v2275_v1 = vld [vmem:[#allocation4 + $0x1e8] sm:$0xff] }
 0x5ba   :  { %v2277_v60 = vld [vmem:[#allocation4 + $0x1f8] sm:$0xff]  ;;  %v2274_v3 = vld [vmem:[#allocation4 + $0x1e0] sm:$0xff]  ;;  %v2276_v19 = vld [vmem:[#allocation4 + $0x1f0] sm:$0xff] }
 0x5bb   :  { %2640 = vmatpush1.bf16.msra.mxu1 %v2232_v4  ;;  %v2281_v4 = vld [vmem:[#allocation4 + $0x218] sm:$0xff]  ;;  %v2316_v62 = vld [vmem:[#allocation4 + $0x330] sm:$0xff]  ;;  %v2322_v10 = vld [vmem:[#allocation4 + $0x360] sm:$0xff] }
 0x5bc   :  { %2804 = vmatpush1.bf16.msra.mxu0 %v2234_v5  ;;  %2641 = vmatprep.subr.bf16.mxu1 %v2239_v45  ;;  %v2283_v5 = vld [vmem:[#allocation4 + $0x228] sm:$0xff]  ;;  %v2280_v45 = vld [vmem:[#allocation4 + $0x210] sm:$0xff]  ;;  %v2418_v44 = vld [vmem:[#allocation4 + $0x660] sm:$0xff] }
 0x5bd   :  { %2805 = vmatprep.subr.bf16.mxu0 %v2241_v12  ;;  %v2282_v12 = vld [vmem:[#allocation4 + $0x220] sm:$0xff]  ;;  %v2412_v23 = vld [vmem:[#allocation4 + $0x630] sm:$0xff] }
 0x5be   :  { %v2508_v43 = vld [vmem:[#allocation4 + $0x930] sm:$0xff]  ;;  %v2514_v13 = vld [vmem:[#allocation4 + $0x960] sm:$0xff] }
 0x5bf   :  { %2642 = vmatpush1.bf16.msra.mxu1 %v2238_v14  ;;  %v2287_v14 = vld [vmem:[#allocation4 + $0x248] sm:$0xff]  ;;  %v2230_v58 = vld [vmem:[#allocation4 + $0x80] sm:$0xff] }
 0x5c0   :  { %2806 = vmatpush1.bf16.msra.mxu0 %v2240_v49  ;;  %2643 = vmatprep.subr.bf16.mxu1 %v2245_v59  ;;  %v2289_v49 = vld [vmem:[#allocation4 + $0x258] sm:$0xff]  ;;  %v2286_v59 = vld [vmem:[#allocation4 + $0x240] sm:$0xff] }
 0x5c1   :  { %2807 = vmatprep.subr.bf16.mxu0 %v2247_v7  ;;  %v2288_v7 = vld [vmem:[#allocation4 + $0x250] sm:$0xff] }
 0x5c3   :  { %2644 = vmatpush1.bf16.msra.mxu1 %v2244_v57  ;;  %v2293_v57 = vld [vmem:[#allocation4 + $0x278] sm:$0xff] }
 0x5c4   :  { %2808 = vmatpush1.bf16.msra.mxu0 %v2246_v8  ;;  %2645 = vmatprep.subr.bf16.mxu1 %v2251_v56  ;;  %v2295_v8 = vld [vmem:[#allocation4 + $0x288] sm:$0xff]  ;;  %v2292_v56 = vld [vmem:[#allocation4 + $0x270] sm:$0xff] }
 0x5c5   :  { %2809 = vmatprep.subr.bf16.mxu0 %v2253_v31  ;;  %v2294_v31 = vld [vmem:[#allocation4 + $0x280] sm:$0xff] }
 0x5c7   :  { %2646 = vmatpush1.bf16.msra.mxu1 %v2250_v6  ;;  %v2299_v6 = vld [vmem:[#allocation4 + $0x2a8] sm:$0xff] }
 0x5c8   :  { %2810 = vmatpush1.bf16.msra.mxu0 %v2252_v15  ;;  %2647 = vmatprep.subr.bf16.mxu1 %v2257_v42  ;;  %v2301_v15 = vld [vmem:[#allocation4 + $0x2b8] sm:$0xff]  ;;  %v2298_v42 = vld [vmem:[#allocation4 + $0x2a0] sm:$0xff] }
 0x5c9   :  { %2811 = vmatprep.subr.bf16.mxu0 %v2259_v30  ;;  %v2300_v30 = vld [vmem:[#allocation4 + $0x2b0] sm:$0xff] }
 0x5cb   :  { %2648 = vmatpush1.bf16.msra.mxu1 %v2256_v24  ;;  %v2305_v24 = vld [vmem:[#allocation4 + $0x2d8] sm:$0xff] }
 0x5cc   :  { %2812 = vmatpush1.bf16.msra.mxu0 %v2258_v26  ;;  %2649 = vmatprep.subr.bf16.mxu1 %v2263_v33  ;;  %v2307_v26 = vld [vmem:[#allocation4 + $0x2e8] sm:$0xff]  ;;  %v2304_v33 = vld [vmem:[#allocation4 + $0x2d0] sm:$0xff] }
 0x5cd   :  { %2813 = vmatprep.subr.bf16.mxu0 %v2265_v52  ;;  %v2306_v52 = vld [vmem:[#allocation4 + $0x2e0] sm:$0xff] }
 0x5cf   :  { %2650 = vmatpush1.bf16.msra.mxu1 %v2262_v35  ;;  %v2311_v35 = vld [vmem:[#allocation4 + $0x308] sm:$0xff] }
 0x5d0   :  { %2814 = vmatpush1.bf16.msra.mxu0 %v2264_v53  ;;  %2651 = vmatprep.subr.bf16.mxu1 %v2269_v28  ;;  %v2313_v53 = vld [vmem:[#allocation4 + $0x318] sm:$0xff]  ;;  %v5076_v28 = vpack.c.bf16 %v2194_v18, %v2194_v18  ;;  %v2318_v18 = vld [vmem:[#allocation4 + $0x340] sm:$0xff] }
 0x5d1   :  { %2815 = vmatprep.subr.bf16.mxu0 %v2271_v37  ;;  %v2310_v37 = vld [vmem:[#allocation4 + $0x300] sm:$0xff] }
 0x5d3   :  { %2652 = vmatpush1.bf16.msra.mxu1 %v2268_v38  ;;  %v2312_v38 = vld [vmem:[#allocation4 + $0x310] sm:$0xff] }
 0x5d4   :  { %2816 = vmatpush1.bf16.msra.mxu0 %v2270_v39  ;;  %2653 = vmatprep.subr.bf16.mxu1 %v2275_v1  ;;  %v2317_v39 = vld [vmem:[#allocation4 + $0x338] sm:$0xff]  ;;  %v2319_v1 = vld [vmem:[#allocation4 + $0x348] sm:$0xff] }
 0x5d5   :  { %2817 = vmatprep.subr.bf16.mxu0 %v2277_v60  ;;  %v5081_v60 = vpack.c.bf16 %v2197_v25, %v2197_v25  ;;  %v2324_v25 = vld [vmem:[#allocation4 + $0x370] sm:$0xff] }
 0x5d7   :  { %2654 = vmatpush1.bf16.msra.mxu1 %v2274_v3  ;;  %v2323_v3 = vld [vmem:[#allocation4 + $0x368] sm:$0xff] }
 0x5d8   :  { %2818 = vmatpush1.bf16.msra.mxu0 %v2276_v19  ;;  %2655 = vmatprep.subr.bf16.mxu1 %v2281_v4  ;;  %v2325_v19 = vld [vmem:[#allocation4 + $0x378] sm:$0xff] }
 0x5d9   :  { %2819 = vmatprep.subr.bf16.mxu0 %v2283_v5  ;;  %v2329_v4 = vld [vmem:[#allocation4 + $0x398] sm:$0xff]  ;;  %v2331_v5 = vld [vmem:[#allocation4 + $0x3a8] sm:$0xff] }
 0x5db   :  { %2656 = vmatpush1.bf16.msra.mxu1 %v2280_v45  ;;  %v2328_v45 = vld [vmem:[#allocation4 + $0x390] sm:$0xff] }
 0x5dc   :  { %2820 = vmatpush1.bf16.msra.mxu0 %v2282_v12  ;;  %2657 = vmatprep.subr.bf16.mxu1 %v2287_v14  ;;  %v2330_v12 = vld [vmem:[#allocation4 + $0x3a0] sm:$0xff]  ;;  %v2335_v14 = vld [vmem:[#allocation4 + $0x3c8] sm:$0xff] }
 0x5dd   :  { %2821 = vmatprep.subr.bf16.mxu0 %v2289_v49  ;;  %v2337_v49 = vld [vmem:[#allocation4 + $0x3d8] sm:$0xff] }
 0x5df   :  { %2658 = vmatpush1.bf16.msra.mxu1 %v2286_v59  ;;  %v2334_v59 = vld [vmem:[#allocation4 + $0x3c0] sm:$0xff] }
 0x5e0   :  { %2822 = vmatpush1.bf16.msra.mxu0 %v2288_v7  ;;  %2659 = vmatprep.subr.bf16.mxu1 %v2293_v57  ;;  %v2336_v7 = vld [vmem:[#allocation4 + $0x3d0] sm:$0xff]  ;;  %v2341_v57 = vld [vmem:[#allocation4 + $0x3f8] sm:$0xff] }
 0x5e1   :  { %2823 = vmatprep.subr.bf16.mxu0 %v2295_v8  ;;  %v2343_v8 = vld [vmem:[#allocation4 + $0x408] sm:$0xff] }
 0x5e3   :  { %2660 = vmatpush1.bf16.msra.mxu1 %v2292_v56  ;;  %v2340_v56 = vld [vmem:[#allocation4 + $0x3f0] sm:$0xff] }
 0x5e4   :  { %2824 = vmatpush1.bf16.msra.mxu0 %v2294_v31  ;;  %2661 = vmatprep.subr.bf16.mxu1 %v2299_v6  ;;  %v2342_v31 = vld [vmem:[#allocation4 + $0x400] sm:$0xff]  ;;  %v2347_v6 = vld [vmem:[#allocation4 + $0x428] sm:$0xff] }
 0x5e5   :  { %2825 = vmatprep.subr.bf16.mxu0 %v2301_v15  ;;  %v2349_v15 = vld [vmem:[#allocation4 + $0x438] sm:$0xff] }
 0x5e7   :  { %2662 = vmatpush1.bf16.msra.mxu1 %v2298_v42  ;;  %v2346_v42 = vld [vmem:[#allocation4 + $0x420] sm:$0xff] }
 0x5e8   :  { %2826 = vmatpush1.bf16.msra.mxu0 %v2300_v30  ;;  %2663 = vmatprep.subr.bf16.mxu1 %v2305_v24  ;;  %v2348_v30 = vld [vmem:[#allocation4 + $0x430] sm:$0xff]  ;;  %v2353_v24 = vld [vmem:[#allocation4 + $0x458] sm:$0xff] }
 0x5e9   :  { %2827 = vmatprep.subr.bf16.mxu0 %v2307_v26  ;;  %v2355_v26 = vld [vmem:[#allocation4 + $0x468] sm:$0xff] }
 0x5eb   :  { %2664 = vmatpush1.bf16.msra.mxu1 %v2304_v33  ;;  %v2352_v33 = vld [vmem:[#allocation4 + $0x450] sm:$0xff] }
 0x5ec   :  { %2828 = vmatpush1.bf16.msra.mxu0 %v2306_v52  ;;  %2674 = vmatprep.subr.bf16.mxu1 %v2311_v35  ;;  %v2354_v52 = vld [vmem:[#allocation4 + $0x460] sm:$0xff]  ;;  %v2359_v35 = vld [vmem:[#allocation4 + $0x488] sm:$0xff] }
 0x5ed   :  { %2838 = vmatprep.subr.bf16.mxu0 %v2313_v53  ;;  %v2361_v53 = vld [vmem:[#allocation4 + $0x498] sm:$0xff] }
 0x5ee   :  { %2666 = vmatmul.mubr.bf16.vlgmr.msra.gmra.mrb[28].mxu1 %v5076_v28 }
 0x5ef   :  { %2830 = vmatmul.mubr.bf16.vlgmr.msra.gmra.mrb[24].mxu0 %v5076_v28  ;;  %2675 = vmatpush1.bf16.msra.mxu1 %v2310_v37  ;;  %v2358_v37 = vld [vmem:[#allocation4 + $0x480] sm:$0xff] }
 0x5f0   :  { %2839 = vmatpush1.bf16.msra.mxu0 %v2312_v38  ;;  %2676 = vmatprep.subr.bf16.mxu1 %v2317_v39  ;;  %v2360_v38 = vld [vmem:[#allocation4 + $0x490] sm:$0xff]  ;;  %v2365_v39 = vld [vmem:[#allocation4 + $0x4b8] sm:$0xff] }
 0x5f1   :  { %2840 = vmatprep.subr.bf16.mxu0 %v2319_v1  ;;  %2706 = vmatprep.mubr.bf16.mxu1 %v5081_v60  ;;  %v2367_v1 = vld [vmem:[#allocation4 + $0x4c8] sm:$0xff] }
 0x5f2   :  { %2870 = vmatprep.mubr.bf16.mxu0 %v5081_v60 }
 0x5f3   :  { %2677 = vmatpush1.bf16.msra.mxu1 %v2316_v62  ;;  %v2364_v62 = vld [vmem:[#allocation4 + $0x4b0] sm:$0xff] }
 0x5f4   :  { %2841 = vmatpush1.bf16.msra.mxu0 %v2318_v18  ;;  %2678 = vmatprep.subr.bf16.mxu1 %v2323_v3  ;;  %v2366_v18 = vld [vmem:[#allocation4 + $0x4c0] sm:$0xff]  ;;  %v2371_v3 = vld [vmem:[#allocation4 + $0x4e8] sm:$0xff] }
 0x5f5   :  { %2842 = vmatprep.subr.bf16.mxu0 %v2325_v19  ;;  %v2373_v19 = vld [vmem:[#allocation4 + $0x4f8] sm:$0xff] }
 0x5f7   :  { %2679 = vmatpush1.bf16.msra.mxu1 %v2322_v10  ;;  %v2370_v10 = vld [vmem:[#allocation4 + $0x4e0] sm:$0xff] }
 0x5f8   :  { %2843 = vmatpush1.bf16.msra.mxu0 %v2324_v25  ;;  %2680 = vmatprep.subr.bf16.mxu1 %v2329_v4  ;;  %v2372_v25 = vld [vmem:[#allocation4 + $0x4f0] sm:$0xff]  ;;  %v2377_v4 = vld [vmem:[#allocation4 + $0x518] sm:$0xff] }
 0x5f9   :  { %2844 = vmatprep.subr.bf16.mxu0 %v2331_v5  ;;  %v2379_v5 = vld [vmem:[#allocation4 + $0x528] sm:$0xff] }
 0x5fb   :  { %2681 = vmatpush1.bf16.msra.mxu1 %v2328_v45  ;;  %v2376_v45 = vld [vmem:[#allocation4 + $0x510] sm:$0xff] }
 0x5fc   :  { %2845 = vmatpush1.bf16.msra.mxu0 %v2330_v12  ;;  %2682 = vmatprep.subr.bf16.mxu1 %v2335_v14  ;;  %v2378_v12 = vld [vmem:[#allocation4 + $0x520] sm:$0xff]  ;;  %v2383_v14 = vld [vmem:[#allocation4 + $0x548] sm:$0xff] }
 0x5fd   :  { %2846 = vmatprep.subr.bf16.mxu0 %v2337_v49  ;;  %v2385_v49 = vld [vmem:[#allocation4 + $0x558] sm:$0xff] }
 0x5ff   :  { %2683 = vmatpush1.bf16.msra.mxu1 %v2334_v59  ;;  %v2382_v59 = vld [vmem:[#allocation4 + $0x540] sm:$0xff] }
 0x600   :  { %2847 = vmatpush1.bf16.msra.mxu0 %v2336_v7  ;;  %2684 = vmatprep.subr.bf16.mxu1 %v2341_v57  ;;  %v2384_v7 = vld [vmem:[#allocation4 + $0x550] sm:$0xff]  ;;  %v2389_v57 = vld [vmem:[#allocation4 + $0x578] sm:$0xff] }
 0x601   :  { %2848 = vmatprep.subr.bf16.mxu0 %v2343_v8  ;;  %v2391_v8 = vld [vmem:[#allocation4 + $0x588] sm:$0xff] }
 0x603   :  { %2685 = vmatpush1.bf16.msra.mxu1 %v2340_v56  ;;  %v2388_v56 = vld [vmem:[#allocation4 + $0x570] sm:$0xff] }
 0x604   :  { %2849 = vmatpush1.bf16.msra.mxu0 %v2342_v31  ;;  %2686 = vmatprep.subr.bf16.mxu1 %v2347_v6  ;;  %v2390_v31 = vld [vmem:[#allocation4 + $0x580] sm:$0xff]  ;;  %v2395_v6 = vld [vmem:[#allocation4 + $0x5a8] sm:$0xff] }
 0x605   :  { %2850 = vmatprep.subr.bf16.mxu0 %v2349_v15  ;;  %v2397_v15 = vld [vmem:[#allocation4 + $0x5b8] sm:$0xff] }
 0x607   :  { %2687 = vmatpush1.bf16.msra.mxu1 %v2346_v42  ;;  %v2394_v42 = vld [vmem:[#allocation4 + $0x5a0] sm:$0xff] }
 0x608   :  { %2851 = vmatpush1.bf16.msra.mxu0 %v2348_v30  ;;  %2688 = vmatprep.subr.bf16.mxu1 %v2353_v24  ;;  %v2396_v30 = vld [vmem:[#allocation4 + $0x5b0] sm:$0xff]  ;;  %v2401_v24 = vld [vmem:[#allocation4 + $0x5d8] sm:$0xff] }
 0x609   :  { %2852 = vmatprep.subr.bf16.mxu0 %v2355_v26  ;;  %v2403_v26 = vld [vmem:[#allocation4 + $0x5e8] sm:$0xff] }
 0x60b   :  { %2689 = vmatpush1.bf16.msra.mxu1 %v2352_v33  ;;  %v2400_v33 = vld [vmem:[#allocation4 + $0x5d0] sm:$0xff] }
 0x60c   :  { %2853 = vmatpush1.bf16.msra.mxu0 %v2354_v52  ;;  %2690 = vmatprep.subr.bf16.mxu1 %v2359_v35  ;;  %v2402_v52 = vld [vmem:[#allocation4 + $0x5e0] sm:$0xff]  ;;  %v2407_v35 = vld [vmem:[#allocation4 + $0x608] sm:$0xff] }
 0x60d   :  { %2854 = vmatprep.subr.bf16.mxu0 %v2361_v53  ;;  %v2409_v53 = vld [vmem:[#allocation4 + $0x618] sm:$0xff] }
 0x60f   :  { %2691 = vmatpush1.bf16.msra.mxu1 %v2358_v37  ;;  %v5090_v37 = vpack.c.bf16 %v2196_v55, %v2196_v55  ;;  %v2414_v55 = vld [vmem:[#allocation4 + $0x640] sm:$0xff] }
 0x610   :  { %2855 = vmatpush1.bf16.msra.mxu0 %v2360_v38  ;;  %2692 = vmatprep.subr.bf16.mxu1 %v2365_v39  ;;  %v2406_v38 = vld [vmem:[#allocation4 + $0x600] sm:$0xff]  ;;  %v2408_v39 = vld [vmem:[#allocation4 + $0x610] sm:$0xff] }
 0x611   :  { %2856 = vmatprep.subr.bf16.mxu0 %v2367_v1  ;;  %v2413_v1 = vld [vmem:[#allocation4 + $0x638] sm:$0xff] }
 0x613   :  { %2693 = vmatpush1.bf16.msra.mxu1 %v2364_v62  ;;  %v2415_v62 = vld [vmem:[#allocation4 + $0x648] sm:$0xff] }
 0x614   :  { %2857 = vmatpush1.bf16.msra.mxu0 %v2366_v18  ;;  %2694 = vmatprep.subr.bf16.mxu1 %v2371_v3  ;;  %v5095_v18 = vpack.c.bf16 %v2199_v2, %v2199_v2  ;;  %v2419_v3 = vld [vmem:[#allocation4 + $0x668] sm:$0xff]  ;;  %v2420_v2 = vld [vmem:[#allocation4 + $0x670] sm:$0xff] }
 0x615   :  { %2858 = vmatprep.subr.bf16.mxu0 %v2373_v19  ;;  %v2421_v19 = vld [vmem:[#allocation4 + $0x678] sm:$0xff] }
 0x617   :  { %2695 = vmatpush1.bf16.msra.mxu1 %v2370_v10  ;;  %v2425_v10 = vld [vmem:[#allocation4 + $0x698] sm:$0xff] }
 0x618   :  { %2859 = vmatpush1.bf16.msra.mxu0 %v2372_v25  ;;  %2696 = vmatprep.subr.bf16.mxu1 %v2377_v4  ;;  %v2427_v25 = vld [vmem:[#allocation4 + $0x6a8] sm:$0xff]  ;;  %v2424_v4 = vld [vmem:[#allocation4 + $0x690] sm:$0xff] }
 0x619   :  { %2860 = vmatprep.subr.bf16.mxu0 %v2379_v5  ;;  %v2426_v5 = vld [vmem:[#allocation4 + $0x6a0] sm:$0xff] }
 0x61b   :  { %2697 = vmatpush1.bf16.msra.mxu1 %v2376_v45  ;;  %v2431_v45 = vld [vmem:[#allocation4 + $0x6c8] sm:$0xff] }
 0x61c   :  { %2861 = vmatpush1.bf16.msra.mxu0 %v2378_v12  ;;  %2698 = vmatprep.subr.bf16.mxu1 %v2383_v14  ;;  %v2433_v12 = vld [vmem:[#allocation4 + $0x6d8] sm:$0xff]  ;;  %v2430_v14 = vld [vmem:[#allocation4 + $0x6c0] sm:$0xff] }
 0x61d   :  { %2862 = vmatprep.subr.bf16.mxu0 %v2385_v49  ;;  %v2432_v49 = vld [vmem:[#allocation4 + $0x6d0] sm:$0xff] }
 0x61f   :  { %2699 = vmatpush1.bf16.msra.mxu1 %v2382_v59  ;;  %v2437_v59 = vld [vmem:[#allocation4 + $0x6f8] sm:$0xff] }
 0x620   :  { %2863 = vmatpush1.bf16.msra.mxu0 %v2384_v7  ;;  %2700 = vmatprep.subr.bf16.mxu1 %v2389_v57  ;;  %v2439_v7 = vld [vmem:[#allocation4 + $0x708] sm:$0xff]  ;;  %v2436_v57 = vld [vmem:[#allocation4 + $0x6f0] sm:$0xff] }
 0x621   :  { %2864 = vmatprep.subr.bf16.mxu0 %v2391_v8  ;;  %v2438_v8 = vld [vmem:[#allocation4 + $0x700] sm:$0xff] }
 0x623   :  { %2701 = vmatpush1.bf16.msra.mxu1 %v2388_v56  ;;  %v2443_v56 = vld [vmem:[#allocation4 + $0x728] sm:$0xff] }
 0x624   :  { %2865 = vmatpush1.bf16.msra.mxu0 %v2390_v31  ;;  %2702 = vmatprep.subr.bf16.mxu1 %v2395_v6  ;;  %v2445_v31 = vld [vmem:[#allocation4 + $0x738] sm:$0xff]  ;;  %v2442_v6 = vld [vmem:[#allocation4 + $0x720] sm:$0xff] }
 0x625   :  { %2866 = vmatprep.subr.bf16.mxu0 %v2397_v15  ;;  %v2444_v15 = vld [vmem:[#allocation4 + $0x730] sm:$0xff] }
 0x627   :  { %2703 = vmatpush1.bf16.msra.mxu1 %v2394_v42  ;;  %v2449_v42 = vld [vmem:[#allocation4 + $0x758] sm:$0xff] }
 0x628   :  { %2867 = vmatpush1.bf16.msra.mxu0 %v2396_v30  ;;  %2704 = vmatprep.subr.bf16.mxu1 %v2401_v24  ;;  %v2451_v30 = vld [vmem:[#allocation4 + $0x768] sm:$0xff]  ;;  %v2448_v24 = vld [vmem:[#allocation4 + $0x750] sm:$0xff] }
 0x629   :  { %2868 = vmatprep.subr.bf16.mxu0 %v2403_v26  ;;  %v2450_v26 = vld [vmem:[#allocation4 + $0x760] sm:$0xff] }
 0x62b   :  { %2705 = vmatpush1.bf16.msra.mxu1 %v2400_v33  ;;  %v2455_v33 = vld [vmem:[#allocation4 + $0x788] sm:$0xff] }
 0x62c   :  { %2869 = vmatpush1.bf16.msra.mxu0 %v2402_v52  ;;  %2715 = vmatprep.subr.bf16.mxu1 %v2407_v35  ;;  %v2457_v52 = vld [vmem:[#allocation4 + $0x798] sm:$0xff]  ;;  %v2454_v35 = vld [vmem:[#allocation4 + $0x780] sm:$0xff] }
 0x62d   :  { %2879 = vmatprep.subr.bf16.mxu0 %v2409_v53  ;;  %v2456_v53 = vld [vmem:[#allocation4 + $0x790] sm:$0xff] }
 0x62e   :  { %2707 = vmatmul.mubr.bf16.vlgmr.msra.gmra.mrb[28].mxu1 %v5090_v37 }
 0x62f   :  { %2871 = vmatmul.mubr.bf16.vlgmr.msra.gmra.mrb[24].mxu0 %v5090_v37  ;;  %2716 = vmatpush1.bf16.msra.mxu1 %v2406_v38  ;;  %v2461_v38 = vld [vmem:[#allocation4 + $0x7b8] sm:$0xff] }
 0x630   :  { %2880 = vmatpush1.bf16.msra.mxu0 %v2408_v39  ;;  %2717 = vmatprep.subr.bf16.mxu1 %v2413_v1  ;;  %v2463_v39 = vld [vmem:[#allocation4 + $0x7c8] sm:$0xff]  ;;  %v2460_v1 = vld [vmem:[#allocation4 + $0x7b0] sm:$0xff] }
 0x631   :  { %2881 = vmatprep.subr.bf16.mxu0 %v2415_v62  ;;  %2747 = vmatprep.mubr.bf16.mxu1 %v5095_v18  ;;  %v2462_v62 = vld [vmem:[#allocation4 + $0x7c0] sm:$0xff] }
 0x632   :  { %2911 = vmatprep.mubr.bf16.mxu0 %v5095_v18 }
 0x633   :  { %2718 = vmatpush1.bf16.msra.mxu1 %v2412_v23  ;;  %v2467_v23 = vld [vmem:[#allocation4 + $0x7e8] sm:$0xff] }
 0x634   :  { %2882 = vmatpush1.bf16.msra.mxu0 %v2414_v55  ;;  %2719 = vmatprep.subr.bf16.mxu1 %v2419_v3  ;;  %v2469_v55 = vld [vmem:[#allocation4 + $0x7f8] sm:$0xff]  ;;  %v2466_v3 = vld [vmem:[#allocation4 + $0x7e0] sm:$0xff] }
 0x635   :  { %2883 = vmatprep.subr.bf16.mxu0 %v2421_v19  ;;  %v2468_v19 = vld [vmem:[#allocation4 + $0x7f0] sm:$0xff] }
 0x637   :  { %2720 = vmatpush1.bf16.msra.mxu1 %v2418_v44  ;;  %v2473_v44 = vld [vmem:[#allocation4 + $0x818] sm:$0xff] }
 0x638   :  { %2884 = vmatpush1.bf16.msra.mxu0 %v2420_v2  ;;  %2721 = vmatprep.subr.bf16.mxu1 %v2425_v10  ;;  %v2475_v2 = vld [vmem:[#allocation4 + $0x828] sm:$0xff]  ;;  %v2472_v10 = vld [vmem:[#allocation4 + $0x810] sm:$0xff] }
 0x639   :  { %2885 = vmatprep.subr.bf16.mxu0 %v2427_v25  ;;  %v2474_v25 = vld [vmem:[#allocation4 + $0x820] sm:$0xff] }
 0x63b   :  { %2722 = vmatpush1.bf16.msra.mxu1 %v2424_v4  ;;  %v2479_v4 = vld [vmem:[#allocation4 + $0x848] sm:$0xff] }
 0x63c   :  { %2886 = vmatpush1.bf16.msra.mxu0 %v2426_v5  ;;  %2723 = vmatprep.subr.bf16.mxu1 %v2431_v45  ;;  %v2481_v5 = vld [vmem:[#allocation4 + $0x858] sm:$0xff]  ;;  %v2478_v45 = vld [vmem:[#allocation4 + $0x840] sm:$0xff] }
 0x63d   :  { %2887 = vmatprep.subr.bf16.mxu0 %v2433_v12  ;;  %v2480_v12 = vld [vmem:[#allocation4 + $0x850] sm:$0xff] }
 0x63f   :  { %2724 = vmatpush1.bf16.msra.mxu1 %v2430_v14  ;;  %v2485_v14 = vld [vmem:[#allocation4 + $0x878] sm:$0xff] }
 0x640   :  { %2888 = vmatpush1.bf16.msra.mxu0 %v2432_v49  ;;  %2725 = vmatprep.subr.bf16.mxu1 %v2437_v59  ;;  %v2487_v49 = vld [vmem:[#allocation4 + $0x888] sm:$0xff]  ;;  %v2484_v59 = vld [vmem:[#allocation4 + $0x870] sm:$0xff] }
 0x641   :  { %2889 = vmatprep.subr.bf16.mxu0 %v2439_v7  ;;  %v2486_v7 = vld [vmem:[#allocation4 + $0x880] sm:$0xff] }
 0x643   :  { %2726 = vmatpush1.bf16.msra.mxu1 %v2436_v57  ;;  %v2491_v57 = vld [vmem:[#allocation4 + $0x8a8] sm:$0xff] }
 0x644   :  { %2890 = vmatpush1.bf16.msra.mxu0 %v2438_v8  ;;  %2727 = vmatprep.subr.bf16.mxu1 %v2443_v56  ;;  %v2493_v8 = vld [vmem:[#allocation4 + $0x8b8] sm:$0xff]  ;;  %v2490_v56 = vld [vmem:[#allocation4 + $0x8a0] sm:$0xff] }
 0x645   :  { %2891 = vmatprep.subr.bf16.mxu0 %v2445_v31  ;;  %v2492_v31 = vld [vmem:[#allocation4 + $0x8b0] sm:$0xff] }
 0x647   :  { %2728 = vmatpush1.bf16.msra.mxu1 %v2442_v6  ;;  %v2497_v6 = vld [vmem:[#allocation4 + $0x8d8] sm:$0xff] }
 0x648   :  { %2892 = vmatpush1.bf16.msra.mxu0 %v2444_v15  ;;  %2729 = vmatprep.subr.bf16.mxu1 %v2449_v42  ;;  %v2499_v15 = vld [vmem:[#allocation4 + $0x8e8] sm:$0xff]  ;;  %v2496_v42 = vld [vmem:[#allocation4 + $0x8d0] sm:$0xff] }
 0x649   :  { %2893 = vmatprep.subr.bf16.mxu0 %v2451_v30  ;;  %v2498_v30 = vld [vmem:[#allocation4 + $0x8e0] sm:$0xff] }
 0x64b   :  { %2730 = vmatpush1.bf16.msra.mxu1 %v2448_v24  ;;  %v2503_v24 = vld [vmem:[#allocation4 + $0x908] sm:$0xff] }
 0x64c   :  { %2894 = vmatpush1.bf16.msra.mxu0 %v2450_v26  ;;  %2731 = vmatprep.subr.bf16.mxu1 %v2455_v33  ;;  %v2505_v26 = vld [vmem:[#allocation4 + $0x918] sm:$0xff]  ;;  %v5104_v33 = vpack.c.bf16 %v2198_v51, %v2198_v51  ;;  %v2510_v51 = vld [vmem:[#allocation4 + $0x940] sm:$0xff] }
 0x64d   :  { %2895 = vmatprep.subr.bf16.mxu0 %v2457_v52  ;;  %v2502_v52 = vld [vmem:[#allocation4 + $0x900] sm:$0xff] }
 0x64f   :  { %2732 = vmatpush1.bf16.msra.mxu1 %v2454_v35  ;;  %v2504_v35 = vld [vmem:[#allocation4 + $0x910] sm:$0xff] }
 0x650   :  { %2896 = vmatpush1.bf16.msra.mxu0 %v2456_v53  ;;  %2733 = vmatprep.subr.bf16.mxu1 %v2461_v38  ;;  %v2509_v53 = vld [vmem:[#allocation4 + $0x938] sm:$0xff]  ;;  %v2511_v38 = vld [vmem:[#allocation4 + $0x948] sm:$0xff] }
 0x651   :  { %2897 = vmatprep.subr.bf16.mxu0 %v2463_v39  ;;  %v5109_v39 = vpack.c.bf16 %v2201_v9, %v2201_v9  ;;  %v2516_v9 = vld [vmem:[#allocation4 + $0x970] sm:$0xff] }
 0x653   :  { %2734 = vmatpush1.bf16.msra.mxu1 %v2460_v1  ;;  %v2515_v1 = vld [vmem:[#allocation4 + $0x968] sm:$0xff] }
 0x654   :  { %2898 = vmatpush1.bf16.msra.mxu0 %v2462_v62  ;;  %2735 = vmatprep.subr.bf16.mxu1 %v2467_v23  ;;  %v2517_v62 = vld [vmem:[#allocation4 + $0x978] sm:$0xff] }
 0x655   :  { %2899 = vmatprep.subr.bf16.mxu0 %v2469_v55  ;;  %v2521_v23 = vld [vmem:[#allocation4 + $0x998] sm:$0xff]  ;;  %v2523_v55 = vld [vmem:[#allocation4 + $0x9a8] sm:$0xff] }
 0x657   :  { %2736 = vmatpush1.bf16.msra.mxu1 %v2466_v3  ;;  %v2520_v3 = vld [vmem:[#allocation4 + $0x990] sm:$0xff] }
 0x658   :  { %2900 = vmatpush1.bf16.msra.mxu0 %v2468_v19  ;;  %2737 = vmatprep.subr.bf16.mxu1 %v2473_v44  ;;  %v2522_v19 = vld [vmem:[#allocation4 + $0x9a0] sm:$0xff]  ;;  %v2527_v44 = vld [vmem:[#allocation4 + $0x9c8] sm:$0xff] }
 0x659   :  { %2901 = vmatprep.subr.bf16.mxu0 %v2475_v2  ;;  %v2529_v2 = vld [vmem:[#allocation4 + $0x9d8] sm:$0xff] }
 0x65b   :  { %2738 = vmatpush1.bf16.msra.mxu1 %v2472_v10  ;;  %v2526_v10 = vld [vmem:[#allocation4 + $0x9c0] sm:$0xff] }
 0x65c   :  { %2902 = vmatpush1.bf16.msra.mxu0 %v2474_v25  ;;  %2739 = vmatprep.subr.bf16.mxu1 %v2479_v4  ;;  %v2528_v25 = vld [vmem:[#allocation4 + $0x9d0] sm:$0xff]  ;;  %v2533_v4 = vld [vmem:[#allocation4 + $0x9f8] sm:$0xff] }
 0x65d   :  { %2903 = vmatprep.subr.bf16.mxu0 %v2481_v5  ;;  %v2535_v5 = vld [vmem:[#allocation4 + $0xa08] sm:$0xff] }
 0x65f   :  { %2740 = vmatpush1.bf16.msra.mxu1 %v2478_v45  ;;  %v2532_v45 = vld [vmem:[#allocation4 + $0x9f0] sm:$0xff] }
 0x660   :  { %2904 = vmatpush1.bf16.msra.mxu0 %v2480_v12  ;;  %2741 = vmatprep.subr.bf16.mxu1 %v2485_v14  ;;  %v2534_v12 = vld [vmem:[#allocation4 + $0xa00] sm:$0xff]  ;;  %v2539_v14 = vld [vmem:[#allocation4 + $0xa28] sm:$0xff] }
 0x661   :  { %2905 = vmatprep.subr.bf16.mxu0 %v2487_v49  ;;  %v2541_v49 = vld [vmem:[#allocation4 + $0xa38] sm:$0xff] }
 0x663   :  { %2742 = vmatpush1.bf16.msra.mxu1 %v2484_v59  ;;  %v2538_v59 = vld [vmem:[#allocation4 + $0xa20] sm:$0xff] }
 0x664   :  { %2906 = vmatpush1.bf16.msra.mxu0 %v2486_v7  ;;  %2743 = vmatprep.subr.bf16.mxu1 %v2491_v57  ;;  %v2540_v7 = vld [vmem:[#allocation4 + $0xa30] sm:$0xff]  ;;  %v2545_v57 = vld [vmem:[#allocation4 + $0xa58] sm:$0xff] }
 0x665   :  { %2907 = vmatprep.subr.bf16.mxu0 %v2493_v8  ;;  %v2547_v8 = vld [vmem:[#allocation4 + $0xa68] sm:$0xff] }
 0x667   :  { %2744 = vmatpush1.bf16.msra.mxu1 %v2490_v56  ;;  %v2544_v56 = vld [vmem:[#allocation4 + $0xa50] sm:$0xff] }
 0x668   :  { %2908 = vmatpush1.bf16.msra.mxu0 %v2492_v31  ;;  %2745 = vmatprep.subr.bf16.mxu1 %v2497_v6  ;;  %v2546_v31 = vld [vmem:[#allocation4 + $0xa60] sm:$0xff]  ;;  %v2551_v6 = vld [vmem:[#allocation4 + $0xa88] sm:$0xff] }
 0x669   :  { %2909 = vmatprep.subr.bf16.mxu0 %v2499_v15  ;;  %v2553_v15 = vld [vmem:[#allocation4 + $0xa98] sm:$0xff] }
 0x66b   :  { %2746 = vmatpush1.bf16.msra.mxu1 %v2496_v42  ;;  %v2550_v42 = vld [vmem:[#allocation4 + $0xa80] sm:$0xff] }
 0x66c   :  { %2910 = vmatpush1.bf16.msra.mxu0 %v2498_v30  ;;  %2756 = vmatprep.subr.bf16.mxu1 %v2503_v24  ;;  %v2552_v30 = vld [vmem:[#allocation4 + $0xa90] sm:$0xff]  ;;  %v2557_v24 = vld [vmem:[#allocation4 + $0xab8] sm:$0xff] }
 0x66d   :  { %2920 = vmatprep.subr.bf16.mxu0 %v2505_v26  ;;  %v2559_v26 = vld [vmem:[#allocation4 + $0xac8] sm:$0xff] }
 0x66e   :  { %2748 = vmatmul.mubr.bf16.vlgmr.msra.gmra.mrb[28].mxu1 %v5104_v33 }
 0x66f   :  { %2912 = vmatmul.mubr.bf16.vlgmr.msra.gmra.mrb[24].mxu0 %v5104_v33  ;;  %2757 = vmatpush1.bf16.msra.mxu1 %v2502_v52  ;;  %v2556_v52 = vld [vmem:[#allocation4 + $0xab0] sm:$0xff] }
 0x670   :  { %2921 = vmatpush1.bf16.msra.mxu0 %v2504_v35  ;;  %2758 = vmatprep.subr.bf16.mxu1 %v2509_v53  ;;  %v2558_v35 = vld [vmem:[#allocation4 + $0xac0] sm:$0xff]  ;;  %v2563_v53 = vld [vmem:[#allocation4 + $0xae8] sm:$0xff] }
 0x671   :  { %2922 = vmatprep.subr.bf16.mxu0 %v2511_v38  ;;  %2788 = vmatprep.mubr.bf16.mxu1 %v5109_v39  ;;  %v2565_v38 = vld [vmem:[#allocation4 + $0xaf8] sm:$0xff] }
 0x672   :  { %2952 = vmatprep.mubr.bf16.mxu0 %v5109_v39 }
 0x673   :  { %2759 = vmatpush1.bf16.msra.mxu1 %v2508_v43  ;;  %v2562_v43 = vld [vmem:[#allocation4 + $0xae0] sm:$0xff] }
 0x674   :  { %2923 = vmatpush1.bf16.msra.mxu0 %v2510_v51  ;;  %2760 = vmatprep.subr.bf16.mxu1 %v2515_v1  ;;  %v2564_v51 = vld [vmem:[#allocation4 + $0xaf0] sm:$0xff]  ;;  %v2569_v1 = vld [vmem:[#allocation4 + $0xb18] sm:$0xff] }
 0x675   :  { %2924 = vmatprep.subr.bf16.mxu0 %v2517_v62  ;;  %v2571_v62 = vld [vmem:[#allocation4 + $0xb28] sm:$0xff] }
 0x677   :  { %2761 = vmatpush1.bf16.msra.mxu1 %v2514_v13  ;;  %v2568_v13 = vld [vmem:[#allocation4 + $0xb10] sm:$0xff] }
 0x678   :  { %2925 = vmatpush1.bf16.msra.mxu0 %v2516_v9  ;;  %2762 = vmatprep.subr.bf16.mxu1 %v2521_v23  ;;  %v2570_v9 = vld [vmem:[#allocation4 + $0xb20] sm:$0xff]  ;;  %v2575_v23 = vld [vmem:[#allocation4 + $0xb48] sm:$0xff] }
 0x679   :  { %2926 = vmatprep.subr.bf16.mxu0 %v2523_v55  ;;  %v2577_v55 = vld [vmem:[#allocation4 + $0xb58] sm:$0xff] }
 0x67b   :  { %2763 = vmatpush1.bf16.msra.mxu1 %v2520_v3  ;;  %v2574_v3 = vld [vmem:[#allocation4 + $0xb40] sm:$0xff] }
 0x67c   :  { %2927 = vmatpush1.bf16.msra.mxu0 %v2522_v19  ;;  %2764 = vmatprep.subr.bf16.mxu1 %v2527_v44  ;;  %v2576_v19 = vld [vmem:[#allocation4 + $0xb50] sm:$0xff]  ;;  %v2581_v44 = vld [vmem:[#allocation4 + $0xb78] sm:$0xff] }
 0x67d   :  { %2928 = vmatprep.subr.bf16.mxu0 %v2529_v2  ;;  %v2583_v2 = vld [vmem:[#allocation4 + $0xb88] sm:$0xff] }
 0x67f   :  { %2765 = vmatpush1.bf16.msra.mxu1 %v2526_v10  ;;  %v2580_v10 = vld [vmem:[#allocation4 + $0xb70] sm:$0xff] }
 0x680   :  { %2929 = vmatpush1.bf16.msra.mxu0 %v2528_v25  ;;  %2766 = vmatprep.subr.bf16.mxu1 %v2533_v4  ;;  %v2582_v25 = vld [vmem:[#allocation4 + $0xb80] sm:$0xff]  ;;  %v2587_v4 = vld [vmem:[#allocation4 + $0xba8] sm:$0xff] }
 0x681   :  { %2930 = vmatprep.subr.bf16.mxu0 %v2535_v5  ;;  %v2589_v5 = vld [vmem:[#allocation4 + $0xbb8] sm:$0xff] }
 0x683   :  { %2767 = vmatpush1.bf16.msra.mxu1 %v2532_v45  ;;  %v2586_v45 = vld [vmem:[#allocation4 + $0xba0] sm:$0xff] }
 0x684   :  { %2931 = vmatpush1.bf16.msra.mxu0 %v2534_v12  ;;  %2768 = vmatprep.subr.bf16.mxu1 %v2539_v14  ;;  %v2588_v12 = vld [vmem:[#allocation4 + $0xbb0] sm:$0xff]  ;;  %v2593_v14 = vld [vmem:[#allocation4 + $0xbd8] sm:$0xff] }
 0x685   :  { %2932 = vmatprep.subr.bf16.mxu0 %v2541_v49  ;;  %v2595_v49 = vld [vmem:[#allocation4 + $0xbe8] sm:$0xff] }
 0x687   :  { %2769 = vmatpush1.bf16.msra.mxu1 %v2538_v59  ;;  %v2592_v59 = vld [vmem:[#allocation4 + $0xbd0] sm:$0xff] }
 0x688   :  { %2933 = vmatpush1.bf16.msra.mxu0 %v2540_v7  ;;  %2770 = vmatprep.subr.bf16.mxu1 %v2545_v57  ;;  %v2594_v7 = vld [vmem:[#allocation4 + $0xbe0] sm:$0xff]  ;;  %v2219_v57 = vld [vmem:[#allocation4 + $0x28] sm:$0xff] }
 0x689   :  { %2934 = vmatprep.subr.bf16.mxu0 %v2547_v8  ;;  %v5118_v8 = vpack.c.bf16 %v2200_v54, %v2200_v54  ;;  %v2237_v54 = vld [vmem:[#allocation4 + $0xb8] sm:$0xff] }
 0x68b   :  { %2771 = vmatpush1.bf16.msra.mxu1 %v2544_v56  ;;  %v2218_v56 = vld [vmem:[#allocation4 + $0x20] sm:$0xff] }
 0x68c   :  { %2935 = vmatpush1.bf16.msra.mxu0 %v2546_v31  ;;  %2772 = vmatprep.subr.bf16.mxu1 %v2551_v6  ;;  %v2225_v31 = vld [vmem:[#allocation4 + $0x58] sm:$0xff]  ;;  %v2224_v6 = vld [vmem:[#allocation4 + $0x50] sm:$0xff] }
 0x68d   :  { %2936 = vmatprep.subr.bf16.mxu0 %v2553_v15  ;;  %v2231_v15 = vld [vmem:[#allocation4 + $0x88] sm:$0xff] }
 0x68f   :  { %2773 = vmatpush1.bf16.msra.mxu1 %v2550_v42  ;;  %v2236_v42 = vld [vmem:[#allocation4 + $0xb0] sm:$0xff] }
 0x690   :  { %2937 = vmatpush1.bf16.msra.mxu0 %v2552_v30  ;;  %2774 = vmatprep.subr.bf16.mxu1 %v2557_v24  ;;  %v2243_v30 = vld [vmem:[#allocation4 + $0xe8] sm:$0xff]  ;;  %v2242_v24 = vld [vmem:[#allocation4 + $0xe0] sm:$0xff] }
 0x691   :  { %2938 = vmatprep.subr.bf16.mxu0 %v2559_v26  ;;  %v2249_v26 = vld [vmem:[#allocation4 + $0x118] sm:$0xff] }
 0x693   :  { %2775 = vmatpush1.bf16.msra.mxu1 %v2556_v52  ;;  %v2248_v52 = vld [vmem:[#allocation4 + $0x110] sm:$0xff] }
 0x694   :  { %2939 = vmatpush1.bf16.msra.mxu0 %v2558_v35  ;;  %2776 = vmatprep.subr.bf16.mxu1 %v2563_v53  ;;  %v2255_v35 = vld [vmem:[#allocation4 + $0x148] sm:$0xff]  ;;  %v2261_v53 = vld [vmem:[#allocation4 + $0x178] sm:$0xff] }
 0x695   :  { %2940 = vmatprep.subr.bf16.mxu0 %v2565_v38  ;;  %v2260_v38 = vld [vmem:[#allocation4 + $0x170] sm:$0xff] }
 0x697   :  { %2777 = vmatpush1.bf16.msra.mxu1 %v2562_v43  ;;  %v2267_v43 = vld [vmem:[#allocation4 + $0x1a8] sm:$0xff] }
 0x698   :  { %2941 = vmatpush1.bf16.msra.mxu0 %v2564_v51  ;;  %2778 = vmatprep.subr.bf16.mxu1 %v2569_v1  ;;  %v2266_v51 = vld [vmem:[#allocation4 + $0x1a0] sm:$0xff]  ;;  %v2273_v1 = vld [vmem:[#allocation4 + $0x1d8] sm:$0xff] }
 0x699   :  { %2942 = vmatprep.subr.bf16.mxu0 %v2571_v62  ;;  %v2272_v62 = vld [vmem:[#allocation4 + $0x1d0] sm:$0xff] }
 0x69b   :  { %2779 = vmatpush1.bf16.msra.mxu1 %v2568_v13  ;;  %v2279_v13 = vld [vmem:[#allocation4 + $0x208] sm:$0xff] }
 0x69c   :  { %2943 = vmatpush1.bf16.msra.mxu0 %v2570_v9  ;;  %2780 = vmatprep.subr.bf16.mxu1 %v2575_v23  ;;  %v2278_v9 = vld [vmem:[#allocation4 + $0x200] sm:$0xff]  ;;  %v2285_v23 = vld [vmem:[#allocation4 + $0x238] sm:$0xff] }
 0x69d   :  { %2944 = vmatprep.subr.bf16.mxu0 %v2577_v55  ;;  %v2284_v55 = vld [vmem:[#allocation4 + $0x230] sm:$0xff] }
 0x69f   :  { %2781 = vmatpush1.bf16.msra.mxu1 %v2574_v3  ;;  %v2291_v3 = vld [vmem:[#allocation4 + $0x268] sm:$0xff] }
 0x6a0   :  { %2945 = vmatpush1.bf16.msra.mxu0 %v2576_v19  ;;  %2782 = vmatprep.subr.bf16.mxu1 %v2581_v44  ;;  %v2290_v19 = vld [vmem:[#allocation4 + $0x260] sm:$0xff]  ;;  %v2297_v44 = vld [vmem:[#allocation4 + $0x298] sm:$0xff] }
 0x6a1   :  { %2946 = vmatprep.subr.bf16.mxu0 %v2583_v2  ;;  %v2296_v2 = vld [vmem:[#allocation4 + $0x290] sm:$0xff] }
 0x6a3   :  { %2783 = vmatpush1.bf16.msra.mxu1 %v2580_v10  ;;  %v2303_v10 = vld [vmem:[#allocation4 + $0x2c8] sm:$0xff] }
 0x6a4   :  { %2947 = vmatpush1.bf16.msra.mxu0 %v2582_v25  ;;  %2784 = vmatprep.subr.bf16.mxu1 %v2587_v4  ;;  %v2302_v25 = vld [vmem:[#allocation4 + $0x2c0] sm:$0xff]  ;;  %v2309_v4 = vld [vmem:[#allocation4 + $0x2f8] sm:$0xff] }
 0x6a5   :  { %2948 = vmatprep.subr.bf16.mxu0 %v2589_v5  ;;  %v2308_v5 = vld [vmem:[#allocation4 + $0x2f0] sm:$0xff] }
 0x6a7   :  { %2785 = vmatpush1.bf16.msra.mxu1 %v2586_v45  ;;  %v2315_v45 = vld [vmem:[#allocation4 + $0x328] sm:$0xff] }
 0x6a8   :  { %2949 = vmatpush1.bf16.msra.mxu0 %v2588_v12  ;;  %2786 = vmatprep.subr.bf16.mxu1 %v2593_v14  ;;  %v2314_v12 = vld [vmem:[#allocation4 + $0x320] sm:$0xff]  ;;  %v2321_v14 = vld [vmem:[#allocation4 + $0x358] sm:$0xff] }
 0x6a9   :  { %2950 = vmatprep.subr.bf16.mxu0 %v2595_v49  ;;  %v2320_v49 = vld [vmem:[#allocation4 + $0x350] sm:$0xff] }
 0x6ab   :  { %2787 = vmatpush1.bf16.msra.mxu1 %v2592_v59  ;;  %v2327_v59 = vld [vmem:[#allocation4 + $0x388] sm:$0xff] }
 0x6ac   :  { %2951 = vmatpush1.bf16.msra.mxu0 %v2594_v7  ;;  %2961 = vmatprep.subr.bf16.mxu1 %v2219_v57  ;;  %v2326_v7 = vld [vmem:[#allocation4 + $0x380] sm:$0xff]  ;;  %v2333_v57 = vld [vmem:[#allocation4 + $0x3b8] sm:$0xff] }
 0x6ae   :  { %2789 = vmatmul.mubr.bf16.vlgmr.msra.gmra.mrb[28].mxu1 %v5118_v8 }
 0x6af   :  { %2953 = vmatmul.mubr.bf16.vlgmr.msra.gmra.mrb[24].mxu0 %v5118_v8  ;;  %2962 = vmatpush1.bf16.msra.mxu1 %v2218_v56  ;;  %v2332_v56 = vld [vmem:[#allocation4 + $0x3b0] sm:$0xff] }
 0x6b0   :  { %2993 = vmatprep.mubr.bf16.mxu1 %v5069_v40  ;;  %2963 = vmatprep.subr.bf16.mxu1 %v2225_v31  ;;  %v2254_v40 = vld [vmem:[#allocation4 + $0x140] sm:$0xff]  ;;  %v2339_v31 = vld [vmem:[#allocation4 + $0x3e8] sm:$0xff] }
 0x6b3   :  { %2964 = vmatpush1.bf16.msra.mxu1 %v2224_v6  ;;  %v2338_v6 = vld [vmem:[#allocation4 + $0x3e0] sm:$0xff] }
 0x6b4   :  { %2965 = vmatprep.subr.bf16.mxu1 %v2231_v15  ;;  %v2345_v15 = vld [vmem:[#allocation4 + $0x418] sm:$0xff] }
 0x6b7   :  { %2966 = vmatpush1.bf16.msra.mxu1 %v2230_v58  ;;  %v2351_v58 = vld [vmem:[#allocation4 + $0x448] sm:$0xff] }
 0x6b8   :  { %2967 = vmatprep.subr.bf16.mxu1 %v2237_v54  ;;  %v2357_v54 = vld [vmem:[#allocation4 + $0x478] sm:$0xff] }
 0x6bb   :  { %2968 = vmatpush1.bf16.msra.mxu1 %v2236_v42  ;;  %v2356_v42 = vld [vmem:[#allocation4 + $0x470] sm:$0xff] }
 0x6bc   :  { %2969 = vmatprep.subr.bf16.mxu1 %v2243_v30  ;;  %v2363_v30 = vld [vmem:[#allocation4 + $0x4a8] sm:$0xff] }
 0x6bf   :  { %2970 = vmatpush1.bf16.msra.mxu1 %v2242_v24  ;;  %v2362_v24 = vld [vmem:[#allocation4 + $0x4a0] sm:$0xff] }
 0x6c0   :  { %2971 = vmatprep.subr.bf16.mxu1 %v2249_v26  ;;  %v2369_v26 = vld [vmem:[#allocation4 + $0x4d8] sm:$0xff] }
 0x6c3   :  { %2972 = vmatpush1.bf16.msra.mxu1 %v2248_v52  ;;  %v2368_v52 = vld [vmem:[#allocation4 + $0x4d0] sm:$0xff] }
 0x6c4   :  { %2973 = vmatprep.subr.bf16.mxu1 %v2255_v35  ;;  %v2375_v35 = vld [vmem:[#allocation4 + $0x508] sm:$0xff] }
 0x6c7   :  { %2974 = vmatpush1.bf16.msra.mxu1 %v2254_v40  ;;  %v2374_v40 = vld [vmem:[#allocation4 + $0x500] sm:$0xff] }
 0x6c8   :  { %2975 = vmatprep.subr.bf16.mxu1 %v2261_v53  ;;  %v2381_v53 = vld [vmem:[#allocation4 + $0x538] sm:$0xff] }
 0x6cb   :  { %2976 = vmatpush1.bf16.msra.mxu1 %v2260_v38  ;;  %v2380_v38 = vld [vmem:[#allocation4 + $0x530] sm:$0xff] }
 0x6cc   :  { %2977 = vmatprep.subr.bf16.mxu1 %v2267_v43  ;;  %v2387_v43 = vld [vmem:[#allocation4 + $0x568] sm:$0xff] }
 0x6cf   :  { %2978 = vmatpush1.bf16.msra.mxu1 %v2266_v51  ;;  %v2386_v51 = vld [vmem:[#allocation4 + $0x560] sm:$0xff] }
 0x6d0   :  { %2979 = vmatprep.subr.bf16.mxu1 %v2273_v1  ;;  %v2393_v1 = vld [vmem:[#allocation4 + $0x598] sm:$0xff] }
 0x6d3   :  { %2980 = vmatpush1.bf16.msra.mxu1 %v2272_v62  ;;  %v2392_v62 = vld [vmem:[#allocation4 + $0x590] sm:$0xff] }
 0x6d4   :  { %2981 = vmatprep.subr.bf16.mxu1 %v2279_v13  ;;  %v2399_v13 = vld [vmem:[#allocation4 + $0x5c8] sm:$0xff] }
 0x6d7   :  { %2982 = vmatpush1.bf16.msra.mxu1 %v2278_v9  ;;  %v2398_v9 = vld [vmem:[#allocation4 + $0x5c0] sm:$0xff] }
 0x6d8   :  { %2983 = vmatprep.subr.bf16.mxu1 %v2285_v23  ;;  %v2405_v23 = vld [vmem:[#allocation4 + $0x5f8] sm:$0xff] }
 0x6db   :  { %2984 = vmatpush1.bf16.msra.mxu1 %v2284_v55  ;;  %v2404_v55 = vld [vmem:[#allocation4 + $0x5f0] sm:$0xff] }
 0x6dc   :  { %2985 = vmatprep.subr.bf16.mxu1 %v2291_v3  ;;  %v2411_v3 = vld [vmem:[#allocation4 + $0x628] sm:$0xff] }
 0x6df   :  { %2986 = vmatpush1.bf16.msra.mxu1 %v2290_v19  ;;  %v2410_v19 = vld [vmem:[#allocation4 + $0x620] sm:$0xff] }
 0x6e0   :  { %2987 = vmatprep.subr.bf16.mxu1 %v2297_v44  ;;  %v2417_v44 = vld [vmem:[#allocation4 + $0x658] sm:$0xff] }
 0x6e3   :  { %2988 = vmatpush1.bf16.msra.mxu1 %v2296_v2  ;;  %v2416_v2 = vld [vmem:[#allocation4 + $0x650] sm:$0xff] }
 0x6e4   :  { %2989 = vmatprep.subr.bf16.mxu1 %v2303_v10  ;;  %v2423_v10 = vld [vmem:[#allocation4 + $0x688] sm:$0xff] }
 0x6e7   :  { %2990 = vmatpush1.bf16.msra.mxu1 %v2302_v25  ;;  %v2422_v25 = vld [vmem:[#allocation4 + $0x680] sm:$0xff] }
 0x6e8   :  { %2991 = vmatprep.subr.bf16.mxu1 %v2309_v4  ;;  %v2429_v4 = vld [vmem:[#allocation4 + $0x6b8] sm:$0xff] }
 0x6eb   :  { %2992 = vmatpush1.bf16.msra.mxu1 %v2308_v5  ;;  %v2428_v5 = vld [vmem:[#allocation4 + $0x6b0] sm:$0xff] }
 0x6ec   :  { %3002 = vmatprep.subr.bf16.mxu1 %v2315_v45  ;;  %v2435_v45 = vld [vmem:[#allocation4 + $0x6e8] sm:$0xff] }
 0x6ee   :  { %2994 = vmatmul.mubr.bf16.vlgmr.msra.gmra.mrb[32].mxu1 %v5076_v28  ;;  %v2344_v28 = vld [vmem:[#allocation4 + $0x410] sm:$0xff] }
 0x6ef   :  { %3003 = vmatpush1.bf16.msra.mxu1 %v2314_v12  ;;  %3034 = vmatprep.mubr.bf16.mxu1 %v5081_v60  ;;  %v2350_v60 = vld [vmem:[#allocation4 + $0x440] sm:$0xff] }
 0x6f0   :  { %3004 = vmatprep.subr.bf16.mxu1 %v2321_v14  ;;  %v2434_v12 = vld [vmem:[#allocation4 + $0x6e0] sm:$0xff]  ;;  %v2441_v14 = vld [vmem:[#allocation4 + $0x718] sm:$0xff] }
 0x6f3   :  { %3005 = vmatpush1.bf16.msra.mxu1 %v2320_v49  ;;  %v2447_v49 = vld [vmem:[#allocation4 + $0x748] sm:$0xff] }
 0x6f4   :  { %3006 = vmatprep.subr.bf16.mxu1 %v2327_v59  ;;  %v2453_v59 = vld [vmem:[#allocation4 + $0x778] sm:$0xff] }
 0x6f7   :  { %3007 = vmatpush1.bf16.msra.mxu1 %v2326_v7  ;;  %v2452_v7 = vld [vmem:[#allocation4 + $0x770] sm:$0xff] }
 0x6f8   :  { %3008 = vmatprep.subr.bf16.mxu1 %v2333_v57  ;;  %v2459_v57 = vld [vmem:[#allocation4 + $0x7a8] sm:$0xff] }
 0x6fb   :  { %3009 = vmatpush1.bf16.msra.mxu1 %v2332_v56  ;;  %v2458_v56 = vld [vmem:[#allocation4 + $0x7a0] sm:$0xff] }
 0x6fc   :  { %3010 = vmatprep.subr.bf16.mxu1 %v2339_v31  ;;  %v2465_v31 = vld [vmem:[#allocation4 + $0x7d8] sm:$0xff] }
 0x6ff   :  { %3011 = vmatpush1.bf16.msra.mxu1 %v2338_v6  ;;  %v2464_v6 = vld [vmem:[#allocation4 + $0x7d0] sm:$0xff] }
 0x700   :  { %3012 = vmatprep.subr.bf16.mxu1 %v2345_v15  ;;  %v2471_v15 = vld [vmem:[#allocation4 + $0x808] sm:$0xff] }
 0x703   :  { %3013 = vmatpush1.bf16.msra.mxu1 %v2344_v28  ;;  %v2470_v28 = vld [vmem:[#allocation4 + $0x800] sm:$0xff] }
 0x704   :  { %3014 = vmatprep.subr.bf16.mxu1 %v2351_v58  ;;  %v2477_v58 = vld [vmem:[#allocation4 + $0x838] sm:$0xff] }
 0x707   :  { %3015 = vmatpush1.bf16.msra.mxu1 %v2350_v60  ;;  %v2476_v60 = vld [vmem:[#allocation4 + $0x830] sm:$0xff] }
 0x708   :  { %3016 = vmatprep.subr.bf16.mxu1 %v2357_v54  ;;  %v2483_v54 = vld [vmem:[#allocation4 + $0x868] sm:$0xff] }
 0x70b   :  { %3017 = vmatpush1.bf16.msra.mxu1 %v2356_v42  ;;  %v2482_v42 = vld [vmem:[#allocation4 + $0x860] sm:$0xff] }
 0x70c   :  { %3018 = vmatprep.subr.bf16.mxu1 %v2363_v30  ;;  %v2489_v30 = vld [vmem:[#allocation4 + $0x898] sm:$0xff] }
 0x70f   :  { %3019 = vmatpush1.bf16.msra.mxu1 %v2362_v24  ;;  %v2488_v24 = vld [vmem:[#allocation4 + $0x890] sm:$0xff] }
 0x710   :  { %3020 = vmatprep.subr.bf16.mxu1 %v2369_v26  ;;  %v2495_v26 = vld [vmem:[#allocation4 + $0x8c8] sm:$0xff] }
 0x713   :  { %3021 = vmatpush1.bf16.msra.mxu1 %v2368_v52  ;;  %v2494_v52 = vld [vmem:[#allocation4 + $0x8c0] sm:$0xff] }
 0x714   :  { %3022 = vmatprep.subr.bf16.mxu1 %v2375_v35  ;;  %v2501_v35 = vld [vmem:[#allocation4 + $0x8f8] sm:$0xff] }
 0x717   :  { %3023 = vmatpush1.bf16.msra.mxu1 %v2374_v40  ;;  %v2500_v40 = vld [vmem:[#allocation4 + $0x8f0] sm:$0xff] }
 0x718   :  { %3024 = vmatprep.subr.bf16.mxu1 %v2381_v53  ;;  %v2507_v53 = vld [vmem:[#allocation4 + $0x928] sm:$0xff] }
 0x71b   :  { %3025 = vmatpush1.bf16.msra.mxu1 %v2380_v38  ;;  %v2506_v38 = vld [vmem:[#allocation4 + $0x920] sm:$0xff] }
 0x71c   :  { %3026 = vmatprep.subr.bf16.mxu1 %v2387_v43  ;;  %v2513_v43 = vld [vmem:[#allocation4 + $0x958] sm:$0xff] }
 0x71f   :  { %3027 = vmatpush1.bf16.msra.mxu1 %v2386_v51  ;;  %v2512_v51 = vld [vmem:[#allocation4 + $0x950] sm:$0xff] }
 0x720   :  { %3028 = vmatprep.subr.bf16.mxu1 %v2393_v1  ;;  %v2519_v1 = vld [vmem:[#allocation4 + $0x988] sm:$0xff] }
 0x723   :  { %3029 = vmatpush1.bf16.msra.mxu1 %v2392_v62  ;;  %v2518_v62 = vld [vmem:[#allocation4 + $0x980] sm:$0xff] }
 0x724   :  { %3030 = vmatprep.subr.bf16.mxu1 %v2399_v13  ;;  %v2525_v13 = vld [vmem:[#allocation4 + $0x9b8] sm:$0xff] }
 0x727   :  { %3031 = vmatpush1.bf16.msra.mxu1 %v2398_v9  ;;  %v2524_v9 = vld [vmem:[#allocation4 + $0x9b0] sm:$0xff] }
 0x728   :  { %3032 = vmatprep.subr.bf16.mxu1 %v2405_v23  ;;  %v2531_v23 = vld [vmem:[#allocation4 + $0x9e8] sm:$0xff] }
 0x72b   :  { %3033 = vmatpush1.bf16.msra.mxu1 %v2404_v55  ;;  %v2530_v55 = vld [vmem:[#allocation4 + $0x9e0] sm:$0xff] }
 0x72c   :  { %3043 = vmatprep.subr.bf16.mxu1 %v2411_v3  ;;  %v2537_v3 = vld [vmem:[#allocation4 + $0xa18] sm:$0xff] }
 0x72e   :  { %3035 = vmatmul.mubr.bf16.vlgmr.msra.gmra.mrb[32].mxu1 %v5090_v37  ;;  %v2440_v37 = vld [vmem:[#allocation4 + $0x710] sm:$0xff] }
 0x72f   :  { %3044 = vmatpush1.bf16.msra.mxu1 %v2410_v19  ;;  %3075 = vmatprep.mubr.bf16.mxu1 %v5095_v18  ;;  %v2446_v18 = vld [vmem:[#allocation4 + $0x740] sm:$0xff] }
 0x730   :  { %3045 = vmatprep.subr.bf16.mxu1 %v2417_v44  ;;  %v2543_v44 = vld [vmem:[#allocation4 + $0xa48] sm:$0xff] }
 0x733   :  { %3046 = vmatpush1.bf16.msra.mxu1 %v2416_v2 }
 0x734   :  { %3047 = vmatprep.subr.bf16.mxu1 %v2423_v10 }
 0x737   :  { %3048 = vmatpush1.bf16.msra.mxu1 %v2422_v25 }
 0x738   :  { %3049 = vmatprep.subr.bf16.mxu1 %v2429_v4 }
 0x73b   :  { %3050 = vmatpush1.bf16.msra.mxu1 %v2428_v5 }
 0x73c   :  { %3051 = vmatprep.subr.bf16.mxu1 %v2435_v45  ;;  %v2542_v45 = vld [vmem:[#allocation4 + $0xa40] sm:$0xff] }
 0x73f   :  { %3052 = vmatpush1.bf16.msra.mxu1 %v2434_v12 }
 0x740   :  { %3053 = vmatprep.subr.bf16.mxu1 %v2441_v14  ;;  %v2549_v14 = vld [vmem:[#allocation4 + $0xa78] sm:$0xff] }
 0x743   :  { %3054 = vmatpush1.bf16.msra.mxu1 %v2440_v37  ;;  %v2548_v37 = vld [vmem:[#allocation4 + $0xa70] sm:$0xff] }
 0x744   :  { %3055 = vmatprep.subr.bf16.mxu1 %v2447_v49  ;;  %v2555_v49 = vld [vmem:[#allocation4 + $0xaa8] sm:$0xff] }
 0x747   :  { %3056 = vmatpush1.bf16.msra.mxu1 %v2446_v18  ;;  %v2554_v18 = vld [vmem:[#allocation4 + $0xaa0] sm:$0xff] }
 0x748   :  { %3057 = vmatprep.subr.bf16.mxu1 %v2453_v59  ;;  %v2561_v59 = vld [vmem:[#allocation4 + $0xad8] sm:$0xff] }
 0x74b   :  { %3058 = vmatpush1.bf16.msra.mxu1 %v2452_v7  ;;  %v2560_v7 = vld [vmem:[#allocation4 + $0xad0] sm:$0xff] }
 0x74c   :  { %3059 = vmatprep.subr.bf16.mxu1 %v2459_v57  ;;  %v2567_v57 = vld [vmem:[#allocation4 + $0xb08] sm:$0xff] }
 0x74f   :  { %3060 = vmatpush1.bf16.msra.mxu1 %v2458_v56  ;;  %v2566_v56 = vld [vmem:[#allocation4 + $0xb00] sm:$0xff] }
 0x750   :  { %3061 = vmatprep.subr.bf16.mxu1 %v2465_v31  ;;  %v2573_v31 = vld [vmem:[#allocation4 + $0xb38] sm:$0xff] }
 0x753   :  { %3062 = vmatpush1.bf16.msra.mxu1 %v2464_v6  ;;  %v2572_v6 = vld [vmem:[#allocation4 + $0xb30] sm:$0xff] }
 0x754   :  { %3063 = vmatprep.subr.bf16.mxu1 %v2471_v15  ;;  %v2579_v15 = vld [vmem:[#allocation4 + $0xb68] sm:$0xff] }
 0x757   :  { %3064 = vmatpush1.bf16.msra.mxu1 %v2470_v28  ;;  %v2578_v28 = vld [vmem:[#allocation4 + $0xb60] sm:$0xff] }
 0x758   :  { %3065 = vmatprep.subr.bf16.mxu1 %v2477_v58  ;;  %v2585_v58 = vld [vmem:[#allocation4 + $0xb98] sm:$0xff] }
 0x75b   :  { %3066 = vmatpush1.bf16.msra.mxu1 %v2476_v60  ;;  %v2584_v60 = vld [vmem:[#allocation4 + $0xb90] sm:$0xff] }
 0x75c   :  { %3067 = vmatprep.subr.bf16.mxu1 %v2483_v54  ;;  %v2591_v54 = vld [vmem:[#allocation4 + $0xbc8] sm:$0xff] }
 0x75f   :  { %3068 = vmatpush1.bf16.msra.mxu1 %v2482_v42  ;;  %v2590_v42 = vld [vmem:[#allocation4 + $0xbc0] sm:$0xff] }
 0x760   :  { %3069 = vmatprep.subr.bf16.mxu1 %v2489_v30  ;;  %v2597_v30 = vld [vmem:[#allocation4 + $0xbf8] sm:$0xff] }
 0x763   :  { %3070 = vmatpush1.bf16.msra.mxu1 %v2488_v24  ;;  %v2596_v24 = vld [vmem:[#allocation4 + $0xbf0] sm:$0xff] }
 0x764   :  { %3071 = vmatprep.subr.bf16.mxu1 %v2495_v26  ;;  %v2599_v26 = vld [vmem:[#allocation9 + $0x3] ss:$8 sm:$0xf] }
 0x767   :  { %3072 = vmatpush1.bf16.msra.mxu1 %v2494_v52  ;;  %v2600_v52 = vld [vmem:[#allocation9 + $0x3] ss:$8 sm:$0x30] }
 0x768   :  { %3073 = vmatprep.subr.bf16.mxu1 %v2501_v35  ;;  %v2601_v35 = vor.u32 %v2600_v52, %v2599_v26 }
 0x76b   :  { %3074 = vmatpush1.bf16.msra.mxu1 %v2500_v40  ;;  %v2606_v40 = vrot.slane %v2601_v35, %v4841_v11 }
 0x76c   :  { %3084 = vmatprep.subr.bf16.mxu1 %v2507_v53  ;;  %v2610_v53 = vrot.slane %v2601_v35, %v4844_v46 }
 0x76e   :  { %3076 = vmatmul.mubr.bf16.vlgmr.msra.gmra.mrb[32].mxu1 %v5104_v33  ;;  %v2536_v33 = vld [vmem:[#allocation4 + $0xa10] sm:$0xff] }
 0x76f   :  { %3085 = vmatpush1.bf16.msra.mxu1 %v2506_v38  ;;  %3116 = vmatprep.mubr.bf16.mxu1 %v5109_v39 }
 0x770   :  { %3086 = vmatprep.subr.bf16.mxu1 %v2513_v43 }
 0x773   :  { %3087 = vmatpush1.bf16.msra.mxu1 %v2512_v51  ;;  %v2614_v51 = vrot.slane %v2601_v35, %v4861_v48 }
 0x774   :  { %3088 = vmatprep.subr.bf16.mxu1 %v2519_v1 }
 0x777   :  { %3089 = vmatpush1.bf16.msra.mxu1 %v2518_v62  ;;  %v2618_v62 = vrot.slane %v2601_v35, %v4864_v27 }
 0x778   :  { %3090 = vmatprep.subr.bf16.mxu1 %v2525_v13 }
 0x77b   :  { %3091 = vmatpush1.bf16.msra.mxu1 %v2524_v9  ;;  %v3135_v9 = vrot.slane %v4720_v0, %v4841_v11 }
 0x77c   :  { %3092 = vmatprep.subr.bf16.mxu1 %v2531_v23  ;;  %v3139_v23 = vrot.slane %v4720_v0, %v4844_v46 }
 0x77f   :  { %3093 = vmatpush1.bf16.msra.mxu1 %v2530_v55 }
 0x780   :  { %3094 = vmatprep.subr.bf16.mxu1 %v2537_v3  ;;  %v2622_v3 = vrot.slane %v2601_v35, %v4881_v47 }
 0x781   :  { %v2790_v19 = vpop.f32.mrb[28].mxu1 }
 0x782   :  { %v2954_v39 = vpop.f32.mrb[24].mxu0  ;;  %v2792_v2 = vpop.f32.mrb[29].mxu1  ;;  %v4291_v38 = vadd.f32 %v2790_v19, %v2606_v40  ;;  %v3143_v19 = vrot.slane %v4720_v0, %v4861_v48 }
 0x783   :  { %v2956_v10 = vpop.f32.mrb[25].mxu0  ;;  %v2794_v25 = vpop.f32.mrb[30].mxu1  ;;  %3095 = vmatpush1.bf16.msra.mxu1 %v2536_v33  ;;  %v4292_v43 = vadd.f32 %v2792_v2, %v2610_v53  ;;  %v4293_v1 = vadd.f32 %v2954_v39, %v2614_v51  ;;  %v2626_v33 = vrot.slane %v2601_v35, %v4884_v20 }
 0x784   :  { %v2958_v4 = vpop.f32.mrb[26].mxu0  ;;  %v2795_v5 = vpop.f32.mrb[31].mxu1  ;;  %3096 = vmatprep.subr.bf16.mxu1 %v2543_v44  ;;  %4434 = vtanh.f32 %v4291_v38  ;;  %v4294_v13 = vadd.f32 %v2956_v10, %v2618_v62 }
 0x785   :  { %v2959_v12 = vpop.f32.mrb[27].mxu0  ;;  %4436 = vtanh.f32 %v4292_v43  ;;  %v3147_v5 = vrot.slane %v4720_v0, %v4864_v27 }
 0x786   :  { %4438 = vtanh.f32 %v4293_v1 }
 0x787   :  { %3097 = vmatpush1.bf16.msra.mxu1 %v2542_v45  ;;  %4440 = vtanh.f32 %v4294_v13 }
 0x788   :  { %3098 = vmatprep.subr.bf16.mxu1 %v2549_v14 }
 0x78b   :  { %3099 = vmatpush1.bf16.msra.mxu1 %v2548_v37 }
 0x78c   :  { %3100 = vmatprep.subr.bf16.mxu1 %v2555_v49 }
 0x78f   :  { %3101 = vmatpush1.bf16.msra.mxu1 %v2554_v18 }
 0x790   :  { %3102 = vmatprep.subr.bf16.mxu1 %v2561_v59 }
 0x793   :  { %3103 = vmatpush1.bf16.msra.mxu1 %v2560_v7 }
 0x794   :  { %3104 = vmatprep.subr.bf16.mxu1 %v2567_v57 }
 0x797   :  { %3105 = vmatpush1.bf16.msra.mxu1 %v2566_v56 }
 0x798   :  { %3106 = vmatprep.subr.bf16.mxu1 %v2573_v31 }
 0x79b   :  { %3107 = vmatpush1.bf16.msra.mxu1 %v2572_v6  ;;  %v3151_v6 = vrot.slane %v4720_v0, %v4881_v47 }
 0x79c   :  { %3108 = vmatprep.subr.bf16.mxu1 %v2579_v15 }
 0x79f   :  { %3109 = vmatpush1.bf16.msra.mxu1 %v2578_v28  ;;  %v3155_v28 = vrot.slane %v4720_v0, %v4884_v20 }
 0x7a0   :  { %3110 = vmatprep.subr.bf16.mxu1 %v2585_v58 }
 0x7a3   :  { %3111 = vmatpush1.bf16.msra.mxu1 %v2584_v60 }
 0x7a4   :  { %3112 = vmatprep.subr.bf16.mxu1 %v2591_v54 }
 0x7a7   :  { %3113 = vmatpush1.bf16.msra.mxu1 %v2590_v42 }
 0x7a8   :  { %3114 = vmatprep.subr.bf16.mxu1 %v2597_v30 }
 0x7ab   :  { %3115 = vmatpush1.bf16.msra.mxu1 %v2596_v24 }
 0x7ae   :  { %3117 = vmatmul.mubr.bf16.vlgmr.msra.gmra.mrb[32].mxu1 %v5118_v8  ;;  %v4435_v8 = vpop.eup %4434 }
 0x7af   :  { %v4437_v55 = vpop.eup %4436  ;;  %v3162_v39 = vmul.f32 %v4435_v8, %v3135_v9 }
 0x7b0   :  { %v3163_v44 = vmul.f32 %v4437_v55, %v3139_v23  ;;  %v4439_v2 = vpop.eup %4438 }
 0x7b1   :  { %v3164_v14 = vmul.f32 %v4439_v2, %v3143_v19  ;;  %v3168_v37 = vmul.f32 %v3162_v39, %v3162_v39  ;;  %v4441_v18 = vpop.eup %4440 }
 0x7b2   :  { %v3169_v49 = vmul.f32 %v3163_v44, %v3163_v44  ;;  %v3165_v7 = vmul.f32 %v4441_v18, %v3147_v5 }
 0x7b3   :  { %v3170_v48 = vmul.f32 %v3164_v14, %v3164_v14  ;;  %v3174_v57 = vsel %vm2022_vm5, %v3168_v37, 0.0 }
 0x7b4   :  { %v3175_v56 = vsel %vm2022_vm5, %v3169_v49, 0.0  ;;  %v3171_v27 = vmul.f32 %v3165_v7, %v3165_v7 }
 0x7b5   :  { %v3176_v31 = vadd.f32 %v3175_v56, %v3174_v57  ;;  %v3177_v15 = vsel %vm2022_vm5, %v3170_v48, 0.0 }
 0x7b6   :  { %v3179_v30 = vsel %vm2022_vm5, %v3171_v27, 0.0 }
 0x7b7   :  { %v3178_v60 = vadd.f32 %v3177_v15, %v3176_v31 }
 0x7b9   :  { %v3180_v35 = vadd.f32 %v3179_v30, %v3178_v60 }
 0x881   :  { %v3118_v10 = vpop.f32.mrb[32].mxu1 }
 0x882   :  { %v4295_v25 = vadd.f32 %v3118_v10, %v2622_v3  ;;  %v3120_v4 = vpop.f32.mrb[33].mxu1 }
 0x883   :  { %v4296_v45 = vadd.f32 %v3120_v4, %v2626_v33  ;;  %v3122_v12 = vpop.f32.mrb[34].mxu1 }
 0x884   :  { %4442 = vtanh.f32 %v4295_v25  ;;  %v3123_v59 = vpop.f32.mrb[35].mxu1 }
 0x885   :  { %4444 = vtanh.f32 %v4296_v45 }
 0x88e   :  { %v4443_v58 = vpop.eup %4442 }
 0x88f   :  { %v4445_v54 = vpop.eup %4444  ;;  %v3166_v42 = vmul.f32 %v4443_v58, %v3151_v6 }
 0x890   :  { %v3167_v24 = vmul.f32 %v4445_v54, %v3155_v28 }
 0x891   :  { %v3172_v26 = vmul.f32 %v3166_v42, %v3166_v42 }
 0x892   :  { %v3173_v52 = vmul.f32 %v3167_v24, %v3167_v24 }
 0x893   :  { %v3181_v40 = vsel %vm2022_vm5, %v3172_v26, 0.0 }
 0x894   :  { %v3182_v53 = vadd.f32 %v3181_v40, %v3180_v35  ;;  %v3183_v47 = vsel %vm2022_vm5, %v3173_v52, 0.0 }
 0x896   :  { %v3184_v38 = vadd.f32 %v3183_v47, %v3182_v53 }
 0x898   :  { %3185 = vadd.xlane.f32.xlu0 %v3184_v38 }
 0x925   :  { %v3186_v43 = vpop.xlane.xlu0 %3185 }
 0x926   :  { %4446 = vrsqrt.f32 %v3186_v43  ;;  %vm3189_vm6 = vcmp.eq.f32.partialorder %v3186_v43, inf  ;;  %v3192_v51 = vand.u32 2147483648, %v3186_v43  ;;  %vm3191_vm7 = vcmp.eq.f32.partialorder %v3186_v43, 0.0 }
 0x930   :  { %v4447_v0 = vpop.eup %4446 }
 0x931   :  { %v3188_v20 = vmul.f32 %v4447_v0, %v3186_v43 }
 0x933   :  { %v3190_v1 = vsel %vm3189_vm6, %v3186_v43, %v3188_v20 }
 0x934   :  { %v3193_v62 = vsel %vm3191_vm7, %v3192_v51, %v3190_v1 }
 0x935   :  { %v3194_v13 = vadd.f32 1e-08, %v3193_v62 }
 0x937   :  { %4448 = vrcp.f32 %v3194_v13 }
 0x941   :  { %v4449_v8 = vpop.eup %4448 }
 0x942   :  { %v3196_v9 = vmul.f32 %v4449_v8, %v3162_v39  ;;  %v3197_v23 = vmul.f32 %v4449_v8, %v3163_v44  ;;  %v3198_v55 = vmul.f32 %v4449_v8, %v3164_v14  ;;  %v3199_v3 = vmul.f32 %v4449_v8, %v3165_v7 }
 0x943   :  { %v3200_v33 = vmul.f32 %v4449_v8, %v3166_v42  ;;  %v3201_v19 = vmul.f32 %v4449_v8, %v3167_v24 }
 0x944   :  { %v3202_v2 = vadd.f32 %v3196_v9, %v4856_v22  ;;  %v3203_v10 = vadd.f32 %v3197_v23, %v4858_v29  ;;  %v3204_v25 = vadd.f32 %v3198_v55, %v4876_v61  ;;  %v3205_v4 = vadd.f32 %v3199_v3, %v4878_v63 }
 0x945   :  { %v3206_v5 = vadd.f32 %v3200_v33, %v4896_v21  ;;  %v3207_v45 = vadd.f32 %v3201_v19, %v4898_v36 }
 0x946   :  { %v5160_v12 = vmul.f32 0.5, %v3202_v2  ;;  %v5162_v39 = vmul.f32 0.5, %v3203_v10  ;;  %v5164_v44 = vmul.f32 0.5, %v3204_v25  ;;  %v5166_v14 = vmul.f32 0.5, %v3205_v4 }
 0x947   :  { %v5168_v37 = vmul.f32 0.5, %v3206_v5  ;;  %v5170_v22 = vmul.f32 0.5, %v3207_v45 }
 0x948   :  { %4500 = dma.done.wait [#allocation6 + $0x3], 12288 }
 0x949   :  { %4501 = vsyncadd [#allocation6 + $0x3], 4294955008  ;;  %v3218_v29 = vpack.c.bf16 %v5162_v39, %v5162_v39  ;;  %v3224_v61 = vld [vmem:[#allocation5 + $0x8] sm:$0xff]  ;;  %v3223_v63 = vld [vmem:[#allocation5] sm:$0xff]  ;;  %v3217_v1 = vpack.c.bf16 %v5160_v12, %v5160_v12  ;;  %v3220_v62 = vpack.c.bf16 %v5166_v14, %v5166_v14  ;;  %vm4201_vm9 = vcmask 1041408  }
 0x94a   :  { %v3226_v21 = vld [vmem:[#allocation5 + $0x18] sm:$0xff]  ;;  %3332 = vmatprep.subr.bf16.mxu0 %v3224_v61  ;;  %v3225_v36 = vld [vmem:[#allocation5 + $0x10] sm:$0xff]  ;;  %v3228_v49 = vld [vmem:[#allocation5 + $0x28] sm:$0xff] }
 0x94b   :  { %3364 = vmatprep.mubr.bf16.mxu0 %v3218_v29  ;;  %3333 = vmatpush1.bf16.msra.mxu0 %v3223_v63  ;;  %v3227_v18 = vld [vmem:[#allocation5 + $0x20] sm:$0xff]  ;;  %v3230_v59 = vld [vmem:[#allocation5 + $0x38] sm:$0xff]  ;;  %v3229_v7 = vld [vmem:[#allocation5 + $0x30] sm:$0xff] }
 0x94c   :  { %3334 = vmatprep.subr.bf16.mxu0 %v3226_v21  ;;  %v3232_v48 = vld [vmem:[#allocation5 + $0x48] sm:$0xff]  ;;  %v3231_v57 = vld [vmem:[#allocation5 + $0x40] sm:$0xff]  ;;  %v3234_v56 = vld [vmem:[#allocation5 + $0x58] sm:$0xff] }
 0x94d   :  { %v3233_v31 = vld [vmem:[#allocation5 + $0x50] sm:$0xff]  ;;  %v3236_v6 = vld [vmem:[#allocation5 + $0x68] sm:$0xff]  ;;  %v3235_v27 = vld [vmem:[#allocation5 + $0x60] sm:$0xff] }
 0x94e   :  { %v3238_v15 = vld [vmem:[#allocation5 + $0x78] sm:$0xff]  ;;  %v3237_v28 = vld [vmem:[#allocation5 + $0x70] sm:$0xff]  ;;  %v3240_v58 = vld [vmem:[#allocation5 + $0x88] sm:$0xff] }
 0x94f   :  { %3335 = vmatpush1.bf16.msra.mxu0 %v3225_v36  ;;  %v3239_v60 = vld [vmem:[#allocation5 + $0x80] sm:$0xff]  ;;  %v3242_v54 = vld [vmem:[#allocation5 + $0x98] sm:$0xff]  ;;  %v3241_v42 = vld [vmem:[#allocation5 + $0x90] sm:$0xff] }
 0x950   :  { %3336 = vmatprep.subr.bf16.mxu0 %v3228_v49  ;;  %v3244_v30 = vld [vmem:[#allocation5 + $0xa8] sm:$0xff]  ;;  %v3243_v24 = vld [vmem:[#allocation5 + $0xa0] sm:$0xff]  ;;  %v3246_v26 = vld [vmem:[#allocation5 + $0xb8] sm:$0xff] }
 0x951   :  { %v3245_v52 = vld [vmem:[#allocation5 + $0xb0] sm:$0xff]  ;;  %v3248_v35 = vld [vmem:[#allocation5 + $0xc8] sm:$0xff]  ;;  %v3247_v40 = vld [vmem:[#allocation5 + $0xc0] sm:$0xff] }
 0x952   :  { %v3250_v53 = vld [vmem:[#allocation5 + $0xd8] sm:$0xff]  ;;  %v3249_v47 = vld [vmem:[#allocation5 + $0xd0] sm:$0xff]  ;;  %v3252_v38 = vld [vmem:[#allocation5 + $0xe8] sm:$0xff] }
 0x953   :  { %3337 = vmatpush1.bf16.msra.mxu0 %v3227_v18  ;;  %v3251_v43 = vld [vmem:[#allocation5 + $0xe0] sm:$0xff]  ;;  %v3254_v0 = vld [vmem:[#allocation5 + $0xf8] sm:$0xff]  ;;  %v3253_v20 = vld [vmem:[#allocation5 + $0xf0] sm:$0xff] }
 0x954   :  { %3338 = vmatprep.subr.bf16.mxu0 %v3230_v59  ;;  %v3256_v51 = vld [vmem:[#allocation5 + $0x108] sm:$0xff]  ;;  %v3255_v13 = vld [vmem:[#allocation5 + $0x100] sm:$0xff]  ;;  %v3258_v8 = vld [vmem:[#allocation5 + $0x118] sm:$0xff] }
 0x955   :  { %v3257_v9 = vld [vmem:[#allocation5 + $0x110] sm:$0xff]  ;;  %v3260_v23 = vld [vmem:[#allocation5 + $0x128] sm:$0xff]  ;;  %v3259_v55 = vld [vmem:[#allocation5 + $0x120] sm:$0xff] }
 0x956   :  { %v3262_v3 = vld [vmem:[#allocation5 + $0x138] sm:$0xff]  ;;  %v3261_v33 = vld [vmem:[#allocation5 + $0x130] sm:$0xff]  ;;  %v3264_v19 = vld [vmem:[#allocation5 + $0x148] sm:$0xff] }
 0x957   :  { %3339 = vmatpush1.bf16.msra.mxu0 %v3229_v7  ;;  %v3263_v2 = vld [vmem:[#allocation5 + $0x140] sm:$0xff]  ;;  %v3266_v10 = vld [vmem:[#allocation5 + $0x158] sm:$0xff]  ;;  %v3265_v25 = vld [vmem:[#allocation5 + $0x150] sm:$0xff] }
 0x958   :  { %3340 = vmatprep.subr.bf16.mxu0 %v3232_v48  ;;  %v3268_v4 = vld [vmem:[#allocation5 + $0x168] sm:$0xff]  ;;  %v3267_v5 = vld [vmem:[#allocation5 + $0x160] sm:$0xff]  ;;  %v3270_v45 = vld [vmem:[#allocation5 + $0x178] sm:$0xff] }
 0x959   :  { %v3269_v29 = vld [vmem:[#allocation5 + $0x170] sm:$0xff]  ;;  %v3272_v61 = vld [vmem:[#allocation5 + $0x188] sm:$0xff]  ;;  %v3271_v63 = vld [vmem:[#allocation5 + $0x180] sm:$0xff] }
 0x95a   :  { %v3274_v21 = vld [vmem:[#allocation5 + $0x198] sm:$0xff]  ;;  %v3273_v36 = vld [vmem:[#allocation5 + $0x190] sm:$0xff]  ;;  %v3276_v49 = vld [vmem:[#allocation5 + $0x1a8] sm:$0xff] }
 0x95b   :  { %3341 = vmatpush1.bf16.msra.mxu0 %v3231_v57  ;;  %v3275_v18 = vld [vmem:[#allocation5 + $0x1a0] sm:$0xff]  ;;  %v3278_v59 = vld [vmem:[#allocation5 + $0x1b8] sm:$0xff]  ;;  %v3277_v7 = vld [vmem:[#allocation5 + $0x1b0] sm:$0xff] }
 0x95c   :  { %3342 = vmatprep.subr.bf16.mxu0 %v3234_v56  ;;  %v3280_v48 = vld [vmem:[#allocation5 + $0x1c8] sm:$0xff]  ;;  %v3279_v57 = vld [vmem:[#allocation5 + $0x1c0] sm:$0xff]  ;;  %v3282_v56 = vld [vmem:[#allocation5 + $0x1d8] sm:$0xff] }
 0x95f   :  { %3343 = vmatpush1.bf16.msra.mxu0 %v3233_v31  ;;  %v3281_v31 = vld [vmem:[#allocation5 + $0x1d0] sm:$0xff] }
 0x960   :  { %3344 = vmatprep.subr.bf16.mxu0 %v3236_v6  ;;  %v3284_v6 = vld [vmem:[#allocation5 + $0x1e8] sm:$0xff] }
 0x963   :  { %3345 = vmatpush1.bf16.msra.mxu0 %v3235_v27  ;;  %v3283_v27 = vld [vmem:[#allocation5 + $0x1e0] sm:$0xff] }
 0x964   :  { %3346 = vmatprep.subr.bf16.mxu0 %v3238_v15  ;;  %v3286_v15 = vld [vmem:[#allocation5 + $0x1f8] sm:$0xff] }
 0x967   :  { %3347 = vmatpush1.bf16.msra.mxu0 %v3237_v28  ;;  %v3285_v28 = vld [vmem:[#allocation5 + $0x1f0] sm:$0xff] }
 0x968   :  { %3348 = vmatprep.subr.bf16.mxu0 %v3240_v58  ;;  %v3288_v58 = vld [vmem:[#allocation5 + $0x208] sm:$0xff] }
 0x96b   :  { %3349 = vmatpush1.bf16.msra.mxu0 %v3239_v60  ;;  %v3219_v60 = vpack.c.bf16 %v5164_v44, %v5164_v44 }
 0x96c   :  { %3350 = vmatprep.subr.bf16.mxu0 %v3242_v54  ;;  %v3222_v54 = vpack.c.bf16 %v5170_v22, %v5170_v22 }
 0x96f   :  { %3351 = vmatpush1.bf16.msra.mxu0 %v3241_v42  ;;  %v3287_v42 = vld [vmem:[#allocation5 + $0x200] sm:$0xff] }
 0x970   :  { %3352 = vmatprep.subr.bf16.mxu0 %v3244_v30  ;;  %v3290_v30 = vld [vmem:[#allocation5 + $0x218] sm:$0xff] }
 0x973   :  { %3353 = vmatpush1.bf16.msra.mxu0 %v3243_v24  ;;  %v3289_v24 = vld [vmem:[#allocation5 + $0x210] sm:$0xff] }
 0x974   :  { %3354 = vmatprep.subr.bf16.mxu0 %v3246_v26  ;;  %v3292_v26 = vld [vmem:[#allocation5 + $0x228] sm:$0xff] }
 0x977   :  { %3355 = vmatpush1.bf16.msra.mxu0 %v3245_v52  ;;  %v3291_v52 = vld [vmem:[#allocation5 + $0x220] sm:$0xff] }
 0x978   :  { %3356 = vmatprep.subr.bf16.mxu0 %v3248_v35  ;;  %v3294_v35 = vld [vmem:[#allocation5 + $0x238] sm:$0xff] }
 0x97b   :  { %3357 = vmatpush1.bf16.msra.mxu0 %v3247_v40  ;;  %v3293_v40 = vld [vmem:[#allocation5 + $0x230] sm:$0xff] }
 0x97c   :  { %3358 = vmatprep.subr.bf16.mxu0 %v3250_v53  ;;  %v3296_v53 = vld [vmem:[#allocation5 + $0x248] sm:$0xff] }
 0x97f   :  { %3359 = vmatpush1.bf16.msra.mxu0 %v3249_v47  ;;  %v3295_v47 = vld [vmem:[#allocation5 + $0x240] sm:$0xff] }
 0x980   :  { %3360 = vmatprep.subr.bf16.mxu0 %v3252_v38  ;;  %v3298_v38 = vld [vmem:[#allocation5 + $0x258] sm:$0xff] }
 0x983   :  { %3361 = vmatpush1.bf16.msra.mxu0 %v3251_v43  ;;  %v3297_v43 = vld [vmem:[#allocation5 + $0x250] sm:$0xff] }
 0x984   :  { %3362 = vmatprep.subr.bf16.mxu0 %v3254_v0  ;;  %v3300_v0 = vld [vmem:[#allocation5 + $0x268] sm:$0xff] }
 0x987   :  { %3363 = vmatpush1.bf16.msra.mxu0 %v3253_v20  ;;  %v3299_v20 = vld [vmem:[#allocation5 + $0x260] sm:$0xff] }
 0x988   :  { %3373 = vmatprep.subr.bf16.mxu0 %v3256_v51  ;;  %v3302_v51 = vld [vmem:[#allocation5 + $0x278] sm:$0xff] }
 0x98a   :  { %3365 = vmatmul.mubr.bf16.vlgmr.msra.gmra.mrb[28].mxu0 %v3217_v1  ;;  %v3301_v1 = vld [vmem:[#allocation5 + $0x270] sm:$0xff] }
 0x98b   :  { %3374 = vmatpush1.bf16.msra.mxu0 %v3255_v13  ;;  %3405 = vmatprep.mubr.bf16.mxu0 %v3220_v62  ;;  %v3304_v62 = vld [vmem:[#allocation5 + $0x288] sm:$0xff]  ;;  %v3303_v13 = vld [vmem:[#allocation5 + $0x280] sm:$0xff] }
 0x98c   :  { %3375 = vmatprep.subr.bf16.mxu0 %v3258_v8  ;;  %v3306_v8 = vld [vmem:[#allocation5 + $0x298] sm:$0xff] }
 0x98f   :  { %3376 = vmatpush1.bf16.msra.mxu0 %v3257_v9  ;;  %v3305_v9 = vld [vmem:[#allocation5 + $0x290] sm:$0xff] }
 0x990   :  { %3377 = vmatprep.subr.bf16.mxu0 %v3260_v23  ;;  %v3308_v23 = vld [vmem:[#allocation5 + $0x2a8] sm:$0xff] }
 0x993   :  { %3378 = vmatpush1.bf16.msra.mxu0 %v3259_v55  ;;  %v3307_v55 = vld [vmem:[#allocation5 + $0x2a0] sm:$0xff] }
 0x994   :  { %3379 = vmatprep.subr.bf16.mxu0 %v3262_v3  ;;  %v3310_v3 = vld [vmem:[#allocation5 + $0x2b8] sm:$0xff] }
 0x997   :  { %3380 = vmatpush1.bf16.msra.mxu0 %v3261_v33  ;;  %v3309_v33 = vld [vmem:[#allocation5 + $0x2b0] sm:$0xff] }
 0x998   :  { %3381 = vmatprep.subr.bf16.mxu0 %v3264_v19  ;;  %v3312_v19 = vld [vmem:[#allocation5 + $0x2c8] sm:$0xff] }
 0x99b   :  { %3382 = vmatpush1.bf16.msra.mxu0 %v3263_v2  ;;  %v3311_v2 = vld [vmem:[#allocation5 + $0x2c0] sm:$0xff] }
 0x99c   :  { %3383 = vmatprep.subr.bf16.mxu0 %v3266_v10  ;;  %v3314_v10 = vld [vmem:[#allocation5 + $0x2d8] sm:$0xff] }
 0x99f   :  { %3384 = vmatpush1.bf16.msra.mxu0 %v3265_v25  ;;  %v3313_v25 = vld [vmem:[#allocation5 + $0x2d0] sm:$0xff] }
 0x9a0   :  { %3385 = vmatprep.subr.bf16.mxu0 %v3268_v4  ;;  %v3316_v4 = vld [vmem:[#allocation5 + $0x2e8] sm:$0xff] }
 0x9a3   :  { %3386 = vmatpush1.bf16.msra.mxu0 %v3267_v5  ;;  %v3315_v5 = vld [vmem:[#allocation5 + $0x2e0] sm:$0xff] }
 0x9a4   :  { %3387 = vmatprep.subr.bf16.mxu0 %v3270_v45  ;;  %v3318_v45 = vld [vmem:[#allocation5 + $0x2f8] sm:$0xff] }
 0x9a7   :  { %3388 = vmatpush1.bf16.msra.mxu0 %v3269_v29  ;;  %v3317_v29 = vld [vmem:[#allocation5 + $0x2f0] sm:$0xff] }
 0x9a8   :  { %3389 = vmatprep.subr.bf16.mxu0 %v3272_v61  ;;  %v3221_v61 = vpack.c.bf16 %v5168_v37, %v5168_v37 }
 0x9ab   :  { %3390 = vmatpush1.bf16.msra.mxu0 %v3271_v63  ;;  %v3320_v63 = vld [vmem:[#allocation9 + $0x5] ss:$8 sm:$0x3] }
 0x9ac   :  { %3391 = vmatprep.subr.bf16.mxu0 %v3274_v21  ;;  %v3325_v21 = vrot.slane %v3320_v63, %v4841_v11 }
 0x9af   :  { %3392 = vmatpush1.bf16.msra.mxu0 %v3273_v36  ;;  %v3329_v36 = vrot.slane %v3320_v63, %v4844_v46  ;;  %v3552_v63 = vld [vmem:[#allocation2 + $0x188] sm:$0xff] }
 0x9b0   :  { %3393 = vmatprep.subr.bf16.mxu0 %v3276_v49  ;;  %v3458_v49 = vld [vmem:[#allocation9 + $0x6] ss:$8 sm:$0x3] }
 0x9b3   :  { %3394 = vmatpush1.bf16.msra.mxu0 %v3275_v18 }
 0x9b4   :  { %3395 = vmatprep.subr.bf16.mxu0 %v3278_v59 }
 0x9b7   :  { %3396 = vmatpush1.bf16.msra.mxu0 %v3277_v7 }
 0x9b8   :  { %3397 = vmatprep.subr.bf16.mxu0 %v3280_v48  ;;  %v3463_v48 = vrot.slane %v3458_v49, %v4841_v11  ;;  %v3506_v11 = vld [vmem:[#allocation2 + $0x18] sm:$0xff] }
 0x9b9   :  { %3914 = vmatprep.subr.bf16.mxu1 %v3506_v11  ;;  %v3584_v11 = vld [vmem:[#allocation2 + $0x288] sm:$0xff] }
 0x9bb   :  { %3398 = vmatpush1.bf16.msra.mxu0 %v3279_v57 }
 0x9bc   :  { %3399 = vmatprep.subr.bf16.mxu0 %v3282_v56 }
 0x9bf   :  { %3400 = vmatpush1.bf16.msra.mxu0 %v3281_v31  ;;  %v3467_v31 = vrot.slane %v3458_v49, %v4844_v46  ;;  %v3505_v46 = vld [vmem:[#allocation2 + $0x10] sm:$0xff] }
 0x9c0   :  { %3401 = vmatprep.subr.bf16.mxu0 %v3284_v6  ;;  %3915 = vmatpush1.bf16.msra.mxu1 %v3505_v46  ;;  %v3553_v49 = vld [vmem:[#allocation2 + $0x190] sm:$0xff]  ;;  %v3583_v46 = vld [vmem:[#allocation2 + $0x280] sm:$0xff] }
 0x9c3   :  { %3402 = vmatpush1.bf16.msra.mxu0 %v3283_v27 }
 0x9c4   :  { %3403 = vmatprep.subr.bf16.mxu0 %v3286_v15 }
 0x9c7   :  { %3404 = vmatpush1.bf16.msra.mxu0 %v3285_v28 }
 0x9c8   :  { %3414 = vmatprep.subr.bf16.mxu0 %v3288_v58 }
 0x9ca   :  { %3406 = vmatmul.mubr.bf16.vlgmr.msra.gmra.mrb[28].mxu0 %v3219_v60 }
 0x9cb   :  { %3415 = vmatpush1.bf16.msra.mxu0 %v3287_v42  ;;  %3446 = vmatprep.mubr.bf16.mxu0 %v3222_v54 }
 0x9cc   :  { %3416 = vmatprep.subr.bf16.mxu0 %v3290_v30  ;;  %v4528_v30 = vmov 0  }
 0x9cd   :  { %4450 = vset.pattern.permute.xlu0 %v4528_v30  ;;  %4451 = vset.pattern.permute.xlu1 %v4528_v30  ;;  %v3577_v30 = vld [vmem:[#allocation2 + $0x250] sm:$0xff] }
 0x9cf   :  { %3417 = vmatpush1.bf16.msra.mxu0 %v3289_v24  ;;  %v3504_v24 = vld [vmem:[#allocation2 + $0x8] sm:$0xff] }
 0x9d0   :  { %3418 = vmatprep.subr.bf16.mxu0 %v3292_v26  ;;  %v3503_v26 = vld [vmem:[#allocation2] sm:$0xff] }
 0x9d3   :  { %3419 = vmatpush1.bf16.msra.mxu0 %v3291_v52  ;;  %v3510_v52 = vld [vmem:[#allocation2 + $0x38] sm:$0xff] }
 0x9d4   :  { %3420 = vmatprep.subr.bf16.mxu0 %v3294_v35  ;;  %v3512_v35 = vld [vmem:[#allocation2 + $0x48] sm:$0xff] }
 0x9d5   :  { %3916 = vmatprep.subr.bf16.mxu1 %v3512_v35  ;;  %v3590_v35 = vld [vmem:[#allocation2 + $0x2b8] sm:$0xff] }
 0x9d7   :  { %3421 = vmatpush1.bf16.msra.mxu0 %v3293_v40  ;;  %v3509_v40 = vld [vmem:[#allocation2 + $0x30] sm:$0xff] }
 0x9d8   :  { %3422 = vmatprep.subr.bf16.mxu0 %v3296_v53  ;;  %v3511_v53 = vld [vmem:[#allocation2 + $0x40] sm:$0xff] }
 0x9d9   :  { %3917 = vmatpush1.bf16.msra.mxu1 %v3511_v53  ;;  %v3589_v53 = vld [vmem:[#allocation2 + $0x2b0] sm:$0xff] }
 0x9db   :  { %3423 = vmatpush1.bf16.msra.mxu0 %v3295_v47  ;;  %v3516_v47 = vld [vmem:[#allocation2 + $0x68] sm:$0xff] }
 0x9dc   :  { %3424 = vmatprep.subr.bf16.mxu0 %v3298_v38  ;;  %v3518_v38 = vld [vmem:[#allocation2 + $0x78] sm:$0xff] }
 0x9dd   :  { %3918 = vmatprep.subr.bf16.mxu1 %v3518_v38 }
 0x9df   :  { %3425 = vmatpush1.bf16.msra.mxu0 %v3297_v43  ;;  %v3515_v43 = vld [vmem:[#allocation2 + $0x60] sm:$0xff] }
 0x9e0   :  { %3426 = vmatprep.subr.bf16.mxu0 %v3300_v0  ;;  %v3517_v0 = vld [vmem:[#allocation2 + $0x70] sm:$0xff] }
 0x9e1   :  { %3919 = vmatpush1.bf16.msra.mxu1 %v3517_v0 }
 0x9e3   :  { %3427 = vmatpush1.bf16.msra.mxu0 %v3299_v20  ;;  %v3522_v20 = vld [vmem:[#allocation2 + $0x98] sm:$0xff] }
 0x9e4   :  { %3428 = vmatprep.subr.bf16.mxu0 %v3302_v51  ;;  %v3524_v51 = vld [vmem:[#allocation2 + $0xa8] sm:$0xff] }
 0x9e5   :  { %3920 = vmatprep.subr.bf16.mxu1 %v3524_v51 }
 0x9e7   :  { %3429 = vmatpush1.bf16.msra.mxu0 %v3301_v1  ;;  %v3521_v1 = vld [vmem:[#allocation2 + $0x90] sm:$0xff] }
 0x9e8   :  { %3430 = vmatprep.subr.bf16.mxu0 %v3304_v62  ;;  %v3523_v62 = vld [vmem:[#allocation2 + $0xa0] sm:$0xff] }
 0x9e9   :  { %3921 = vmatpush1.bf16.msra.mxu1 %v3523_v62 }
 0x9eb   :  { %3431 = vmatpush1.bf16.msra.mxu0 %v3303_v13  ;;  %v3528_v13 = vld [vmem:[#allocation2 + $0xc8] sm:$0xff] }
 0x9ec   :  { %3432 = vmatprep.subr.bf16.mxu0 %v3306_v8  ;;  %v3530_v8 = vld [vmem:[#allocation2 + $0xd8] sm:$0xff] }
 0x9ed   :  { %3922 = vmatprep.subr.bf16.mxu1 %v3530_v8  ;;  %v3596_v8 = vld [vmem:[#allocation2 + $0x2e8] sm:$0xff] }
 0x9ef   :  { %3433 = vmatpush1.bf16.msra.mxu0 %v3305_v9  ;;  %v3527_v9 = vld [vmem:[#allocation2 + $0xc0] sm:$0xff] }
 0x9f0   :  { %3434 = vmatprep.subr.bf16.mxu0 %v3308_v23  ;;  %v3529_v23 = vld [vmem:[#allocation2 + $0xd0] sm:$0xff] }
 0x9f1   :  { %3923 = vmatpush1.bf16.msra.mxu1 %v3529_v23  ;;  %v3595_v23 = vld [vmem:[#allocation2 + $0x2e0] sm:$0xff] }
 0x9f3   :  { %3435 = vmatpush1.bf16.msra.mxu0 %v3307_v55  ;;  %v3534_v55 = vld [vmem:[#allocation2 + $0xf8] sm:$0xff] }
 0x9f4   :  { %3436 = vmatprep.subr.bf16.mxu0 %v3310_v3  ;;  %v3536_v3 = vld [vmem:[#allocation2 + $0x108] sm:$0xff] }
 0x9f5   :  { %3924 = vmatprep.subr.bf16.mxu1 %v3536_v3  ;;  %v3602_v3 = vld [vmem:[#allocation2 + $0x318] sm:$0xff] }
 0x9f7   :  { %3437 = vmatpush1.bf16.msra.mxu0 %v3309_v33  ;;  %v3533_v33 = vld [vmem:[#allocation2 + $0xf0] sm:$0xff] }
 0x9f8   :  { %3438 = vmatprep.subr.bf16.mxu0 %v3312_v19  ;;  %v3535_v19 = vld [vmem:[#allocation2 + $0x100] sm:$0xff] }
 0x9f9   :  { %3925 = vmatpush1.bf16.msra.mxu1 %v3535_v19 }
 0x9fb   :  { %3439 = vmatpush1.bf16.msra.mxu0 %v3311_v2  ;;  %v3540_v2 = vld [vmem:[#allocation2 + $0x128] sm:$0xff] }
 0x9fc   :  { %3440 = vmatprep.subr.bf16.mxu0 %v3314_v10  ;;  %v3542_v10 = vld [vmem:[#allocation2 + $0x138] sm:$0xff] }
 0x9fd   :  { %3926 = vmatprep.subr.bf16.mxu1 %v3542_v10 }
 0x9ff   :  { %3441 = vmatpush1.bf16.msra.mxu0 %v3313_v25  ;;  %v3539_v25 = vld [vmem:[#allocation2 + $0x120] sm:$0xff] }
 0xa00   :  { %3442 = vmatprep.subr.bf16.mxu0 %v3316_v4  ;;  %v3541_v4 = vld [vmem:[#allocation2 + $0x130] sm:$0xff] }
 0xa01   :  { %3927 = vmatpush1.bf16.msra.mxu1 %v3541_v4 }
 0xa03   :  { %3443 = vmatpush1.bf16.msra.mxu0 %v3315_v5  ;;  %v3546_v5 = vld [vmem:[#allocation2 + $0x158] sm:$0xff] }
 0xa04   :  { %3444 = vmatprep.subr.bf16.mxu0 %v3318_v45  ;;  %v3548_v45 = vld [vmem:[#allocation2 + $0x168] sm:$0xff] }
 0xa05   :  { %3928 = vmatprep.subr.bf16.mxu1 %v3548_v45  ;;  %v3601_v45 = vld [vmem:[#allocation2 + $0x310] sm:$0xff] }
 0xa07   :  { %3445 = vmatpush1.bf16.msra.mxu0 %v3317_v29  ;;  %v3545_v29 = vld [vmem:[#allocation2 + $0x150] sm:$0xff] }
 0xa08   :  { %3791 = vmatprep.subr.bf16.mxu0 %v3504_v24  ;;  %v3582_v24 = vld [vmem:[#allocation2 + $0x278] sm:$0xff] }
 0xa0a   :  { %3447 = vmatmul.mubr.bf16.vlgmr.msra.gmra.mrb[28].mxu0 %v3221_v61  ;;  %v3547_v61 = vld [vmem:[#allocation2 + $0x160] sm:$0xff] }
 0xa0b   :  { %3792 = vmatpush1.bf16.msra.mxu0 %v3503_v26  ;;  %3929 = vmatpush1.bf16.msra.mxu1 %v3547_v61  ;;  %v3581_v26 = vld [vmem:[#allocation2 + $0x270] sm:$0xff]  ;;  %v3607_v61 = vld [vmem:[#allocation2 + $0x340] sm:$0xff] }
 0xa0c   :  { %3793 = vmatprep.subr.bf16.mxu0 %v3510_v52  ;;  %v3588_v52 = vld [vmem:[#allocation2 + $0x2a8] sm:$0xff] }
 0xa0f   :  { %3794 = vmatpush1.bf16.msra.mxu0 %v3509_v40  ;;  %v3587_v40 = vld [vmem:[#allocation2 + $0x2a0] sm:$0xff] }
 0xa10   :  { %3795 = vmatprep.subr.bf16.mxu0 %v3516_v47  ;;  %v3477_v47 = vld [vmem:[#allocation9 + $0x7] ss:$0 sm:$0xff] }
 0xa13   :  { %3796 = vmatpush1.bf16.msra.mxu0 %v3515_v43 }
 0xa14   :  { %3797 = vmatprep.subr.bf16.mxu0 %v3522_v20 }
 0xa17   :  { %3798 = vmatpush1.bf16.msra.mxu0 %v3521_v1 }
 0xa18   :  { %3799 = vmatprep.subr.bf16.mxu0 %v3528_v13  ;;  %v3594_v13 = vld [vmem:[#allocation2 + $0x2d8] sm:$0xff] }
 0xa1b   :  { %3800 = vmatpush1.bf16.msra.mxu0 %v3527_v9  ;;  %v3593_v9 = vld [vmem:[#allocation2 + $0x2d0] sm:$0xff] }
 0xa1c   :  { %3801 = vmatprep.subr.bf16.mxu0 %v3534_v55  ;;  %v3600_v55 = vld [vmem:[#allocation2 + $0x308] sm:$0xff] }
 0xa1f   :  { %3802 = vmatpush1.bf16.msra.mxu0 %v3533_v33 }
 0xa20   :  { %3803 = vmatprep.subr.bf16.mxu0 %v3540_v2 }
 0xa23   :  { %3804 = vmatpush1.bf16.msra.mxu0 %v3539_v25 }
 0xa24   :  { %3805 = vmatprep.subr.bf16.mxu0 %v3546_v5  ;;  %v3599_v5 = vld [vmem:[#allocation2 + $0x300] sm:$0xff] }
 0xa27   :  { %3806 = vmatpush1.bf16.msra.mxu0 %v3545_v29  ;;  %v3605_v29 = vld [vmem:[#allocation2 + $0x330] sm:$0xff] }
 0xa28   :  { %3807 = vmatprep.subr.bf16.mxu0 %v3552_v63  ;;  %v3612_v63 = vld [vmem:[#allocation2 + $0x368] sm:$0xff] }
 0xadd   :  { %v3448_v18 = vpop.f32.mrb[28].mxu0 }
 0xade   :  { %v4297_v59 = vadd.f32 %v3448_v18, %v3325_v21  ;;  %v3450_v7 = vpop.f32.mrb[29].mxu0  ;;  %v3554_v21 = vld [vmem:[#allocation2 + $0x198] sm:$0xff] }
 0xadf   :  { %v4298_v57 = vadd.f32 %v3450_v7, %v3329_v36  ;;  %v3452_v56 = vpop.f32.mrb[30].mxu0  ;;  %3930 = vmatprep.subr.bf16.mxu1 %v3554_v21  ;;  %v3551_v36 = vld [vmem:[#allocation2 + $0x180] sm:$0xff]  ;;  %v3558_v18 = vld [vmem:[#allocation2 + $0x1b8] sm:$0xff]  ;;  %v3557_v7 = vld [vmem:[#allocation2 + $0x1b0] sm:$0xff] }
 0xae0   :  { %v3455_v6 = vmax.f32 %v4297_v59, 0.0  ;;  %v3453_v27 = vpop.f32.mrb[31].mxu0  ;;  %v3560_v59 = vld [vmem:[#allocation2 + $0x1c8] sm:$0xff]  ;;  %3808 = vmatpush1.bf16.msra.mxu0 %v3551_v36  ;;  %3931 = vmatpush1.bf16.msra.mxu1 %v3553_v49  ;;  %v3566_v56 = vld [vmem:[#allocation2 + $0x1f8] sm:$0xff]  ;;  %v3611_v36 = vld [vmem:[#allocation2 + $0x360] sm:$0xff] }
 0xae1   :  { %v3456_v15 = vmax.f32 %v4298_v57, 0.0  ;;  %3809 = vmatprep.subr.bf16.mxu0 %v3558_v18  ;;  %3932 = vmatprep.subr.bf16.mxu1 %v3560_v59  ;;  %v3564_v57 = vld [vmem:[#allocation2 + $0x1e8] sm:$0xff]  ;;  %v3570_v27 = vld [vmem:[#allocation2 + $0x218] sm:$0xff]  ;;  %v3613_v49 = vld [vmem:[#allocation2 + $0x370] sm:$0xff] }
 0xae2   :  { %v3470_v28 = vmul.f32 %v3463_v48, %v3455_v6  ;;  %v3559_v48 = vld [vmem:[#allocation2 + $0x1c0] sm:$0xff]  ;;  %v3565_v6 = vld [vmem:[#allocation2 + $0x1f0] sm:$0xff]  ;;  %v3614_v21 = vld [vmem:[#allocation2 + $0x378] sm:$0xff] }
 0xae3   :  { %v3471_v58 = vmul.f32 %v3467_v31, %v3456_v15  ;;  %v3563_v31 = vld [vmem:[#allocation2 + $0x1e0] sm:$0xff]  ;;  %v3572_v15 = vld [vmem:[#allocation2 + $0x228] sm:$0xff]  ;;  %v3618_v18 = vld [vmem:[#allocation2 + $0x398] sm:$0xff] }
 0xae4   :  { %v3472_v60 = vsel %vm2022_vm5, %v3470_v28, 0.0  ;;  %3810 = vmatpush1.bf16.msra.mxu0 %v3557_v7  ;;  %3933 = vmatpush1.bf16.msra.mxu1 %v3559_v48  ;;  %v3569_v28 = vld [vmem:[#allocation2 + $0x210] sm:$0xff]  ;;  %v3620_v59 = vld [vmem:[#allocation2 + $0x3a8] sm:$0xff]  ;;  %v3619_v48 = vld [vmem:[#allocation2 + $0x3a0] sm:$0xff] }
 0xae5   :  { %v3473_v54 = vsel %vm2022_vm5, %v3471_v58, 0.0  ;;  %3811 = vmatprep.subr.bf16.mxu0 %v3564_v57  ;;  %3934 = vmatprep.subr.bf16.mxu1 %v3566_v56  ;;  %v3571_v58 = vld [vmem:[#allocation2 + $0x220] sm:$0xff]  ;;  %v3617_v7 = vld [vmem:[#allocation2 + $0x390] sm:$0xff]  ;;  %v3624_v57 = vld [vmem:[#allocation2 + $0x3c8] sm:$0xff] }
 0xae6   :  { %v3474_v42 = vadd.f32 %v3473_v54, %v3472_v60  ;;  %v3576_v60 = vld [vmem:[#allocation2 + $0x248] sm:$0xff]  ;;  %v3578_v54 = vld [vmem:[#allocation2 + $0x258] sm:$0xff] }
 0xae7   :  { %v3626_v56 = vld [vmem:[#allocation2 + $0x3d8] sm:$0xff] }
 0xae8   :  { %3475 = vadd.xlane.f32.xlu0 %v3474_v42  ;;  %3812 = vmatpush1.bf16.msra.mxu0 %v3563_v31  ;;  %v3575_v42 = vld [vmem:[#allocation2 + $0x240] sm:$0xff] }
 0xae9   :  { %3935 = vmatpush1.bf16.msra.mxu1 %v3565_v6  ;;  %3813 = vmatprep.subr.bf16.mxu0 %v3570_v27  ;;  %v3623_v31 = vld [vmem:[#allocation2 + $0x3c0] sm:$0xff]  ;;  %v3625_v6 = vld [vmem:[#allocation2 + $0x3d0] sm:$0xff]  ;;  %v3630_v27 = vld [vmem:[#allocation2 + $0x3f8] sm:$0xff] }
 0xaea   :  { %3936 = vmatprep.subr.bf16.mxu1 %v3572_v15  ;;  %v3632_v15 = vld [vmem:[#allocation2 + $0x408] sm:$0xff] }
 0xaec   :  { %3814 = vmatpush1.bf16.msra.mxu0 %v3569_v28  ;;  %v3629_v28 = vld [vmem:[#allocation2 + $0x3f0] sm:$0xff] }
 0xaed   :  { %3937 = vmatpush1.bf16.msra.mxu1 %v3571_v58  ;;  %3815 = vmatprep.subr.bf16.mxu0 %v3576_v60  ;;  %v3631_v58 = vld [vmem:[#allocation2 + $0x400] sm:$0xff]  ;;  %v3636_v60 = vld [vmem:[#allocation2 + $0x428] sm:$0xff] }
 0xaee   :  { %3938 = vmatprep.subr.bf16.mxu1 %v3578_v54  ;;  %v3638_v54 = vld [vmem:[#allocation2 + $0x438] sm:$0xff] }
 0xaf0   :  { %3816 = vmatpush1.bf16.msra.mxu0 %v3575_v42  ;;  %v3635_v42 = vld [vmem:[#allocation2 + $0x420] sm:$0xff] }
 0xaf1   :  { %3939 = vmatpush1.bf16.msra.mxu1 %v3577_v30  ;;  %3817 = vmatprep.subr.bf16.mxu0 %v3582_v24  ;;  %v3637_v30 = vld [vmem:[#allocation2 + $0x430] sm:$0xff]  ;;  %v3642_v24 = vld [vmem:[#allocation2 + $0x458] sm:$0xff] }
 0xaf2   :  { %3940 = vmatprep.subr.bf16.mxu1 %v3584_v11  ;;  %v3644_v11 = vld [vmem:[#allocation2 + $0x468] sm:$0xff] }
 0xaf4   :  { %3818 = vmatpush1.bf16.msra.mxu0 %v3581_v26  ;;  %v3641_v26 = vld [vmem:[#allocation2 + $0x450] sm:$0xff] }
 0xaf5   :  { %3941 = vmatpush1.bf16.msra.mxu1 %v3583_v46  ;;  %3819 = vmatprep.subr.bf16.mxu0 %v3588_v52  ;;  %v3643_v46 = vld [vmem:[#allocation2 + $0x460] sm:$0xff]  ;;  %v3648_v52 = vld [vmem:[#allocation2 + $0x488] sm:$0xff] }
 0xaf6   :  { %3942 = vmatprep.subr.bf16.mxu1 %v3590_v35  ;;  %v3650_v35 = vld [vmem:[#allocation2 + $0x498] sm:$0xff] }
 0xaf8   :  { %3820 = vmatpush1.bf16.msra.mxu0 %v3587_v40  ;;  %v3647_v40 = vld [vmem:[#allocation2 + $0x480] sm:$0xff] }
 0xaf9   :  { %3943 = vmatpush1.bf16.msra.mxu1 %v3589_v53  ;;  %3821 = vmatprep.subr.bf16.mxu0 %v3594_v13  ;;  %v3649_v53 = vld [vmem:[#allocation2 + $0x490] sm:$0xff] }
 0xafa   :  { %3944 = vmatprep.subr.bf16.mxu1 %v3596_v8  ;;  %v3661_v13 = vld [vmem:[#allocation2 + $0x4f0] sm:$0xff]  ;;  %v3666_v8 = vld [vmem:[#allocation2 + $0x518] sm:$0xff] }
 0xafc   :  { %3822 = vmatpush1.bf16.msra.mxu0 %v3593_v9  ;;  %v3668_v9 = vld [vmem:[#allocation2 + $0x528] sm:$0xff] }
 0xafd   :  { %3945 = vmatpush1.bf16.msra.mxu1 %v3595_v23  ;;  %3832 = vmatprep.subr.bf16.mxu0 %v3600_v55  ;;  %v3665_v23 = vld [vmem:[#allocation2 + $0x510] sm:$0xff]  ;;  %v3667_v55 = vld [vmem:[#allocation2 + $0x520] sm:$0xff] }
 0xafe   :  { %3955 = vmatprep.subr.bf16.mxu1 %v3602_v3  ;;  %v3672_v3 = vld [vmem:[#allocation2 + $0x548] sm:$0xff] }
 0xb75   :  { %v3476_v38 = vpop.xlane.xlu0 %3475 }
 0xb76   :  { %v3478_v43 = vadd.f32 %v3477_v47, %v3476_v38  ;;  %v3654_v47 = vld [vmem:[#allocation2 + $0x4b8] sm:$0xff]  ;;  %v3656_v38 = vld [vmem:[#allocation2 + $0x4c8] sm:$0xff] }
 0xb78   :  { %v4278_v0 = vmul.f32 -1.442695, %v3478_v43  ;;  %v3653_v43 = vld [vmem:[#allocation2 + $0x4b0] sm:$0xff] }
 0xb7a   :  { %4452 = vpow2.f32 %v4278_v0  ;;  %v3655_v0 = vld [vmem:[#allocation2 + $0x4c0] sm:$0xff] }
 0xb84   :  { %v4453_v20 = vpop.eup %4452 }
 0xb85   :  { %v3482_v51 = vadd.f32 1.0, %v4453_v20  ;;  %v3660_v20 = vld [vmem:[#allocation2 + $0x4e8] sm:$0xff] }
 0xb87   :  { %4454 = vrcp.f32 %v3482_v51  ;;  %v3662_v51 = vld [vmem:[#allocation2 + $0x4f8] sm:$0xff] }
 0xb91   :  { %v5190_v1 = vpop.eup %4454 }
 0xb92   :  { %v3485_v62 = vsub.f32 1.0, %v5190_v1 }
 0xb94   :  { %3488 = vperm.xlu0 %4450, %v3485_v62   ;;  %v3659_v62 = vld [vmem:[#allocation2 + $0x4e0] sm:$0xff] }
 0xc13   :  { %v5193_v33 = vpop.permute.xlu0 %3488 }
 0xc14   :  { %v5197_v19 = vmul.f32 %v5193_v33, %v5160_v12  ;;  %v5201_v2 = vmul.f32 %v5193_v33, %v5162_v39  ;;  %v5205_v10 = vmul.f32 %v5193_v33, %v5166_v14  ;;  %v3606_v39 = vld [vmem:[#allocation2 + $0x338] sm:$0xff]  ;;  %v3608_v14 = vld [vmem:[#allocation2 + $0x348] sm:$0xff] }
 0xc16   :  { %v5209_v25 = vpack.c.bf16 %v5201_v2, %v5201_v2  ;;  %v5213_v4 = vpack.c.bf16 %v5197_v19, %v5197_v19  ;;  %v5221_v12 = vpack.c.bf16 %v5205_v10, %v5205_v10 }
 0xc18   :  { %3823 = vmatprep.mubr.bf16.mxu0 %v5209_v25  ;;  %3946 = vmatprep.mubr.bf16.mxu1 %v5209_v25 }
 0xc19   :  { %3824 = vmatmul.mubr.bf16.vlgmr.msra.gmra.mrb[32].mxu0 %v5213_v4  ;;  %3947 = vmatmul.mubr.bf16.vlgmr.msra.gmra.mrb[36].mxu1 %v5213_v4 }
 0xc1a   :  { %3833 = vmatpush1.bf16.msra.mxu0 %v3599_v5  ;;  %3956 = vmatpush1.bf16.msra.mxu1 %v3601_v45  ;;  %v3674_v5 = vld [vmem:[#allocation2 + $0x558] sm:$0xff]  ;;  %v3671_v45 = vld [vmem:[#allocation2 + $0x540] sm:$0xff] }
 0xc1b   :  { %3864 = vmatprep.mubr.bf16.mxu0 %v5221_v12  ;;  %3987 = vmatprep.mubr.bf16.mxu1 %v5221_v12 }
 0xc1c   :  { %3834 = vmatprep.subr.bf16.mxu0 %v3606_v39  ;;  %3957 = vmatprep.subr.bf16.mxu1 %v3608_v14  ;;  %v3673_v39 = vld [vmem:[#allocation2 + $0x550] sm:$0xff]  ;;  %v3678_v14 = vld [vmem:[#allocation2 + $0x578] sm:$0xff] }
 0xc1e   :  { %3835 = vmatpush1.bf16.msra.mxu0 %v3605_v29  ;;  %3958 = vmatpush1.bf16.msra.mxu1 %v3607_v61  ;;  %v3680_v29 = vld [vmem:[#allocation2 + $0x588] sm:$0xff]  ;;  %v3677_v61 = vld [vmem:[#allocation2 + $0x570] sm:$0xff] }
 0xc1f   :  { %3836 = vmatprep.subr.bf16.mxu0 %v3612_v63  ;;  %3959 = vmatprep.subr.bf16.mxu1 %v3614_v21  ;;  %v3679_v63 = vld [vmem:[#allocation2 + $0x580] sm:$0xff]  ;;  %v3684_v21 = vld [vmem:[#allocation2 + $0x5a8] sm:$0xff] }
 0xc22   :  { %3837 = vmatpush1.bf16.msra.mxu0 %v3611_v36  ;;  %3960 = vmatpush1.bf16.msra.mxu1 %v3613_v49  ;;  %v3686_v36 = vld [vmem:[#allocation2 + $0x5b8] sm:$0xff]  ;;  %v3683_v49 = vld [vmem:[#allocation2 + $0x5a0] sm:$0xff] }
 0xc23   :  { %3838 = vmatprep.subr.bf16.mxu0 %v3618_v18  ;;  %3961 = vmatprep.subr.bf16.mxu1 %v3620_v59  ;;  %v3685_v18 = vld [vmem:[#allocation2 + $0x5b0] sm:$0xff]  ;;  %v3690_v59 = vld [vmem:[#allocation2 + $0x5d8] sm:$0xff] }
 0xc26   :  { %3839 = vmatpush1.bf16.msra.mxu0 %v3617_v7  ;;  %3962 = vmatpush1.bf16.msra.mxu1 %v3619_v48  ;;  %v3692_v7 = vld [vmem:[#allocation2 + $0x5e8] sm:$0xff]  ;;  %v5227_v48 = vmul.f32 %v5193_v33, %v5164_v44  ;;  %v3695_v44 = vld [vmem:[#allocation2 + $0x600] sm:$0xff] }
 0xc27   :  { %3840 = vmatprep.subr.bf16.mxu0 %v3624_v57  ;;  %3963 = vmatprep.subr.bf16.mxu1 %v3626_v56  ;;  %v3689_v57 = vld [vmem:[#allocation2 + $0x5d0] sm:$0xff]  ;;  %v3691_v56 = vld [vmem:[#allocation2 + $0x5e0] sm:$0xff] }
 0xc2a   :  { %3841 = vmatpush1.bf16.msra.mxu0 %v3623_v31  ;;  %3964 = vmatpush1.bf16.msra.mxu1 %v3625_v6  ;;  %v3696_v31 = vld [vmem:[#allocation2 + $0x608] sm:$0xff]  ;;  %v3698_v6 = vld [vmem:[#allocation2 + $0x618] sm:$0xff] }
 0xc2b   :  { %3842 = vmatprep.subr.bf16.mxu0 %v3630_v27  ;;  %3965 = vmatprep.subr.bf16.mxu1 %v3632_v15  ;;  %v5231_v27 = vmul.f32 %v5193_v33, %v5170_v22  ;;  %v5235_v15 = vpack.c.bf16 %v5227_v48, %v5227_v48  ;;  %v3702_v22 = vld [vmem:[#allocation2 + $0x638] sm:$0xff] }
 0xc2e   :  { %3843 = vmatpush1.bf16.msra.mxu0 %v3629_v28  ;;  %3966 = vmatpush1.bf16.msra.mxu1 %v3631_v58  ;;  %v5239_v28 = vpack.c.bf16 %v5231_v27, %v5231_v27  ;;  %v3697_v58 = vld [vmem:[#allocation2 + $0x610] sm:$0xff] }
 0xc2f   :  { %3844 = vmatprep.subr.bf16.mxu0 %v3636_v60  ;;  %3967 = vmatprep.subr.bf16.mxu1 %v3638_v54  ;;  %v3704_v60 = vld [vmem:[#allocation2 + $0x648] sm:$0xff]  ;;  %v3701_v54 = vld [vmem:[#allocation2 + $0x630] sm:$0xff] }
 0xc32   :  { %3845 = vmatpush1.bf16.msra.mxu0 %v3635_v42  ;;  %3968 = vmatpush1.bf16.msra.mxu1 %v3637_v30  ;;  %v3703_v42 = vld [vmem:[#allocation2 + $0x640] sm:$0xff]  ;;  %v3708_v30 = vld [vmem:[#allocation2 + $0x668] sm:$0xff] }
 0xc33   :  { %3846 = vmatprep.subr.bf16.mxu0 %v3642_v24  ;;  %3969 = vmatprep.subr.bf16.mxu1 %v3644_v11  ;;  %v3710_v24 = vld [vmem:[#allocation2 + $0x678] sm:$0xff]  ;;  %v3707_v11 = vld [vmem:[#allocation2 + $0x660] sm:$0xff] }
 0xc36   :  { %3847 = vmatpush1.bf16.msra.mxu0 %v3641_v26  ;;  %3970 = vmatpush1.bf16.msra.mxu1 %v3643_v46  ;;  %v3709_v26 = vld [vmem:[#allocation2 + $0x670] sm:$0xff]  ;;  %v3714_v46 = vld [vmem:[#allocation2 + $0x698] sm:$0xff] }
 0xc37   :  { %3848 = vmatprep.subr.bf16.mxu0 %v3648_v52  ;;  %3971 = vmatprep.subr.bf16.mxu1 %v3650_v35  ;;  %v3716_v52 = vld [vmem:[#allocation2 + $0x6a8] sm:$0xff]  ;;  %v3713_v35 = vld [vmem:[#allocation2 + $0x690] sm:$0xff] }
 0xc3a   :  { %3849 = vmatpush1.bf16.msra.mxu0 %v3647_v40  ;;  %3972 = vmatpush1.bf16.msra.mxu1 %v3649_v53  ;;  %v3715_v40 = vld [vmem:[#allocation2 + $0x6a0] sm:$0xff]  ;;  %v3720_v53 = vld [vmem:[#allocation2 + $0x6c8] sm:$0xff] }
 0xc3b   :  { %3850 = vmatprep.subr.bf16.mxu0 %v3654_v47  ;;  %3973 = vmatprep.subr.bf16.mxu1 %v3656_v38  ;;  %v3722_v47 = vld [vmem:[#allocation2 + $0x6d8] sm:$0xff]  ;;  %v3719_v38 = vld [vmem:[#allocation2 + $0x6c0] sm:$0xff] }
 0xc3e   :  { %3851 = vmatpush1.bf16.msra.mxu0 %v3653_v43  ;;  %3974 = vmatpush1.bf16.msra.mxu1 %v3655_v0  ;;  %v3721_v43 = vld [vmem:[#allocation2 + $0x6d0] sm:$0xff]  ;;  %v3726_v0 = vld [vmem:[#allocation2 + $0x6f8] sm:$0xff] }
 0xc3f   :  { %3852 = vmatprep.subr.bf16.mxu0 %v3660_v20  ;;  %3975 = vmatprep.subr.bf16.mxu1 %v3662_v51  ;;  %v3728_v20 = vld [vmem:[#allocation2 + $0x708] sm:$0xff]  ;;  %v3725_v51 = vld [vmem:[#allocation2 + $0x6f0] sm:$0xff] }
 0xc42   :  { %3853 = vmatpush1.bf16.msra.mxu0 %v3659_v62  ;;  %3976 = vmatpush1.bf16.msra.mxu1 %v3661_v13  ;;  %v3727_v62 = vld [vmem:[#allocation2 + $0x700] sm:$0xff]  ;;  %v3732_v13 = vld [vmem:[#allocation2 + $0x728] sm:$0xff] }
 0xc43   :  { %3854 = vmatprep.subr.bf16.mxu0 %v3666_v8  ;;  %3977 = vmatprep.subr.bf16.mxu1 %v3668_v9  ;;  %v3734_v8 = vld [vmem:[#allocation2 + $0x738] sm:$0xff]  ;;  %v3731_v9 = vld [vmem:[#allocation2 + $0x720] sm:$0xff] }
 0xc46   :  { %3855 = vmatpush1.bf16.msra.mxu0 %v3665_v23  ;;  %3978 = vmatpush1.bf16.msra.mxu1 %v3667_v55  ;;  %v3733_v23 = vld [vmem:[#allocation2 + $0x730] sm:$0xff]  ;;  %v3738_v55 = vld [vmem:[#allocation2 + $0x758] sm:$0xff] }
 0xc47   :  { %3856 = vmatprep.subr.bf16.mxu0 %v3672_v3  ;;  %3979 = vmatprep.subr.bf16.mxu1 %v3674_v5  ;;  %v3740_v3 = vld [vmem:[#allocation2 + $0x768] sm:$0xff]  ;;  %v3737_v5 = vld [vmem:[#allocation2 + $0x750] sm:$0xff] }
 0xc4a   :  { %3857 = vmatpush1.bf16.msra.mxu0 %v3671_v45  ;;  %3980 = vmatpush1.bf16.msra.mxu1 %v3673_v39  ;;  %v3739_v45 = vld [vmem:[#allocation2 + $0x760] sm:$0xff]  ;;  %v3744_v39 = vld [vmem:[#allocation2 + $0x788] sm:$0xff] }
 0xc4b   :  { %3858 = vmatprep.subr.bf16.mxu0 %v3678_v14  ;;  %3981 = vmatprep.subr.bf16.mxu1 %v3680_v29  ;;  %v3746_v14 = vld [vmem:[#allocation2 + $0x798] sm:$0xff]  ;;  %v3743_v29 = vld [vmem:[#allocation2 + $0x780] sm:$0xff] }
 0xc4e   :  { %3859 = vmatpush1.bf16.msra.mxu0 %v3677_v61  ;;  %3982 = vmatpush1.bf16.msra.mxu1 %v3679_v63  ;;  %v3745_v61 = vld [vmem:[#allocation2 + $0x790] sm:$0xff]  ;;  %v3750_v63 = vld [vmem:[#allocation2 + $0x7b8] sm:$0xff] }
 0xc4f   :  { %3860 = vmatprep.subr.bf16.mxu0 %v3684_v21  ;;  %3983 = vmatprep.subr.bf16.mxu1 %v3686_v36  ;;  %v3752_v21 = vld [vmem:[#allocation2 + $0x7c8] sm:$0xff]  ;;  %v3749_v36 = vld [vmem:[#allocation2 + $0x7b0] sm:$0xff] }
 0xc52   :  { %3861 = vmatpush1.bf16.msra.mxu0 %v3683_v49  ;;  %3984 = vmatpush1.bf16.msra.mxu1 %v3685_v18  ;;  %v3751_v49 = vld [vmem:[#allocation2 + $0x7c0] sm:$0xff]  ;;  %v3756_v18 = vld [vmem:[#allocation2 + $0x7e8] sm:$0xff] }
 0xc53   :  { %3862 = vmatprep.subr.bf16.mxu0 %v3690_v59  ;;  %3985 = vmatprep.subr.bf16.mxu1 %v3692_v7  ;;  %v3758_v59 = vld [vmem:[#allocation2 + $0x7f8] sm:$0xff]  ;;  %v3755_v7 = vld [vmem:[#allocation2 + $0x7e0] sm:$0xff] }
 0xc56   :  { %3863 = vmatpush1.bf16.msra.mxu0 %v3689_v57  ;;  %3986 = vmatpush1.bf16.msra.mxu1 %v3691_v56  ;;  %v3757_v57 = vld [vmem:[#allocation2 + $0x7f0] sm:$0xff]  ;;  %v3762_v56 = vld [vmem:[#allocation2 + $0x818] sm:$0xff] }
 0xc57   :  { %3873 = vmatprep.subr.bf16.mxu0 %v3696_v31  ;;  %3996 = vmatprep.subr.bf16.mxu1 %v3698_v6  ;;  %v3764_v31 = vld [vmem:[#allocation2 + $0x828] sm:$0xff]  ;;  %v3761_v6 = vld [vmem:[#allocation2 + $0x810] sm:$0xff] }
 0xc59   :  { %3865 = vmatmul.mubr.bf16.vlgmr.msra.gmra.mrb[32].mxu0 %v5235_v15  ;;  %3988 = vmatmul.mubr.bf16.vlgmr.msra.gmra.mrb[36].mxu1 %v5235_v15 }
 0xc5a   :  { %3874 = vmatpush1.bf16.msra.mxu0 %v3695_v44  ;;  %3905 = vmatprep.mubr.bf16.mxu0 %v5239_v28  ;;  %v3763_v44 = vld [vmem:[#allocation2 + $0x820] sm:$0xff] }
 0xc5b   :  { %3997 = vmatpush1.bf16.msra.mxu1 %v3697_v58  ;;  %4028 = vmatprep.mubr.bf16.mxu1 %v5239_v28  ;;  %v3768_v58 = vld [vmem:[#allocation2 + $0x848] sm:$0xff] }
 0xc5c   :  { %3875 = vmatprep.subr.bf16.mxu0 %v3702_v22  ;;  %3998 = vmatprep.subr.bf16.mxu1 %v3704_v60  ;;  %v3770_v22 = vld [vmem:[#allocation2 + $0x858] sm:$0xff]  ;;  %v3767_v60 = vld [vmem:[#allocation2 + $0x840] sm:$0xff] }
 0xc5e   :  { %3876 = vmatpush1.bf16.msra.mxu0 %v3701_v54  ;;  %v3769_v54 = vld [vmem:[#allocation2 + $0x850] sm:$0xff] }
 0xc5f   :  { %3999 = vmatpush1.bf16.msra.mxu1 %v3703_v42  ;;  %3877 = vmatprep.subr.bf16.mxu0 %v3708_v30  ;;  %v3774_v42 = vld [vmem:[#allocation2 + $0x878] sm:$0xff]  ;;  %v3776_v30 = vld [vmem:[#allocation2 + $0x888] sm:$0xff] }
 0xc60   :  { %4000 = vmatprep.subr.bf16.mxu1 %v3710_v24  ;;  %v3773_v24 = vld [vmem:[#allocation2 + $0x870] sm:$0xff] }
 0xc62   :  { %3878 = vmatpush1.bf16.msra.mxu0 %v3707_v11  ;;  %v3775_v11 = vld [vmem:[#allocation2 + $0x880] sm:$0xff] }
 0xc63   :  { %4001 = vmatpush1.bf16.msra.mxu1 %v3709_v26  ;;  %3879 = vmatprep.subr.bf16.mxu0 %v3714_v46  ;;  %v3780_v26 = vld [vmem:[#allocation2 + $0x8a8] sm:$0xff]  ;;  %v3782_v46 = vld [vmem:[#allocation2 + $0x8b8] sm:$0xff] }
 0xc64   :  { %4002 = vmatprep.subr.bf16.mxu1 %v3716_v52  ;;  %v3779_v52 = vld [vmem:[#allocation2 + $0x8a0] sm:$0xff] }
 0xc66   :  { %3880 = vmatpush1.bf16.msra.mxu0 %v3713_v35  ;;  %v3781_v35 = vld [vmem:[#allocation2 + $0x8b0] sm:$0xff] }
 0xc67   :  { %4003 = vmatpush1.bf16.msra.mxu1 %v3715_v40  ;;  %3881 = vmatprep.subr.bf16.mxu0 %v3720_v53  ;;  %v3786_v40 = vld [vmem:[#allocation2 + $0x8d8] sm:$0xff]  ;;  %v3788_v53 = vld [vmem:[#allocation2 + $0x8e8] sm:$0xff] }
 0xc68   :  { %4004 = vmatprep.subr.bf16.mxu1 %v3722_v47  ;;  %v5247_v47 = vmul.f32 %v5193_v33, %v5168_v37  ;;  %v3513_v37 = vld [vmem:[#allocation2 + $0x50] sm:$0xff]  ;;  %v3520_v33 = vld [vmem:[#allocation2 + $0x88] sm:$0xff] }
 0xc6a   :  { %3882 = vmatpush1.bf16.msra.mxu0 %v3719_v38  ;;  %v3785_v38 = vld [vmem:[#allocation2 + $0x8d0] sm:$0xff] }
 0xc6b   :  { %4005 = vmatpush1.bf16.msra.mxu1 %v3721_v43  ;;  %3883 = vmatprep.subr.bf16.mxu0 %v3726_v0  ;;  %v3787_v43 = vld [vmem:[#allocation2 + $0x8e0] sm:$0xff]  ;;  %v3508_v0 = vld [vmem:[#allocation2 + $0x28] sm:$0xff] }
 0xc6c   :  { %4006 = vmatprep.subr.bf16.mxu1 %v3728_v20  ;;  %v5251_v20 = vpack.c.bf16 %v5247_v47, %v5247_v47 }
 0xc6e   :  { %3884 = vmatpush1.bf16.msra.mxu0 %v3725_v51  ;;  %v3507_v51 = vld [vmem:[#allocation2 + $0x20] sm:$0xff] }
 0xc6f   :  { %4007 = vmatpush1.bf16.msra.mxu1 %v3727_v62  ;;  %3885 = vmatprep.subr.bf16.mxu0 %v3732_v13  ;;  %v3514_v62 = vld [vmem:[#allocation2 + $0x58] sm:$0xff]  ;;  %v3519_v13 = vld [vmem:[#allocation2 + $0x80] sm:$0xff] }
 0xc70   :  { %4008 = vmatprep.subr.bf16.mxu1 %v3734_v8  ;;  %v3526_v8 = vld [vmem:[#allocation2 + $0xb8] sm:$0xff] }
 0xc72   :  { %3886 = vmatpush1.bf16.msra.mxu0 %v3731_v9  ;;  %v3525_v9 = vld [vmem:[#allocation2 + $0xb0] sm:$0xff] }
 0xc73   :  { %4009 = vmatpush1.bf16.msra.mxu1 %v3733_v23  ;;  %3887 = vmatprep.subr.bf16.mxu0 %v3738_v55  ;;  %v3532_v23 = vld [vmem:[#allocation2 + $0xe8] sm:$0xff]  ;;  %v3531_v55 = vld [vmem:[#allocation2 + $0xe0] sm:$0xff] }
 0xc74   :  { %4010 = vmatprep.subr.bf16.mxu1 %v3740_v3  ;;  %v3538_v3 = vld [vmem:[#allocation2 + $0x118] sm:$0xff] }
 0xc76   :  { %3888 = vmatpush1.bf16.msra.mxu0 %v3737_v5  ;;  %v3537_v5 = vld [vmem:[#allocation2 + $0x110] sm:$0xff] }
 0xc77   :  { %4011 = vmatpush1.bf16.msra.mxu1 %v3739_v45  ;;  %3889 = vmatprep.subr.bf16.mxu0 %v3744_v39  ;;  %v3544_v45 = vld [vmem:[#allocation2 + $0x148] sm:$0xff]  ;;  %v3550_v39 = vld [vmem:[#allocation2 + $0x178] sm:$0xff] }
 0xc78   :  { %4012 = vmatprep.subr.bf16.mxu1 %v3746_v14  ;;  %v3549_v14 = vld [vmem:[#allocation2 + $0x170] sm:$0xff] }
 0xc7a   :  { %3890 = vmatpush1.bf16.msra.mxu0 %v3743_v29  ;;  %v3556_v29 = vld [vmem:[#allocation2 + $0x1a8] sm:$0xff] }
 0xc7b   :  { %4013 = vmatpush1.bf16.msra.mxu1 %v3745_v61  ;;  %3891 = vmatprep.subr.bf16.mxu0 %v3750_v63  ;;  %v3555_v61 = vld [vmem:[#allocation2 + $0x1a0] sm:$0xff]  ;;  %v3562_v63 = vld [vmem:[#allocation2 + $0x1d8] sm:$0xff] }
 0xc7c   :  { %4014 = vmatprep.subr.bf16.mxu1 %v3752_v21  ;;  %v3561_v21 = vld [vmem:[#allocation2 + $0x1d0] sm:$0xff] }
 0xc7e   :  { %3892 = vmatpush1.bf16.msra.mxu0 %v3749_v36  ;;  %v3568_v36 = vld [vmem:[#allocation2 + $0x208] sm:$0xff] }
 0xc7f   :  { %4015 = vmatpush1.bf16.msra.mxu1 %v3751_v49  ;;  %3893 = vmatprep.subr.bf16.mxu0 %v3756_v18  ;;  %v3567_v49 = vld [vmem:[#allocation2 + $0x200] sm:$0xff]  ;;  %v3574_v18 = vld [vmem:[#allocation2 + $0x238] sm:$0xff] }
 0xc80   :  { %4016 = vmatprep.subr.bf16.mxu1 %v3758_v59  ;;  %v3573_v59 = vld [vmem:[#allocation2 + $0x230] sm:$0xff] }
 0xc82   :  { %3894 = vmatpush1.bf16.msra.mxu0 %v3755_v7  ;;  %v3580_v7 = vld [vmem:[#allocation2 + $0x268] sm:$0xff] }
 0xc83   :  { %4017 = vmatpush1.bf16.msra.mxu1 %v3757_v57  ;;  %3895 = vmatprep.subr.bf16.mxu0 %v3762_v56  ;;  %v3579_v57 = vld [vmem:[#allocation2 + $0x260] sm:$0xff]  ;;  %v3586_v56 = vld [vmem:[#allocation2 + $0x298] sm:$0xff] }
 0xc84   :  { %4018 = vmatprep.subr.bf16.mxu1 %v3764_v31  ;;  %v3585_v31 = vld [vmem:[#allocation2 + $0x290] sm:$0xff] }
 0xc86   :  { %3896 = vmatpush1.bf16.msra.mxu0 %v3761_v6  ;;  %v3592_v6 = vld [vmem:[#allocation2 + $0x2c8] sm:$0xff] }
 0xc87   :  { %4019 = vmatpush1.bf16.msra.mxu1 %v3763_v44  ;;  %3897 = vmatprep.subr.bf16.mxu0 %v3768_v58  ;;  %v3591_v44 = vld [vmem:[#allocation2 + $0x2c0] sm:$0xff]  ;;  %v3598_v58 = vld [vmem:[#allocation2 + $0x2f8] sm:$0xff] }
 0xc88   :  { %4020 = vmatprep.subr.bf16.mxu1 %v3770_v22  ;;  %v3597_v22 = vld [vmem:[#allocation2 + $0x2f0] sm:$0xff] }
 0xc8a   :  { %3898 = vmatpush1.bf16.msra.mxu0 %v3767_v60  ;;  %v3604_v60 = vld [vmem:[#allocation2 + $0x328] sm:$0xff] }
 0xc8b   :  { %4021 = vmatpush1.bf16.msra.mxu1 %v3769_v54  ;;  %3899 = vmatprep.subr.bf16.mxu0 %v3774_v42  ;;  %v3603_v54 = vld [vmem:[#allocation2 + $0x320] sm:$0xff]  ;;  %v3610_v42 = vld [vmem:[#allocation2 + $0x358] sm:$0xff] }
 0xc8c   :  { %4022 = vmatprep.subr.bf16.mxu1 %v3776_v30  ;;  %v3609_v30 = vld [vmem:[#allocation2 + $0x350] sm:$0xff] }
 0xc8e   :  { %3900 = vmatpush1.bf16.msra.mxu0 %v3773_v24  ;;  %v3616_v24 = vld [vmem:[#allocation2 + $0x388] sm:$0xff] }
 0xc8f   :  { %4023 = vmatpush1.bf16.msra.mxu1 %v3775_v11  ;;  %3901 = vmatprep.subr.bf16.mxu0 %v3780_v26  ;;  %v3615_v11 = vld [vmem:[#allocation2 + $0x380] sm:$0xff]  ;;  %v3622_v26 = vld [vmem:[#allocation2 + $0x3b8] sm:$0xff] }
 0xc90   :  { %4024 = vmatprep.subr.bf16.mxu1 %v3782_v46  ;;  %v3621_v46 = vld [vmem:[#allocation2 + $0x3b0] sm:$0xff] }
 0xc92   :  { %3902 = vmatpush1.bf16.msra.mxu0 %v3779_v52  ;;  %v3628_v52 = vld [vmem:[#allocation2 + $0x3e8] sm:$0xff] }
 0xc93   :  { %4025 = vmatpush1.bf16.msra.mxu1 %v3781_v35  ;;  %3903 = vmatprep.subr.bf16.mxu0 %v3786_v40  ;;  %v3627_v35 = vld [vmem:[#allocation2 + $0x3e0] sm:$0xff]  ;;  %v3634_v40 = vld [vmem:[#allocation2 + $0x418] sm:$0xff] }
 0xc94   :  { %4026 = vmatprep.subr.bf16.mxu1 %v3788_v53  ;;  %v3640_v53 = vld [vmem:[#allocation2 + $0x448] sm:$0xff] }
 0xc96   :  { %3904 = vmatpush1.bf16.msra.mxu0 %v3785_v38  ;;  %v3646_v38 = vld [vmem:[#allocation2 + $0x478] sm:$0xff] }
 0xc97   :  { %4027 = vmatpush1.bf16.msra.mxu1 %v3787_v43  ;;  %4037 = vmatprep.subr.bf16.mxu0 %v3508_v0  ;;  %v3645_v43 = vld [vmem:[#allocation2 + $0x470] sm:$0xff]  ;;  %v3652_v0 = vld [vmem:[#allocation2 + $0x4a8] sm:$0xff] }
 0xc99   :  { %3906 = vmatmul.mubr.bf16.vlgmr.msra.gmra.mrb[32].mxu0 %v5251_v20 }
 0xc9a   :  { %4029 = vmatmul.mubr.bf16.vlgmr.msra.gmra.mrb[36].mxu1 %v5251_v20  ;;  %4038 = vmatpush1.bf16.msra.mxu0 %v3507_v51  ;;  %v3651_v51 = vld [vmem:[#allocation2 + $0x4a0] sm:$0xff] }
 0xc9b   :  { %4069 = vmatprep.mubr.bf16.mxu0 %v5209_v25  ;;  %4039 = vmatprep.subr.bf16.mxu0 %v3514_v62  ;;  %v3543_v25 = vld [vmem:[#allocation2 + $0x140] sm:$0xff]  ;;  %v3658_v62 = vld [vmem:[#allocation2 + $0x4d8] sm:$0xff] }
 0xc9e   :  { %4040 = vmatpush1.bf16.msra.mxu0 %v3513_v37  ;;  %v3657_v37 = vld [vmem:[#allocation2 + $0x4d0] sm:$0xff] }
 0xc9f   :  { %4041 = vmatprep.subr.bf16.mxu0 %v3520_v33  ;;  %v3664_v33 = vld [vmem:[#allocation2 + $0x508] sm:$0xff] }
 0xca2   :  { %4042 = vmatpush1.bf16.msra.mxu0 %v3519_v13  ;;  %v3663_v13 = vld [vmem:[#allocation2 + $0x500] sm:$0xff] }
 0xca3   :  { %4043 = vmatprep.subr.bf16.mxu0 %v3526_v8  ;;  %v3670_v8 = vld [vmem:[#allocation2 + $0x538] sm:$0xff] }
 0xca6   :  { %4044 = vmatpush1.bf16.msra.mxu0 %v3525_v9  ;;  %v3669_v9 = vld [vmem:[#allocation2 + $0x530] sm:$0xff] }
 0xca7   :  { %4045 = vmatprep.subr.bf16.mxu0 %v3532_v23  ;;  %v3676_v23 = vld [vmem:[#allocation2 + $0x568] sm:$0xff] }
 0xcaa   :  { %4046 = vmatpush1.bf16.msra.mxu0 %v3531_v55  ;;  %v3675_v55 = vld [vmem:[#allocation2 + $0x560] sm:$0xff] }
 0xcab   :  { %4047 = vmatprep.subr.bf16.mxu0 %v3538_v3  ;;  %v3682_v3 = vld [vmem:[#allocation2 + $0x598] sm:$0xff] }
 0xcae   :  { %4048 = vmatpush1.bf16.msra.mxu0 %v3537_v5  ;;  %v3681_v5 = vld [vmem:[#allocation2 + $0x590] sm:$0xff] }
 0xcaf   :  { %4049 = vmatprep.subr.bf16.mxu0 %v3544_v45  ;;  %v3688_v45 = vld [vmem:[#allocation2 + $0x5c8] sm:$0xff] }
 0xcb2   :  { %4050 = vmatpush1.bf16.msra.mxu0 %v3543_v25  ;;  %v3687_v25 = vld [vmem:[#allocation2 + $0x5c0] sm:$0xff] }
 0xcb3   :  { %4051 = vmatprep.subr.bf16.mxu0 %v3550_v39  ;;  %v3694_v39 = vld [vmem:[#allocation2 + $0x5f8] sm:$0xff] }
 0xcb6   :  { %4052 = vmatpush1.bf16.msra.mxu0 %v3549_v14  ;;  %v3693_v14 = vld [vmem:[#allocation2 + $0x5f0] sm:$0xff] }
 0xcb7   :  { %4053 = vmatprep.subr.bf16.mxu0 %v3556_v29  ;;  %v3700_v29 = vld [vmem:[#allocation2 + $0x628] sm:$0xff] }
 0xcba   :  { %4054 = vmatpush1.bf16.msra.mxu0 %v3555_v61  ;;  %v3699_v61 = vld [vmem:[#allocation2 + $0x620] sm:$0xff] }
 0xcbb   :  { %4055 = vmatprep.subr.bf16.mxu0 %v3562_v63  ;;  %v3706_v63 = vld [vmem:[#allocation2 + $0x658] sm:$0xff] }
 0xcbe   :  { %4056 = vmatpush1.bf16.msra.mxu0 %v3561_v21  ;;  %v3705_v21 = vld [vmem:[#allocation2 + $0x650] sm:$0xff] }
 0xcbf   :  { %4057 = vmatprep.subr.bf16.mxu0 %v3568_v36  ;;  %v3712_v36 = vld [vmem:[#allocation2 + $0x688] sm:$0xff] }
 0xcc2   :  { %4058 = vmatpush1.bf16.msra.mxu0 %v3567_v49  ;;  %v3711_v49 = vld [vmem:[#allocation2 + $0x680] sm:$0xff] }
 0xcc3   :  { %4059 = vmatprep.subr.bf16.mxu0 %v3574_v18  ;;  %v3718_v18 = vld [vmem:[#allocation2 + $0x6b8] sm:$0xff] }
 0xcc6   :  { %4060 = vmatpush1.bf16.msra.mxu0 %v3573_v59  ;;  %v3717_v59 = vld [vmem:[#allocation2 + $0x6b0] sm:$0xff] }
 0xcc7   :  { %4061 = vmatprep.subr.bf16.mxu0 %v3580_v7  ;;  %v3724_v7 = vld [vmem:[#allocation2 + $0x6e8] sm:$0xff] }
 0xcca   :  { %4062 = vmatpush1.bf16.msra.mxu0 %v3579_v57  ;;  %v3723_v57 = vld [vmem:[#allocation2 + $0x6e0] sm:$0xff] }
 0xccb   :  { %4063 = vmatprep.subr.bf16.mxu0 %v3586_v56  ;;  %v3730_v56 = vld [vmem:[#allocation2 + $0x718] sm:$0xff] }
 0xcce   :  { %4064 = vmatpush1.bf16.msra.mxu0 %v3585_v31  ;;  %v3736_v31 = vld [vmem:[#allocation2 + $0x748] sm:$0xff] }
 0xccf   :  { %4065 = vmatprep.subr.bf16.mxu0 %v3592_v6  ;;  %v3742_v6 = vld [vmem:[#allocation2 + $0x778] sm:$0xff] }
 0xcd2   :  { %4066 = vmatpush1.bf16.msra.mxu0 %v3591_v44  ;;  %v3741_v44 = vld [vmem:[#allocation2 + $0x770] sm:$0xff] }
 0xcd3   :  { %4067 = vmatprep.subr.bf16.mxu0 %v3598_v58  ;;  %v3748_v58 = vld [vmem:[#allocation2 + $0x7a8] sm:$0xff] }
 0xcd6   :  { %4068 = vmatpush1.bf16.msra.mxu0 %v3597_v22  ;;  %v3747_v22 = vld [vmem:[#allocation2 + $0x7a0] sm:$0xff] }
 0xcd7   :  { %4078 = vmatprep.subr.bf16.mxu0 %v3604_v60  ;;  %v3754_v60 = vld [vmem:[#allocation2 + $0x7d8] sm:$0xff] }
 0xcd9   :  { %4070 = vmatmul.mubr.bf16.vlgmr.msra.gmra.mrb[36].mxu0 %v5213_v4  ;;  %v3633_v4 = vld [vmem:[#allocation2 + $0x410] sm:$0xff] }
 0xcda   :  { %4079 = vmatpush1.bf16.msra.mxu0 %v3603_v54  ;;  %4110 = vmatprep.mubr.bf16.mxu0 %v5221_v12  ;;  %v3639_v12 = vld [vmem:[#allocation2 + $0x440] sm:$0xff]  ;;  %v3753_v54 = vld [vmem:[#allocation2 + $0x7d0] sm:$0xff] }
 0xcdb   :  { %4080 = vmatprep.subr.bf16.mxu0 %v3610_v42  ;;  %v3760_v42 = vld [vmem:[#allocation2 + $0x808] sm:$0xff] }
 0xcde   :  { %4081 = vmatpush1.bf16.msra.mxu0 %v3609_v30  ;;  %v3759_v30 = vld [vmem:[#allocation2 + $0x800] sm:$0xff] }
 0xcdf   :  { %4082 = vmatprep.subr.bf16.mxu0 %v3616_v24  ;;  %v3766_v24 = vld [vmem:[#allocation2 + $0x838] sm:$0xff] }
 0xce2   :  { %4083 = vmatpush1.bf16.msra.mxu0 %v3615_v11  ;;  %v3765_v11 = vld [vmem:[#allocation2 + $0x830] sm:$0xff] }
 0xce3   :  { %4084 = vmatprep.subr.bf16.mxu0 %v3622_v26  ;;  %v3772_v26 = vld [vmem:[#allocation2 + $0x868] sm:$0xff] }
 0xce6   :  { %4085 = vmatpush1.bf16.msra.mxu0 %v3621_v46  ;;  %v3771_v46 = vld [vmem:[#allocation2 + $0x860] sm:$0xff] }
 0xce7   :  { %4086 = vmatprep.subr.bf16.mxu0 %v3628_v52  ;;  %v3778_v52 = vld [vmem:[#allocation2 + $0x898] sm:$0xff] }
 0xcea   :  { %4087 = vmatpush1.bf16.msra.mxu0 %v3627_v35  ;;  %v3777_v35 = vld [vmem:[#allocation2 + $0x890] sm:$0xff] }
 0xceb   :  { %4088 = vmatprep.subr.bf16.mxu0 %v3634_v40  ;;  %v3784_v40 = vld [vmem:[#allocation2 + $0x8c8] sm:$0xff] }
 0xcee   :  { %4089 = vmatpush1.bf16.msra.mxu0 %v3633_v4  ;;  %v3783_v4 = vld [vmem:[#allocation2 + $0x8c0] sm:$0xff] }
 0xcef   :  { %4090 = vmatprep.subr.bf16.mxu0 %v3640_v53  ;;  %v3790_v53 = vld [vmem:[#allocation2 + $0x8f8] sm:$0xff] }
 0xcf2   :  { %4091 = vmatpush1.bf16.msra.mxu0 %v3639_v12  ;;  %v3789_v12 = vld [vmem:[#allocation2 + $0x8f0] sm:$0xff] }
 0xcf3   :  { %4092 = vmatprep.subr.bf16.mxu0 %v3646_v38 }
 0xcf6   :  { %4093 = vmatpush1.bf16.msra.mxu0 %v3645_v43 }
 0xcf7   :  { %4094 = vmatprep.subr.bf16.mxu0 %v3652_v0 }
 0xcfa   :  { %4095 = vmatpush1.bf16.msra.mxu0 %v3651_v51 }
 0xcfb   :  { %4096 = vmatprep.subr.bf16.mxu0 %v3658_v62 }
 0xcfe   :  { %4097 = vmatpush1.bf16.msra.mxu0 %v3657_v37 }
 0xcff   :  { %4098 = vmatprep.subr.bf16.mxu0 %v3664_v33 }
 0xd02   :  { %4099 = vmatpush1.bf16.msra.mxu0 %v3663_v13 }
 0xd03   :  { %4100 = vmatprep.subr.bf16.mxu0 %v3670_v8 }
 0xd06   :  { %4101 = vmatpush1.bf16.msra.mxu0 %v3669_v9 }
 0xd07   :  { %4102 = vmatprep.subr.bf16.mxu0 %v3676_v23 }
 0xd0a   :  { %4103 = vmatpush1.bf16.msra.mxu0 %v3675_v55 }
 0xd0b   :  { %4104 = vmatprep.subr.bf16.mxu0 %v3682_v3 }
 0xd0e   :  { %4105 = vmatpush1.bf16.msra.mxu0 %v3681_v5 }
 0xd0f   :  { %4106 = vmatprep.subr.bf16.mxu0 %v3688_v45 }
 0xd12   :  { %4107 = vmatpush1.bf16.msra.mxu0 %v3687_v25 }
 0xd13   :  { %4108 = vmatprep.subr.bf16.mxu0 %v3694_v39 }
 0xd16   :  { %4109 = vmatpush1.bf16.msra.mxu0 %v3693_v14 }
 0xd17   :  { %4119 = vmatprep.subr.bf16.mxu0 %v3700_v29 }
 0xd19   :  { %4111 = vmatmul.mubr.bf16.vlgmr.msra.gmra.mrb[36].mxu0 %v5235_v15  ;;  %v3729_v15 = vld [vmem:[#allocation2 + $0x710] sm:$0xff] }
 0xd1a   :  { %4120 = vmatpush1.bf16.msra.mxu0 %v3699_v61  ;;  %4151 = vmatprep.mubr.bf16.mxu0 %v5239_v28  ;;  %v3735_v28 = vld [vmem:[#allocation2 + $0x740] sm:$0xff] }
 0xd1b   :  { %4121 = vmatprep.subr.bf16.mxu0 %v3706_v63 }
 0xd1e   :  { %4122 = vmatpush1.bf16.msra.mxu0 %v3705_v21 }
 0xd1f   :  { %4123 = vmatprep.subr.bf16.mxu0 %v3712_v36 }
 0xd22   :  { %4124 = vmatpush1.bf16.msra.mxu0 %v3711_v49 }
 0xd23   :  { %4125 = vmatprep.subr.bf16.mxu0 %v3718_v18 }
 0xd26   :  { %4126 = vmatpush1.bf16.msra.mxu0 %v3717_v59 }
 0xd27   :  { %4127 = vmatprep.subr.bf16.mxu0 %v3724_v7 }
 0xd2a   :  { %4128 = vmatpush1.bf16.msra.mxu0 %v3723_v57 }
 0xd2b   :  { %4129 = vmatprep.subr.bf16.mxu0 %v3730_v56 }
 0xd2e   :  { %4130 = vmatpush1.bf16.msra.mxu0 %v3729_v15 }
 0xd2f   :  { %4131 = vmatprep.subr.bf16.mxu0 %v3736_v31 }
 0xd32   :  { %4132 = vmatpush1.bf16.msra.mxu0 %v3735_v28 }
 0xd33   :  { %4133 = vmatprep.subr.bf16.mxu0 %v3742_v6 }
 0xd36   :  { %4134 = vmatpush1.bf16.msra.mxu0 %v3741_v44 }
 0xd37   :  { %4135 = vmatprep.subr.bf16.mxu0 %v3748_v58  ;;  %v5327_v58 = vld [vmem:[#allocation25_spill] sm:$0xff] }
 0xd3a   :  { %4136 = vmatpush1.bf16.msra.mxu0 %v3747_v22  ;;  %v4195_v22 = vsel %vm2022_vm5, %v5197_v19, %v5327_v58  ;;  %v5332_v19 = vld [vmem:[#allocation30_spill] sm:$0xff] }
 0xd3b   :  { %4137 = vmatprep.subr.bf16.mxu0 %v3754_v60  ;;  %v5328_v60 = vld [vmem:[#allocation27_spill] sm:$0xff] }
 0xd3e   :  { %4138 = vmatpush1.bf16.msra.mxu0 %v3753_v54  ;;  %v4197_v54 = vsel %vm2022_vm5, %v5227_v48, %v5328_v60 }
 0xd3f   :  { %4139 = vmatprep.subr.bf16.mxu0 %v3760_v42 }
 0xd42   :  { %4140 = vmatpush1.bf16.msra.mxu0 %v3759_v30 }
 0xd43   :  { %4141 = vmatprep.subr.bf16.mxu0 %v3766_v24  ;;  %v5330_v24 = vld [vmem:[#allocation26_spill] sm:$0xff] }
 0xd46   :  { %4142 = vmatpush1.bf16.msra.mxu0 %v3765_v11  ;;  %v4196_v11 = vsel %vm2022_vm5, %v5201_v2, %v5330_v24 }
 0xd47   :  { %4143 = vmatprep.subr.bf16.mxu0 %v3772_v26  ;;  %v5331_v26 = vld [vmem:[#allocation28_spill] sm:$0xff] }
 0xd4a   :  { %4144 = vmatpush1.bf16.msra.mxu0 %v3771_v46  ;;  %v4198_v46 = vsel %vm2022_vm5, %v5205_v10, %v5331_v26 }
 0xd4b   :  { %4145 = vmatprep.subr.bf16.mxu0 %v3778_v52 }
 0xd4e   :  { %4146 = vmatpush1.bf16.msra.mxu0 %v3777_v35  ;;  %v4200_v35 = vsel %vm2022_vm5, %v5231_v27, %v5332_v19 }
 0xd4f   :  { %4147 = vmatprep.subr.bf16.mxu0 %v3784_v40 }
 0xd52   :  { %4148 = vmatpush1.bf16.msra.mxu0 %v3783_v4 }
 0xd53   :  { %4149 = vmatprep.subr.bf16.mxu0 %v3790_v53 }
 0xd56   :  { %4150 = vmatpush1.bf16.msra.mxu0 %v3789_v12 }
 0xd59   :  { %4152 = vmatmul.mubr.bf16.vlgmr.msra.gmra.mrb[36].mxu0 %v5251_v20 }
 0xd6c   :  { %v3907_v38 = vpop.f32.mrb[32].mxu0 }
 0xd6d   :  { %v4299_v43 = vadd.f32 %v3907_v38, %v4848_v16  ;;  %v4030_v0 = vpop.f32.mrb[36].mxu1  ;;  %v3909_v51 = vpop.f32.mrb[33].mxu0 }
 0xd6e   :  { %v4301_v62 = vadd.f32 %v4030_v0, %v4868_v32  ;;  %v4300_v37 = vadd.f32 %v3909_v51, %v4852_v17  ;;  %v4032_v33 = vpop.f32.mrb[37].mxu1  ;;  %v3911_v13 = vpop.f32.mrb[34].mxu0 }
 0xd6f   :  { %v4160_v8 = vmul.f32 %v4299_v43, %v4299_v43  ;;  %v4302_v9 = vadd.f32 %v4032_v33, %v4872_v34  ;;  %v4034_v23 = vpop.f32.mrb[38].mxu1  ;;  %v3912_v55 = vpop.f32.mrb[35].mxu0 }
 0xd70   :  { %v4162_v3 = vmul.f32 %v4301_v62, %v4301_v62  ;;  %v4161_v5 = vmul.f32 %v4300_v37, %v4300_v37  ;;  %v4035_v45 = vpop.f32.mrb[39].mxu1 }
 0xd71   :  { %v4166_v20 = vsel %vm2022_vm5, %v4160_v8, 0.0  ;;  %v4163_v25 = vmul.f32 %v4302_v9, %v4302_v9 }
 0xd72   :  { %v4167_v16 = vsel %vm2022_vm5, %v4161_v5, 0.0  ;;  %v4169_v32 = vsel %vm2022_vm5, %v4162_v3, 0.0 }
 0xd73   :  { %v4168_v39 = vadd.f32 %v4167_v16, %v4166_v20  ;;  %v4171_v17 = vsel %vm2022_vm5, %v4163_v25, 0.0 }
 0xd75   :  { %v4170_v14 = vadd.f32 %v4169_v32, %v4168_v39 }
 0xd77   :  { %v4172_v29 = vadd.f32 %v4171_v17, %v4170_v14 }
 0xe2c   :  { %v4153_v61 = vpop.f32.mrb[36].mxu0 }
 0xe2d   :  { %v4303_v34 = vadd.f32 %v4153_v61, %v4888_v41  ;;  %v4155_v63 = vpop.f32.mrb[37].mxu0 }
 0xe2e   :  { %v4304_v21 = vadd.f32 %v4155_v63, %v4892_v50  ;;  %v4157_v36 = vpop.f32.mrb[38].mxu0 }
 0xe2f   :  { %v4164_v49 = vmul.f32 %v4303_v34, %v4303_v34  ;;  %v4158_v18 = vpop.f32.mrb[39].mxu0 }
 0xe30   :  { %v4165_v59 = vmul.f32 %v4304_v21, %v4304_v21 }
 0xe31   :  { %v4173_v7 = vsel %vm2022_vm5, %v4164_v49, 0.0 }
 0xe32   :  { %v4174_v57 = vadd.f32 %v4173_v7, %v4172_v29  ;;  %v4175_v56 = vsel %vm2022_vm5, %v4165_v59, 0.0 }
 0xe34   :  { %v4176_v15 = vadd.f32 %v4175_v56, %v4174_v57 }
 0xe36   :  { %4177 = vadd.xlane.f32.xlu1 %v4176_v15 }
 0xe47   :  { %4188 = vperm.xlu1 %4451, %v5190_v1   ;;  %v5329_v1 = vld [vmem:[#allocation29_spill] sm:$0xff] }
 0xe48   :  { %v4199_v30 = vsel %vm2022_vm5, %v5247_v47, %v5329_v1 }
 0xec3   :  { %v4178_v31 = vpop.xlane.xlu1 %4177 }
 0xec4   :  { %4456 = vrsqrt.f32 %v4178_v31  ;;  %vm4181_vm8 = vcmp.eq.f32.partialorder %v4178_v31, inf  ;;  %v4184_v50 = vand.u32 2147483648, %v4178_v31  ;;  %vm4183_vm10 = vcmp.eq.f32.partialorder %v4178_v31, 0.0 }
 0xec7   :  { %v4189_v28 = vpop.permute.xlu1 %4188 }
 0xec8   :  { %v4190_v44 = vrot.slane %v4189_v28, 6 }
 0xeca   :  { %v4202_v40 = vsel %vm4201_vm9, %v4195_v22, %v4190_v44  ;;  %v4203_v4 = vsel %vm4201_vm9, %v4196_v11, %v4190_v44  ;;  %v4204_v47 = vsel %vm4201_vm9, %v4197_v54, %v4190_v44  ;;  %v4205_v53 = vsel %vm4201_vm9, %v4198_v46, %v4190_v44 }
 0xecb   :  { %v4206_v2 = vsel %vm4201_vm9, %v4199_v30, %v4190_v44  ;;  %v4207_v12 = vsel %vm4201_vm9, %v4200_v35, %v4190_v44 }
 0xece   :  { %v4457_v41 = vpop.eup %4456 }
 0xecf   :  { %v4180_v6 = vmul.f32 %v4457_v41, %v4178_v31 }
 0xed1   :  { %v4182_v42 = vsel %vm4181_vm8, %v4178_v31, %v4180_v6 }
 0xed2   :  { %v4185_v52 = vsel %vm4183_vm10, %v4184_v50, %v4182_v42 }
 0xed3   :  { %v4193_v48 = vrot.slane %v4185_v52, 5 }
 0xed5   :  { %v4208_v10 = vsel %vm336_vm4, %v4202_v40, %v4193_v48  ;;  %v4209_v38 = vsel %vm336_vm4, %v4203_v4, %v4193_v48  ;;  %v4210_v43 = vsel %vm336_vm4, %v4204_v47, %v4193_v48  ;;  %v4211_v27 = vsel %vm336_vm4, %v4205_v53, %v4193_v48 }
 0xed6   :  { %v4212_v0 = vsel %vm336_vm4, %v4206_v2, %v4193_v48  ;;  %v4213_v51 = vsel %vm336_vm4, %v4207_v12, %v4193_v48  ;;  %v4220_v62 = vcombine.low %v4208_v10, %v4209_v38  ;;  %v4221_v37 = vcombine.low %v4210_v43, %v4211_v27 }
 0xed7   :  { %v4222_v33 = vcombine.low %v4212_v0, %v4213_v51 }
 0xed8   :  { %4226 = vst [vmem:[%s5320_s7] sm:$0xff] %v4220_v62  ;;  %4227 = vst [vmem:[%s5320_s7 + $0x8] sm:$0xff] %v4221_v37 }
 0xed9   :  { %4228 = vst [vmem:[%s5320_s7 + $0x10] sm:$0xff] %v4222_v33 }
 0xeda   :  { %4233 = vsyncpa [#allocation10], 1 }
 0xedb   :  { %4234 = vsyncmov [#allocation6] }
 0xede   :  { %s4235_s16 = vpop.sfrf %4234 }
 0xedf   :  { %p4279_p11 = scmp.ne.s32.totalorder %s4235_s16, 0 }
 0xee1   :  { %4239 = shalt.err (%p4279_p11)  }
 0xee2   :  { %4241 = vsyncmov [#allocation6 + $0x1] }
 0xee5   :  { %s4242_s6 = vpop.sfrf %4241 }
 0xee6   :  { %p4280_p12 = scmp.ne.s32.totalorder %s4242_s6, 0 }
 0xee8   :  { %4246 = shalt.err (%p4280_p12)  }
 0xee9   :  { %4248 = vsyncmov [#allocation6 + $0x2] }
 0xeec   :  { %s4249_s21 = vpop.sfrf %4248 }
 0xeed   :  { %p4281_p13 = scmp.ne.s32.totalorder %s4249_s21, 0 }
 0xeef   :  { %4253 = shalt.err (%p4281_p13)  }
 0xef0   :  { %4255 = vsyncmov [#allocation6 + $0x3] }
 0xef3   :  { %s4256_s27 = vpop.sfrf %4255 }
 0xef4   :  { %p4282_p0 = scmp.ne.s32.totalorder %s4256_s27, 0 }
 0xef6   :  { %4260 = shalt.err (%p4282_p0)  }

</bundles_post_ra>
